<compile_context>
chip_gen: v7x
topology: tpu7x:2x2x1
jax: 0.10.0
libtpu: 0.0.40
codegen_flags: <defaults>
</compile_context>

<pallas_src>
import functools
import math

import jax
import jax.numpy as jnp
import numpy as np
from jax.experimental import pallas as pl
from jax.experimental.pallas import tpu as pltpu

CPAD = 128   # lane-dense channel padding
NOUT = 128   # lane-dense padding of the final fc2 output


def _round_up(x, m):
    return -(-x // m) * m


# ------------------------------ Pallas kernel -------------------------------

def _conv_relu_pool_layer(x_ref, w_ref, b_ref, acc_ref, emit, *, k, Ho, Wo, Wp, chunk):
    """conv(k, stride=1, 'same') + bias + ReLU + maxpool(2,2) for ONE image.

    x_ref:   (Hp*Wp, CPAD) bf16.  Zero-padded image: interior pixel (i, j) is
             at flattened row (i + k//2)*Wp + (j + k//2); columns past the real
             zero border (W alignment pad) are junk that is never read for a
             real output row.
    w_ref:   (k*k, CPAD, CPAD) bf16, tap (di, dj) at index di*k+dj, (Cin, Cout).
    b_ref:   (1, CPAD) f32.
    acc_ref: (>=Rc, CPAD) f32 scratch; written ONCE per chunk then read for
             pooling (no per-tap read-modify-write).
    emit(po, row): consumer of pooled row `po` (row: (Wo//2, CPAD) f32, after
             bias + ReLU).
    """
    Pw = Wo // 2
    Rc = (chunk - 1) * Wp + Wo           # conv rows of one chunk (embedded, stride Wp)
    Lc = (chunk + k - 2) * Wp + Wo       # input rows covering all di shifts of a chunk
    bias = b_ref[...]                    # loaded once per layer
    for c in range(Ho // chunk):
        base = c * chunk * Wp
        acc = None
        # dj-outer: each column-shifted slab is loaded once and reused for all di.
        for dj in range(k):
            s = x_ref[pl.ds(base + dj, Lc), :]
            for di in range(k):
                lhs = s[di * Wp: di * Wp + Rc, :]          # 16-aligned static view
                contrib = jnp.dot(lhs, w_ref[di * k + dj],
                                  preferred_element_type=jnp.float32)
                acc = contrib if acc is None else acc + contrib
        acc_ref[pl.ds(0, Rc), :] = acc                     # single store per chunk
        # 2x2 max-pool; bias + ReLU applied after the max (they commute) -> 4x
        # fewer elementwise ops.
        for po in range(chunk // 2):
            r0 = (2 * po) * Wp
            r1 = r0 + Wp
            m = jnp.maximum(
                jnp.maximum(acc_ref[pl.ds(r0, Pw, stride=2), :],
                            acc_ref[pl.ds(r0 + 1, Pw, stride=2), :]),
                jnp.maximum(acc_ref[pl.ds(r1, Pw, stride=2), :],
                            acc_ref[pl.ds(r1 + 1, Pw, stride=2), :]))
            emit(c * (chunk // 2) + po, jnp.maximum(m + bias, 0.0))


def _convnet_kernel(x_ref, cw1_ref, cb1_ref, cw2_ref, cb2_ref, cw3_ref, cb3_ref,
                    f1w_ref, f1b_ref, f2w_ref, f2b_ref, o_ref,
                    a2_ref, a3_ref, acc_ref, *, layers):
    """Whole ConvNet forward for one image; activations never leave VMEM."""
    (k1, Ho1, Wo1, Wp1, ch1), (k2, Ho2, Wo2, Wp2, ch2), (k3, Ho3, Wo3, Wp3, ch3) = layers

    # Zero the padded activation buffers so the 'same' zero border (and the W
    # alignment pad) is correct.  Done every grid step: with a parallel grid
    # each TensorCore owns its own scratch and its own subset of steps.
    a2_ref[...] = jnp.zeros_like(a2_ref)
    a3_ref[...] = jnp.zeros_like(a3_ref)

    def emit_a2(po, row):   # pooled layer-1 row -> layer-2 padded interior
        a2_ref[pl.ds((1 + po) * Wp2 + 1, Wo1 // 2), :] = row.astype(a2_ref.dtype)

    def emit_a3(po, row):   # pooled layer-2 row -> layer-3 padded interior
        a3_ref[pl.ds((1 + po) * Wp3 + 1, Wo2 // 2), :] = row.astype(a3_ref.dtype)

    pooled3 = [None] * (Ho3 // 2)

    def emit_p3(po, row):   # pooled layer-3 rows stay in registers for the FCs
        pooled3[po] = row

    _conv_relu_pool_layer(x_ref, cw1_ref, cb1_ref, acc_ref, emit_a2,
                          k=k1, Ho=Ho1, Wo=Wo1, Wp=Wp1, chunk=ch1)
    _conv_relu_pool_layer(a2_ref, cw2_ref, cb2_ref, acc_ref, emit_a3,
                          k=k2, Ho=Ho2, Wo=Wo2, Wp=Wp2, chunk=ch2)
    _conv_relu_pool_layer(a3_ref, cw3_ref, cb3_ref, acc_ref, emit_p3,
                          k=k3, Ho=Ho3, Wo=Wo3, Wp=Wp3, chunk=ch3)

    # fc1 + ReLU + fc2.  fc1 weights were pre-permuted to (S3, CPAD, 512) in
    # NHWC/lane-padded order, so the pooled rows are consumed directly.
    Pw3 = Wo3 // 2
    h = None
    for po in range(Ho3 // 2):
        row = pooled3[po].astype(jnp.bfloat16)             # (Pw3, CPAD)
        for pw in range(Pw3):
            s_idx = po * Pw3 + pw
            contrib = jnp.dot(row[pw:pw + 1, :], f1w_ref[s_idx],
                              preferred_element_type=jnp.float32)
            h = contrib if h is None else h + contrib
    h = jnp.maximum(h + f1b_ref[...], 0.0)                 # (1, 512) f32
    out = jnp.dot(h.astype(jnp.bfloat16), f2w_ref[...],
                  preferred_element_type=jnp.float32)
    o_ref[...] = out + f2b_ref[...]                        # (1, NOUT) lane-dense


# ------------------------------ forward wrapper -----------------------------

def convnet_forward(x_nchw, p):
    """Forward pass matching ConvNet.forward (odd kernels, stride=1 only)."""
    # TODO(synk): only stride=1 convs are implemented (the module's default).
    convs = p["conv"]
    N, Cin, H, W = x_nchw.shape

    # Static per-layer geometry derived from (static) shapes.
    layers = []
    ho, wo = H, W
    for wt, _ in convs:
        k = math.isqrt(wt.shape[0])
        assert k * k == wt.shape[0] and k % 2 == 1
        assert ho % 2 == 0 and wo % 2 == 0
        pad = k // 2
        layers.append(dict(k=k, Ho=ho, Wo=wo, Hp=ho + 2 * pad,
                           Wp=_round_up(wo + 2 * pad, 16),   # bf16-tile-aligned row stride
                           chunk=4 if ho % 4 == 0 else 2))
        ho, wo = ho // 2, wo // 2

    l0, l1, l2 = layers
    HID = p["fc1_b"].shape[0]
    F = p["fc2_b"].shape[0]

    # Input-only glue: NCHW -> NHWC, bf16, zero border + alignment pad,
    # lane-pad channels to 128, flatten (H, W) onto the sublane axis.
    pad0 = l0["k"] // 2
    xp = jnp.transpose(x_nchw, (0, 2, 3, 1)).astype(jnp.bfloat16)
    xp = jnp.pad(xp, ((0, 0), (pad0, pad0), (pad0, l0["Wp"] - W - pad0),
                      (0, CPAD - Cin)))
    xp = xp.reshape(N, l0["Hp"] * l0["Wp"], CPAD)

    # Tiny weight-side pads (biases / fc2 lanes) kept here so the real channel
    # counts remain visible for the cost estimate.
    cbs = [jnp.pad(b, (0, CPAD - b.shape[0])).reshape(1, CPAD).astype(jnp.float32)
           for _, b in convs]
    f1b = p["fc1_b"].reshape(1, HID).astype(jnp.float32)
    f2w = jnp.pad(p["fc2_w"], ((0, 0), (0, NOUT - F)))
    f2b = jnp.pad(p["fc2_b"], (0, NOUT - F)).reshape(1, NOUT).astype(jnp.float32)

    # Real-op-count cost estimate.
    flops = 0
    cin, ho, wo = Cin, H, W
    for wt, b in convs:
        k = math.isqrt(wt.shape[0])
        cout = b.shape[0]
        flops += 2 * ho * wo * k * k * cin * cout
        cin, ho, wo = cout, ho // 2, wo // 2
    flops += 2 * cin * ho * wo * HID + 2 * HID * F
    flops *= N
    bytes_accessed = (xp.size * 2
                      + sum(wt.size * 2 + CPAD * 4 for wt, _ in convs)
                      + p["fc1_w"].size * 2 + HID * 4
                      + f2w.size * 2 + NOUT * 4
                      + N * NOUT * 4)

    kern = functools.partial(
        _convnet_kernel,
        layers=tuple((l["k"], l["Ho"], l["Wo"], l["Wp"], l["chunk"]) for l in layers))
    rc_max = max((l["chunk"] - 1) * l["Wp"] + l["Wo"] for l in layers)

    out = pl.pallas_call(
        kern,
        out_shape=jax.ShapeDtypeStruct((N, 1, NOUT), jnp.float32),
        grid=(N,),
        in_specs=[
            pl.BlockSpec((None, l0["Hp"] * l0["Wp"], CPAD), lambda n: (n, 0, 0)),
            pl.BlockSpec(convs[0][0].shape, lambda n: (0, 0, 0)),
            pl.BlockSpec((1, CPAD), lambda n: (0, 0)),
            pl.BlockSpec(convs[1][0].shape, lambda n: (0, 0, 0)),
            pl.BlockSpec((1, CPAD), lambda n: (0, 0)),
            pl.BlockSpec(convs[2][0].shape, lambda n: (0, 0, 0)),
            pl.BlockSpec((1, CPAD), lambda n: (0, 0)),
            pl.BlockSpec(p["fc1_w"].shape, lambda n: (0, 0, 0)),
            pl.BlockSpec((1, HID), lambda n: (0, 0)),
            pl.BlockSpec(f2w.shape, lambda n: (0, 0)),
            pl.BlockSpec((1, NOUT), lambda n: (0, 0)),
        ],
        out_specs=pl.BlockSpec((None, 1, NOUT), lambda n: (n, 0, 0)),
        scratch_shapes=[
            pltpu.VMEM((l1["Hp"] * l1["Wp"], CPAD), jnp.bfloat16),   # layer-2 padded act
            pltpu.VMEM((l2["Hp"] * l2["Wp"], CPAD), jnp.bfloat16),   # layer-3 padded act
            pltpu.VMEM((rc_max, CPAD), jnp.float32),                 # per-chunk conv acc
        ],
        compiler_params=pltpu.CompilerParams(dimension_semantics=("parallel",)),
        cost_estimate=pl.CostEstimate(flops=flops, transcendentals=0,
                                      bytes_accessed=bytes_accessed),
    )(xp, convs[0][0], cbs[0], convs[1][0], cbs[1], convs[2][0], cbs[2],
      p["fc1_w"], f1b, f2w, f2b)
    return out.reshape(N, NOUT)[:, :F]


# --------------------------- parameter preparation --------------------------

def prepare_params(params):
    """One-time packing of torch-layout params into the kernel's layout."""
    conv = []
    for w, b in params["convs"]:
        cout, cin, k, k2 = w.shape
        assert k == k2
        wt = jnp.transpose(w, (2, 3, 1, 0)).reshape(k * k, cin, cout)
        wt = jnp.pad(wt, ((0, 0), (0, CPAD - cin), (0, CPAD - cout))).astype(jnp.bfloat16)
        conv.append((wt, b.astype(jnp.float32)))
    # fc1_w is (flat, 512) with flat in torch NCHW flatten order (c*S3 + s).
    # Re-permute to (S3, CPAD, 512) so the kernel consumes pooled NHWC/CPAD
    # rows directly (no transpose/slice before fc1).
    c3 = params["convs"][-1][0].shape[0]
    flat, hid = params["fc1_w"].shape
    s3 = flat // c3
    f1w = params["fc1_w"].reshape(c3, s3, hid).transpose(1, 0, 2)
    f1w = jnp.pad(f1w, ((0, 0), (0, CPAD - c3), (0, 0))).astype(jnp.bfloat16)
    return {"conv": conv,
            "fc1_w": f1w,
            "fc1_b": params["fc1_b"].astype(jnp.float32),
            "fc2_w": params["fc2_w"].astype(jnp.bfloat16),
            "fc2_b": params["fc2_b"].astype(jnp.float32)}


def init_params(key, input_dim=(3, 16, 16), num_features=1,
                kernel=(3, 3, 3), features_size=(16, 32, 64), stride=(1, 1, 1)):
    keys = jax.random.split(key, 2 * len(kernel) + 4)
    convs = []
    in_ch, H, W = input_dim
    ki = 0
    for k, f, s in zip(kernel, features_size, stride):
        fan_in = in_ch * k * k
        w = jax.random.normal(keys[ki], (f, in_ch, k, k), jnp.float32) / jnp.sqrt(fan_in)
        b = jax.random.normal(keys[ki + 1], (f,), jnp.float32) * 0.01
        convs.append((w, b))
        ki += 2
        in_ch = f
        H = ((H + 2 * (k // 2) - k) // s + 1) // 2    # 'same' conv then pool /2
        W = ((W + 2 * (k // 2) - k) // s + 1) // 2
    flat = in_ch * H * W
    params = {"convs": convs}
    params["fc1_w"] = jax.random.normal(keys[ki], (flat, 512), jnp.float32) / jnp.sqrt(flat)
    params["fc1_b"] = jax.random.normal(keys[ki + 1], (512,), jnp.float32) * 0.01
    params["fc2_w"] = jax.random.normal(keys[ki + 2], (512, num_features), jnp.float32) / jnp.sqrt(512.0)
    params["fc2_b"] = jax.random.normal(keys[ki + 3], (num_features,), jnp.float32) * 0.01
    return params


# ------------------------------ pure-JAX reference ---------------------------

def convnet_reference(x_nchw, params):
    """Reference with the same bf16-operand / f32-accumulate precision as the kernel."""
    f32, bf16 = jnp.float32, jnp.bfloat16
    x = x_nchw.astype(bf16).astype(f32)
    for w, b in params["convs"]:
        x = jax.lax.conv_general_dilated(
            x, w.astype(bf16).astype(f32), window_strides=(1, 1), padding="SAME",
            dimension_numbers=("NCHW", "OIHW", "NCHW"))
        x = jnp.maximum(x + b[None, :, None, None], 0.0)
        x = jax.lax.reduce_window(x, -jnp.inf, jax.lax.max,
                                  (1, 1, 2, 2), (1, 1, 2, 2), "VALID")
        x = x.astype(bf16).astype(f32)
    xf = x.reshape(x.shape[0], -1)
    h = jnp.maximum(xf @ params["fc1_w"].astype(bf16).astype(f32) + params["fc1_b"], 0.0)
    h = h.astype(bf16).astype(f32)
    return h @ params["fc2_w"].astype(bf16).astype(f32) + params["fc2_b"]


# ----------------------------------- main -----------------------------------

if __name__ == "__main__":
    key = jax.random.PRNGKey(0)
    k_x, k_p = jax.random.split(key)

    batch, input_dim = 2, (3, 16, 16)                 # NCHW input (2, 3, 16, 16)
    x = jax.random.normal(k_x, (batch,) + input_dim, jnp.float32)
    params = init_params(k_p, input_dim=input_dim, num_features=1)

    prepared = prepare_params(params)                 # one-time weight packing
    out = jax.block_until_ready(jax.jit(convnet_forward)(x, prepared))
    assert out.shape == (batch, 1) and out.dtype == jnp.float32

    # Tolerance check vs a precision-matched pure-JAX reference (bf16 drift is
    # expected and accepted; see review).
    ref = jax.block_until_ready(jax.jit(convnet_reference)(x, params))
    np.testing.assert_allclose(np.asarray(out), np.asarray(ref), rtol=2e-2, atol=2e-2)

    # TODO(synk): train_step (Adam + MSELoss backward) is training machinery
    # with no single Pallas forward-kernel equivalent; only forward implemented.
    print("KERNEL_OK")
</pallas_src>

<mosaic_0001>
module attributes {stable_mosaic.version = 11 : i64} {
  func.func @_convnet_kernel(%arg0: i32, %arg1: memref<1x576x128xbf16, #tpu.memory_space<vmem>>, %arg2: memref<9x128x128xbf16, #tpu.memory_space<vmem>>, %arg3: memref<1x128xf32, #tpu.memory_space<vmem>>, %arg4: memref<9x128x128xbf16, #tpu.memory_space<vmem>>, %arg5: memref<1x128xf32, #tpu.memory_space<vmem>>, %arg6: memref<9x128x128xbf16, #tpu.memory_space<vmem>>, %arg7: memref<1x128xf32, #tpu.memory_space<vmem>>, %arg8: memref<4x128x512xbf16, #tpu.memory_space<vmem>>, %arg9: memref<1x512xf32, #tpu.memory_space<vmem>>, %arg10: memref<512x128xbf16, #tpu.memory_space<vmem>>, %arg11: memref<1x128xf32, #tpu.memory_space<vmem>>, %arg12: memref<1x1x128xf32, #tpu.memory_space<vmem>>, %arg13: memref<160x128xbf16, #tpu.memory_space<vmem>>, %arg14: memref<96x128xbf16, #tpu.memory_space<vmem>>, %arg15: memref<112x128xf32, #tpu.memory_space<vmem>>) attributes {dimension_semantics = [#tpu.dimension_semantics<parallel>], iteration_bounds = array<i64: 2>, scalar_prefetch = 0 : i64, scratch_operands = 3 : i64, tpu.core_type = #tpu.core_type<tc>, window_params = [{transform_indices = @transform_0, window_bounds = array<i64: 1, 576, 128>}, {pipeline_mode = #tpu.pipeline_mode<synchronous>, transform_indices = @transform_1, window_bounds = array<i64: 9, 128, 128>}, {pipeline_mode = #tpu.pipeline_mode<synchronous>, transform_indices = @transform_2, window_bounds = array<i64: 1, 128>}, {pipeline_mode = #tpu.pipeline_mode<synchronous>, transform_indices = @transform_3, window_bounds = array<i64: 9, 128, 128>}, {pipeline_mode = #tpu.pipeline_mode<synchronous>, transform_indices = @transform_4, window_bounds = array<i64: 1, 128>}, {pipeline_mode = #tpu.pipeline_mode<synchronous>, transform_indices = @transform_5, window_bounds = array<i64: 9, 128, 128>}, {pipeline_mode = #tpu.pipeline_mode<synchronous>, transform_indices = @transform_6, window_bounds = array<i64: 1, 128>}, {pipeline_mode = #tpu.pipeline_mode<synchronous>, transform_indices = @transform_7, window_bounds = array<i64: 4, 128, 512>}, {pipeline_mode = #tpu.pipeline_mode<synchronous>, transform_indices = @transform_8, window_bounds = array<i64: 1, 512>}, {pipeline_mode = #tpu.pipeline_mode<synchronous>, transform_indices = @transform_9, window_bounds = array<i64: 512, 128>}, {pipeline_mode = #tpu.pipeline_mode<synchronous>, transform_indices = @transform_10, window_bounds = array<i64: 1, 128>}, {transform_indices = @transform_11, window_bounds = array<i64: 1, 1, 128>}]} {
    %cst = arith.constant 0.000000e+00 : bf16
    %0 = vector.broadcast %cst : bf16 to vector<160x128xbf16>
    %c0 = arith.constant 0 : index
    %c0_0 = arith.constant 0 : index
    %1 = vector.load %arg13[%c0, %c0_0] : memref<160x128xbf16, #tpu.memory_space<vmem>>, vector<160x128xbf16>
    tpu.vector_store %arg13[%c0, %c0_0], %0 {strides = array<i32>} : memref<160x128xbf16, #tpu.memory_space<vmem>>, vector<160x128xbf16>,
    %cst_1 = arith.constant 0.000000e+00 : bf16
    %2 = vector.broadcast %cst_1 : bf16 to vector<96x128xbf16>
    %c0_2 = arith.constant 0 : index
    %c0_3 = arith.constant 0 : index
    %3 = vector.load %arg14[%c0_2, %c0_3] : memref<96x128xbf16, #tpu.memory_space<vmem>>, vector<96x128xbf16>
    tpu.vector_store %arg14[%c0_2, %c0_3], %2 {strides = array<i32>} : memref<96x128xbf16, #tpu.memory_space<vmem>>, vector<96x128xbf16>,
    %c0_4 = arith.constant 0 : index
    %c0_5 = arith.constant 0 : index
    %4 = vector.load %arg3[%c0_4, %c0_5] : memref<1x128xf32, #tpu.memory_space<vmem>>, vector<1x128xf32>
    %c0_6 = arith.constant 0 : index
    %c0_7 = arith.constant 0 : index
    %c0_8 = arith.constant 0 : index
    %5 = vector.load %arg1[%c0_6, %c0_7, %c0_8] : memref<1x576x128xbf16, #tpu.memory_space<vmem>>, vector<1x176x128xbf16>
    %6 = vector.shape_cast %5 : vector<1x176x128xbf16> to vector<176x128xbf16>
    %7 = vector.extract_strided_slice %6 {offsets = [0, 0], sizes = [112, 128], strides = [1, 1]} : vector<176x128xbf16> to vector<112x128xbf16>
    %c0_9 = arith.constant 0 : index
    %c0_10 = arith.constant 0 : index
    %c0_11 = arith.constant 0 : index
    %8 = vector.load %arg2[%c0_9, %c0_10, %c0_11] : memref<9x128x128xbf16, #tpu.memory_space<vmem>>, vector<1x128x128xbf16>
    %9 = vector.shape_cast %8 : vector<1x128x128xbf16> to vector<128x128xbf16>
    %cst_12 = arith.constant dense<0.000000e+00> : vector<112x128xf32>
    %10 = tpu.matmul %7, %9, %cst_12 {dimension_numbers = #tpu.dot_dimension_numbers<[1], [0], [0], [1], [0, 0, 1, 1], [], []>} : vector<112x128xbf16>, vector<128x128xbf16>, vector<112x128xf32> -> vector<112x128xf32>
    %11 = vector.extract_strided_slice %6 {offsets = [32, 0], sizes = [112, 128], strides = [1, 1]} : vector<176x128xbf16> to vector<112x128xbf16>
    %c3 = arith.constant 3 : index
    %c0_13 = arith.constant 0 : index
    %c0_14 = arith.constant 0 : index
    %12 = vector.load %arg2[%c3, %c0_13, %c0_14] : memref<9x128x128xbf16, #tpu.memory_space<vmem>>, vector<1x128x128xbf16>
    %13 = vector.shape_cast %12 : vector<1x128x128xbf16> to vector<128x128xbf16>
    %cst_15 = arith.constant dense<0.000000e+00> : vector<112x128xf32>
    %14 = tpu.matmul %11, %13, %cst_15 {dimension_numbers = #tpu.dot_dimension_numbers<[1], [0], [0], [1], [0, 0, 1, 1], [], []>} : vector<112x128xbf16>, vector<128x128xbf16>, vector<112x128xf32> -> vector<112x128xf32>
    %15 = arith.addf %10, %14 : vector<112x128xf32>
    %16 = vector.extract_strided_slice %6 {offsets = [64, 0], sizes = [112, 128], strides = [1, 1]} : vector<176x128xbf16> to vector<112x128xbf16>
    %c6 = arith.constant 6 : index
    %c0_16 = arith.constant 0 : index
    %c0_17 = arith.constant 0 : index
    %17 = vector.load %arg2[%c6, %c0_16, %c0_17] : memref<9x128x128xbf16, #tpu.memory_space<vmem>>, vector<1x128x128xbf16>
    %18 = vector.shape_cast %17 : vector<1x128x128xbf16> to vector<128x128xbf16>
    %cst_18 = arith.constant dense<0.000000e+00> : vector<112x128xf32>
    %19 = tpu.matmul %16, %18, %cst_18 {dimension_numbers = #tpu.dot_dimension_numbers<[1], [0], [0], [1], [0, 0, 1, 1], [], []>} : vector<112x128xbf16>, vector<128x128xbf16>, vector<112x128xf32> -> vector<112x128xf32>
    %20 = arith.addf %15, %19 : vector<112x128xf32>
    %c0_19 = arith.constant 0 : index
    %c1 = arith.constant 1 : index
    %c0_20 = arith.constant 0 : index
    %21 = vector.load %arg1[%c0_19, %c1, %c0_20] : memref<1x576x128xbf16, #tpu.memory_space<vmem>>, vector<1x176x128xbf16>
    %22 = vector.shape_cast %21 : vector<1x176x128xbf16> to vector<176x128xbf16>
    %23 = vector.extract_strided_slice %22 {offsets = [0, 0], sizes = [112, 128], strides = [1, 1]} : vector<176x128xbf16> to vector<112x128xbf16>
    %c1_21 = arith.constant 1 : index
    %c0_22 = arith.constant 0 : index
    %c0_23 = arith.constant 0 : index
    %24 = vector.load %arg2[%c1_21, %c0_22, %c0_23] : memref<9x128x128xbf16, #tpu.memory_space<vmem>>, vector<1x128x128xbf16>
    %25 = vector.shape_cast %24 : vector<1x128x128xbf16> to vector<128x128xbf16>
    %cst_24 = arith.constant dense<0.000000e+00> : vector<112x128xf32>
    %26 = tpu.matmul %23, %25, %cst_24 {dimension_numbers = #tpu.dot_dimension_numbers<[1], [0], [0], [1], [0, 0, 1, 1], [], []>} : vector<112x128xbf16>, vector<128x128xbf16>, vector<112x128xf32> -> vector<112x128xf32>
    %27 = arith.addf %20, %26 : vector<112x128xf32>
    %28 = vector.extract_strided_slice %22 {offsets = [32, 0], sizes = [112, 128], strides = [1, 1]} : vector<176x128xbf16> to vector<112x128xbf16>
    %c4 = arith.constant 4 : index
    %c0_25 = arith.constant 0 : index
    %c0_26 = arith.constant 0 : index
    %29 = vector.load %arg2[%c4, %c0_25, %c0_26] : memref<9x128x128xbf16, #tpu.memory_space<vmem>>, vector<1x128x128xbf16>
    %30 = vector.shape_cast %29 : vector<1x128x128xbf16> to vector<128x128xbf16>
    %cst_27 = arith.constant dense<0.000000e+00> : vector<112x128xf32>
    %31 = tpu.matmul %28, %30, %cst_27 {dimension_numbers = #tpu.dot_dimension_numbers<[1], [0], [0], [1], [0, 0, 1, 1], [], []>} : vector<112x128xbf16>, vector<128x128xbf16>, vector<112x128xf32> -> vector<112x128xf32>
    %32 = arith.addf %27, %31 : vector<112x128xf32>
    %33 = vector.extract_strided_slice %22 {offsets = [64, 0], sizes = [112, 128], strides = [1, 1]} : vector<176x128xbf16> to vector<112x128xbf16>
    %c7 = arith.constant 7 : index
    %c0_28 = arith.constant 0 : index
    %c0_29 = arith.constant 0 : index
    %34 = vector.load %arg2[%c7, %c0_28, %c0_29] : memref<9x128x128xbf16, #tpu.memory_space<vmem>>, vector<1x128x128xbf16>
    %35 = vector.shape_cast %34 : vector<1x128x128xbf16> to vector<128x128xbf16>
    %cst_30 = arith.constant dense<0.000000e+00> : vector<112x128xf32>
    %36 = tpu.matmul %33, %35, %cst_30 {dimension_numbers = #tpu.dot_dimension_numbers<[1], [0], [0], [1], [0, 0, 1, 1], [], []>} : vector<112x128xbf16>, vector<128x128xbf16>, vector<112x128xf32> -> vector<112x128xf32>
    %37 = arith.addf %32, %36 : vector<112x128xf32>
    %c0_31 = arith.constant 0 : index
    %c2 = arith.constant 2 : index
    %c0_32 = arith.constant 0 : index
    %38 = vector.load %arg1[%c0_31, %c2, %c0_32] : memref<1x576x128xbf16, #tpu.memory_space<vmem>>, vector<1x176x128xbf16>
    %39 = vector.shape_cast %38 : vector<1x176x128xbf16> to vector<176x128xbf16>
    %40 = vector.extract_strided_slice %39 {offsets = [0, 0], sizes = [112, 128], strides = [1, 1]} : vector<176x128xbf16> to vector<112x128xbf16>
    %c2_33 = arith.constant 2 : index
    %c0_34 = arith.constant 0 : index
    %c0_35 = arith.constant 0 : index
    %41 = vector.load %arg2[%c2_33, %c0_34, %c0_35] : memref<9x128x128xbf16, #tpu.memory_space<vmem>>, vector<1x128x128xbf16>
    %42 = vector.shape_cast %41 : vector<1x128x128xbf16> to vector<128x128xbf16>
    %cst_36 = arith.constant dense<0.000000e+00> : vector<112x128xf32>
    %43 = tpu.matmul %40, %42, %cst_36 {dimension_numbers = #tpu.dot_dimension_numbers<[1], [0], [0], [1], [0, 0, 1, 1], [], []>} : vector<112x128xbf16>, vector<128x128xbf16>, vector<112x128xf32> -> vector<112x128xf32>
    %44 = arith.addf %37, %43 : vector<112x128xf32>
    %45 = vector.extract_strided_slice %39 {offsets = [32, 0], sizes = [112, 128], strides = [1, 1]} : vector<176x128xbf16> to vector<112x128xbf16>
    %c5 = arith.constant 5 : index
    %c0_37 = arith.constant 0 : index
    %c0_38 = arith.constant 0 : index
    %46 = vector.load %arg2[%c5, %c0_37, %c0_38] : memref<9x128x128xbf16, #tpu.memory_space<vmem>>, vector<1x128x128xbf16>
    %47 = vector.shape_cast %46 : vector<1x128x128xbf16> to vector<128x128xbf16>
    %cst_39 = arith.constant dense<0.000000e+00> : vector<112x128xf32>
    %48 = tpu.matmul %45, %47, %cst_39 {dimension_numbers = #tpu.dot_dimension_numbers<[1], [0], [0], [1], [0, 0, 1, 1], [], []>} : vector<112x128xbf16>, vector<128x128xbf16>, vector<112x128xf32> -> vector<112x128xf32>
    %49 = arith.addf %44, %48 : vector<112x128xf32>
    %50 = vector.extract_strided_slice %39 {offsets = [64, 0], sizes = [112, 128], strides = [1, 1]} : vector<176x128xbf16> to vector<112x128xbf16>
    %c8 = arith.constant 8 : index
    %c0_40 = arith.constant 0 : index
    %c0_41 = arith.constant 0 : index
    %51 = vector.load %arg2[%c8, %c0_40, %c0_41] : memref<9x128x128xbf16, #tpu.memory_space<vmem>>, vector<1x128x128xbf16>
    %52 = vector.shape_cast %51 : vector<1x128x128xbf16> to vector<128x128xbf16>
    %cst_42 = arith.constant dense<0.000000e+00> : vector<112x128xf32>
    %53 = tpu.matmul %50, %52, %cst_42 {dimension_numbers = #tpu.dot_dimension_numbers<[1], [0], [0], [1], [0, 0, 1, 1], [], []>} : vector<112x128xbf16>, vector<128x128xbf16>, vector<112x128xf32> -> vector<112x128xf32>
    %54 = arith.addf %49, %53 : vector<112x128xf32>
    %c0_43 = arith.constant 0 : index
    %c0_44 = arith.constant 0 : index
    %55 = vector.load %arg15[%c0_43, %c0_44] : memref<112x128xf32, #tpu.memory_space<vmem>>, vector<112x128xf32>
    tpu.vector_store %arg15[%c0_43, %c0_44], %54 {strides = array<i32>} : memref<112x128xf32, #tpu.memory_space<vmem>>, vector<112x128xf32>,
    %c0_45 = arith.constant 0 : index
    %c0_46 = arith.constant 0 : index
    %56 = tpu.strided_load %arg15[%c0_45, %c0_46] {strides = array<i32: 2, 1>} : memref<112x128xf32, #tpu.memory_space<vmem>>, vector<8x128xf32>
    %c1_47 = arith.constant 1 : index
    %c0_48 = arith.constant 0 : index
    %57 = tpu.strided_load %arg15[%c1_47, %c0_48] {strides = array<i32: 2, 1>} : memref<112x128xf32, #tpu.memory_space<vmem>>, vector<8x128xf32>
    %58 = arith.maximumf %56, %57 : vector<8x128xf32>
    %c32 = arith.constant 32 : index
    %c0_49 = arith.constant 0 : index
    %59 = tpu.strided_load %arg15[%c32, %c0_49] {strides = array<i32: 2, 1>} : memref<112x128xf32, #tpu.memory_space<vmem>>, vector<8x128xf32>
    %c33 = arith.constant 33 : index
    %c0_50 = arith.constant 0 : index
    %60 = tpu.strided_load %arg15[%c33, %c0_50] {strides = array<i32: 2, 1>} : memref<112x128xf32, #tpu.memory_space<vmem>>, vector<8x128xf32>
    %61 = arith.maximumf %59, %60 : vector<8x128xf32>
    %62 = arith.maximumf %58, %61 : vector<8x128xf32>
    %63 = vector.broadcast %4 : vector<1x128xf32> to vector<8x128xf32>
    %64 = arith.addf %62, %63 : vector<8x128xf32>
    %cst_51 = arith.constant 0.000000e+00 : f32
    %65 = vector.broadcast %cst_51 : f32 to vector<8x128xf32>
    %66 = arith.maximumf %64, %65 : vector<8x128xf32>
    %67 = arith.truncf %66 : vector<8x128xf32> to vector<8x128xbf16>
    %c17 = arith.constant 17 : index
    %c0_52 = arith.constant 0 : index
    %68 = vector.load %arg13[%c17, %c0_52] : memref<160x128xbf16, #tpu.memory_space<vmem>>, vector<8x128xbf16>
    tpu.vector_store %arg13[%c17, %c0_52], %67 {strides = array<i32>} : memref<160x128xbf16, #tpu.memory_space<vmem>>, vector<8x128xbf16>,
    %c64 = arith.constant 64 : index
    %c0_53 = arith.constant 0 : index
    %69 = tpu.strided_load %arg15[%c64, %c0_53] {strides = array<i32: 2, 1>} : memref<112x128xf32, #tpu.memory_space<vmem>>, vector<8x128xf32>
    %c65 = arith.constant 65 : index
    %c0_54 = arith.constant 0 : index
    %70 = tpu.strided_load %arg15[%c65, %c0_54] {strides = array<i32: 2, 1>} : memref<112x128xf32, #tpu.memory_space<vmem>>, vector<8x128xf32>
    %71 = arith.maximumf %69, %70 : vector<8x128xf32>
    %c96 = arith.constant 96 : index
    %c0_55 = arith.constant 0 : index
    %72 = tpu.strided_load %arg15[%c96, %c0_55] {strides = array<i32: 2, 1>} : memref<112x128xf32, #tpu.memory_space<vmem>>, vector<8x128xf32>
    %c97 = arith.constant 97 : index
    %c0_56 = arith.constant 0 : index
    %73 = tpu.strided_load %arg15[%c97, %c0_56] {strides = array<i32: 2, 1>} : memref<112x128xf32, #tpu.memory_space<vmem>>, vector<8x128xf32>
    %74 = arith.maximumf %72, %73 : vector<8x128xf32>
    %75 = arith.maximumf %71, %74 : vector<8x128xf32>
    %76 = vector.broadcast %4 : vector<1x128xf32> to vector<8x128xf32>
    %77 = arith.addf %75, %76 : vector<8x128xf32>
    %cst_57 = arith.constant 0.000000e+00 : f32
    %78 = vector.broadcast %cst_57 : f32 to vector<8x128xf32>
    %79 = arith.maximumf %77, %78 : vector<8x128xf32>
    %80 = arith.truncf %79 : vector<8x128xf32> to vector<8x128xbf16>
    %c33_58 = arith.constant 33 : index
    %c0_59 = arith.constant 0 : index
    %81 = vector.load %arg13[%c33_58, %c0_59] : memref<160x128xbf16, #tpu.memory_space<vmem>>, vector<8x128xbf16>
    tpu.vector_store %arg13[%c33_58, %c0_59], %80 {strides = array<i32>} : memref<160x128xbf16, #tpu.memory_space<vmem>>, vector<8x128xbf16>,
    %c0_60 = arith.constant 0 : index
    %c128 = arith.constant 128 : index
    %c0_61 = arith.constant 0 : index
    %82 = vector.load %arg1[%c0_60, %c128, %c0_61] : memref<1x576x128xbf16, #tpu.memory_space<vmem>>, vector<1x176x128xbf16>
    %83 = vector.shape_cast %82 : vector<1x176x128xbf16> to vector<176x128xbf16>
    %84 = vector.extract_strided_slice %83 {offsets = [0, 0], sizes = [112, 128], strides = [1, 1]} : vector<176x128xbf16> to vector<112x128xbf16>
    %c0_62 = arith.constant 0 : index
    %c0_63 = arith.constant 0 : index
    %c0_64 = arith.constant 0 : index
    %85 = vector.load %arg2[%c0_62, %c0_63, %c0_64] : memref<9x128x128xbf16, #tpu.memory_space<vmem>>, vector<1x128x128xbf16>
    %86 = vector.shape_cast %85 : vector<1x128x128xbf16> to vector<128x128xbf16>
    %cst_65 = arith.constant dense<0.000000e+00> : vector<112x128xf32>
    %87 = tpu.matmul %84, %86, %cst_65 {dimension_numbers = #tpu.dot_dimension_numbers<[1], [0], [0], [1], [0, 0, 1, 1], [], []>} : vector<112x128xbf16>, vector<128x128xbf16>, vector<112x128xf32> -> vector<112x128xf32>
    %88 = vector.extract_strided_slice %83 {offsets = [32, 0], sizes = [112, 128], strides = [1, 1]} : vector<176x128xbf16> to vector<112x128xbf16>
    %c3_66 = arith.constant 3 : index
    %c0_67 = arith.constant 0 : index
    %c0_68 = arith.constant 0 : index
    %89 = vector.load %arg2[%c3_66, %c0_67, %c0_68] : memref<9x128x128xbf16, #tpu.memory_space<vmem>>, vector<1x128x128xbf16>
    %90 = vector.shape_cast %89 : vector<1x128x128xbf16> to vector<128x128xbf16>
    %cst_69 = arith.constant dense<0.000000e+00> : vector<112x128xf32>
    %91 = tpu.matmul %88, %90, %cst_69 {dimension_numbers = #tpu.dot_dimension_numbers<[1], [0], [0], [1], [0, 0, 1, 1], [], []>} : vector<112x128xbf16>, vector<128x128xbf16>, vector<112x128xf32> -> vector<112x128xf32>
    %92 = arith.addf %87, %91 : vector<112x128xf32>
    %93 = vector.extract_strided_slice %83 {offsets = [64, 0], sizes = [112, 128], strides = [1, 1]} : vector<176x128xbf16> to vector<112x128xbf16>
    %c6_70 = arith.constant 6 : index
    %c0_71 = arith.constant 0 : index
    %c0_72 = arith.constant 0 : index
    %94 = vector.load %arg2[%c6_70, %c0_71, %c0_72] : memref<9x128x128xbf16, #tpu.memory_space<vmem>>, vector<1x128x128xbf16>
    %95 = vector.shape_cast %94 : vector<1x128x128xbf16> to vector<128x128xbf16>
    %cst_73 = arith.constant dense<0.000000e+00> : vector<112x128xf32>
    %96 = tpu.matmul %93, %95, %cst_73 {dimension_numbers = #tpu.dot_dimension_numbers<[1], [0], [0], [1], [0, 0, 1, 1], [], []>} : vector<112x128xbf16>, vector<128x128xbf16>, vector<112x128xf32> -> vector<112x128xf32>
    %97 = arith.addf %92, %96 : vector<112x128xf32>
    %c0_74 = arith.constant 0 : index
    %c129 = arith.constant 129 : index
    %c0_75 = arith.constant 0 : index
    %98 = vector.load %arg1[%c0_74, %c129, %c0_75] : memref<1x576x128xbf16, #tpu.memory_space<vmem>>, vector<1x176x128xbf16>
    %99 = vector.shape_cast %98 : vector<1x176x128xbf16> to vector<176x128xbf16>
    %100 = vector.extract_strided_slice %99 {offsets = [0, 0], sizes = [112, 128], strides = [1, 1]} : vector<176x128xbf16> to vector<112x128xbf16>
    %c1_76 = arith.constant 1 : index
    %c0_77 = arith.constant 0 : index
    %c0_78 = arith.constant 0 : index
    %101 = vector.load %arg2[%c1_76, %c0_77, %c0_78] : memref<9x128x128xbf16, #tpu.memory_space<vmem>>, vector<1x128x128xbf16>
    %102 = vector.shape_cast %101 : vector<1x128x128xbf16> to vector<128x128xbf16>
    %cst_79 = arith.constant dense<0.000000e+00> : vector<112x128xf32>
    %103 = tpu.matmul %100, %102, %cst_79 {dimension_numbers = #tpu.dot_dimension_numbers<[1], [0], [0], [1], [0, 0, 1, 1], [], []>} : vector<112x128xbf16>, vector<128x128xbf16>, vector<112x128xf32> -> vector<112x128xf32>
    %104 = arith.addf %97, %103 : vector<112x128xf32>
    %105 = vector.extract_strided_slice %99 {offsets = [32, 0], sizes = [112, 128], strides = [1, 1]} : vector<176x128xbf16> to vector<112x128xbf16>
    %c4_80 = arith.constant 4 : index
    %c0_81 = arith.constant 0 : index
    %c0_82 = arith.constant 0 : index
    %106 = vector.load %arg2[%c4_80, %c0_81, %c0_82] : memref<9x128x128xbf16, #tpu.memory_space<vmem>>, vector<1x128x128xbf16>
    %107 = vector.shape_cast %106 : vector<1x128x128xbf16> to vector<128x128xbf16>
    %cst_83 = arith.constant dense<0.000000e+00> : vector<112x128xf32>
    %108 = tpu.matmul %105, %107, %cst_83 {dimension_numbers = #tpu.dot_dimension_numbers<[1], [0], [0], [1], [0, 0, 1, 1], [], []>} : vector<112x128xbf16>, vector<128x128xbf16>, vector<112x128xf32> -> vector<112x128xf32>
    %109 = arith.addf %104, %108 : vector<112x128xf32>
    %110 = vector.extract_strided_slice %99 {offsets = [64, 0], sizes = [112, 128], strides = [1, 1]} : vector<176x128xbf16> to vector<112x128xbf16>
    %c7_84 = arith.constant 7 : index
    %c0_85 = arith.constant 0 : index
    %c0_86 = arith.constant 0 : index
    %111 = vector.load %arg2[%c7_84, %c0_85, %c0_86] : memref<9x128x128xbf16, #tpu.memory_space<vmem>>, vector<1x128x128xbf16>
    %112 = vector.shape_cast %111 : vector<1x128x128xbf16> to vector<128x128xbf16>
    %cst_87 = arith.constant dense<0.000000e+00> : vector<112x128xf32>
    %113 = tpu.matmul %110, %112, %cst_87 {dimension_numbers = #tpu.dot_dimension_numbers<[1], [0], [0], [1], [0, 0, 1, 1], [], []>} : vector<112x128xbf16>, vector<128x128xbf16>, vector<112x128xf32> -> vector<112x128xf32>
    %114 = arith.addf %109, %113 : vector<112x128xf32>
    %c0_88 = arith.constant 0 : index
    %c130 = arith.constant 130 : index
    %c0_89 = arith.constant 0 : index
    %115 = vector.load %arg1[%c0_88, %c130, %c0_89] : memref<1x576x128xbf16, #tpu.memory_space<vmem>>, vector<1x176x128xbf16>
    %116 = vector.shape_cast %115 : vector<1x176x128xbf16> to vector<176x128xbf16>
    %117 = vector.extract_strided_slice %116 {offsets = [0, 0], sizes = [112, 128], strides = [1, 1]} : vector<176x128xbf16> to vector<112x128xbf16>
    %c2_90 = arith.constant 2 : index
    %c0_91 = arith.constant 0 : index
    %c0_92 = arith.constant 0 : index
    %118 = vector.load %arg2[%c2_90, %c0_91, %c0_92] : memref<9x128x128xbf16, #tpu.memory_space<vmem>>, vector<1x128x128xbf16>
    %119 = vector.shape_cast %118 : vector<1x128x128xbf16> to vector<128x128xbf16>
    %cst_93 = arith.constant dense<0.000000e+00> : vector<112x128xf32>
    %120 = tpu.matmul %117, %119, %cst_93 {dimension_numbers = #tpu.dot_dimension_numbers<[1], [0], [0], [1], [0, 0, 1, 1], [], []>} : vector<112x128xbf16>, vector<128x128xbf16>, vector<112x128xf32> -> vector<112x128xf32>
    %121 = arith.addf %114, %120 : vector<112x128xf32>
    %122 = vector.extract_strided_slice %116 {offsets = [32, 0], sizes = [112, 128], strides = [1, 1]} : vector<176x128xbf16> to vector<112x128xbf16>
    %c5_94 = arith.constant 5 : index
    %c0_95 = arith.constant 0 : index
    %c0_96 = arith.constant 0 : index
    %123 = vector.load %arg2[%c5_94, %c0_95, %c0_96] : memref<9x128x128xbf16, #tpu.memory_space<vmem>>, vector<1x128x128xbf16>
    %124 = vector.shape_cast %123 : vector<1x128x128xbf16> to vector<128x128xbf16>
    %cst_97 = arith.constant dense<0.000000e+00> : vector<112x128xf32>
    %125 = tpu.matmul %122, %124, %cst_97 {dimension_numbers = #tpu.dot_dimension_numbers<[1], [0], [0], [1], [0, 0, 1, 1], [], []>} : vector<112x128xbf16>, vector<128x128xbf16>, vector<112x128xf32> -> vector<112x128xf32>
    %126 = arith.addf %121, %125 : vector<112x128xf32>
    %127 = vector.extract_strided_slice %116 {offsets = [64, 0], sizes = [112, 128], strides = [1, 1]} : vector<176x128xbf16> to vector<112x128xbf16>
    %c8_98 = arith.constant 8 : index
    %c0_99 = arith.constant 0 : index
    %c0_100 = arith.constant 0 : index
    %128 = vector.load %arg2[%c8_98, %c0_99, %c0_100] : memref<9x128x128xbf16, #tpu.memory_space<vmem>>, vector<1x128x128xbf16>
    %129 = vector.shape_cast %128 : vector<1x128x128xbf16> to vector<128x128xbf16>
    %cst_101 = arith.constant dense<0.000000e+00> : vector<112x128xf32>
    %130 = tpu.matmul %127, %129, %cst_101 {dimension_numbers = #tpu.dot_dimension_numbers<[1], [0], [0], [1], [0, 0, 1, 1], [], []>} : vector<112x128xbf16>, vector<128x128xbf16>, vector<112x128xf32> -> vector<112x128xf32>
    %131 = arith.addf %126, %130 : vector<112x128xf32>
    %c0_102 = arith.constant 0 : index
    %c0_103 = arith.constant 0 : index
    %132 = vector.load %arg15[%c0_102, %c0_103] : memref<112x128xf32, #tpu.memory_space<vmem>>, vector<112x128xf32>
    tpu.vector_store %arg15[%c0_102, %c0_103], %131 {strides = array<i32>} : memref<112x128xf32, #tpu.memory_space<vmem>>, vector<112x128xf32>,
    %c0_104 = arith.constant 0 : index
    %c0_105 = arith.constant 0 : index
    %133 = tpu.strided_load %arg15[%c0_104, %c0_105] {strides = array<i32: 2, 1>} : memref<112x128xf32, #tpu.memory_space<vmem>>, vector<8x128xf32>
    %c1_106 = arith.constant 1 : index
    %c0_107 = arith.constant 0 : index
    %134 = tpu.strided_load %arg15[%c1_106, %c0_107] {strides = array<i32: 2, 1>} : memref<112x128xf32, #tpu.memory_space<vmem>>, vector<8x128xf32>
    %135 = arith.maximumf %133, %134 : vector<8x128xf32>
    %c32_108 = arith.constant 32 : index
    %c0_109 = arith.constant 0 : index
    %136 = tpu.strided_load %arg15[%c32_108, %c0_109] {strides = array<i32: 2, 1>} : memref<112x128xf32, #tpu.memory_space<vmem>>, vector<8x128xf32>
    %c33_110 = arith.constant 33 : index
    %c0_111 = arith.constant 0 : index
    %137 = tpu.strided_load %arg15[%c33_110, %c0_111] {strides = array<i32: 2, 1>} : memref<112x128xf32, #tpu.memory_space<vmem>>, vector<8x128xf32>
    %138 = arith.maximumf %136, %137 : vector<8x128xf32>
    %139 = arith.maximumf %135, %138 : vector<8x128xf32>
    %140 = vector.broadcast %4 : vector<1x128xf32> to vector<8x128xf32>
    %141 = arith.addf %139, %140 : vector<8x128xf32>
    %cst_112 = arith.constant 0.000000e+00 : f32
    %142 = vector.broadcast %cst_112 : f32 to vector<8x128xf32>
    %143 = arith.maximumf %141, %142 : vector<8x128xf32>
    %144 = arith.truncf %143 : vector<8x128xf32> to vector<8x128xbf16>
    %c49 = arith.constant 49 : index
    %c0_113 = arith.constant 0 : index
    %145 = vector.load %arg13[%c49, %c0_113] : memref<160x128xbf16, #tpu.memory_space<vmem>>, vector<8x128xbf16>
    tpu.vector_store %arg13[%c49, %c0_113], %144 {strides = array<i32>} : memref<160x128xbf16, #tpu.memory_space<vmem>>, vector<8x128xbf16>,
    %c64_114 = arith.constant 64 : index
    %c0_115 = arith.constant 0 : index
    %146 = tpu.strided_load %arg15[%c64_114, %c0_115] {strides = array<i32: 2, 1>} : memref<112x128xf32, #tpu.memory_space<vmem>>, vector<8x128xf32>
    %c65_116 = arith.constant 65 : index
    %c0_117 = arith.constant 0 : index
    %147 = tpu.strided_load %arg15[%c65_116, %c0_117] {strides = array<i32: 2, 1>} : memref<112x128xf32, #tpu.memory_space<vmem>>, vector<8x128xf32>
    %148 = arith.maximumf %146, %147 : vector<8x128xf32>
    %c96_118 = arith.constant 96 : index
    %c0_119 = arith.constant 0 : index
    %149 = tpu.strided_load %arg15[%c96_118, %c0_119] {strides = array<i32: 2, 1>} : memref<112x128xf32, #tpu.memory_space<vmem>>, vector<8x128xf32>
    %c97_120 = arith.constant 97 : index
    %c0_121 = arith.constant 0 : index
    %150 = tpu.strided_load %arg15[%c97_120, %c0_121] {strides = array<i32: 2, 1>} : memref<112x128xf32, #tpu.memory_space<vmem>>, vector<8x128xf32>
    %151 = arith.maximumf %149, %150 : vector<8x128xf32>
    %152 = arith.maximumf %148, %151 : vector<8x128xf32>
    %153 = vector.broadcast %4 : vector<1x128xf32> to vector<8x128xf32>
    %154 = arith.addf %152, %153 : vector<8x128xf32>
    %cst_122 = arith.constant 0.000000e+00 : f32
    %155 = vector.broadcast %cst_122 : f32 to vector<8x128xf32>
    %156 = arith.maximumf %154, %155 : vector<8x128xf32>
    %157 = arith.truncf %156 : vector<8x128xf32> to vector<8x128xbf16>
    %c65_123 = arith.constant 65 : index
    %c0_124 = arith.constant 0 : index
    %158 = vector.load %arg13[%c65_123, %c0_124] : memref<160x128xbf16, #tpu.memory_space<vmem>>, vector<8x128xbf16>
    tpu.vector_store %arg13[%c65_123, %c0_124], %157 {strides = array<i32>} : memref<160x128xbf16, #tpu.memory_space<vmem>>, vector<8x128xbf16>,
    %c0_125 = arith.constant 0 : index
    %c256 = arith.constant 256 : index
    %c0_126 = arith.constant 0 : index
    %159 = vector.load %arg1[%c0_125, %c256, %c0_126] : memref<1x576x128xbf16, #tpu.memory_space<vmem>>, vector<1x176x128xbf16>
    %160 = vector.shape_cast %159 : vector<1x176x128xbf16> to vector<176x128xbf16>
    %161 = vector.extract_strided_slice %160 {offsets = [0, 0], sizes = [112, 128], strides = [1, 1]} : vector<176x128xbf16> to vector<112x128xbf16>
    %c0_127 = arith.constant 0 : index
    %c0_128 = arith.constant 0 : index
    %c0_129 = arith.constant 0 : index
    %162 = vector.load %arg2[%c0_127, %c0_128, %c0_129] : memref<9x128x128xbf16, #tpu.memory_space<vmem>>, vector<1x128x128xbf16>
    %163 = vector.shape_cast %162 : vector<1x128x128xbf16> to vector<128x128xbf16>
    %cst_130 = arith.constant dense<0.000000e+00> : vector<112x128xf32>
    %164 = tpu.matmul %161, %163, %cst_130 {dimension_numbers = #tpu.dot_dimension_numbers<[1], [0], [0], [1], [0, 0, 1, 1], [], []>} : vector<112x128xbf16>, vector<128x128xbf16>, vector<112x128xf32> -> vector<112x128xf32>
    %165 = vector.extract_strided_slice %160 {offsets = [32, 0], sizes = [112, 128], strides = [1, 1]} : vector<176x128xbf16> to vector<112x128xbf16>
    %c3_131 = arith.constant 3 : index
    %c0_132 = arith.constant 0 : index
    %c0_133 = arith.constant 0 : index
    %166 = vector.load %arg2[%c3_131, %c0_132, %c0_133] : memref<9x128x128xbf16, #tpu.memory_space<vmem>>, vector<1x128x128xbf16>
    %167 = vector.shape_cast %166 : vector<1x128x128xbf16> to vector<128x128xbf16>
    %cst_134 = arith.constant dense<0.000000e+00> : vector<112x128xf32>
    %168 = tpu.matmul %165, %167, %cst_134 {dimension_numbers = #tpu.dot_dimension_numbers<[1], [0], [0], [1], [0, 0, 1, 1], [], []>} : vector<112x128xbf16>, vector<128x128xbf16>, vector<112x128xf32> -> vector<112x128xf32>
    %169 = arith.addf %164, %168 : vector<112x128xf32>
    %170 = vector.extract_strided_slice %160 {offsets = [64, 0], sizes = [112, 128], strides = [1, 1]} : vector<176x128xbf16> to vector<112x128xbf16>
    %c6_135 = arith.constant 6 : index
    %c0_136 = arith.constant 0 : index
    %c0_137 = arith.constant 0 : index
    %171 = vector.load %arg2[%c6_135, %c0_136, %c0_137] : memref<9x128x128xbf16, #tpu.memory_space<vmem>>, vector<1x128x128xbf16>
    %172 = vector.shape_cast %171 : vector<1x128x128xbf16> to vector<128x128xbf16>
    %cst_138 = arith.constant dense<0.000000e+00> : vector<112x128xf32>
    %173 = tpu.matmul %170, %172, %cst_138 {dimension_numbers = #tpu.dot_dimension_numbers<[1], [0], [0], [1], [0, 0, 1, 1], [], []>} : vector<112x128xbf16>, vector<128x128xbf16>, vector<112x128xf32> -> vector<112x128xf32>
    %174 = arith.addf %169, %173 : vector<112x128xf32>
    %c0_139 = arith.constant 0 : index
    %c257 = arith.constant 257 : index
    %c0_140 = arith.constant 0 : index
    %175 = vector.load %arg1[%c0_139, %c257, %c0_140] : memref<1x576x128xbf16, #tpu.memory_space<vmem>>, vector<1x176x128xbf16>
    %176 = vector.shape_cast %175 : vector<1x176x128xbf16> to vector<176x128xbf16>
    %177 = vector.extract_strided_slice %176 {offsets = [0, 0], sizes = [112, 128], strides = [1, 1]} : vector<176x128xbf16> to vector<112x128xbf16>
    %c1_141 = arith.constant 1 : index
    %c0_142 = arith.constant 0 : index
    %c0_143 = arith.constant 0 : index
    %178 = vector.load %arg2[%c1_141, %c0_142, %c0_143] : memref<9x128x128xbf16, #tpu.memory_space<vmem>>, vector<1x128x128xbf16>
    %179 = vector.shape_cast %178 : vector<1x128x128xbf16> to vector<128x128xbf16>
    %cst_144 = arith.constant dense<0.000000e+00> : vector<112x128xf32>
    %180 = tpu.matmul %177, %179, %cst_144 {dimension_numbers = #tpu.dot_dimension_numbers<[1], [0], [0], [1], [0, 0, 1, 1], [], []>} : vector<112x128xbf16>, vector<128x128xbf16>, vector<112x128xf32> -> vector<112x128xf32>
    %181 = arith.addf %174, %180 : vector<112x128xf32>
    %182 = vector.extract_strided_slice %176 {offsets = [32, 0], sizes = [112, 128], strides = [1, 1]} : vector<176x128xbf16> to vector<112x128xbf16>
    %c4_145 = arith.constant 4 : index
    %c0_146 = arith.constant 0 : index
    %c0_147 = arith.constant 0 : index
    %183 = vector.load %arg2[%c4_145, %c0_146, %c0_147] : memref<9x128x128xbf16, #tpu.memory_space<vmem>>, vector<1x128x128xbf16>
    %184 = vector.shape_cast %183 : vector<1x128x128xbf16> to vector<128x128xbf16>
    %cst_148 = arith.constant dense<0.000000e+00> : vector<112x128xf32>
    %185 = tpu.matmul %182, %184, %cst_148 {dimension_numbers = #tpu.dot_dimension_numbers<[1], [0], [0], [1], [0, 0, 1, 1], [], []>} : vector<112x128xbf16>, vector<128x128xbf16>, vector<112x128xf32> -> vector<112x128xf32>
    %186 = arith.addf %181, %185 : vector<112x128xf32>
    %187 = vector.extract_strided_slice %176 {offsets = [64, 0], sizes = [112, 128], strides = [1, 1]} : vector<176x128xbf16> to vector<112x128xbf16>
    %c7_149 = arith.constant 7 : index
    %c0_150 = arith.constant 0 : index
    %c0_151 = arith.constant 0 : index
    %188 = vector.load %arg2[%c7_149, %c0_150, %c0_151] : memref<9x128x128xbf16, #tpu.memory_space<vmem>>, vector<1x128x128xbf16>
    %189 = vector.shape_cast %188 : vector<1x128x128xbf16> to vector<128x128xbf16>
    %cst_152 = arith.constant dense<0.000000e+00> : vector<112x128xf32>
    %190 = tpu.matmul %187, %189, %cst_152 {dimension_numbers = #tpu.dot_dimension_numbers<[1], [0], [0], [1], [0, 0, 1, 1], [], []>} : vector<112x128xbf16>, vector<128x128xbf16>, vector<112x128xf32> -> vector<112x128xf32>
    %191 = arith.addf %186, %190 : vector<112x128xf32>
    %c0_153 = arith.constant 0 : index
    %c258 = arith.constant 258 : index
    %c0_154 = arith.constant 0 : index
    %192 = vector.load %arg1[%c0_153, %c258, %c0_154] : memref<1x576x128xbf16, #tpu.memory_space<vmem>>, vector<1x176x128xbf16>
    %193 = vector.shape_cast %192 : vector<1x176x128xbf16> to vector<176x128xbf16>
    %194 = vector.extract_strided_slice %193 {offsets = [0, 0], sizes = [112, 128], strides = [1, 1]} : vector<176x128xbf16> to vector<112x128xbf16>
    %c2_155 = arith.constant 2 : index
    %c0_156 = arith.constant 0 : index
    %c0_157 = arith.constant 0 : index
    %195 = vector.load %arg2[%c2_155, %c0_156, %c0_157] : memref<9x128x128xbf16, #tpu.memory_space<vmem>>, vector<1x128x128xbf16>
    %196 = vector.shape_cast %195 : vector<1x128x128xbf16> to vector<128x128xbf16>
    %cst_158 = arith.constant dense<0.000000e+00> : vector<112x128xf32>
    %197 = tpu.matmul %194, %196, %cst_158 {dimension_numbers = #tpu.dot_dimension_numbers<[1], [0], [0], [1], [0, 0, 1, 1], [], []>} : vector<112x128xbf16>, vector<128x128xbf16>, vector<112x128xf32> -> vector<112x128xf32>
    %198 = arith.addf %191, %197 : vector<112x128xf32>
    %199 = vector.extract_strided_slice %193 {offsets = [32, 0], sizes = [112, 128], strides = [1, 1]} : vector<176x128xbf16> to vector<112x128xbf16>
    %c5_159 = arith.constant 5 : index
    %c0_160 = arith.constant 0 : index
    %c0_161 = arith.constant 0 : index
    %200 = vector.load %arg2[%c5_159, %c0_160, %c0_161] : memref<9x128x128xbf16, #tpu.memory_space<vmem>>, vector<1x128x128xbf16>
    %201 = vector.shape_cast %200 : vector<1x128x128xbf16> to vector<128x128xbf16>
    %cst_162 = arith.constant dense<0.000000e+00> : vector<112x128xf32>
    %202 = tpu.matmul %199, %201, %cst_162 {dimension_numbers = #tpu.dot_dimension_numbers<[1], [0], [0], [1], [0, 0, 1, 1], [], []>} : vector<112x128xbf16>, vector<128x128xbf16>, vector<112x128xf32> -> vector<112x128xf32>
    %203 = arith.addf %198, %202 : vector<112x128xf32>
    %204 = vector.extract_strided_slice %193 {offsets = [64, 0], sizes = [112, 128], strides = [1, 1]} : vector<176x128xbf16> to vector<112x128xbf16>
    %c8_163 = arith.constant 8 : index
    %c0_164 = arith.constant 0 : index
    %c0_165 = arith.constant 0 : index
    %205 = vector.load %arg2[%c8_163, %c0_164, %c0_165] : memref<9x128x128xbf16, #tpu.memory_space<vmem>>, vector<1x128x128xbf16>
    %206 = vector.shape_cast %205 : vector<1x128x128xbf16> to vector<128x128xbf16>
    %cst_166 = arith.constant dense<0.000000e+00> : vector<112x128xf32>
    %207 = tpu.matmul %204, %206, %cst_166 {dimension_numbers = #tpu.dot_dimension_numbers<[1], [0], [0], [1], [0, 0, 1, 1], [], []>} : vector<112x128xbf16>, vector<128x128xbf16>, vector<112x128xf32> -> vector<112x128xf32>
    %208 = arith.addf %203, %207 : vector<112x128xf32>
    %c0_167 = arith.constant 0 : index
    %c0_168 = arith.constant 0 : index
    %209 = vector.load %arg15[%c0_167, %c0_168] : memref<112x128xf32, #tpu.memory_space<vmem>>, vector<112x128xf32>
    tpu.vector_store %arg15[%c0_167, %c0_168], %208 {strides = array<i32>} : memref<112x128xf32, #tpu.memory_space<vmem>>, vector<112x128xf32>,
    %c0_169 = arith.constant 0 : index
    %c0_170 = arith.constant 0 : index
    %210 = tpu.strided_load %arg15[%c0_169, %c0_170] {strides = array<i32: 2, 1>} : memref<112x128xf32, #tpu.memory_space<vmem>>, vector<8x128xf32>
    %c1_171 = arith.constant 1 : index
    %c0_172 = arith.constant 0 : index
    %211 = tpu.strided_load %arg15[%c1_171, %c0_172] {strides = array<i32: 2, 1>} : memref<112x128xf32, #tpu.memory_space<vmem>>, vector<8x128xf32>
    %212 = arith.maximumf %210, %211 : vector<8x128xf32>
    %c32_173 = arith.constant 32 : index
    %c0_174 = arith.constant 0 : index
    %213 = tpu.strided_load %arg15[%c32_173, %c0_174] {strides = array<i32: 2, 1>} : memref<112x128xf32, #tpu.memory_space<vmem>>, vector<8x128xf32>
    %c33_175 = arith.constant 33 : index
    %c0_176 = arith.constant 0 : index
    %214 = tpu.strided_load %arg15[%c33_175, %c0_176] {strides = array<i32: 2, 1>} : memref<112x128xf32, #tpu.memory_space<vmem>>, vector<8x128xf32>
    %215 = arith.maximumf %213, %214 : vector<8x128xf32>
    %216 = arith.maximumf %212, %215 : vector<8x128xf32>
    %217 = vector.broadcast %4 : vector<1x128xf32> to vector<8x128xf32>
    %218 = arith.addf %216, %217 : vector<8x128xf32>
    %cst_177 = arith.constant 0.000000e+00 : f32
    %219 = vector.broadcast %cst_177 : f32 to vector<8x128xf32>
    %220 = arith.maximumf %218, %219 : vector<8x128xf32>
    %221 = arith.truncf %220 : vector<8x128xf32> to vector<8x128xbf16>
    %c81 = arith.constant 81 : index
    %c0_178 = arith.constant 0 : index
    %222 = vector.load %arg13[%c81, %c0_178] : memref<160x128xbf16, #tpu.memory_space<vmem>>, vector<8x128xbf16>
    tpu.vector_store %arg13[%c81, %c0_178], %221 {strides = array<i32>} : memref<160x128xbf16, #tpu.memory_space<vmem>>, vector<8x128xbf16>,
    %c64_179 = arith.constant 64 : index
    %c0_180 = arith.constant 0 : index
    %223 = tpu.strided_load %arg15[%c64_179, %c0_180] {strides = array<i32: 2, 1>} : memref<112x128xf32, #tpu.memory_space<vmem>>, vector<8x128xf32>
    %c65_181 = arith.constant 65 : index
    %c0_182 = arith.constant 0 : index
    %224 = tpu.strided_load %arg15[%c65_181, %c0_182] {strides = array<i32: 2, 1>} : memref<112x128xf32, #tpu.memory_space<vmem>>, vector<8x128xf32>
    %225 = arith.maximumf %223, %224 : vector<8x128xf32>
    %c96_183 = arith.constant 96 : index
    %c0_184 = arith.constant 0 : index
    %226 = tpu.strided_load %arg15[%c96_183, %c0_184] {strides = array<i32: 2, 1>} : memref<112x128xf32, #tpu.memory_space<vmem>>, vector<8x128xf32>
    %c97_185 = arith.constant 97 : index
    %c0_186 = arith.constant 0 : index
    %227 = tpu.strided_load %arg15[%c97_185, %c0_186] {strides = array<i32: 2, 1>} : memref<112x128xf32, #tpu.memory_space<vmem>>, vector<8x128xf32>
    %228 = arith.maximumf %226, %227 : vector<8x128xf32>
    %229 = arith.maximumf %225, %228 : vector<8x128xf32>
    %230 = vector.broadcast %4 : vector<1x128xf32> to vector<8x128xf32>
    %231 = arith.addf %229, %230 : vector<8x128xf32>
    %cst_187 = arith.constant 0.000000e+00 : f32
    %232 = vector.broadcast %cst_187 : f32 to vector<8x128xf32>
    %233 = arith.maximumf %231, %232 : vector<8x128xf32>
    %234 = arith.truncf %233 : vector<8x128xf32> to vector<8x128xbf16>
    %c97_188 = arith.constant 97 : index
    %c0_189 = arith.constant 0 : index
    %235 = vector.load %arg13[%c97_188, %c0_189] : memref<160x128xbf16, #tpu.memory_space<vmem>>, vector<8x128xbf16>
    tpu.vector_store %arg13[%c97_188, %c0_189], %234 {strides = array<i32>} : memref<160x128xbf16, #tpu.memory_space<vmem>>, vector<8x128xbf16>,
    %c0_190 = arith.constant 0 : index
    %c384 = arith.constant 384 : index
    %c0_191 = arith.constant 0 : index
    %236 = vector.load %arg1[%c0_190, %c384, %c0_191] : memref<1x576x128xbf16, #tpu.memory_space<vmem>>, vector<1x176x128xbf16>
    %237 = vector.shape_cast %236 : vector<1x176x128xbf16> to vector<176x128xbf16>
    %238 = vector.extract_strided_slice %237 {offsets = [0, 0], sizes = [112, 128], strides = [1, 1]} : vector<176x128xbf16> to vector<112x128xbf16>
    %c0_192 = arith.constant 0 : index
    %c0_193 = arith.constant 0 : index
    %c0_194 = arith.constant 0 : index
    %239 = vector.load %arg2[%c0_192, %c0_193, %c0_194] : memref<9x128x128xbf16, #tpu.memory_space<vmem>>, vector<1x128x128xbf16>
    %240 = vector.shape_cast %239 : vector<1x128x128xbf16> to vector<128x128xbf16>
    %cst_195 = arith.constant dense<0.000000e+00> : vector<112x128xf32>
    %241 = tpu.matmul %238, %240, %cst_195 {dimension_numbers = #tpu.dot_dimension_numbers<[1], [0], [0], [1], [0, 0, 1, 1], [], []>} : vector<112x128xbf16>, vector<128x128xbf16>, vector<112x128xf32> -> vector<112x128xf32>
    %242 = vector.extract_strided_slice %237 {offsets = [32, 0], sizes = [112, 128], strides = [1, 1]} : vector<176x128xbf16> to vector<112x128xbf16>
    %c3_196 = arith.constant 3 : index
    %c0_197 = arith.constant 0 : index
    %c0_198 = arith.constant 0 : index
    %243 = vector.load %arg2[%c3_196, %c0_197, %c0_198] : memref<9x128x128xbf16, #tpu.memory_space<vmem>>, vector<1x128x128xbf16>
    %244 = vector.shape_cast %243 : vector<1x128x128xbf16> to vector<128x128xbf16>
    %cst_199 = arith.constant dense<0.000000e+00> : vector<112x128xf32>
    %245 = tpu.matmul %242, %244, %cst_199 {dimension_numbers = #tpu.dot_dimension_numbers<[1], [0], [0], [1], [0, 0, 1, 1], [], []>} : vector<112x128xbf16>, vector<128x128xbf16>, vector<112x128xf32> -> vector<112x128xf32>
    %246 = arith.addf %241, %245 : vector<112x128xf32>
    %247 = vector.extract_strided_slice %237 {offsets = [64, 0], sizes = [112, 128], strides = [1, 1]} : vector<176x128xbf16> to vector<112x128xbf16>
    %c6_200 = arith.constant 6 : index
    %c0_201 = arith.constant 0 : index
    %c0_202 = arith.constant 0 : index
    %248 = vector.load %arg2[%c6_200, %c0_201, %c0_202] : memref<9x128x128xbf16, #tpu.memory_space<vmem>>, vector<1x128x128xbf16>
    %249 = vector.shape_cast %248 : vector<1x128x128xbf16> to vector<128x128xbf16>
    %cst_203 = arith.constant dense<0.000000e+00> : vector<112x128xf32>
    %250 = tpu.matmul %247, %249, %cst_203 {dimension_numbers = #tpu.dot_dimension_numbers<[1], [0], [0], [1], [0, 0, 1, 1], [], []>} : vector<112x128xbf16>, vector<128x128xbf16>, vector<112x128xf32> -> vector<112x128xf32>
    %251 = arith.addf %246, %250 : vector<112x128xf32>
    %c0_204 = arith.constant 0 : index
    %c385 = arith.constant 385 : index
    %c0_205 = arith.constant 0 : index
    %252 = vector.load %arg1[%c0_204, %c385, %c0_205] : memref<1x576x128xbf16, #tpu.memory_space<vmem>>, vector<1x176x128xbf16>
    %253 = vector.shape_cast %252 : vector<1x176x128xbf16> to vector<176x128xbf16>
    %254 = vector.extract_strided_slice %253 {offsets = [0, 0], sizes = [112, 128], strides = [1, 1]} : vector<176x128xbf16> to vector<112x128xbf16>
    %c1_206 = arith.constant 1 : index
    %c0_207 = arith.constant 0 : index
    %c0_208 = arith.constant 0 : index
    %255 = vector.load %arg2[%c1_206, %c0_207, %c0_208] : memref<9x128x128xbf16, #tpu.memory_space<vmem>>, vector<1x128x128xbf16>
    %256 = vector.shape_cast %255 : vector<1x128x128xbf16> to vector<128x128xbf16>
    %cst_209 = arith.constant dense<0.000000e+00> : vector<112x128xf32>
    %257 = tpu.matmul %254, %256, %cst_209 {dimension_numbers = #tpu.dot_dimension_numbers<[1], [0], [0], [1], [0, 0, 1, 1], [], []>} : vector<112x128xbf16>, vector<128x128xbf16>, vector<112x128xf32> -> vector<112x128xf32>
    %258 = arith.addf %251, %257 : vector<112x128xf32>
    %259 = vector.extract_strided_slice %253 {offsets = [32, 0], sizes = [112, 128], strides = [1, 1]} : vector<176x128xbf16> to vector<112x128xbf16>
    %c4_210 = arith.constant 4 : index
    %c0_211 = arith.constant 0 : index
    %c0_212 = arith.constant 0 : index
    %260 = vector.load %arg2[%c4_210, %c0_211, %c0_212] : memref<9x128x128xbf16, #tpu.memory_space<vmem>>, vector<1x128x128xbf16>
    %261 = vector.shape_cast %260 : vector<1x128x128xbf16> to vector<128x128xbf16>
    %cst_213 = arith.constant dense<0.000000e+00> : vector<112x128xf32>
    %262 = tpu.matmul %259, %261, %cst_213 {dimension_numbers = #tpu.dot_dimension_numbers<[1], [0], [0], [1], [0, 0, 1, 1], [], []>} : vector<112x128xbf16>, vector<128x128xbf16>, vector<112x128xf32> -> vector<112x128xf32>
    %263 = arith.addf %258, %262 : vector<112x128xf32>
    %264 = vector.extract_strided_slice %253 {offsets = [64, 0], sizes = [112, 128], strides = [1, 1]} : vector<176x128xbf16> to vector<112x128xbf16>
    %c7_214 = arith.constant 7 : index
    %c0_215 = arith.constant 0 : index
    %c0_216 = arith.constant 0 : index
    %265 = vector.load %arg2[%c7_214, %c0_215, %c0_216] : memref<9x128x128xbf16, #tpu.memory_space<vmem>>, vector<1x128x128xbf16>
    %266 = vector.shape_cast %265 : vector<1x128x128xbf16> to vector<128x128xbf16>
    %cst_217 = arith.constant dense<0.000000e+00> : vector<112x128xf32>
    %267 = tpu.matmul %264, %266, %cst_217 {dimension_numbers = #tpu.dot_dimension_numbers<[1], [0], [0], [1], [0, 0, 1, 1], [], []>} : vector<112x128xbf16>, vector<128x128xbf16>, vector<112x128xf32> -> vector<112x128xf32>
    %268 = arith.addf %263, %267 : vector<112x128xf32>
    %c0_218 = arith.constant 0 : index
    %c386 = arith.constant 386 : index
    %c0_219 = arith.constant 0 : index
    %269 = vector.load %arg1[%c0_218, %c386, %c0_219] : memref<1x576x128xbf16, #tpu.memory_space<vmem>>, vector<1x176x128xbf16>
    %270 = vector.shape_cast %269 : vector<1x176x128xbf16> to vector<176x128xbf16>
    %271 = vector.extract_strided_slice %270 {offsets = [0, 0], sizes = [112, 128], strides = [1, 1]} : vector<176x128xbf16> to vector<112x128xbf16>
    %c2_220 = arith.constant 2 : index
    %c0_221 = arith.constant 0 : index
    %c0_222 = arith.constant 0 : index
    %272 = vector.load %arg2[%c2_220, %c0_221, %c0_222] : memref<9x128x128xbf16, #tpu.memory_space<vmem>>, vector<1x128x128xbf16>
    %273 = vector.shape_cast %272 : vector<1x128x128xbf16> to vector<128x128xbf16>
    %cst_223 = arith.constant dense<0.000000e+00> : vector<112x128xf32>
    %274 = tpu.matmul %271, %273, %cst_223 {dimension_numbers = #tpu.dot_dimension_numbers<[1], [0], [0], [1], [0, 0, 1, 1], [], []>} : vector<112x128xbf16>, vector<128x128xbf16>, vector<112x128xf32> -> vector<112x128xf32>
    %275 = arith.addf %268, %274 : vector<112x128xf32>
    %276 = vector.extract_strided_slice %270 {offsets = [32, 0], sizes = [112, 128], strides = [1, 1]} : vector<176x128xbf16> to vector<112x128xbf16>
    %c5_224 = arith.constant 5 : index
    %c0_225 = arith.constant 0 : index
    %c0_226 = arith.constant 0 : index
    %277 = vector.load %arg2[%c5_224, %c0_225, %c0_226] : memref<9x128x128xbf16, #tpu.memory_space<vmem>>, vector<1x128x128xbf16>
    %278 = vector.shape_cast %277 : vector<1x128x128xbf16> to vector<128x128xbf16>
    %cst_227 = arith.constant dense<0.000000e+00> : vector<112x128xf32>
    %279 = tpu.matmul %276, %278, %cst_227 {dimension_numbers = #tpu.dot_dimension_numbers<[1], [0], [0], [1], [0, 0, 1, 1], [], []>} : vector<112x128xbf16>, vector<128x128xbf16>, vector<112x128xf32> -> vector<112x128xf32>
    %280 = arith.addf %275, %279 : vector<112x128xf32>
    %281 = vector.extract_strided_slice %270 {offsets = [64, 0], sizes = [112, 128], strides = [1, 1]} : vector<176x128xbf16> to vector<112x128xbf16>
    %c8_228 = arith.constant 8 : index
    %c0_229 = arith.constant 0 : index
    %c0_230 = arith.constant 0 : index
    %282 = vector.load %arg2[%c8_228, %c0_229, %c0_230] : memref<9x128x128xbf16, #tpu.memory_space<vmem>>, vector<1x128x128xbf16>
    %283 = vector.shape_cast %282 : vector<1x128x128xbf16> to vector<128x128xbf16>
    %cst_231 = arith.constant dense<0.000000e+00> : vector<112x128xf32>
    %284 = tpu.matmul %281, %283, %cst_231 {dimension_numbers = #tpu.dot_dimension_numbers<[1], [0], [0], [1], [0, 0, 1, 1], [], []>} : vector<112x128xbf16>, vector<128x128xbf16>, vector<112x128xf32> -> vector<112x128xf32>
    %285 = arith.addf %280, %284 : vector<112x128xf32>
    %c0_232 = arith.constant 0 : index
    %c0_233 = arith.constant 0 : index
    %286 = vector.load %arg15[%c0_232, %c0_233] : memref<112x128xf32, #tpu.memory_space<vmem>>, vector<112x128xf32>
    tpu.vector_store %arg15[%c0_232, %c0_233], %285 {strides = array<i32>} : memref<112x128xf32, #tpu.memory_space<vmem>>, vector<112x128xf32>,
    %c0_234 = arith.constant 0 : index
    %c0_235 = arith.constant 0 : index
    %287 = tpu.strided_load %arg15[%c0_234, %c0_235] {strides = array<i32: 2, 1>} : memref<112x128xf32, #tpu.memory_space<vmem>>, vector<8x128xf32>
    %c1_236 = arith.constant 1 : index
    %c0_237 = arith.constant 0 : index
    %288 = tpu.strided_load %arg15[%c1_236, %c0_237] {strides = array<i32: 2, 1>} : memref<112x128xf32, #tpu.memory_space<vmem>>, vector<8x128xf32>
    %289 = arith.maximumf %287, %288 : vector<8x128xf32>
    %c32_238 = arith.constant 32 : index
    %c0_239 = arith.constant 0 : index
    %290 = tpu.strided_load %arg15[%c32_238, %c0_239] {strides = array<i32: 2, 1>} : memref<112x128xf32, #tpu.memory_space<vmem>>, vector<8x128xf32>
    %c33_240 = arith.constant 33 : index
    %c0_241 = arith.constant 0 : index
    %291 = tpu.strided_load %arg15[%c33_240, %c0_241] {strides = array<i32: 2, 1>} : memref<112x128xf32, #tpu.memory_space<vmem>>, vector<8x128xf32>
    %292 = arith.maximumf %290, %291 : vector<8x128xf32>
    %293 = arith.maximumf %289, %292 : vector<8x128xf32>
    %294 = vector.broadcast %4 : vector<1x128xf32> to vector<8x128xf32>
    %295 = arith.addf %293, %294 : vector<8x128xf32>
    %cst_242 = arith.constant 0.000000e+00 : f32
    %296 = vector.broadcast %cst_242 : f32 to vector<8x128xf32>
    %297 = arith.maximumf %295, %296 : vector<8x128xf32>
    %298 = arith.truncf %297 : vector<8x128xf32> to vector<8x128xbf16>
    %c113 = arith.constant 113 : index
    %c0_243 = arith.constant 0 : index
    %299 = vector.load %arg13[%c113, %c0_243] : memref<160x128xbf16, #tpu.memory_space<vmem>>, vector<8x128xbf16>
    tpu.vector_store %arg13[%c113, %c0_243], %298 {strides = array<i32>} : memref<160x128xbf16, #tpu.memory_space<vmem>>, vector<8x128xbf16>,
    %c64_244 = arith.constant 64 : index
    %c0_245 = arith.constant 0 : index
    %300 = tpu.strided_load %arg15[%c64_244, %c0_245] {strides = array<i32: 2, 1>} : memref<112x128xf32, #tpu.memory_space<vmem>>, vector<8x128xf32>
    %c65_246 = arith.constant 65 : index
    %c0_247 = arith.constant 0 : index
    %301 = tpu.strided_load %arg15[%c65_246, %c0_247] {strides = array<i32: 2, 1>} : memref<112x128xf32, #tpu.memory_space<vmem>>, vector<8x128xf32>
    %302 = arith.maximumf %300, %301 : vector<8x128xf32>
    %c96_248 = arith.constant 96 : index
    %c0_249 = arith.constant 0 : index
    %303 = tpu.strided_load %arg15[%c96_248, %c0_249] {strides = array<i32: 2, 1>} : memref<112x128xf32, #tpu.memory_space<vmem>>, vector<8x128xf32>
    %c97_250 = arith.constant 97 : index
    %c0_251 = arith.constant 0 : index
    %304 = tpu.strided_load %arg15[%c97_250, %c0_251] {strides = array<i32: 2, 1>} : memref<112x128xf32, #tpu.memory_space<vmem>>, vector<8x128xf32>
    %305 = arith.maximumf %303, %304 : vector<8x128xf32>
    %306 = arith.maximumf %302, %305 : vector<8x128xf32>
    %307 = vector.broadcast %4 : vector<1x128xf32> to vector<8x128xf32>
    %308 = arith.addf %306, %307 : vector<8x128xf32>
    %cst_252 = arith.constant 0.000000e+00 : f32
    %309 = vector.broadcast %cst_252 : f32 to vector<8x128xf32>
    %310 = arith.maximumf %308, %309 : vector<8x128xf32>
    %311 = arith.truncf %310 : vector<8x128xf32> to vector<8x128xbf16>
    %c129_253 = arith.constant 129 : index
    %c0_254 = arith.constant 0 : index
    %312 = vector.load %arg13[%c129_253, %c0_254] : memref<160x128xbf16, #tpu.memory_space<vmem>>, vector<8x128xbf16>
    tpu.vector_store %arg13[%c129_253, %c0_254], %311 {strides = array<i32>} : memref<160x128xbf16, #tpu.memory_space<vmem>>, vector<8x128xbf16>,
    %c0_255 = arith.constant 0 : index
    %c0_256 = arith.constant 0 : index
    %313 = vector.load %arg5[%c0_255, %c0_256] : memref<1x128xf32, #tpu.memory_space<vmem>>, vector<1x128xf32>
    %c0_257 = arith.constant 0 : index
    %c0_258 = arith.constant 0 : index
    %314 = vector.load %arg13[%c0_257, %c0_258] : memref<160x128xbf16, #tpu.memory_space<vmem>>, vector<88x128xbf16>
    %315 = vector.extract_strided_slice %314 {offsets = [0, 0], sizes = [56, 128], strides = [1, 1]} : vector<88x128xbf16> to vector<56x128xbf16>
    %c0_259 = arith.constant 0 : index
    %c0_260 = arith.constant 0 : index
    %c0_261 = arith.constant 0 : index
    %316 = vector.load %arg4[%c0_259, %c0_260, %c0_261] : memref<9x128x128xbf16, #tpu.memory_space<vmem>>, vector<1x128x128xbf16>
    %317 = vector.shape_cast %316 : vector<1x128x128xbf16> to vector<128x128xbf16>
    %cst_262 = arith.constant dense<0.000000e+00> : vector<56x128xf32>
    %318 = tpu.matmul %315, %317, %cst_262 {dimension_numbers = #tpu.dot_dimension_numbers<[1], [0], [0], [1], [0, 0, 1, 1], [], []>} : vector<56x128xbf16>, vector<128x128xbf16>, vector<56x128xf32> -> vector<56x128xf32>
    %319 = vector.extract_strided_slice %314 {offsets = [16, 0], sizes = [56, 128], strides = [1, 1]} : vector<88x128xbf16> to vector<56x128xbf16>
    %c3_263 = arith.constant 3 : index
    %c0_264 = arith.constant 0 : index
    %c0_265 = arith.constant 0 : index
    %320 = vector.load %arg4[%c3_263, %c0_264, %c0_265] : memref<9x128x128xbf16, #tpu.memory_space<vmem>>, vector<1x128x128xbf16>
    %321 = vector.shape_cast %320 : vector<1x128x128xbf16> to vector<128x128xbf16>
    %cst_266 = arith.constant dense<0.000000e+00> : vector<56x128xf32>
    %322 = tpu.matmul %319, %321, %cst_266 {dimension_numbers = #tpu.dot_dimension_numbers<[1], [0], [0], [1], [0, 0, 1, 1], [], []>} : vector<56x128xbf16>, vector<128x128xbf16>, vector<56x128xf32> -> vector<56x128xf32>
    %323 = arith.addf %318, %322 : vector<56x128xf32>
    %324 = vector.extract_strided_slice %314 {offsets = [32, 0], sizes = [56, 128], strides = [1, 1]} : vector<88x128xbf16> to vector<56x128xbf16>
    %c6_267 = arith.constant 6 : index
    %c0_268 = arith.constant 0 : index
    %c0_269 = arith.constant 0 : index
    %325 = vector.load %arg4[%c6_267, %c0_268, %c0_269] : memref<9x128x128xbf16, #tpu.memory_space<vmem>>, vector<1x128x128xbf16>
    %326 = vector.shape_cast %325 : vector<1x128x128xbf16> to vector<128x128xbf16>
    %cst_270 = arith.constant dense<0.000000e+00> : vector<56x128xf32>
    %327 = tpu.matmul %324, %326, %cst_270 {dimension_numbers = #tpu.dot_dimension_numbers<[1], [0], [0], [1], [0, 0, 1, 1], [], []>} : vector<56x128xbf16>, vector<128x128xbf16>, vector<56x128xf32> -> vector<56x128xf32>
    %328 = arith.addf %323, %327 : vector<56x128xf32>
    %c1_271 = arith.constant 1 : index
    %c0_272 = arith.constant 0 : index
    %329 = vector.load %arg13[%c1_271, %c0_272] : memref<160x128xbf16, #tpu.memory_space<vmem>>, vector<88x128xbf16>
    %330 = vector.extract_strided_slice %329 {offsets = [0, 0], sizes = [56, 128], strides = [1, 1]} : vector<88x128xbf16> to vector<56x128xbf16>
    %c1_273 = arith.constant 1 : index
    %c0_274 = arith.constant 0 : index
    %c0_275 = arith.constant 0 : index
    %331 = vector.load %arg4[%c1_273, %c0_274, %c0_275] : memref<9x128x128xbf16, #tpu.memory_space<vmem>>, vector<1x128x128xbf16>
    %332 = vector.shape_cast %331 : vector<1x128x128xbf16> to vector<128x128xbf16>
    %cst_276 = arith.constant dense<0.000000e+00> : vector<56x128xf32>
    %333 = tpu.matmul %330, %332, %cst_276 {dimension_numbers = #tpu.dot_dimension_numbers<[1], [0], [0], [1], [0, 0, 1, 1], [], []>} : vector<56x128xbf16>, vector<128x128xbf16>, vector<56x128xf32> -> vector<56x128xf32>
    %334 = arith.addf %328, %333 : vector<56x128xf32>
    %335 = vector.extract_strided_slice %329 {offsets = [16, 0], sizes = [56, 128], strides = [1, 1]} : vector<88x128xbf16> to vector<56x128xbf16>
    %c4_277 = arith.constant 4 : index
    %c0_278 = arith.constant 0 : index
    %c0_279 = arith.constant 0 : index
    %336 = vector.load %arg4[%c4_277, %c0_278, %c0_279] : memref<9x128x128xbf16, #tpu.memory_space<vmem>>, vector<1x128x128xbf16>
    %337 = vector.shape_cast %336 : vector<1x128x128xbf16> to vector<128x128xbf16>
    %cst_280 = arith.constant dense<0.000000e+00> : vector<56x128xf32>
    %338 = tpu.matmul %335, %337, %cst_280 {dimension_numbers = #tpu.dot_dimension_numbers<[1], [0], [0], [1], [0, 0, 1, 1], [], []>} : vector<56x128xbf16>, vector<128x128xbf16>, vector<56x128xf32> -> vector<56x128xf32>
    %339 = arith.addf %334, %338 : vector<56x128xf32>
    %340 = vector.extract_strided_slice %329 {offsets = [32, 0], sizes = [56, 128], strides = [1, 1]} : vector<88x128xbf16> to vector<56x128xbf16>
    %c7_281 = arith.constant 7 : index
    %c0_282 = arith.constant 0 : index
    %c0_283 = arith.constant 0 : index
    %341 = vector.load %arg4[%c7_281, %c0_282, %c0_283] : memref<9x128x128xbf16, #tpu.memory_space<vmem>>, vector<1x128x128xbf16>
    %342 = vector.shape_cast %341 : vector<1x128x128xbf16> to vector<128x128xbf16>
    %cst_284 = arith.constant dense<0.000000e+00> : vector<56x128xf32>
    %343 = tpu.matmul %340, %342, %cst_284 {dimension_numbers = #tpu.dot_dimension_numbers<[1], [0], [0], [1], [0, 0, 1, 1], [], []>} : vector<56x128xbf16>, vector<128x128xbf16>, vector<56x128xf32> -> vector<56x128xf32>
    %344 = arith.addf %339, %343 : vector<56x128xf32>
    %c2_285 = arith.constant 2 : index
    %c0_286 = arith.constant 0 : index
    %345 = vector.load %arg13[%c2_285, %c0_286] : memref<160x128xbf16, #tpu.memory_space<vmem>>, vector<88x128xbf16>
    %346 = vector.extract_strided_slice %345 {offsets = [0, 0], sizes = [56, 128], strides = [1, 1]} : vector<88x128xbf16> to vector<56x128xbf16>
    %c2_287 = arith.constant 2 : index
    %c0_288 = arith.constant 0 : index
    %c0_289 = arith.constant 0 : index
    %347 = vector.load %arg4[%c2_287, %c0_288, %c0_289] : memref<9x128x128xbf16, #tpu.memory_space<vmem>>, vector<1x128x128xbf16>
    %348 = vector.shape_cast %347 : vector<1x128x128xbf16> to vector<128x128xbf16>
    %cst_290 = arith.constant dense<0.000000e+00> : vector<56x128xf32>
    %349 = tpu.matmul %346, %348, %cst_290 {dimension_numbers = #tpu.dot_dimension_numbers<[1], [0], [0], [1], [0, 0, 1, 1], [], []>} : vector<56x128xbf16>, vector<128x128xbf16>, vector<56x128xf32> -> vector<56x128xf32>
    %350 = arith.addf %344, %349 : vector<56x128xf32>
    %351 = vector.extract_strided_slice %345 {offsets = [16, 0], sizes = [56, 128], strides = [1, 1]} : vector<88x128xbf16> to vector<56x128xbf16>
    %c5_291 = arith.constant 5 : index
    %c0_292 = arith.constant 0 : index
    %c0_293 = arith.constant 0 : index
    %352 = vector.load %arg4[%c5_291, %c0_292, %c0_293] : memref<9x128x128xbf16, #tpu.memory_space<vmem>>, vector<1x128x128xbf16>
    %353 = vector.shape_cast %352 : vector<1x128x128xbf16> to vector<128x128xbf16>
    %cst_294 = arith.constant dense<0.000000e+00> : vector<56x128xf32>
    %354 = tpu.matmul %351, %353, %cst_294 {dimension_numbers = #tpu.dot_dimension_numbers<[1], [0], [0], [1], [0, 0, 1, 1], [], []>} : vector<56x128xbf16>, vector<128x128xbf16>, vector<56x128xf32> -> vector<56x128xf32>
    %355 = arith.addf %350, %354 : vector<56x128xf32>
    %356 = vector.extract_strided_slice %345 {offsets = [32, 0], sizes = [56, 128], strides = [1, 1]} : vector<88x128xbf16> to vector<56x128xbf16>
    %c8_295 = arith.constant 8 : index
    %c0_296 = arith.constant 0 : index
    %c0_297 = arith.constant 0 : index
    %357 = vector.load %arg4[%c8_295, %c0_296, %c0_297] : memref<9x128x128xbf16, #tpu.memory_space<vmem>>, vector<1x128x128xbf16>
    %358 = vector.shape_cast %357 : vector<1x128x128xbf16> to vector<128x128xbf16>
    %cst_298 = arith.constant dense<0.000000e+00> : vector<56x128xf32>
    %359 = tpu.matmul %356, %358, %cst_298 {dimension_numbers = #tpu.dot_dimension_numbers<[1], [0], [0], [1], [0, 0, 1, 1], [], []>} : vector<56x128xbf16>, vector<128x128xbf16>, vector<56x128xf32> -> vector<56x128xf32>
    %360 = arith.addf %355, %359 : vector<56x128xf32>
    %c0_299 = arith.constant 0 : index
    %c0_300 = arith.constant 0 : index
    %361 = vector.load %arg15[%c0_299, %c0_300] : memref<112x128xf32, #tpu.memory_space<vmem>>, vector<56x128xf32>
    tpu.vector_store %arg15[%c0_299, %c0_300], %360 {strides = array<i32>} : memref<112x128xf32, #tpu.memory_space<vmem>>, vector<56x128xf32>,
    %c0_301 = arith.constant 0 : index
    %c0_302 = arith.constant 0 : index
    %362 = tpu.strided_load %arg15[%c0_301, %c0_302] {strides = array<i32: 2, 1>} : memref<112x128xf32, #tpu.memory_space<vmem>>, vector<4x128xf32>
    %c1_303 = arith.constant 1 : index
    %c0_304 = arith.constant 0 : index
    %363 = tpu.strided_load %arg15[%c1_303, %c0_304] {strides = array<i32: 2, 1>} : memref<112x128xf32, #tpu.memory_space<vmem>>, vector<4x128xf32>
    %364 = arith.maximumf %362, %363 : vector<4x128xf32>
    %c16 = arith.constant 16 : index
    %c0_305 = arith.constant 0 : index
    %365 = tpu.strided_load %arg15[%c16, %c0_305] {strides = array<i32: 2, 1>} : memref<112x128xf32, #tpu.memory_space<vmem>>, vector<4x128xf32>
    %c17_306 = arith.constant 17 : index
    %c0_307 = arith.constant 0 : index
    %366 = tpu.strided_load %arg15[%c17_306, %c0_307] {strides = array<i32: 2, 1>} : memref<112x128xf32, #tpu.memory_space<vmem>>, vector<4x128xf32>
    %367 = arith.maximumf %365, %366 : vector<4x128xf32>
    %368 = arith.maximumf %364, %367 : vector<4x128xf32>
    %369 = vector.broadcast %313 : vector<1x128xf32> to vector<4x128xf32>
    %370 = arith.addf %368, %369 : vector<4x128xf32>
    %cst_308 = arith.constant 0.000000e+00 : f32
    %371 = vector.broadcast %cst_308 : f32 to vector<4x128xf32>
    %372 = arith.maximumf %370, %371 : vector<4x128xf32>
    %373 = arith.truncf %372 : vector<4x128xf32> to vector<4x128xbf16>
    %c17_309 = arith.constant 17 : index
    %c0_310 = arith.constant 0 : index
    %374 = vector.load %arg14[%c17_309, %c0_310] : memref<96x128xbf16, #tpu.memory_space<vmem>>, vector<4x128xbf16>
    tpu.vector_store %arg14[%c17_309, %c0_310], %373 {strides = array<i32>} : memref<96x128xbf16, #tpu.memory_space<vmem>>, vector<4x128xbf16>,
    %c32_311 = arith.constant 32 : index
    %c0_312 = arith.constant 0 : index
    %375 = tpu.strided_load %arg15[%c32_311, %c0_312] {strides = array<i32: 2, 1>} : memref<112x128xf32, #tpu.memory_space<vmem>>, vector<4x128xf32>
    %c33_313 = arith.constant 33 : index
    %c0_314 = arith.constant 0 : index
    %376 = tpu.strided_load %arg15[%c33_313, %c0_314] {strides = array<i32: 2, 1>} : memref<112x128xf32, #tpu.memory_space<vmem>>, vector<4x128xf32>
    %377 = arith.maximumf %375, %376 : vector<4x128xf32>
    %c48 = arith.constant 48 : index
    %c0_315 = arith.constant 0 : index
    %378 = tpu.strided_load %arg15[%c48, %c0_315] {strides = array<i32: 2, 1>} : memref<112x128xf32, #tpu.memory_space<vmem>>, vector<4x128xf32>
    %c49_316 = arith.constant 49 : index
    %c0_317 = arith.constant 0 : index
    %379 = tpu.strided_load %arg15[%c49_316, %c0_317] {strides = array<i32: 2, 1>} : memref<112x128xf32, #tpu.memory_space<vmem>>, vector<4x128xf32>
    %380 = arith.maximumf %378, %379 : vector<4x128xf32>
    %381 = arith.maximumf %377, %380 : vector<4x128xf32>
    %382 = vector.broadcast %313 : vector<1x128xf32> to vector<4x128xf32>
    %383 = arith.addf %381, %382 : vector<4x128xf32>
    %cst_318 = arith.constant 0.000000e+00 : f32
    %384 = vector.broadcast %cst_318 : f32 to vector<4x128xf32>
    %385 = arith.maximumf %383, %384 : vector<4x128xf32>
    %386 = arith.truncf %385 : vector<4x128xf32> to vector<4x128xbf16>
    %c33_319 = arith.constant 33 : index
    %c0_320 = arith.constant 0 : index
    %387 = vector.load %arg14[%c33_319, %c0_320] : memref<96x128xbf16, #tpu.memory_space<vmem>>, vector<4x128xbf16>
    tpu.vector_store %arg14[%c33_319, %c0_320], %386 {strides = array<i32>} : memref<96x128xbf16, #tpu.memory_space<vmem>>, vector<4x128xbf16>,
    %c64_321 = arith.constant 64 : index
    %c0_322 = arith.constant 0 : index
    %388 = vector.load %arg13[%c64_321, %c0_322] : memref<160x128xbf16, #tpu.memory_space<vmem>>, vector<88x128xbf16>
    %389 = vector.extract_strided_slice %388 {offsets = [0, 0], sizes = [56, 128], strides = [1, 1]} : vector<88x128xbf16> to vector<56x128xbf16>
    %c0_323 = arith.constant 0 : index
    %c0_324 = arith.constant 0 : index
    %c0_325 = arith.constant 0 : index
    %390 = vector.load %arg4[%c0_323, %c0_324, %c0_325] : memref<9x128x128xbf16, #tpu.memory_space<vmem>>, vector<1x128x128xbf16>
    %391 = vector.shape_cast %390 : vector<1x128x128xbf16> to vector<128x128xbf16>
    %cst_326 = arith.constant dense<0.000000e+00> : vector<56x128xf32>
    %392 = tpu.matmul %389, %391, %cst_326 {dimension_numbers = #tpu.dot_dimension_numbers<[1], [0], [0], [1], [0, 0, 1, 1], [], []>} : vector<56x128xbf16>, vector<128x128xbf16>, vector<56x128xf32> -> vector<56x128xf32>
    %393 = vector.extract_strided_slice %388 {offsets = [16, 0], sizes = [56, 128], strides = [1, 1]} : vector<88x128xbf16> to vector<56x128xbf16>
    %c3_327 = arith.constant 3 : index
    %c0_328 = arith.constant 0 : index
    %c0_329 = arith.constant 0 : index
    %394 = vector.load %arg4[%c3_327, %c0_328, %c0_329] : memref<9x128x128xbf16, #tpu.memory_space<vmem>>, vector<1x128x128xbf16>
    %395 = vector.shape_cast %394 : vector<1x128x128xbf16> to vector<128x128xbf16>
    %cst_330 = arith.constant dense<0.000000e+00> : vector<56x128xf32>
    %396 = tpu.matmul %393, %395, %cst_330 {dimension_numbers = #tpu.dot_dimension_numbers<[1], [0], [0], [1], [0, 0, 1, 1], [], []>} : vector<56x128xbf16>, vector<128x128xbf16>, vector<56x128xf32> -> vector<56x128xf32>
    %397 = arith.addf %392, %396 : vector<56x128xf32>
    %398 = vector.extract_strided_slice %388 {offsets = [32, 0], sizes = [56, 128], strides = [1, 1]} : vector<88x128xbf16> to vector<56x128xbf16>
    %c6_331 = arith.constant 6 : index
    %c0_332 = arith.constant 0 : index
    %c0_333 = arith.constant 0 : index
    %399 = vector.load %arg4[%c6_331, %c0_332, %c0_333] : memref<9x128x128xbf16, #tpu.memory_space<vmem>>, vector<1x128x128xbf16>
    %400 = vector.shape_cast %399 : vector<1x128x128xbf16> to vector<128x128xbf16>
    %cst_334 = arith.constant dense<0.000000e+00> : vector<56x128xf32>
    %401 = tpu.matmul %398, %400, %cst_334 {dimension_numbers = #tpu.dot_dimension_numbers<[1], [0], [0], [1], [0, 0, 1, 1], [], []>} : vector<56x128xbf16>, vector<128x128xbf16>, vector<56x128xf32> -> vector<56x128xf32>
    %402 = arith.addf %397, %401 : vector<56x128xf32>
    %c65_335 = arith.constant 65 : index
    %c0_336 = arith.constant 0 : index
    %403 = vector.load %arg13[%c65_335, %c0_336] : memref<160x128xbf16, #tpu.memory_space<vmem>>, vector<88x128xbf16>
    %404 = vector.extract_strided_slice %403 {offsets = [0, 0], sizes = [56, 128], strides = [1, 1]} : vector<88x128xbf16> to vector<56x128xbf16>
    %c1_337 = arith.constant 1 : index
    %c0_338 = arith.constant 0 : index
    %c0_339 = arith.constant 0 : index
    %405 = vector.load %arg4[%c1_337, %c0_338, %c0_339] : memref<9x128x128xbf16, #tpu.memory_space<vmem>>, vector<1x128x128xbf16>
    %406 = vector.shape_cast %405 : vector<1x128x128xbf16> to vector<128x128xbf16>
    %cst_340 = arith.constant dense<0.000000e+00> : vector<56x128xf32>
    %407 = tpu.matmul %404, %406, %cst_340 {dimension_numbers = #tpu.dot_dimension_numbers<[1], [0], [0], [1], [0, 0, 1, 1], [], []>} : vector<56x128xbf16>, vector<128x128xbf16>, vector<56x128xf32> -> vector<56x128xf32>
    %408 = arith.addf %402, %407 : vector<56x128xf32>
    %409 = vector.extract_strided_slice %403 {offsets = [16, 0], sizes = [56, 128], strides = [1, 1]} : vector<88x128xbf16> to vector<56x128xbf16>
    %c4_341 = arith.constant 4 : index
    %c0_342 = arith.constant 0 : index
    %c0_343 = arith.constant 0 : index
    %410 = vector.load %arg4[%c4_341, %c0_342, %c0_343] : memref<9x128x128xbf16, #tpu.memory_space<vmem>>, vector<1x128x128xbf16>
    %411 = vector.shape_cast %410 : vector<1x128x128xbf16> to vector<128x128xbf16>
    %cst_344 = arith.constant dense<0.000000e+00> : vector<56x128xf32>
    %412 = tpu.matmul %409, %411, %cst_344 {dimension_numbers = #tpu.dot_dimension_numbers<[1], [0], [0], [1], [0, 0, 1, 1], [], []>} : vector<56x128xbf16>, vector<128x128xbf16>, vector<56x128xf32> -> vector<56x128xf32>
    %413 = arith.addf %408, %412 : vector<56x128xf32>
    %414 = vector.extract_strided_slice %403 {offsets = [32, 0], sizes = [56, 128], strides = [1, 1]} : vector<88x128xbf16> to vector<56x128xbf16>
    %c7_345 = arith.constant 7 : index
    %c0_346 = arith.constant 0 : index
    %c0_347 = arith.constant 0 : index
    %415 = vector.load %arg4[%c7_345, %c0_346, %c0_347] : memref<9x128x128xbf16, #tpu.memory_space<vmem>>, vector<1x128x128xbf16>
    %416 = vector.shape_cast %415 : vector<1x128x128xbf16> to vector<128x128xbf16>
    %cst_348 = arith.constant dense<0.000000e+00> : vector<56x128xf32>
    %417 = tpu.matmul %414, %416, %cst_348 {dimension_numbers = #tpu.dot_dimension_numbers<[1], [0], [0], [1], [0, 0, 1, 1], [], []>} : vector<56x128xbf16>, vector<128x128xbf16>, vector<56x128xf32> -> vector<56x128xf32>
    %418 = arith.addf %413, %417 : vector<56x128xf32>
    %c66 = arith.constant 66 : index
    %c0_349 = arith.constant 0 : index
    %419 = vector.load %arg13[%c66, %c0_349] : memref<160x128xbf16, #tpu.memory_space<vmem>>, vector<88x128xbf16>
    %420 = vector.extract_strided_slice %419 {offsets = [0, 0], sizes = [56, 128], strides = [1, 1]} : vector<88x128xbf16> to vector<56x128xbf16>
    %c2_350 = arith.constant 2 : index
    %c0_351 = arith.constant 0 : index
    %c0_352 = arith.constant 0 : index
    %421 = vector.load %arg4[%c2_350, %c0_351, %c0_352] : memref<9x128x128xbf16, #tpu.memory_space<vmem>>, vector<1x128x128xbf16>
    %422 = vector.shape_cast %421 : vector<1x128x128xbf16> to vector<128x128xbf16>
    %cst_353 = arith.constant dense<0.000000e+00> : vector<56x128xf32>
    %423 = tpu.matmul %420, %422, %cst_353 {dimension_numbers = #tpu.dot_dimension_numbers<[1], [0], [0], [1], [0, 0, 1, 1], [], []>} : vector<56x128xbf16>, vector<128x128xbf16>, vector<56x128xf32> -> vector<56x128xf32>
    %424 = arith.addf %418, %423 : vector<56x128xf32>
    %425 = vector.extract_strided_slice %419 {offsets = [16, 0], sizes = [56, 128], strides = [1, 1]} : vector<88x128xbf16> to vector<56x128xbf16>
    %c5_354 = arith.constant 5 : index
    %c0_355 = arith.constant 0 : index
    %c0_356 = arith.constant 0 : index
    %426 = vector.load %arg4[%c5_354, %c0_355, %c0_356] : memref<9x128x128xbf16, #tpu.memory_space<vmem>>, vector<1x128x128xbf16>
    %427 = vector.shape_cast %426 : vector<1x128x128xbf16> to vector<128x128xbf16>
    %cst_357 = arith.constant dense<0.000000e+00> : vector<56x128xf32>
    %428 = tpu.matmul %425, %427, %cst_357 {dimension_numbers = #tpu.dot_dimension_numbers<[1], [0], [0], [1], [0, 0, 1, 1], [], []>} : vector<56x128xbf16>, vector<128x128xbf16>, vector<56x128xf32> -> vector<56x128xf32>
    %429 = arith.addf %424, %428 : vector<56x128xf32>
    %430 = vector.extract_strided_slice %419 {offsets = [32, 0], sizes = [56, 128], strides = [1, 1]} : vector<88x128xbf16> to vector<56x128xbf16>
    %c8_358 = arith.constant 8 : index
    %c0_359 = arith.constant 0 : index
    %c0_360 = arith.constant 0 : index
    %431 = vector.load %arg4[%c8_358, %c0_359, %c0_360] : memref<9x128x128xbf16, #tpu.memory_space<vmem>>, vector<1x128x128xbf16>
    %432 = vector.shape_cast %431 : vector<1x128x128xbf16> to vector<128x128xbf16>
    %cst_361 = arith.constant dense<0.000000e+00> : vector<56x128xf32>
    %433 = tpu.matmul %430, %432, %cst_361 {dimension_numbers = #tpu.dot_dimension_numbers<[1], [0], [0], [1], [0, 0, 1, 1], [], []>} : vector<56x128xbf16>, vector<128x128xbf16>, vector<56x128xf32> -> vector<56x128xf32>
    %434 = arith.addf %429, %433 : vector<56x128xf32>
    %c0_362 = arith.constant 0 : index
    %c0_363 = arith.constant 0 : index
    %435 = vector.load %arg15[%c0_362, %c0_363] : memref<112x128xf32, #tpu.memory_space<vmem>>, vector<56x128xf32>
    tpu.vector_store %arg15[%c0_362, %c0_363], %434 {strides = array<i32>} : memref<112x128xf32, #tpu.memory_space<vmem>>, vector<56x128xf32>,
    %c0_364 = arith.constant 0 : index
    %c0_365 = arith.constant 0 : index
    %436 = tpu.strided_load %arg15[%c0_364, %c0_365] {strides = array<i32: 2, 1>} : memref<112x128xf32, #tpu.memory_space<vmem>>, vector<4x128xf32>
    %c1_366 = arith.constant 1 : index
    %c0_367 = arith.constant 0 : index
    %437 = tpu.strided_load %arg15[%c1_366, %c0_367] {strides = array<i32: 2, 1>} : memref<112x128xf32, #tpu.memory_space<vmem>>, vector<4x128xf32>
    %438 = arith.maximumf %436, %437 : vector<4x128xf32>
    %c16_368 = arith.constant 16 : index
    %c0_369 = arith.constant 0 : index
    %439 = tpu.strided_load %arg15[%c16_368, %c0_369] {strides = array<i32: 2, 1>} : memref<112x128xf32, #tpu.memory_space<vmem>>, vector<4x128xf32>
    %c17_370 = arith.constant 17 : index
    %c0_371 = arith.constant 0 : index
    %440 = tpu.strided_load %arg15[%c17_370, %c0_371] {strides = array<i32: 2, 1>} : memref<112x128xf32, #tpu.memory_space<vmem>>, vector<4x128xf32>
    %441 = arith.maximumf %439, %440 : vector<4x128xf32>
    %442 = arith.maximumf %438, %441 : vector<4x128xf32>
    %443 = vector.broadcast %313 : vector<1x128xf32> to vector<4x128xf32>
    %444 = arith.addf %442, %443 : vector<4x128xf32>
    %cst_372 = arith.constant 0.000000e+00 : f32
    %445 = vector.broadcast %cst_372 : f32 to vector<4x128xf32>
    %446 = arith.maximumf %444, %445 : vector<4x128xf32>
    %447 = arith.truncf %446 : vector<4x128xf32> to vector<4x128xbf16>
    %c49_373 = arith.constant 49 : index
    %c0_374 = arith.constant 0 : index
    %448 = vector.load %arg14[%c49_373, %c0_374] : memref<96x128xbf16, #tpu.memory_space<vmem>>, vector<4x128xbf16>
    tpu.vector_store %arg14[%c49_373, %c0_374], %447 {strides = array<i32>} : memref<96x128xbf16, #tpu.memory_space<vmem>>, vector<4x128xbf16>,
    %c32_375 = arith.constant 32 : index
    %c0_376 = arith.constant 0 : index
    %449 = tpu.strided_load %arg15[%c32_375, %c0_376] {strides = array<i32: 2, 1>} : memref<112x128xf32, #tpu.memory_space<vmem>>, vector<4x128xf32>
    %c33_377 = arith.constant 33 : index
    %c0_378 = arith.constant 0 : index
    %450 = tpu.strided_load %arg15[%c33_377, %c0_378] {strides = array<i32: 2, 1>} : memref<112x128xf32, #tpu.memory_space<vmem>>, vector<4x128xf32>
    %451 = arith.maximumf %449, %450 : vector<4x128xf32>
    %c48_379 = arith.constant 48 : index
    %c0_380 = arith.constant 0 : index
    %452 = tpu.strided_load %arg15[%c48_379, %c0_380] {strides = array<i32: 2, 1>} : memref<112x128xf32, #tpu.memory_space<vmem>>, vector<4x128xf32>
    %c49_381 = arith.constant 49 : index
    %c0_382 = arith.constant 0 : index
    %453 = tpu.strided_load %arg15[%c49_381, %c0_382] {strides = array<i32: 2, 1>} : memref<112x128xf32, #tpu.memory_space<vmem>>, vector<4x128xf32>
    %454 = arith.maximumf %452, %453 : vector<4x128xf32>
    %455 = arith.maximumf %451, %454 : vector<4x128xf32>
    %456 = vector.broadcast %313 : vector<1x128xf32> to vector<4x128xf32>
    %457 = arith.addf %455, %456 : vector<4x128xf32>
    %cst_383 = arith.constant 0.000000e+00 : f32
    %458 = vector.broadcast %cst_383 : f32 to vector<4x128xf32>
    %459 = arith.maximumf %457, %458 : vector<4x128xf32>
    %460 = arith.truncf %459 : vector<4x128xf32> to vector<4x128xbf16>
    %c65_384 = arith.constant 65 : index
    %c0_385 = arith.constant 0 : index
    %461 = vector.load %arg14[%c65_384, %c0_385] : memref<96x128xbf16, #tpu.memory_space<vmem>>, vector<4x128xbf16>
    tpu.vector_store %arg14[%c65_384, %c0_385], %460 {strides = array<i32>} : memref<96x128xbf16, #tpu.memory_space<vmem>>, vector<4x128xbf16>,
    %c0_386 = arith.constant 0 : index
    %c0_387 = arith.constant 0 : index
    %462 = vector.load %arg7[%c0_386, %c0_387] : memref<1x128xf32, #tpu.memory_space<vmem>>, vector<1x128xf32>
    %c0_388 = arith.constant 0 : index
    %c0_389 = arith.constant 0 : index
    %463 = vector.load %arg14[%c0_388, %c0_389] : memref<96x128xbf16, #tpu.memory_space<vmem>>, vector<84x128xbf16>
    %464 = vector.extract_strided_slice %463 {offsets = [0, 0], sizes = [52, 128], strides = [1, 1]} : vector<84x128xbf16> to vector<52x128xbf16>
    %c0_390 = arith.constant 0 : index
    %c0_391 = arith.constant 0 : index
    %c0_392 = arith.constant 0 : index
    %465 = vector.load %arg6[%c0_390, %c0_391, %c0_392] : memref<9x128x128xbf16, #tpu.memory_space<vmem>>, vector<1x128x128xbf16>
    %466 = vector.shape_cast %465 : vector<1x128x128xbf16> to vector<128x128xbf16>
    %cst_393 = arith.constant dense<0.000000e+00> : vector<52x128xf32>
    %467 = tpu.matmul %464, %466, %cst_393 {dimension_numbers = #tpu.dot_dimension_numbers<[1], [0], [0], [1], [0, 0, 1, 1], [], []>} : vector<52x128xbf16>, vector<128x128xbf16>, vector<52x128xf32> -> vector<52x128xf32>
    %468 = vector.extract_strided_slice %463 {offsets = [16, 0], sizes = [52, 128], strides = [1, 1]} : vector<84x128xbf16> to vector<52x128xbf16>
    %c3_394 = arith.constant 3 : index
    %c0_395 = arith.constant 0 : index
    %c0_396 = arith.constant 0 : index
    %469 = vector.load %arg6[%c3_394, %c0_395, %c0_396] : memref<9x128x128xbf16, #tpu.memory_space<vmem>>, vector<1x128x128xbf16>
    %470 = vector.shape_cast %469 : vector<1x128x128xbf16> to vector<128x128xbf16>
    %cst_397 = arith.constant dense<0.000000e+00> : vector<52x128xf32>
    %471 = tpu.matmul %468, %470, %cst_397 {dimension_numbers = #tpu.dot_dimension_numbers<[1], [0], [0], [1], [0, 0, 1, 1], [], []>} : vector<52x128xbf16>, vector<128x128xbf16>, vector<52x128xf32> -> vector<52x128xf32>
    %472 = arith.addf %467, %471 : vector<52x128xf32>
    %473 = vector.extract_strided_slice %463 {offsets = [32, 0], sizes = [52, 128], strides = [1, 1]} : vector<84x128xbf16> to vector<52x128xbf16>
    %c6_398 = arith.constant 6 : index
    %c0_399 = arith.constant 0 : index
    %c0_400 = arith.constant 0 : index
    %474 = vector.load %arg6[%c6_398, %c0_399, %c0_400] : memref<9x128x128xbf16, #tpu.memory_space<vmem>>, vector<1x128x128xbf16>
    %475 = vector.shape_cast %474 : vector<1x128x128xbf16> to vector<128x128xbf16>
    %cst_401 = arith.constant dense<0.000000e+00> : vector<52x128xf32>
    %476 = tpu.matmul %473, %475, %cst_401 {dimension_numbers = #tpu.dot_dimension_numbers<[1], [0], [0], [1], [0, 0, 1, 1], [], []>} : vector<52x128xbf16>, vector<128x128xbf16>, vector<52x128xf32> -> vector<52x128xf32>
    %477 = arith.addf %472, %476 : vector<52x128xf32>
    %c1_402 = arith.constant 1 : index
    %c0_403 = arith.constant 0 : index
    %478 = vector.load %arg14[%c1_402, %c0_403] : memref<96x128xbf16, #tpu.memory_space<vmem>>, vector<84x128xbf16>
    %479 = vector.extract_strided_slice %478 {offsets = [0, 0], sizes = [52, 128], strides = [1, 1]} : vector<84x128xbf16> to vector<52x128xbf16>
    %c1_404 = arith.constant 1 : index
    %c0_405 = arith.constant 0 : index
    %c0_406 = arith.constant 0 : index
    %480 = vector.load %arg6[%c1_404, %c0_405, %c0_406] : memref<9x128x128xbf16, #tpu.memory_space<vmem>>, vector<1x128x128xbf16>
    %481 = vector.shape_cast %480 : vector<1x128x128xbf16> to vector<128x128xbf16>
    %cst_407 = arith.constant dense<0.000000e+00> : vector<52x128xf32>
    %482 = tpu.matmul %479, %481, %cst_407 {dimension_numbers = #tpu.dot_dimension_numbers<[1], [0], [0], [1], [0, 0, 1, 1], [], []>} : vector<52x128xbf16>, vector<128x128xbf16>, vector<52x128xf32> -> vector<52x128xf32>
    %483 = arith.addf %477, %482 : vector<52x128xf32>
    %484 = vector.extract_strided_slice %478 {offsets = [16, 0], sizes = [52, 128], strides = [1, 1]} : vector<84x128xbf16> to vector<52x128xbf16>
    %c4_408 = arith.constant 4 : index
    %c0_409 = arith.constant 0 : index
    %c0_410 = arith.constant 0 : index
    %485 = vector.load %arg6[%c4_408, %c0_409, %c0_410] : memref<9x128x128xbf16, #tpu.memory_space<vmem>>, vector<1x128x128xbf16>
    %486 = vector.shape_cast %485 : vector<1x128x128xbf16> to vector<128x128xbf16>
    %cst_411 = arith.constant dense<0.000000e+00> : vector<52x128xf32>
    %487 = tpu.matmul %484, %486, %cst_411 {dimension_numbers = #tpu.dot_dimension_numbers<[1], [0], [0], [1], [0, 0, 1, 1], [], []>} : vector<52x128xbf16>, vector<128x128xbf16>, vector<52x128xf32> -> vector<52x128xf32>
    %488 = arith.addf %483, %487 : vector<52x128xf32>
    %489 = vector.extract_strided_slice %478 {offsets = [32, 0], sizes = [52, 128], strides = [1, 1]} : vector<84x128xbf16> to vector<52x128xbf16>
    %c7_412 = arith.constant 7 : index
    %c0_413 = arith.constant 0 : index
    %c0_414 = arith.constant 0 : index
    %490 = vector.load %arg6[%c7_412, %c0_413, %c0_414] : memref<9x128x128xbf16, #tpu.memory_space<vmem>>, vector<1x128x128xbf16>
    %491 = vector.shape_cast %490 : vector<1x128x128xbf16> to vector<128x128xbf16>
    %cst_415 = arith.constant dense<0.000000e+00> : vector<52x128xf32>
    %492 = tpu.matmul %489, %491, %cst_415 {dimension_numbers = #tpu.dot_dimension_numbers<[1], [0], [0], [1], [0, 0, 1, 1], [], []>} : vector<52x128xbf16>, vector<128x128xbf16>, vector<52x128xf32> -> vector<52x128xf32>
    %493 = arith.addf %488, %492 : vector<52x128xf32>
    %c2_416 = arith.constant 2 : index
    %c0_417 = arith.constant 0 : index
    %494 = vector.load %arg14[%c2_416, %c0_417] : memref<96x128xbf16, #tpu.memory_space<vmem>>, vector<84x128xbf16>
    %495 = vector.extract_strided_slice %494 {offsets = [0, 0], sizes = [52, 128], strides = [1, 1]} : vector<84x128xbf16> to vector<52x128xbf16>
    %c2_418 = arith.constant 2 : index
    %c0_419 = arith.constant 0 : index
    %c0_420 = arith.constant 0 : index
    %496 = vector.load %arg6[%c2_418, %c0_419, %c0_420] : memref<9x128x128xbf16, #tpu.memory_space<vmem>>, vector<1x128x128xbf16>
    %497 = vector.shape_cast %496 : vector<1x128x128xbf16> to vector<128x128xbf16>
    %cst_421 = arith.constant dense<0.000000e+00> : vector<52x128xf32>
    %498 = tpu.matmul %495, %497, %cst_421 {dimension_numbers = #tpu.dot_dimension_numbers<[1], [0], [0], [1], [0, 0, 1, 1], [], []>} : vector<52x128xbf16>, vector<128x128xbf16>, vector<52x128xf32> -> vector<52x128xf32>
    %499 = arith.addf %493, %498 : vector<52x128xf32>
    %500 = vector.extract_strided_slice %494 {offsets = [16, 0], sizes = [52, 128], strides = [1, 1]} : vector<84x128xbf16> to vector<52x128xbf16>
    %c5_422 = arith.constant 5 : index
    %c0_423 = arith.constant 0 : index
    %c0_424 = arith.constant 0 : index
    %501 = vector.load %arg6[%c5_422, %c0_423, %c0_424] : memref<9x128x128xbf16, #tpu.memory_space<vmem>>, vector<1x128x128xbf16>
    %502 = vector.shape_cast %501 : vector<1x128x128xbf16> to vector<128x128xbf16>
    %cst_425 = arith.constant dense<0.000000e+00> : vector<52x128xf32>
    %503 = tpu.matmul %500, %502, %cst_425 {dimension_numbers = #tpu.dot_dimension_numbers<[1], [0], [0], [1], [0, 0, 1, 1], [], []>} : vector<52x128xbf16>, vector<128x128xbf16>, vector<52x128xf32> -> vector<52x128xf32>
    %504 = arith.addf %499, %503 : vector<52x128xf32>
    %505 = vector.extract_strided_slice %494 {offsets = [32, 0], sizes = [52, 128], strides = [1, 1]} : vector<84x128xbf16> to vector<52x128xbf16>
    %c8_426 = arith.constant 8 : index
    %c0_427 = arith.constant 0 : index
    %c0_428 = arith.constant 0 : index
    %506 = vector.load %arg6[%c8_426, %c0_427, %c0_428] : memref<9x128x128xbf16, #tpu.memory_space<vmem>>, vector<1x128x128xbf16>
    %507 = vector.shape_cast %506 : vector<1x128x128xbf16> to vector<128x128xbf16>
    %cst_429 = arith.constant dense<0.000000e+00> : vector<52x128xf32>
    %508 = tpu.matmul %505, %507, %cst_429 {dimension_numbers = #tpu.dot_dimension_numbers<[1], [0], [0], [1], [0, 0, 1, 1], [], []>} : vector<52x128xbf16>, vector<128x128xbf16>, vector<52x128xf32> -> vector<52x128xf32>
    %509 = arith.addf %504, %508 : vector<52x128xf32>
    %c0_430 = arith.constant 0 : index
    %c0_431 = arith.constant 0 : index
    %510 = vector.load %arg15[%c0_430, %c0_431] : memref<112x128xf32, #tpu.memory_space<vmem>>, vector<52x128xf32>
    tpu.vector_store %arg15[%c0_430, %c0_431], %509 {strides = array<i32>} : memref<112x128xf32, #tpu.memory_space<vmem>>, vector<52x128xf32>,
    %c0_432 = arith.constant 0 : index
    %c0_433 = arith.constant 0 : index
    %511 = tpu.strided_load %arg15[%c0_432, %c0_433] {strides = array<i32: 2, 1>} : memref<112x128xf32, #tpu.memory_space<vmem>>, vector<2x128xf32>
    %c1_434 = arith.constant 1 : index
    %c0_435 = arith.constant 0 : index
    %512 = tpu.strided_load %arg15[%c1_434, %c0_435] {strides = array<i32: 2, 1>} : memref<112x128xf32, #tpu.memory_space<vmem>>, vector<2x128xf32>
    %513 = arith.maximumf %511, %512 : vector<2x128xf32>
    %c16_436 = arith.constant 16 : index
    %c0_437 = arith.constant 0 : index
    %514 = tpu.strided_load %arg15[%c16_436, %c0_437] {strides = array<i32: 2, 1>} : memref<112x128xf32, #tpu.memory_space<vmem>>, vector<2x128xf32>
    %c17_438 = arith.constant 17 : index
    %c0_439 = arith.constant 0 : index
    %515 = tpu.strided_load %arg15[%c17_438, %c0_439] {strides = array<i32: 2, 1>} : memref<112x128xf32, #tpu.memory_space<vmem>>, vector<2x128xf32>
    %516 = arith.maximumf %514, %515 : vector<2x128xf32>
    %517 = arith.maximumf %513, %516 : vector<2x128xf32>
    %518 = vector.broadcast %462 : vector<1x128xf32> to vector<2x128xf32>
    %519 = arith.addf %517, %518 : vector<2x128xf32>
    %cst_440 = arith.constant 0.000000e+00 : f32
    %520 = vector.broadcast %cst_440 : f32 to vector<2x128xf32>
    %521 = arith.maximumf %519, %520 : vector<2x128xf32>
    %c32_441 = arith.constant 32 : index
    %c0_442 = arith.constant 0 : index
    %522 = tpu.strided_load %arg15[%c32_441, %c0_442] {strides = array<i32: 2, 1>} : memref<112x128xf32, #tpu.memory_space<vmem>>, vector<2x128xf32>
    %c33_443 = arith.constant 33 : index
    %c0_444 = arith.constant 0 : index
    %523 = tpu.strided_load %arg15[%c33_443, %c0_444] {strides = array<i32: 2, 1>} : memref<112x128xf32, #tpu.memory_space<vmem>>, vector<2x128xf32>
    %524 = arith.maximumf %522, %523 : vector<2x128xf32>
    %c48_445 = arith.constant 48 : index
    %c0_446 = arith.constant 0 : index
    %525 = tpu.strided_load %arg15[%c48_445, %c0_446] {strides = array<i32: 2, 1>} : memref<112x128xf32, #tpu.memory_space<vmem>>, vector<2x128xf32>
    %c49_447 = arith.constant 49 : index
    %c0_448 = arith.constant 0 : index
    %526 = tpu.strided_load %arg15[%c49_447, %c0_448] {strides = array<i32: 2, 1>} : memref<112x128xf32, #tpu.memory_space<vmem>>, vector<2x128xf32>
    %527 = arith.maximumf %525, %526 : vector<2x128xf32>
    %528 = arith.maximumf %524, %527 : vector<2x128xf32>
    %529 = vector.broadcast %462 : vector<1x128xf32> to vector<2x128xf32>
    %530 = arith.addf %528, %529 : vector<2x128xf32>
    %cst_449 = arith.constant 0.000000e+00 : f32
    %531 = vector.broadcast %cst_449 : f32 to vector<2x128xf32>
    %532 = arith.maximumf %530, %531 : vector<2x128xf32>
    %533 = arith.truncf %521 : vector<2x128xf32> to vector<2x128xbf16>
    %534 = vector.extract_strided_slice %533 {offsets = [0, 0], sizes = [1, 128], strides = [1, 1]} : vector<2x128xbf16> to vector<1x128xbf16>
    %c0_450 = arith.constant 0 : index
    %c0_451 = arith.constant 0 : index
    %c0_452 = arith.constant 0 : index
    %535 = vector.load %arg8[%c0_450, %c0_451, %c0_452] : memref<4x128x512xbf16, #tpu.memory_space<vmem>>, vector<1x128x512xbf16>
    %536 = vector.shape_cast %535 : vector<1x128x512xbf16> to vector<128x512xbf16>
    %cst_453 = arith.constant dense<0.000000e+00> : vector<1x512xf32>
    %537 = tpu.matmul %534, %536, %cst_453 {dimension_numbers = #tpu.dot_dimension_numbers<[1], [0], [0], [1], [0, 0, 1, 1], [], []>} : vector<1x128xbf16>, vector<128x512xbf16>, vector<1x512xf32> -> vector<1x512xf32>
    %538 = vector.extract_strided_slice %533 {offsets = [1, 0], sizes = [1, 128], strides = [1, 1]} : vector<2x128xbf16> to vector<1x128xbf16>
    %c1_454 = arith.constant 1 : index
    %c0_455 = arith.constant 0 : index
    %c0_456 = arith.constant 0 : index
    %539 = vector.load %arg8[%c1_454, %c0_455, %c0_456] : memref<4x128x512xbf16, #tpu.memory_space<vmem>>, vector<1x128x512xbf16>
    %540 = vector.shape_cast %539 : vector<1x128x512xbf16> to vector<128x512xbf16>
    %cst_457 = arith.constant dense<0.000000e+00> : vector<1x512xf32>
    %541 = tpu.matmul %538, %540, %cst_457 {dimension_numbers = #tpu.dot_dimension_numbers<[1], [0], [0], [1], [0, 0, 1, 1], [], []>} : vector<1x128xbf16>, vector<128x512xbf16>, vector<1x512xf32> -> vector<1x512xf32>
    %542 = arith.addf %537, %541 : vector<1x512xf32>
    %543 = arith.truncf %532 : vector<2x128xf32> to vector<2x128xbf16>
    %544 = vector.extract_strided_slice %543 {offsets = [0, 0], sizes = [1, 128], strides = [1, 1]} : vector<2x128xbf16> to vector<1x128xbf16>
    %c2_458 = arith.constant 2 : index
    %c0_459 = arith.constant 0 : index
    %c0_460 = arith.constant 0 : index
    %545 = vector.load %arg8[%c2_458, %c0_459, %c0_460] : memref<4x128x512xbf16, #tpu.memory_space<vmem>>, vector<1x128x512xbf16>
    %546 = vector.shape_cast %545 : vector<1x128x512xbf16> to vector<128x512xbf16>
    %cst_461 = arith.constant dense<0.000000e+00> : vector<1x512xf32>
    %547 = tpu.matmul %544, %546, %cst_461 {dimension_numbers = #tpu.dot_dimension_numbers<[1], [0], [0], [1], [0, 0, 1, 1], [], []>} : vector<1x128xbf16>, vector<128x512xbf16>, vector<1x512xf32> -> vector<1x512xf32>
    %548 = arith.addf %542, %547 : vector<1x512xf32>
    %549 = vector.extract_strided_slice %543 {offsets = [1, 0], sizes = [1, 128], strides = [1, 1]} : vector<2x128xbf16> to vector<1x128xbf16>
    %c3_462 = arith.constant 3 : index
    %c0_463 = arith.constant 0 : index
    %c0_464 = arith.constant 0 : index
    %550 = vector.load %arg8[%c3_462, %c0_463, %c0_464] : memref<4x128x512xbf16, #tpu.memory_space<vmem>>, vector<1x128x512xbf16>
    %551 = vector.shape_cast %550 : vector<1x128x512xbf16> to vector<128x512xbf16>
    %cst_465 = arith.constant dense<0.000000e+00> : vector<1x512xf32>
    %552 = tpu.matmul %549, %551, %cst_465 {dimension_numbers = #tpu.dot_dimension_numbers<[1], [0], [0], [1], [0, 0, 1, 1], [], []>} : vector<1x128xbf16>, vector<128x512xbf16>, vector<1x512xf32> -> vector<1x512xf32>
    %553 = arith.addf %548, %552 : vector<1x512xf32>
    %c0_466 = arith.constant 0 : index
    %c0_467 = arith.constant 0 : index
    %554 = vector.load %arg9[%c0_466, %c0_467] : memref<1x512xf32, #tpu.memory_space<vmem>>, vector<1x512xf32>
    %555 = arith.addf %553, %554 : vector<1x512xf32>
    %cst_468 = arith.constant 0.000000e+00 : f32
    %556 = vector.broadcast %cst_468 : f32 to vector<1x512xf32>
    %557 = arith.maximumf %555, %556 : vector<1x512xf32>
    %558 = arith.truncf %557 : vector<1x512xf32> to vector<1x512xbf16>
    %c0_469 = arith.constant 0 : index
    %c0_470 = arith.constant 0 : index
    %559 = vector.load %arg10[%c0_469, %c0_470] : memref<512x128xbf16, #tpu.memory_space<vmem>>, vector<512x128xbf16>
    %cst_471 = arith.constant dense<0.000000e+00> : vector<1x128xf32>
    %560 = tpu.matmul %558, %559, %cst_471 {dimension_numbers = #tpu.dot_dimension_numbers<[1], [0], [0], [1], [0, 0, 1, 1], [], []>} : vector<1x512xbf16>, vector<512x128xbf16>, vector<1x128xf32> -> vector<1x128xf32>
    %c0_472 = arith.constant 0 : index
    %c0_473 = arith.constant 0 : index
    %561 = vector.load %arg11[%c0_472, %c0_473] : memref<1x128xf32, #tpu.memory_space<vmem>>, vector<1x128xf32>
    %562 = arith.addf %560, %561 : vector<1x128xf32>
    %c0_474 = arith.constant 0 : index
    %c0_475 = arith.constant 0 : index
    %c0_476 = arith.constant 0 : index
    %563 = vector.load %arg12[%c0_474, %c0_475, %c0_476] : memref<1x1x128xf32, #tpu.memory_space<vmem>>, vector<1x1x128xf32>
    %564 = vector.shape_cast %563 : vector<1x1x128xf32> to vector<1x128xf32>
    %565 = vector.shape_cast %562 : vector<1x128xf32> to vector<1x1x128xf32>
    tpu.vector_store %arg12[%c0_474, %c0_475, %c0_476], %565 {strides = array<i32>} : memref<1x1x128xf32, #tpu.memory_space<vmem>>, vector<1x1x128xf32>,
    return
  }
  func.func @transform_0(%arg0: i32) -> (i32, i32, i32) {
    %c0_i32 = arith.constant 0 : i32
    %c0_i32_0 = arith.constant 0 : i32
    %c0_i32_1 = arith.constant 0 : i32
    return %arg0, %c0_i32, %c0_i32_0 : i32, i32, i32
  }
  func.func @transform_1(%arg0: i32) -> (i32, i32, i32) {
    %c0_i32 = arith.constant 0 : i32
    %c0_i32_0 = arith.constant 0 : i32
    %c0_i32_1 = arith.constant 0 : i32
    %c0_i32_2 = arith.constant 0 : i32
    return %c0_i32, %c0_i32_0, %c0_i32_1 : i32, i32, i32
  }
  func.func @transform_2(%arg0: i32) -> (i32, i32) {
    %c0_i32 = arith.constant 0 : i32
    %c0_i32_0 = arith.constant 0 : i32
    %c0_i32_1 = arith.constant 0 : i32
    return %c0_i32, %c0_i32_0 : i32, i32
  }
  func.func @transform_3(%arg0: i32) -> (i32, i32, i32) {
    %c0_i32 = arith.constant 0 : i32
    %c0_i32_0 = arith.constant 0 : i32
    %c0_i32_1 = arith.constant 0 : i32
    %c0_i32_2 = arith.constant 0 : i32
    return %c0_i32, %c0_i32_0, %c0_i32_1 : i32, i32, i32
  }
  func.func @transform_4(%arg0: i32) -> (i32, i32) {
    %c0_i32 = arith.constant 0 : i32
    %c0_i32_0 = arith.constant 0 : i32
    %c0_i32_1 = arith.constant 0 : i32
    return %c0_i32, %c0_i32_0 : i32, i32
  }
  func.func @transform_5(%arg0: i32) -> (i32, i32, i32) {
    %c0_i32 = arith.constant 0 : i32
    %c0_i32_0 = arith.constant 0 : i32
    %c0_i32_1 = arith.constant 0 : i32
    %c0_i32_2 = arith.constant 0 : i32
    return %c0_i32, %c0_i32_0, %c0_i32_1 : i32, i32, i32
  }
  func.func @transform_6(%arg0: i32) -> (i32, i32) {
    %c0_i32 = arith.constant 0 : i32
    %c0_i32_0 = arith.constant 0 : i32
    %c0_i32_1 = arith.constant 0 : i32
    return %c0_i32, %c0_i32_0 : i32, i32
  }
  func.func @transform_7(%arg0: i32) -> (i32, i32, i32) {
    %c0_i32 = arith.constant 0 : i32
    %c0_i32_0 = arith.constant 0 : i32
    %c0_i32_1 = arith.constant 0 : i32
    %c0_i32_2 = arith.constant 0 : i32
    return %c0_i32, %c0_i32_0, %c0_i32_1 : i32, i32, i32
  }
  func.func @transform_8(%arg0: i32) -> (i32, i32) {
    %c0_i32 = arith.constant 0 : i32
    %c0_i32_0 = arith.constant 0 : i32
    %c0_i32_1 = arith.constant 0 : i32
    return %c0_i32, %c0_i32_0 : i32, i32
  }
  func.func @transform_9(%arg0: i32) -> (i32, i32) {
    %c0_i32 = arith.constant 0 : i32
    %c0_i32_0 = arith.constant 0 : i32
    %c0_i32_1 = arith.constant 0 : i32
    return %c0_i32, %c0_i32_0 : i32, i32
  }
  func.func @transform_10(%arg0: i32) -> (i32, i32) {
    %c0_i32 = arith.constant 0 : i32
    %c0_i32_0 = arith.constant 0 : i32
    %c0_i32_1 = arith.constant 0 : i32
    return %c0_i32, %c0_i32_0 : i32, i32
  }
  func.func @transform_11(%arg0: i32) -> (i32, i32, i32) {
    %c0_i32 = arith.constant 0 : i32
    %c0_i32_0 = arith.constant 0 : i32
    %c0_i32_1 = arith.constant 0 : i32
    return %arg0, %c0_i32, %c0_i32_0 : i32, i32, i32
  }
}

</mosaic_0001>

<bundles_post_ra>
// kernel: convnet_forward.1
= control target key start
LH: loop header
LB: loop body
LE: loop exit
PB: predicated region body
PF: predicated region fallthrough
CT: control target
= control target key end

     0   :  { %16 = vsyncpa [#allocation6], 0  ;;  %s23504_s0 = inlined_call_operand.vmem [shape: bf16[2,576,128], index: 0, kind: input, shape index: {}]   ;;  %s23505_s1 = inlined_call_operand.vmem [shape: bf16[9,128,128], index: 1, kind: input, shape index: {}]   ;;  %s23506_s2 = inlined_call_operand.vmem [shape: f32[1,128], index: 2, kind: input, shape index: {}]   ;;  %s23507_s3 = inlined_call_operand.hbm [shape: bf16[9,128,128], index: 3, kind: input, shape index: {}]   ;;  %s23508_s4 = inlined_call_operand.vmem [shape: f32[1,128], index: 4, kind: input, shape index: {}]   ;;  %s23509_s5 = inlined_call_operand.hbm [shape: bf16[9,128,128], index: 5, kind: input, shape index: {}]   ;;  %s23510_s6 = inlined_call_operand.vmem [shape: f32[1,128], index: 6, kind: input, shape index: {}]   ;;  %s23511_s7 = inlined_call_operand.vmem [shape: bf16[4,128,512], index: 7, kind: input, shape index: {}]   ;;  %s23512_s8 = inlined_call_operand.vmem [shape: f32[1,512], index: 8, kind: input, shape index: {}]   ;;  %s23513_s9 = inlined_call_operand.vmem [shape: bf16[512,128], index: 9, kind: input, shape index: {}]   ;;  %s23514_s10 = inlined_call_operand.vmem [shape: f32[1,128], index: 10, kind: input, shape index: {}]   ;;  %s23515_s11 = inlined_call_operand.vmem [shape: f32[2,1,128], index: 11, kind: output, shape index: {}]  }
   0x1   :  { %17 = vsyncpa [#allocation8], 0  ;;  %s20143_s17 = smov 0  }
   0x2 LB: > { %s20149_s18 = sadd.s32 4294967295, %s20074_s17   ;;  %p13488_p0 = scmp.ge.s32.totalorder %s20074_s17, 1  ;;  %s20074_s17 = sphi %s20143_s17, %s23_s17  }
   0x3   : > { %p290_p1 = scmp.lt.s32.totalorder %s20074_s17, 3  ;;  %s20076_s19 = smov [#allocation5]  }
   0x4   : > { %s308_s20 = sshll.u32 %s20076_s19, 4  ;;  %p23516_p3 = scmp.eq.s32.totalorder %s20149_s18, 0  ;;  %s309_s20 = int_to_ptr.vmem [resolvable:$true] %s308_s20 }
   0x5   : > { %p20153_p2 = pnand %p13488_p0, %p290_p1  ;;  %s20077_s22 = smov [#allocation7]  }
   0x6   : > { %s324_s23 = sshll.u32 %s20077_s22, 4  ;;  %s20004_s27 = scalar_lea.hbm %s23507_s3, 9216  ;;  %s20166_s23 = int_to_ptr.vmem [resolvable:$true] %s324_s23 }
   0x7   : > { %s23518_s21 = scalar_select %p20153_p2, 1, 0 }
   0x8   : > { %p19114_p4 = pneg %p20153_p2  ;;  %p20005_p6 = scmp.ne.s32.totalorder %s23507_s3, %s20004_s27 }
   0x9   : > { %p20011_p10 = scmp.lt.u32.totalorder %s20004_s27, %s23507_s3 }
   0xa   : > { %p20162_p5 = pnand %p23516_p3, %p19114_p4 }
   0xc   : > { %p20006_p7 = pneg %p20162_p5 }
   0xe   : > { %p20007_p8 = pnand %p20006_p7, %p20005_p6 }
  0x10   : > { %p20008_p9 = pneg %p20007_p8 }
  0x12   : > { %p20013_p11 = pnand %p20011_p10, %p20008_p9 }
  0x14   : > { %20016 = shalt.err (!%p20013_p11)
}
  0x15   : > { %s20017_s13 = scalar_lea.vmem %s309_s20, 9216  ;;  %p20025_p1 = scmp.lt.s32.totalorder %s309_s20, %s309_s20 }
  0x16   : > { %p20018_p12 = scmp.ne.s32.totalorder %s309_s20, %s20017_s13  ;;  %p20026_p4 = scmp.lt.s32.totalorder %s20017_s13, %s20017_s13 }
  0x18   : > { %p20020_p13 = pnand %p20018_p12, %p20006_p7  ;;  %p20027_p3 = por %p20026_p4, %p20025_p1 }
  0x1a   : > { %p20021_p0 = pneg %p20020_p13 }
  0x1c   : > { %p20028_p2 = pnand %p20027_p3, %p20021_p0 }
  0x1e   : > { %20031 = shalt.err (!%p20028_p2)
}
  0x1f   : > { %s20078_s14 = smov 64   ;;  %s20079_s15 = smov 4  }
  0x20   : > { %19117 = dma.hbm_to_vmem [thread:$0]  (!%p20162_p5), %s23507_s3, 9216, %s309_s20, [#allocation6], %s20078_s14, %s20078_s14, %s20079_s15  }
  0x21   : > { %s20032_s26 = scalar_lea.hbm %s23509_s5, 9216 }
  0x22   : > { %p20033_p6 = scmp.ne.s32.totalorder %s23509_s5, %s20032_s26  ;;  %p20039_p8 = scmp.lt.u32.totalorder %s20032_s26, %s23509_s5 }
  0x24   : > { %p20035_p2 = pnand %p20033_p6, %p20006_p7 }
  0x26   : > { %p20036_p3 = pneg %p20035_p2 }
  0x28   : > { %p20041_p9 = pnand %p20039_p8, %p20036_p3 }
  0x2a   : > { %20044 = shalt.err (!%p20041_p9)
}
  0x2b   : > { %s20045_s20 = scalar_lea.vmem %s20166_s23, 9216  ;;  %p20053_p13 = scmp.lt.s32.totalorder %s20166_s23, %s20166_s23 }
  0x2c   : > { %p20046_p10 = scmp.ne.s32.totalorder %s20166_s23, %s20045_s20  ;;  %p20054_p0 = scmp.lt.s32.totalorder %s20045_s20, %s20045_s20 }
  0x2e   : > { %p20048_p11 = pnand %p20046_p10, %p20006_p7  ;;  %p20055_p1 = por %p20054_p0, %p20053_p13 }
  0x30   : > { %p20049_p12 = pneg %p20048_p11 }
  0x32   : > { %p20056_p4 = pnand %p20055_p1, %p20049_p12 }
  0x34   : > { %20059 = shalt.err (!%p20056_p4)
}
  0x35   : > { %19120 = dma.hbm_to_vmem [thread:$0]  (!%p20162_p5), %s23509_s5, 9216, %s20166_s23, [#allocation8], %s20078_s14, %s20078_s14, %s20079_s15  }
  0x36   : > { %p23520_p6 = scmp.ne.s32.totalorder %s23518_s21, 0 }
  0x37   : > { %p23521_p2 = scmp.eq.s32.totalorder (!%p23520_p6), %s20149_s18, 0 }
  0x38   : > { %363 = sbr.rel (%p23520_p6) target bundleno = 2994 (0xbb2), region = 64 }
  0x3f   : > { %20065 = dma.done.wait (%p23521_p2), [#allocation6], 9216   ;;  %p23522_p7 = pmov %p23521_p2 }
  0x40   : > { %p23523_p3 = pmov %p23521_p2 }
  0x41   : > { %20067 = vsyncadd (%p23522_p7), [#allocation6], 4294958080 }
  0x42   : > { %20069 = dma.done.wait (%p23523_p3), [#allocation8], 9216   ;;  %p23524_p8 = pmov %p23521_p2 }
  0x43   : > { %v20080_v0 = vmov 0.0   ;;  %vm20081_vm0 = vmmov 0   ;;  %v19140_v1 = vld [vmem:[%s23505_s1 + $0xc0] sm:$0xff]   ;;  %v19142_v3 = vld [vmem:[%s23505_s1 + $0xc8] sm:$0xff]   ;;  %p405_p5 = scmp.lt.s32.totalorder %s20149_s18, 1  ;;  %v19144_v5 = vld [vmem:[%s23505_s1 + $0xd0] sm:$0xff]  }
  0x44   : > { %20071 = vsyncadd (%p23524_p8), [#allocation8], 4294958080  ;;  %15785 = vmatprep.subr.bf16.mxu0 %v20080_v0  ;;  %16181 = vmatprep.subr.bf16.mxu1 %v20080_v0  ;;  %v19141_v2 = vld [vmem:[%s23505_s1 + $0xc0] sm:$0xff]   ;;  %v19143_v4 = vld [vmem:[%s23505_s1 + $0xc8] sm:$0xff]   ;;  %vm1072_vm1 = vsmask.f32 7424 }
  0x45   : > { %15801 = vmatprep.mubr.msk.bf16.mxu0 %vm20081_vm0, %v20080_v0  ;;  %16197 = vmatprep.mubr.msk.bf16.mxu1 %vm20081_vm0, %v20080_v0  ;;  %v19145_v6 = vld [vmem:[%s23505_s1 + $0xd0] sm:$0xff]   ;;  %s23530_s18 = smov (!%p405_p5, %s20149_s18), 1  ;;  %v19146_v7 = vld [vmem:[%s23505_s1 + $0xd8] sm:$0xff]   ;;  %v19148_v9 = vld [vmem:[%s23505_s1 + $0xe0] sm:$0xff]   ;;  %vm1718_vm2 = vcmask 1046528   ;;  %vm2287_vm3 = vcmask 1044480  }
  0x46   : > { %15786 = vmatpush3.bf16.msra.mxu0 %v19140_v1  ;;  %16182 = vmatpush3.bf16.msra.mxu1 %v19141_v2  ;;  %v19147_v8 = vld [vmem:[%s23505_s1 + $0xd8] sm:$0xff]   ;;  %s19105_s13 = smul.u32 288, %s23530_s18  ;;  %v19149_v10 = vld [vmem:[%s23505_s1 + $0xe0] sm:$0xff]   ;;  %v19150_v11 = vld [vmem:[%s23505_s1 + $0xe8] sm:$0xff]   ;;  %vm2288_vm4 = vsmask.f32 4354  ;;  %s412_s27 = scalar_lea.vmem %s23515_s11, %s23530_s18 }
  0x47   : > { %15787 = vmatprep.subr.bf16.mxu0 %v20080_v0  ;;  %16183 = vmatprep.subr.bf16.mxu1 %v20080_v0  ;;  %v19151_v12 = vld [vmem:[%s23505_s1 + $0xe8] sm:$0xff]   ;;  %v19152_v13 = vld [vmem:[%s23505_s1 + $0xf0] sm:$0xff]   ;;  %v19154_v15 = vld [vmem:[%s23505_s1 + $0xf8] sm:$0xff]   ;;  %vm9232_vm6 = vcmask 1042432   ;;  %vm9233_vm7 = vsmask.f32 2306 }
  0x48   : > { %s20276_s19 = scalar_lea.vmem %s23504_s0, %s19105_s13  ;;  %v19153_v14 = vld [vmem:[%s23505_s1 + $0xf0] sm:$0xff]   ;;  %v19155_v16 = vld [vmem:[%s23505_s1 + $0xf8] sm:$0xff]   ;;  %v19158_v19 = vld [vmem:[%s23505_s1] sm:$0xff]  }
  0x49   : > { %v20304_v17 = vld [vmem:[%s20276_s19 + $0x10] sm:$0xff]   ;;  %v19168_v20 = vld [vmem:[%s23505_s1] sm:$0xff]   ;;  %v19160_v21 = vld [vmem:[%s23505_s1 + $0x8] sm:$0xff]  }
  0x4a   : > { %15788 = vmatpush3.bf16.msra.mxu0 %v19142_v3  ;;  %16184 = vmatpush3.bf16.msra.mxu1 %v19143_v4  ;;  %v20307_v18 = vld [vmem:[%s20276_s19 + $0x50] sm:$0xff]   ;;  %v19170_v22 = vld [vmem:[%s23505_s1 + $0x8] sm:$0xff]   ;;  %v20331_v23 = vld [vmem:[%s20276_s19 + $0x18] sm:$0xff]  }
  0x4b   : > { %15789 = vmatprep.subr.bf16.mxu0 %v20080_v0  ;;  %16185 = vmatprep.subr.bf16.mxu1 %v20080_v0  ;;  %v20335_v24 = vld [vmem:[%s20276_s19 + $0x58] sm:$0xff]   ;;  %v19162_v25 = vld [vmem:[%s23505_s1 + $0x10] sm:$0xff]   ;;  %v20359_v29 = vld [vmem:[%s20276_s19 + $0x20] sm:$0xff]  }
  0x4c   : > { %v19173_v26 = vld [vmem:[%s23505_s1 + $0x10] sm:$0xff]   ;;  %v19165_v27 = vld [vmem:[%s23505_s1 + $0x18] sm:$0xff]   ;;  %v20363_v30 = vld [vmem:[%s20276_s19 + $0x60] sm:$0xff]  }
  0x4d   : > { %v19175_v28 = vld [vmem:[%s23505_s1 + $0x18] sm:$0xff]   ;;  %v19169_v31 = vld [vmem:[%s23505_s1 + $0x20] sm:$0xff]   ;;  %v19174_v33 = vld [vmem:[%s23505_s1 + $0x28] sm:$0xff]  }
  0x4e   : > { %15790 = vmatpush3.bf16.msra.mxu0 %v19144_v5  ;;  %16186 = vmatpush3.bf16.msra.mxu1 %v19145_v6  ;;  %v19178_v32 = vld [vmem:[%s23505_s1 + $0x20] sm:$0xff]   ;;  %v19180_v34 = vld [vmem:[%s23505_s1 + $0x28] sm:$0xff]   ;;  %v19179_v37 = vld [vmem:[%s23505_s1 + $0x30] sm:$0xff]  }
  0x4f   : > { %15791 = vmatprep.subr.bf16.mxu0 %v20080_v0  ;;  %16187 = vmatprep.subr.bf16.mxu1 %v20080_v0  ;;  %v20387_v35 = vld [vmem:[%s20276_s19 + $0x28] sm:$0xff]   ;;  %v19183_v38 = vld [vmem:[%s23505_s1 + $0x30] sm:$0xff]   ;;  %v19184_v39 = vld [vmem:[%s23505_s1 + $0x38] sm:$0xff]  }
  0x50   : > { %v20391_v36 = vld [vmem:[%s20276_s19 + $0x68] sm:$0xff]   ;;  %v19185_v40 = vld [vmem:[%s23505_s1 + $0x38] sm:$0xff]   ;;  %v20415_v41 = vld [vmem:[%s20276_s19 + $0x30] sm:$0xff]  }
  0x51   : > { %v20419_v42 = vld [vmem:[%s20276_s19 + $0x70] sm:$0xff]   ;;  %v20430_v43 = vld [vmem:[%s20276_s19 + $0x38] sm:$0xff]   ;;  %v20442_v45 = vld [vmem:[%s20276_s19 + $0x40] sm:$0xff]  }
  0x52   : > { %15792 = vmatpush3.bf16.msra.mxu0 %v19146_v7  ;;  %16188 = vmatpush3.bf16.msra.mxu1 %v19147_v8  ;;  %v20433_v44 = vld [vmem:[%s20276_s19 + $0x78] sm:$0xff]   ;;  %v20445_v46 = vld [vmem:[%s20276_s19 + $0x80] sm:$0xff]   ;;  %v19190_v51 = vld [vmem:[%s23505_s1 + $0x188] sm:$0xff]  }
  0x53   : > { %15793 = vmatprep.subr.bf16.mxu0 %v20080_v0  ;;  %16189 = vmatprep.subr.bf16.mxu1 %v20080_v0  ;;  %v19186_v47 = vld [vmem:[%s20276_s19] sm:$0xff]   ;;  %v19196_v52 = vld [vmem:[%s23505_s1 + $0x188] sm:$0xff]   ;;  %v19192_v55 = vld [vmem:[%s23505_s1 + $0x190] sm:$0xff]  }
  0x54   : > { %v19187_v48 = vld [vmem:[%s20276_s19 + $0x40] sm:$0xff]   ;;  %v19189_v53 = vld [vmem:[%s20276_s19 + $0x8] sm:$0xff]   ;;  %v19197_v56 = vld [vmem:[%s23505_s1 + $0x190] sm:$0xff]  }
  0x55   : > { %v19188_v49 = vld [vmem:[%s23505_s1 + $0x180] sm:$0xff]   ;;  %v19191_v54 = vld [vmem:[%s20276_s19 + $0x48] sm:$0xff]   ;;  %v19193_v57 = vld [vmem:[%s23505_s1 + $0x198] sm:$0xff]  }
  0x56   : > { %15794 = vmatpush3.bf16.msra.mxu0 %v19148_v9  ;;  %16190 = vmatpush3.bf16.msra.mxu1 %v19149_v10  ;;  %v19194_v50 = vld [vmem:[%s23505_s1 + $0x180] sm:$0xff]   ;;  %v19199_v58 = vld [vmem:[%s23505_s1 + $0x198] sm:$0xff]   ;;  %v19198_v61 = vld [vmem:[%s23505_s1 + $0x1a8] sm:$0xff]  }
  0x57   : > { %15795 = vmatprep.subr.bf16.mxu0 %v20080_v0  ;;  %16191 = vmatprep.subr.bf16.mxu1 %v20080_v0  ;;  %v19195_v59 = vld [vmem:[%s23505_s1 + $0x1a0] sm:$0xff]   ;;  %v19202_v62 = vld [vmem:[%s23505_s1 + $0x1a8] sm:$0xff]   ;;  %v19201_v63 = vld [vmem:[%s23505_s1 + $0x1b0] sm:$0xff]  }
  0x58   : > { %v19200_v60 = vld [vmem:[%s23505_s1 + $0x1a0] sm:$0xff]   ;;  %v19203_v1 = vld [vmem:[%s23505_s1 + $0x1b0] sm:$0xff]   ;;  %v19204_v2 = vld [vmem:[%s23505_s1 + $0x1b8] sm:$0xff]  }
  0x59   : > { %v19205_v3 = vld [vmem:[%s23505_s1 + $0x1b8] sm:$0xff]   ;;  %v19206_v4 = vld [vmem:[%s23505_s1 + $0x40] sm:$0xff]   ;;  %v19207_v6 = vld [vmem:[%s23505_s1 + $0x48] sm:$0xff]  }
  0x5a   : > { %15796 = vmatpush3.bf16.msra.mxu0 %v19150_v11  ;;  %16192 = vmatpush3.bf16.msra.mxu1 %v19151_v12  ;;  %v19210_v5 = vld [vmem:[%s23505_s1 + $0x40] sm:$0xff]   ;;  %v19212_v7 = vld [vmem:[%s23505_s1 + $0x48] sm:$0xff]   ;;  %v19208_v8 = vld [vmem:[%s23505_s1 + $0x50] sm:$0xff]  }
  0x5b   : > { %15797 = vmatprep.subr.bf16.mxu0 %v20080_v0  ;;  %16193 = vmatprep.subr.bf16.mxu1 %v20080_v0  ;;  %v19213_v9 = vld [vmem:[%s23505_s1 + $0x50] sm:$0xff]   ;;  %v19209_v10 = vld [vmem:[%s23505_s1 + $0x58] sm:$0xff]   ;;  %v19211_v12 = vld [vmem:[%s23505_s1 + $0x60] sm:$0xff]  }
  0x5c   : > { %v19215_v11 = vld [vmem:[%s23505_s1 + $0x58] sm:$0xff]   ;;  %vm22061_vm5 = vmand %vm2287_vm3, %vm2288_vm4 }
  0x5d   : > { %vm22891_vm8 = vmand %vm9232_vm6, %vm9233_vm7 }
  0x5e   : > { %15798 = vmatpush3.bf16.msra.mxu0 %v19152_v13  ;;  %16194 = vmatpush3.bf16.msra.mxu1 %v19153_v14  ;;  %v19218_v13 = vld [vmem:[%s23505_s1 + $0x60] sm:$0xff]   ;;  %v19214_v14 = vld [vmem:[%s23505_s1 + $0x68] sm:$0xff]  }
  0x5f   : > { %15799 = vmatprep.subr.bf16.mxu0 %v20080_v0  ;;  %16195 = vmatprep.subr.bf16.mxu1 %v20080_v0 }
  0x62   : > { %15800 = vmatpush3.bf16.msra.mxu0 %v19154_v15  ;;  %16196 = vmatpush3.bf16.msra.mxu1 %v19155_v16  ;;  %v19220_v15 = vld [vmem:[%s23505_s1 + $0x68] sm:$0xff]   ;;  %v994_v16 = vld [vmem:[%s20276_s19] sm:$0xf] }
  0x63   : > { %15829 = vmatprep.subr.bf16.mxu0 %v20080_v0  ;;  %16225 = vmatprep.subr.bf16.mxu1 %v20080_v0 }
  0x65   : > { %15802 = vmatmul.mubr.bf16.vlgmr.msra.gmra.mrb[0].mxu0 %v20304_v17  ;;  %16198 = vmatmul.mubr.bf16.vlgmr.msra.gmra.mrb[0].mxu1 %v20307_v18 }
  0x66   : > { %15830 = vmatpush3.bf16.msra.mxu0 %v19158_v19  ;;  %15805 = vmatprep.mubr.msk.bf16.mxu0 %vm20081_vm0, %v20080_v0  ;;  %v19219_v19 = vld [vmem:[%s23505_s1 + $0x70] sm:$0xff]  }
  0x67   : > { %15831 = vmatprep.subr.bf16.mxu0 %v20080_v0  ;;  %16201 = vmatprep.mubr.msk.bf16.mxu1 %vm20081_vm0, %v20080_v0 }
  0x68   : > { %16226 = vmatpush3.bf16.msra.mxu1 %v19168_v20  ;;  %v2880_v20 = vld [vmem:[%s20276_s19 + $0x44] sm:$0xf] }
  0x69   : > { %16227 = vmatprep.subr.bf16.mxu1 %v20080_v0 }
  0x6a   : > { %15832 = vmatpush3.bf16.msra.mxu0 %v19160_v21  ;;  %v19223_v21 = vld [vmem:[%s23505_s1 + $0x70] sm:$0xff]  }
  0x6b   : > { %15833 = vmatprep.subr.bf16.mxu0 %v20080_v0 }
  0x6c   : > { %16228 = vmatpush3.bf16.msra.mxu1 %v19170_v22 }
  0x6d   : > { %15806 = vmatmul.mubr.bf16.gmra.mrb[4].mxu0 %v20331_v23  ;;  %16229 = vmatprep.subr.bf16.mxu1 %v20080_v0 }
  0x6e   : > { %16202 = vmatmul.mubr.bf16.gmra.mrb[4].mxu1 %v20335_v24  ;;  %15809 = vmatprep.mubr.msk.bf16.mxu0 %vm20081_vm0, %v20080_v0 }
  0x6f   : > { %15834 = vmatpush3.bf16.msra.mxu0 %v19162_v25  ;;  %16205 = vmatprep.mubr.msk.bf16.mxu1 %vm20081_vm0, %v20080_v0  ;;  %v20640_v25 = vld [vmem:[%s20276_s19 + $0x48] sm:$0xff]  }
  0x70   : > { %15835 = vmatprep.subr.bf16.mxu0 %v20080_v0  ;;  %16230 = vmatpush3.bf16.msra.mxu1 %v19173_v26  ;;  %v20646_v26 = vld [vmem:[%s20276_s19 + $0x10] sm:$0xff]  }
  0x71   : > { %16231 = vmatprep.subr.bf16.mxu1 %v20080_v0 }
  0x73   : > { %15836 = vmatpush3.bf16.msra.mxu0 %v19165_v27  ;;  %v19224_v27 = vld [vmem:[%s23505_s1 + $0x78] sm:$0xff]  }
  0x74   : > { %15837 = vmatprep.subr.bf16.mxu0 %v20080_v0  ;;  %16232 = vmatpush3.bf16.msra.mxu1 %v19175_v28  ;;  %v19225_v28 = vld [vmem:[%s23505_s1 + $0x78] sm:$0xff]  }
  0x75   : > { %15810 = vmatmul.mubr.bf16.gmra.mrb[8].mxu0 %v20359_v29  ;;  %16233 = vmatprep.subr.bf16.mxu1 %v20080_v0 }
  0x76   : > { %16206 = vmatmul.mubr.bf16.gmra.mrb[8].mxu1 %v20363_v30  ;;  %15813 = vmatprep.mubr.msk.bf16.mxu0 %vm20081_vm0, %v20080_v0 }
  0x77   : > { %16209 = vmatprep.mubr.msk.bf16.mxu1 %vm20081_vm0, %v20080_v0  ;;  %15838 = vmatpush3.bf16.msra.mxu0 %v19169_v31 }
  0x78   : > { %15839 = vmatprep.subr.bf16.mxu0 %v20080_v0  ;;  %16234 = vmatpush3.bf16.msra.mxu1 %v19178_v32  ;;  %v2964_v32 = vshll.u32 %v20640_v25, 16 }
  0x79   : > { %16235 = vmatprep.subr.bf16.mxu1 %v20080_v0 }
  0x7b   : > { %15840 = vmatpush3.bf16.msra.mxu0 %v19174_v33  ;;  %v1089_v33 = vshll.u32 %v20646_v26, 16 }
  0x7c   : > { %15841 = vmatprep.subr.bf16.mxu0 %v20080_v0  ;;  %16236 = vmatpush3.bf16.msra.mxu1 %v19180_v34 }
  0x7d   : > { %15814 = vmatmul.mubr.bf16.gmra.mrb[12].mxu0 %v20387_v35  ;;  %16237 = vmatprep.subr.bf16.mxu1 %v20080_v0 }
  0x7e   : > { %16210 = vmatmul.mubr.bf16.gmra.mrb[12].mxu1 %v20391_v36  ;;  %15817 = vmatprep.mubr.msk.bf16.mxu0 %vm20081_vm0, %v20080_v0 }
  0x7f   : > { %16213 = vmatprep.mubr.msk.bf16.mxu1 %vm20081_vm0, %v20080_v0  ;;  %15842 = vmatpush3.bf16.msra.mxu0 %v19179_v37 }
  0x80   : > { %15843 = vmatprep.subr.bf16.mxu0 %v20080_v0  ;;  %16238 = vmatpush3.bf16.msra.mxu1 %v19183_v38 }
  0x81   : > { %16239 = vmatprep.subr.bf16.mxu1 %v20080_v0 }
  0x83   : > { %15844 = vmatpush3.bf16.msra.mxu0 %v19184_v39  ;;  %v2966_v39 = vrot.slane %v2964_v32, 1 }
  0x84   : > { %16240 = vmatpush3.bf16.msra.mxu1 %v19185_v40  ;;  %15873 = vmatprep.subr.bf16.mxu0 %v20080_v0 }
  0x85   : > { %15818 = vmatmul.mubr.bf16.gmra.mrb[16].mxu0 %v20415_v41  ;;  %16269 = vmatprep.subr.bf16.mxu1 %v20080_v0 }
  0x86   : > { %16214 = vmatmul.mubr.bf16.gmra.mrb[16].mxu1 %v20419_v42  ;;  %15821 = vmatprep.mubr.msk.bf16.mxu0 %vm20081_vm0, %v20080_v0 }
  0x87   : > { %16217 = vmatprep.mubr.msk.bf16.mxu1 %vm20081_vm0, %v20080_v0 }
  0x8d   : > { %15822 = vmatmul.mubr.bf16.gmra.mrb[20].mxu0 %v20430_v43 }
  0x8e   : > { %16218 = vmatmul.mubr.bf16.gmra.mrb[20].mxu1 %v20433_v44  ;;  %15825 = vmatprep.mubr.msk.bf16.mxu0 %vm20081_vm0, %v20080_v0 }
  0x8f   : > { %16221 = vmatprep.mubr.msk.bf16.mxu1 %vm20081_vm0, %v20080_v0 }
  0x95   : > { %15826 = vmatmul.mubr.bf16.gmra.mrb[24].mxu0 %v20442_v45 }
  0x96   : > { %16222 = vmatmul.mubr.bf16.gmra.mrb[24].mxu1 %v20445_v46  ;;  %15845 = vmatprep.mubr.msk.bf16.mxu0 %vm20081_vm0, %v20080_v0 }
  0x97   : > { %16241 = vmatprep.mubr.msk.bf16.mxu1 %vm20081_vm0, %v20080_v0 }
  0x9d   : > { %15846 = vmatmul.mubr.bf16.vlgmr.msra.gmra.mrb[0].mxu0 %v19186_v47  ;;  %v19221_v47 = vld [vmem:[%s20276_s19 + $0x50] sm:$0xff]  }
  0x9e   : > { %16242 = vmatmul.mubr.bf16.vlgmr.msra.gmra.mrb[0].mxu1 %v19187_v48  ;;  %15874 = vmatpush3.bf16.msra.mxu0 %v19188_v49  ;;  %v19222_v48 = vld [vmem:[%s20276_s19 + $0x90] sm:$0xff]   ;;  %v20681_v49 = vld [vmem:[%s20276_s19 + $0x18] sm:$0xff]  }
  0x9f   : > { %15849 = vmatprep.mubr.msk.bf16.mxu0 %vm20081_vm0, %v20080_v0  ;;  %15875 = vmatprep.subr.bf16.mxu0 %v20080_v0 }
  0xa0   : > { %16245 = vmatprep.mubr.msk.bf16.mxu1 %vm20081_vm0, %v20080_v0  ;;  %16270 = vmatpush3.bf16.msra.mxu1 %v19194_v50 }
  0xa1   : > { %16271 = vmatprep.subr.bf16.mxu1 %v20080_v0 }
  0xa2   : > { %15876 = vmatpush3.bf16.msra.mxu0 %v19190_v51  ;;  %v1093_v51 = vshrl.u32 %v20646_v26, 16  ;;  %v19244_v26 = vld [vmem:[%s20276_s19 + $0x68] sm:$0xff]  }
  0xa3   : > { %15877 = vmatprep.subr.bf16.mxu0 %v20080_v0 }
  0xa4   : > { %16272 = vmatpush3.bf16.msra.mxu1 %v19196_v52 }
  0xa5   : > { %15850 = vmatmul.mubr.bf16.gmra.mrb[4].mxu0 %v19189_v53  ;;  %16273 = vmatprep.subr.bf16.mxu1 %v20080_v0  ;;  %v1097_v53 = vshll.u32 %v20681_v49, 16 }
  0xa6   : > { %16246 = vmatmul.mubr.bf16.gmra.mrb[4].mxu1 %v19191_v54  ;;  %15853 = vmatprep.mubr.msk.bf16.mxu0 %vm20081_vm0, %v20080_v0 }
  0xa7   : > { %15878 = vmatpush3.bf16.msra.mxu0 %v19192_v55  ;;  %16249 = vmatprep.mubr.msk.bf16.mxu1 %vm20081_vm0, %v20080_v0 }
  0xa8   : > { %15879 = vmatprep.subr.bf16.mxu0 %v20080_v0  ;;  %16274 = vmatpush3.bf16.msra.mxu1 %v19197_v56  ;;  %v19230_v56 = vld [vmem:[%s23505_s1 + $0x100] sm:$0xff]  }
  0xa9   : > { %16275 = vmatprep.subr.bf16.mxu1 %v20080_v0 }
  0xab   : > { %15880 = vmatpush3.bf16.msra.mxu0 %v19193_v57  ;;  %v19236_v57 = vld [vmem:[%s20276_s19 + $0x58] sm:$0xff]  }
  0xac   : > { %15881 = vmatprep.subr.bf16.mxu0 %v20080_v0  ;;  %16276 = vmatpush3.bf16.msra.mxu1 %v19199_v58 }
  0xad   : > { %15854 = vmatmul.mubr.bf16.gmra.mrb[8].mxu0 %v20304_v17  ;;  %16277 = vmatprep.subr.bf16.mxu1 %v20080_v0  ;;  %v995_v17 = vld [vmem:[%s20276_s19 + $0x4] sm:$0xf] }
  0xae   : > { %16250 = vmatmul.mubr.bf16.gmra.mrb[8].mxu1 %v20307_v18  ;;  %15857 = vmatprep.mubr.msk.bf16.mxu0 %vm20081_vm0, %v20080_v0  ;;  %v2879_v18 = vld [vmem:[%s20276_s19 + $0x40] sm:$0xf]  ;;  %v13579_v22 = vcombine.low %v994_v16, %v995_v17  ;;  %v2984_v16 = vshrl.u32 %v19236_v57, 16 }
  0xaf   : > { %16253 = vmatprep.mubr.msk.bf16.mxu1 %vm20081_vm0, %v20080_v0  ;;  %15882 = vmatpush3.bf16.msra.mxu0 %v19195_v59  ;;  %v19240_v59 = vld [vmem:[%s23505_s1 + $0x100] sm:$0xff]  }
  0xb0   : > { %15883 = vmatprep.subr.bf16.mxu0 %v20080_v0  ;;  %16278 = vmatpush3.bf16.msra.mxu1 %v19200_v60  ;;  %v1074_v34 = vshrl.u32 %v13579_v22, 16 }
  0xb1   : > { %16279 = vmatprep.subr.bf16.mxu1 %v20080_v0 }
  0xb3   : > { %15884 = vmatpush3.bf16.msra.mxu0 %v19198_v61  ;;  %v19232_v61 = vld [vmem:[%s23505_s1 + $0x108] sm:$0xff]  }
  0xb4   : > { %15885 = vmatprep.subr.bf16.mxu0 %v20080_v0  ;;  %16280 = vmatpush3.bf16.msra.mxu1 %v19202_v62 }
  0xb5   : > { %15858 = vmatmul.mubr.bf16.gmra.mrb[12].mxu0 %v20331_v23  ;;  %16281 = vmatprep.subr.bf16.mxu1 %v20080_v0  ;;  %v20634_v23 = vld [vmem:[%s20276_s19 + $0x8] sm:$0xff]  }
  0xb6   : > { %16254 = vmatmul.mubr.bf16.gmra.mrb[12].mxu1 %v20335_v24  ;;  %15861 = vmatprep.mubr.msk.bf16.mxu0 %vm20081_vm0, %v20080_v0  ;;  %v13806_v24 = vcombine.low %v2879_v18, %v2880_v20  ;;  %v1085_v40 = vshrl.u32 %v20634_v23, 16  ;;  %v19241_v18 = vld [vmem:[%s23505_s1 + $0x120] sm:$0xff]  }
  0xb7   : > { %16257 = vmatprep.mubr.msk.bf16.mxu1 %vm20081_vm0, %v20080_v0  ;;  %15886 = vmatpush3.bf16.msra.mxu0 %v19201_v63  ;;  %v2980_v63 = vshll.u32 %v19236_v57, 16  ;;  %v19250_v20 = vld [vmem:[%s23505_s1 + $0x120] sm:$0xff]  }
  0xb8   : > { %15887 = vmatprep.subr.bf16.mxu0 %v20080_v0  ;;  %16282 = vmatpush3.bf16.msra.mxu1 %v19203_v1  ;;  %v2959_v31 = vshll.u32 %v13806_v24, 16  ;;  %v2957_v37 = vshrl.u32 %v13806_v24, 16  ;;  %v19242_v1 = vld [vmem:[%s23505_s1 + $0x108] sm:$0xff]  }
  0xb9   : > { %16283 = vmatprep.subr.bf16.mxu1 %v20080_v0 }
  0xba   : > { %v2961_v38 = vrot.slane %v2959_v31, 1  ;;  %v19252_v31 = vld [vmem:[%s23505_s1 + $0x128] sm:$0xff]  }
  0xbb   : > { %15888 = vmatpush3.bf16.msra.mxu0 %v19204_v2 }
  0xbc   : > { %16284 = vmatpush3.bf16.msra.mxu1 %v19205_v3  ;;  %15917 = vmatprep.subr.bf16.mxu0 %v20080_v0  ;;  %v2962_v55 = vor.u32 %v2961_v38, %v2957_v37  ;;  %v19234_v3 = vld [vmem:[%s23505_s1 + $0x110] sm:$0xff]   ;;  %v2996_v37 = vshll.u32 %v19244_v26, 16 }
  0xbd   : > { %15862 = vmatmul.mubr.bf16.gmra.mrb[16].mxu0 %v20359_v29  ;;  %16313 = vmatprep.subr.bf16.mxu1 %v20080_v0  ;;  %v19257_v38 = vld [vmem:[%s23505_s1 + $0x130] sm:$0xff]  }
  0xbe   : > { %16258 = vmatmul.mubr.bf16.gmra.mrb[16].mxu1 %v20363_v30  ;;  %15865 = vmatprep.mubr.msk.bf16.mxu0 %vm20081_vm0, %v20080_v0  ;;  %v2967_v60 = vsel %vm1072_vm1, %v2962_v55, %v2966_v39 }
  0xbf   : > { %16261 = vmatprep.mubr.msk.bf16.mxu1 %vm20081_vm0, %v20080_v0 }
  0xc5   : > { %15866 = vmatmul.mubr.bf16.gmra.mrb[20].mxu0 %v20387_v35 }
  0xc6   : > { %16262 = vmatmul.mubr.bf16.gmra.mrb[20].mxu1 %v20391_v36  ;;  %15869 = vmatprep.mubr.msk.bf16.mxu0 %vm20081_vm0, %v20080_v0 }
  0xc7   : > { %16265 = vmatprep.mubr.msk.bf16.mxu1 %vm20081_vm0, %v20080_v0 }
  0xcd   : > { %15870 = vmatmul.mubr.bf16.gmra.mrb[24].mxu0 %v20415_v41 }
  0xce   : > { %16266 = vmatmul.mubr.bf16.gmra.mrb[24].mxu1 %v20419_v42  ;;  %15889 = vmatprep.mubr.msk.bf16.mxu0 %vm20081_vm0, %v20080_v0 }
  0xcf   : > { %16285 = vmatprep.mubr.msk.bf16.mxu1 %vm20081_vm0, %v20080_v0 }
  0xd5   : > { %15890 = vmatmul.mubr.bf16.vlgmr.msra.gmra.mrb[0].mxu0 %v20359_v29  ;;  %v1076_v29 = vshll.u32 %v13579_v22, 16 }
  0xd6   : > { %16286 = vmatmul.mubr.bf16.vlgmr.msra.gmra.mrb[0].mxu1 %v20363_v30  ;;  %15918 = vmatpush3.bf16.msra.mxu0 %v19206_v4  ;;  %v1081_v30 = vshll.u32 %v20634_v23, 16  ;;  %v19243_v23 = vld [vmem:[%s20276_s19 + $0x28] sm:$0xff]  }
  0xd7   : > { %15893 = vmatprep.mubr.msk.bf16.mxu0 %vm20081_vm0, %v20080_v0  ;;  %15919 = vmatprep.subr.bf16.mxu0 %v20080_v0  ;;  %v1113_v32 = vshll.u32 %v19243_v23, 16 }
  0xd8   : > { %16289 = vmatprep.mubr.msk.bf16.mxu1 %vm20081_vm0, %v20080_v0  ;;  %16314 = vmatpush3.bf16.msra.mxu1 %v19210_v5  ;;  %v19245_v5 = vld [vmem:[%s23505_s1 + $0x110] sm:$0xff]  }
  0xd9   : > { %16315 = vmatprep.subr.bf16.mxu1 %v20080_v0 }
  0xda   : > { %15920 = vmatpush3.bf16.msra.mxu0 %v19207_v6 }
  0xdb   : > { %15921 = vmatprep.subr.bf16.mxu0 %v20080_v0 }
  0xdc   : > { %16316 = vmatpush3.bf16.msra.mxu1 %v19212_v7  ;;  %v1099_v7 = vrot.slane %v1097_v53, 1 }
  0xdd   : > { %15894 = vmatmul.mubr.bf16.gmra.mrb[4].mxu0 %v20387_v35  ;;  %16317 = vmatprep.subr.bf16.mxu1 %v20080_v0  ;;  %v1078_v35 = vrot.slane %v1076_v29, 1 }
  0xde   : > { %16290 = vmatmul.mubr.bf16.gmra.mrb[4].mxu1 %v20391_v36  ;;  %15897 = vmatprep.mubr.msk.bf16.mxu0 %vm20081_vm0, %v20080_v0  ;;  %v1083_v36 = vrot.slane %v1081_v30, 1  ;;  %v19246_v30 = vld [vmem:[%s23505_s1 + $0x128] sm:$0xff]  }
  0xdf   : > { %15922 = vmatpush3.bf16.msra.mxu0 %v19208_v8  ;;  %16293 = vmatprep.mubr.msk.bf16.mxu1 %vm20081_vm0, %v20080_v0  ;;  %v1079_v52 = vor.u32 %v1078_v35, %v1074_v34  ;;  %v19237_v8 = vld [vmem:[%s23505_s1 + $0x118] sm:$0xff]   ;;  %v19251_v34 = vld [vmem:[%s23505_s1 + $0x130] sm:$0xff]  }
  0xe0   : > { %15923 = vmatprep.subr.bf16.mxu0 %v20080_v0  ;;  %16318 = vmatpush3.bf16.msra.mxu1 %v19213_v9  ;;  %v1087_v62 = vor.u32 %v1085_v40, %v1083_v36  ;;  %v19238_v9 = vld [vmem:[%s20276_s19 + $0x20] sm:$0xff]   ;;  %v1115_v40 = vrot.slane %v1113_v32, 1  ;;  %v19279_v32 = vld [vmem:[%s23505_s1 + $0x1f0] sm:$0xff]  }
  0xe1   : > { %16319 = vmatprep.subr.bf16.mxu1 %v20080_v0  ;;  %v1084_v58 = vsel %vm1072_vm1, %v1079_v52, %v1083_v36  ;;  %v1105_v17 = vshll.u32 %v19238_v9, 16  ;;  %v1109_v29 = vshrl.u32 %v19238_v9, 16 }
  0xe3   : > { %15924 = vmatpush3.bf16.msra.mxu0 %v19209_v10 }
  0xe4   : > { %15925 = vmatprep.subr.bf16.mxu0 %v20080_v0  ;;  %16320 = vmatpush3.bf16.msra.mxu1 %v19215_v11  ;;  %v2982_v11 = vrot.slane %v2980_v63, 1 }
  0xe5   : > { %15898 = vmatmul.mubr.bf16.gmra.mrb[8].mxu0 %v20415_v41  ;;  %16321 = vmatprep.subr.bf16.mxu1 %v20080_v0  ;;  %v1091_v41 = vrot.slane %v1089_v33, 1 }
  0xe6   : > { %16294 = vmatmul.mubr.bf16.gmra.mrb[8].mxu1 %v20419_v42  ;;  %15901 = vmatprep.mubr.msk.bf16.mxu0 %vm20081_vm0, %v20080_v0  ;;  %v19216_v42 = vld [vmem:[%s20276_s19 + $0x48] sm:$0xff]  }
  0xe7   : > { %16297 = vmatprep.mubr.msk.bf16.mxu1 %vm20081_vm0, %v20080_v0  ;;  %15926 = vmatpush3.bf16.msra.mxu0 %v19211_v12  ;;  %v1092_v4 = vsel %vm1072_vm1, %v1087_v62, %v1091_v41  ;;  %v1095_v10 = vor.u32 %v1093_v51, %v1091_v41  ;;  %v1101_v12 = vshrl.u32 %v20681_v49, 16  ;;  %v19248_v41 = vld [vmem:[%s20276_s19 + $0x30] sm:$0xff]   ;;  %v19259_v49 = vld [vmem:[%s23505_s1 + $0x138] sm:$0xff]  }
  0xe8   : > { %15927 = vmatprep.subr.bf16.mxu0 %v20080_v0  ;;  %16322 = vmatpush3.bf16.msra.mxu1 %v19218_v13  ;;  %v19239_v13 = vld [vmem:[%s20276_s19 + $0x60] sm:$0xff]   ;;  %v1121_v52 = vshll.u32 %v19248_v41, 16 }
  0xe9   : > { %16323 = vmatprep.subr.bf16.mxu1 %v20080_v0  ;;  %v2988_v22 = vshll.u32 %v19239_v13, 16  ;;  %v1103_v24 = vor.u32 %v1101_v12, %v1099_v7  ;;  %v2992_v33 = vshrl.u32 %v19239_v13, 16  ;;  %v19261_v12 = vld [vmem:[%s23505_s1 + $0x1c8] sm:$0xff]   ;;  %v1009_v13 = vld [vmem:[%s20276_s19 + $0x3c] sm:$0xf] }
  0xea   : > { %v1123_v57 = vrot.slane %v1121_v52, 1 }
  0xeb   : > { %15928 = vmatpush3.bf16.msra.mxu0 %v19214_v14  ;;  %v19247_v14 = vld [vmem:[%s23505_s1 + $0x118] sm:$0xff]  }
  0xec   : > { %15929 = vmatprep.subr.bf16.mxu0 %v20080_v0  ;;  %16324 = vmatpush3.bf16.msra.mxu1 %v19220_v15 }
  0xed   : > { %15902 = vmatmul.mubr.bf16.gmra.mrb[12].mxu0 %v20430_v43  ;;  %16325 = vmatprep.subr.bf16.mxu1 %v20080_v0  ;;  %v19217_v43 = vld [vmem:[%s20276_s19 + $0x88] sm:$0xff]  }
  0xee   : > { %16298 = vmatmul.mubr.bf16.gmra.mrb[12].mxu1 %v20433_v44  ;;  %15905 = vmatprep.mubr.msk.bf16.mxu0 %vm20081_vm0, %v20080_v0  ;;  %v19233_v44 = vld [vmem:[%s20276_s19 + $0x50] sm:$0xff]  }
  0xef   : > { %16301 = vmatprep.mubr.msk.bf16.mxu1 %vm20081_vm0, %v20080_v0  ;;  %15930 = vmatpush3.bf16.msra.mxu0 %v19219_v19  ;;  %v2976_v54 = vshrl.u32 %v19233_v44, 16  ;;  %v20739_v19 = vsel %vm1072_vm1, %v1095_v10, %v1099_v7  ;;  %v19260_v10 = vld [vmem:[%s23505_s1 + $0x1c0] sm:$0xff]  }
  0xf0   : > { %15931 = vmatprep.subr.bf16.mxu0 %v20080_v0  ;;  %16326 = vmatpush3.bf16.msra.mxu1 %v19223_v21 }
  0xf1   : > { %16327 = vmatprep.subr.bf16.mxu1 %v20080_v0 }
  0xf3   : > { %15932 = vmatpush3.bf16.msra.mxu0 %v19224_v27  ;;  %v2986_v27 = vor.u32 %v2984_v16, %v2982_v11  ;;  %v19267_v16 = vld [vmem:[%s23505_s1 + $0x1d0] sm:$0xff]  }
  0xf4   : > { %16328 = vmatpush3.bf16.msra.mxu1 %v19225_v28  ;;  %15961 = vmatprep.subr.bf16.mxu0 %v20080_v0  ;;  %v2990_v28 = vrot.slane %v2988_v22, 1  ;;  %v19265_v22 = vld [vmem:[%s23505_s1 + $0x1e0] sm:$0xff]  }
  0xf5   : > { %15906 = vmatmul.mubr.bf16.gmra.mrb[16].mxu0 %v20442_v45  ;;  %16357 = vmatprep.subr.bf16.mxu1 %v20080_v0  ;;  %v2968_v45 = vshrl.u32 %v20640_v25, 16  ;;  %v1107_v25 = vrot.slane %v1105_v17, 1 }
  0xf6   : > { %16302 = vmatmul.mubr.bf16.gmra.mrb[16].mxu1 %v20445_v46  ;;  %15909 = vmatprep.mubr.msk.bf16.mxu0 %vm20081_vm0, %v20080_v0  ;;  %v2972_v46 = vshll.u32 %v19233_v44, 16  ;;  %v20772_v36 = vsel %vm1072_vm1, %v2986_v27, %v2990_v28  ;;  %v2998_v44 = vrot.slane %v2996_v37, 1  ;;  %v19274_v27 = vld [vmem:[%s23505_s1 + $0x1e8] sm:$0xff]  }
  0xf7   : > { %16305 = vmatprep.mubr.msk.bf16.mxu1 %vm20081_vm0, %v20080_v0  ;;  %v2970_v2 = vor.u32 %v2968_v45, %v2966_v39  ;;  %v20769_v35 = vsel %vm1072_vm1, %v1103_v24, %v1107_v25  ;;  %v1111_v39 = vor.u32 %v1109_v29, %v1107_v25  ;;  %v20788_v45 = vld [vmem:[%s20276_s19 + $0x38] sm:$0xf]  ;;  %v19270_v29 = vld [vmem:[%s20276_s19 + $0x40] sm:$0xff]  }
  0xf8   : > { %v2974_v50 = vrot.slane %v2972_v46, 1  ;;  %v19258_v46 = vld [vmem:[%s23505_s1 + $0x138] sm:$0xff]   ;;  %v20809_v55 = vcombine.low %v20788_v45, %v20788_v45  ;;  %v20877_v17 = vcombine.low %v20788_v45, %v1009_v13  ;;  %v1328_v37 = vshll.u32 %v19270_v29, 16 }
  0xf9   : > { %v20802_v51 = vsel %vm1072_vm1, %v1111_v39, %v1115_v40  ;;  %v19281_v39 = vld [vmem:[%s23505_s1 + $0x1f8] sm:$0xff]  }
  0xfa   : > { %v2975_v6 = vsel %vm1072_vm1, %v2970_v2, %v2974_v50  ;;  %v2978_v15 = vor.u32 %v2976_v54, %v2974_v50  ;;  %v20798_v50 = vld [vmem:[%s20276_s19 + $0x78] sm:$0xf]  ;;  %v1129_v62 = vshll.u32 %v20809_v55, 16 }
  0xfb   : > { %v19291_v13 = vld [vmem:[%s23505_s1 + $0x98] sm:$0xff]  }
  0xfc   : > { %v20745_v21 = vsel %vm1072_vm1, %v2978_v15, %v2982_v11  ;;  %v19264_v11 = vld [vmem:[%s23505_s1 + $0x1c0] sm:$0xff]   ;;  %v19262_v15 = vld [vmem:[%s23505_s1 + $0x1d0] sm:$0xff]  }
  0xfd   : > { %15910 = vmatmul.mubr.bf16.gmra.mrb[20].mxu0 %v19216_v42  ;;  %v19249_v42 = vld [vmem:[%s20276_s19 + $0x70] sm:$0xff]  }
  0xfe   : > { %16306 = vmatmul.mubr.bf16.gmra.mrb[20].mxu1 %v19217_v43  ;;  %15913 = vmatprep.mubr.msk.bf16.mxu0 %vm20081_vm0, %v20080_v0  ;;  %v2994_v43 = vor.u32 %v2992_v33, %v2990_v28  ;;  %v3004_v54 = vshll.u32 %v19249_v42, 16 }
  0xff   : > { %16309 = vmatprep.mubr.msk.bf16.mxu1 %vm20081_vm0, %v20080_v0 }
 0x100   : > { %v20805_v53 = vsel %vm1072_vm1, %v2994_v43, %v2998_v44 }
 0x105   : > { %15914 = vmatmul.mubr.bf16.gmra.mrb[24].mxu0 %v19221_v47  ;;  %v1117_v47 = vshrl.u32 %v19243_v23, 16  ;;  %v19272_v23 = vld [vmem:[%s23505_s1 + $0x1e0] sm:$0xff]  }
 0x106   : > { %16310 = vmatmul.mubr.bf16.gmra.mrb[24].mxu1 %v19222_v48  ;;  %15933 = vmatprep.mubr.msk.bf16.mxu0 %vm20081_vm0, %v20080_v0  ;;  %v3000_v48 = vshrl.u32 %v19244_v26, 16  ;;  %v19268_v26 = vld [vmem:[%s23505_s1 + $0x1e8] sm:$0xff]  }
 0x107   : > { %16329 = vmatprep.mubr.msk.bf16.mxu1 %vm20081_vm0, %v20080_v0 }
 0x10d   : > { %15934 = vmatmul.mubr.bf16.vlgmr.msra.gmra.mrb[0].mxu0 %v1084_v58  ;;  %v20819_v58 = vcombine.low %v20798_v50, %v20798_v50 }
 0x10e   : > { %16330 = vmatmul.mubr.bf16.vlgmr.msra.gmra.mrb[0].mxu1 %v2967_v60  ;;  %15962 = vmatpush3.bf16.msra.mxu0 %v19230_v56  ;;  %v1119_v56 = vor.u32 %v1117_v47, %v1115_v40  ;;  %v3006_v60 = vrot.slane %v3004_v54, 1  ;;  %v1330_v47 = vrot.slane %v1328_v37, 1 }
 0x10f   : > { %15937 = vmatprep.mubr.msk.bf16.mxu0 %vm20081_vm0, %v20080_v0  ;;  %15963 = vmatprep.subr.bf16.mxu0 %v20080_v0 }
 0x110   : > { %16333 = vmatprep.mubr.msk.bf16.mxu1 %vm20081_vm0, %v20080_v0  ;;  %16358 = vmatpush3.bf16.msra.mxu1 %v19240_v59  ;;  %v3002_v59 = vor.u32 %v3000_v48, %v2998_v44  ;;  %v20825_v63 = vsel %vm1072_vm1, %v1119_v56, %v1123_v57 }
 0x111   : > { %16359 = vmatprep.subr.bf16.mxu1 %v20080_v0 }
 0x112   : > { %15964 = vmatpush3.bf16.msra.mxu0 %v19232_v61  ;;  %v1125_v61 = vshrl.u32 %v19248_v41, 16  ;;  %v20829_v2 = vsel %vm1072_vm1, %v3002_v59, %v3006_v60 }
 0x113   : > { %15965 = vmatprep.subr.bf16.mxu0 %v20080_v0 }
 0x114   : > { %16360 = vmatpush3.bf16.msra.mxu1 %v19242_v1  ;;  %v3012_v1 = vshll.u32 %v20819_v58, 16 }
 0x115   : > { %15938 = vmatmul.mubr.bf16.gmra.mrb[4].mxu0 %v1092_v4  ;;  %16361 = vmatprep.subr.bf16.mxu1 %v20080_v0  ;;  %v20835_v4 = vor.u32 %v1125_v61, %v1123_v57 }
 0x116   : > { %16334 = vmatmul.mubr.bf16.gmra.mrb[4].mxu1 %v2975_v6  ;;  %15941 = vmatprep.mubr.msk.bf16.mxu0 %vm20081_vm0, %v20080_v0  ;;  %v3014_v6 = vrot.slane %v3012_v1, 1 }
 0x117   : > { %15966 = vmatpush3.bf16.msra.mxu0 %v19234_v3  ;;  %16337 = vmatprep.mubr.msk.bf16.mxu1 %vm20081_vm0, %v20080_v0  ;;  %v3008_v3 = vshrl.u32 %v19249_v42, 16 }
 0x118   : > { %15967 = vmatprep.subr.bf16.mxu0 %v20080_v0  ;;  %16362 = vmatpush3.bf16.msra.mxu1 %v19245_v5  ;;  %v1131_v5 = vrot.slane %v1129_v62, 1 }
 0x119   : > { %16363 = vmatprep.subr.bf16.mxu1 %v20080_v0  ;;  %v20839_v7 = vor.u32 %v3008_v3, %v3006_v60 }
 0x11b   : > { %15968 = vmatpush3.bf16.msra.mxu0 %v19237_v8  ;;  %v1132_v8 = vsel %vm1072_vm1, %v20835_v4, %v1131_v5  ;;  %v3015_v9 = vsel %vm1072_vm1, %v20839_v7, %v3014_v6  ;;  %v19282_v5 = vld [vmem:[%s23505_s1 + $0x80] sm:$0xff]  }
 0x11c   : > { %15969 = vmatprep.subr.bf16.mxu0 %v20080_v0  ;;  %16364 = vmatpush3.bf16.msra.mxu1 %v19247_v14  ;;  %v19266_v14 = vld [vmem:[%s23505_s1 + $0x1c8] sm:$0xff]   ;;  %v19286_v6 = vld [vmem:[%s23505_s1 + $0x80] sm:$0xff]  }
 0x11d   : > { %15942 = vmatmul.mubr.bf16.gmra.mrb[8].mxu0 %v20739_v19  ;;  %16365 = vmatprep.subr.bf16.mxu1 %v20080_v0 }
 0x11e   : > { %16338 = vmatmul.mubr.bf16.gmra.mrb[8].mxu1 %v20745_v21  ;;  %15945 = vmatprep.mubr.msk.bf16.mxu0 %vm20081_vm0, %v20080_v0 }
 0x11f   : > { %16341 = vmatprep.mubr.msk.bf16.mxu1 %vm20081_vm0, %v20080_v0  ;;  %15970 = vmatpush3.bf16.msra.mxu0 %v19241_v18  ;;  %v2894_v18 = vld [vmem:[%s20276_s19 + $0x7c] sm:$0xf] }
 0x120   : > { %15971 = vmatprep.subr.bf16.mxu0 %v20080_v0  ;;  %16366 = vmatpush3.bf16.msra.mxu1 %v19250_v20  ;;  %v19269_v20 = vld [vmem:[%s23505_s1 + $0x1d8] sm:$0xff]   ;;  %v20904_v24 = vcombine.low %v20798_v50, %v2894_v18 }
 0x121   : > { %16367 = vmatprep.subr.bf16.mxu1 %v20080_v0 }
 0x122   : > { %v3202_v28 = vshll.u32 %v20904_v24, 16  ;;  %v3206_v45 = vshrl.u32 %v20904_v24, 16 }
 0x123   : > { %15972 = vmatpush3.bf16.msra.mxu0 %v19246_v30  ;;  %v19271_v30 = vld [vmem:[%s20276_s19 + $0x80] sm:$0xff]  }
 0x124   : > { %15973 = vmatprep.subr.bf16.mxu0 %v20080_v0  ;;  %16368 = vmatpush3.bf16.msra.mxu1 %v19252_v31  ;;  %v19273_v31 = vld [vmem:[%s23505_s1 + $0x1f0] sm:$0xff]   ;;  %v3204_v33 = vrot.slane %v3202_v28, 1  ;;  %v3210_v40 = vshll.u32 %v19271_v30, 16  ;;  %v3214_v52 = vshrl.u32 %v19271_v30, 16 }
 0x125   : > { %15946 = vmatmul.mubr.bf16.gmra.mrb[12].mxu0 %v20769_v35  ;;  %16369 = vmatprep.subr.bf16.mxu1 %v20080_v0  ;;  %v19299_v28 = vld [vmem:[%s23505_s1 + $0xb0] sm:$0xff]  }
 0x126   : > { %16342 = vmatmul.mubr.bf16.gmra.mrb[12].mxu1 %v20772_v36  ;;  %15949 = vmatprep.mubr.msk.bf16.mxu0 %vm20081_vm0, %v20080_v0  ;;  %v20968_v44 = vsel %vm1072_vm1, %v20839_v7, %v3204_v33  ;;  %v3212_v48 = vrot.slane %v3210_v40, 1  ;;  %v3208_v56 = vor.u32 %v3206_v45, %v3204_v33  ;;  %v19283_v7 = vld [vmem:[%s23505_s1 + $0x88] sm:$0xff]  }
 0x127   : > { %16345 = vmatprep.mubr.msk.bf16.mxu1 %vm20081_vm0, %v20080_v0  ;;  %15974 = vmatpush3.bf16.msra.mxu0 %v19251_v34  ;;  %v20934_v34 = vld [vmem:[%s20276_s19 + $0x48] sm:$0xf] }
 0x128   : > { %15975 = vmatprep.subr.bf16.mxu0 %v20080_v0  ;;  %16370 = vmatpush3.bf16.msra.mxu1 %v19257_v38  ;;  %v19280_v38 = vld [vmem:[%s23505_s1 + $0x1f8] sm:$0xff]   ;;  %v20960_v42 = vcombine.low %v20934_v34, %v20934_v34  ;;  %v20985_v59 = vsel %vm1072_vm1, %v3208_v56, %v3212_v48  ;;  %v20995_v1 = vor.u32 %v3214_v52, %v3212_v48  ;;  %v19972_v48 = vld [vmem:[%s20276_s19 + $0x8] sm:$0xff]   ;;  %v1697_v56 = vld [vmem:[%s20276_s19] sm:$0xe] }
 0x129   : > { %16371 = vmatprep.subr.bf16.mxu1 %v20080_v0 }
 0x12a   : > { %v1336_v50 = vshll.u32 %v20960_v42, 16 }
 0x12b   : > { %15976 = vmatpush3.bf16.msra.mxu0 %v19258_v46 }
 0x12c   : > { %16372 = vmatpush3.bf16.msra.mxu1 %v19259_v49  ;;  %16005 = vmatprep.subr.bf16.mxu0 %v20080_v0  ;;  %v1332_v49 = vshrl.u32 %v19270_v29, 16  ;;  %v1338_v61 = vrot.slane %v1336_v50, 1 }
 0x12d   : > { %15950 = vmatmul.mubr.bf16.gmra.mrb[16].mxu0 %v20802_v51  ;;  %16401 = vmatprep.subr.bf16.mxu1 %v20080_v0 }
 0x12e   : > { %16346 = vmatmul.mubr.bf16.gmra.mrb[16].mxu1 %v20805_v53  ;;  %15953 = vmatprep.mubr.msk.bf16.mxu0 %vm20081_vm0, %v20080_v0  ;;  %v20991_v60 = vor.u32 %v1332_v49, %v1330_v47  ;;  %v1720_v49 = vrot.slane %v19972_v48, 1  ;;  %v19318_v48 = vld [vmem:[%s23505_s1 + $0x178] sm:$0xff]  }
 0x12f   : > { %16349 = vmatprep.mubr.msk.bf16.mxu1 %vm20081_vm0, %v20080_v0 }
 0x130   : > { %v1339_v3 = vsel %vm1072_vm1, %v20991_v60, %v1338_v61 }
 0x135   : > { %15954 = vmatmul.mubr.bf16.gmra.mrb[20].mxu0 %v20825_v63 }
 0x136   : > { %16350 = vmatmul.mubr.bf16.gmra.mrb[20].mxu1 %v20829_v2  ;;  %15957 = vmatprep.mubr.msk.bf16.mxu0 %vm20081_vm0, %v20080_v0 }
 0x137   : > { %16353 = vmatprep.mubr.msk.bf16.mxu1 %vm20081_vm0, %v20080_v0 }
 0x13d   : > { %15958 = vmatmul.mubr.bf16.gmra.mrb[24].mxu0 %v1132_v8  ;;  %v1013_v8 = vld [vmem:[%s20276_s19 + $0x4c] sm:$0xf] }
 0x13e   : > { %16354 = vmatmul.mubr.bf16.gmra.mrb[24].mxu1 %v3015_v9  ;;  %15977 = vmatprep.mubr.msk.bf16.mxu0 %vm20081_vm0, %v20080_v0  ;;  %v19288_v9 = vld [vmem:[%s23505_s1 + $0x88] sm:$0xff]  }
 0x13f   : > { %16373 = vmatprep.mubr.msk.bf16.mxu1 %vm20081_vm0, %v20080_v0 }
 0x145   : > { %15978 = vmatmul.mubr.bf16.vlgmr.msra.gmra.mrb[0].mxu0 %v20739_v19  ;;  %v19263_v19 = vld [vmem:[%s23505_s1 + $0x1d8] sm:$0xff]  }
 0x146   : > { %16374 = vmatmul.mubr.bf16.vlgmr.msra.gmra.mrb[0].mxu1 %v20745_v21  ;;  %16006 = vmatpush3.bf16.msra.mxu0 %v19260_v10  ;;  %v1320_v21 = vshll.u32 %v20877_v17, 16  ;;  %v19289_v10 = vld [vmem:[%s23505_s1 + $0x90] sm:$0xff]  }
 0x147   : > { %15981 = vmatprep.mubr.msk.bf16.mxu0 %vm20081_vm0, %v20080_v0  ;;  %16007 = vmatprep.subr.bf16.mxu0 %v20080_v0 }
 0x148   : > { %16377 = vmatprep.mubr.msk.bf16.mxu1 %vm20081_vm0, %v20080_v0  ;;  %16402 = vmatpush3.bf16.msra.mxu1 %v19264_v11  ;;  %v1322_v25 = vrot.slane %v1320_v21, 1  ;;  %v21034_v11 = vcombine.low %v20934_v34, %v1013_v8  ;;  %v19300_v34 = vld [vmem:[%s23505_s1 + $0xb8] sm:$0xff]   ;;  %v19975_v8 = vld [vmem:[%s20276_s19 + $0x48] sm:$0xff]  }
 0x149   : > { %16403 = vmatprep.subr.bf16.mxu1 %v20080_v0 }
 0x14a   : > { %16008 = vmatpush3.bf16.msra.mxu0 %v19261_v12  ;;  %v20956_v41 = vsel %vm1072_vm1, %v20835_v4, %v1322_v25  ;;  %v19285_v12 = vld [vmem:[%s23505_s1 + $0x98] sm:$0xff]   ;;  %v1527_v29 = vshrl.u32 %v21034_v11, 16 }
 0x14b   : > { %16009 = vmatprep.subr.bf16.mxu0 %v20080_v0 }
 0x14c   : > { %16404 = vmatpush3.bf16.msra.mxu1 %v19266_v14 }
 0x14d   : > { %15982 = vmatmul.mubr.bf16.gmra.mrb[4].mxu0 %v20769_v35  ;;  %16405 = vmatprep.subr.bf16.mxu1 %v20080_v0  ;;  %v20937_v35 = vld [vmem:[%s20276_s19 + $0x88] sm:$0xf] }
 0x14e   : > { %16378 = vmatmul.mubr.bf16.gmra.mrb[4].mxu1 %v20772_v36  ;;  %15985 = vmatprep.mubr.msk.bf16.mxu0 %vm20081_vm0, %v20080_v0  ;;  %v1324_v36 = vshrl.u32 %v20877_v17, 16  ;;  %v20964_v43 = vcombine.low %v20937_v35, %v20937_v35 }
 0x14f   : > { %16010 = vmatpush3.bf16.msra.mxu0 %v19262_v15  ;;  %16381 = vmatprep.mubr.msk.bf16.mxu1 %vm20081_vm0, %v20080_v0  ;;  %v19294_v15 = vld [vmem:[%s23505_s1 + $0xa0] sm:$0xff]  }
 0x150   : > { %16011 = vmatprep.subr.bf16.mxu0 %v20080_v0  ;;  %16406 = vmatpush3.bf16.msra.mxu1 %v19267_v16  ;;  %v1326_v46 = vor.u32 %v1324_v36, %v1322_v25  ;;  %v3218_v54 = vshll.u32 %v20964_v43, 16  ;;  %v19297_v25 = vld [vmem:[%s20276_s19 + $0x58] ss:$0 sps:$4 sm:$0x11]  }
 0x151   : > { %16407 = vmatprep.subr.bf16.mxu1 %v20080_v0  ;;  %v1539_v33 = vshll.u32 %v19297_v25, 16 }
 0x152   : > { %v20982_v57 = vsel %vm1072_vm1, %v1326_v46, %v1330_v47  ;;  %v3220_v62 = vrot.slane %v3218_v54, 1 }
 0x153   : > { %16012 = vmatpush3.bf16.msra.mxu0 %v19263_v19  ;;  %v19290_v19 = vld [vmem:[%s23505_s1 + $0xa8] sm:$0xff]   ;;  %v1541_v45 = vrot.slane %v1539_v33, 1 }
 0x154   : > { %16013 = vmatprep.subr.bf16.mxu0 %v20080_v0  ;;  %16408 = vmatpush3.bf16.msra.mxu1 %v19269_v20  ;;  %v3221_v4 = vsel %vm1072_vm1, %v20995_v1, %v3220_v62  ;;  %v19296_v20 = vld [vmem:[%s23505_s1 + $0xa8] sm:$0xff]   ;;  %v19973_v62 = vld [vmem:[%s20276_s19 + $0x4] sm:$0xf] }
 0x155   : > { %15986 = vmatmul.mubr.bf16.gmra.mrb[8].mxu0 %v20802_v51  ;;  %16409 = vmatprep.subr.bf16.mxu1 %v20080_v0 }
 0x156   : > { %16382 = vmatmul.mubr.bf16.gmra.mrb[8].mxu1 %v20805_v53  ;;  %15989 = vmatprep.mubr.msk.bf16.mxu0 %vm20081_vm0, %v20080_v0 }
 0x157   : > { %16385 = vmatprep.mubr.msk.bf16.mxu1 %vm20081_vm0, %v20080_v0  ;;  %16014 = vmatpush3.bf16.msra.mxu0 %v19265_v22  ;;  %v19292_v22 = vld [vmem:[%s20276_s19 + $0x50] sm:$0xff]  }
 0x158   : > { %16015 = vmatprep.subr.bf16.mxu0 %v20080_v0  ;;  %16410 = vmatpush3.bf16.msra.mxu1 %v19272_v23  ;;  %v19293_v23 = vld [vmem:[%s20276_s19 + $0x90] sm:$0xff]   ;;  %v1531_v30 = vshll.u32 %v19292_v22, 16 }
 0x159   : > { %16411 = vmatprep.subr.bf16.mxu1 %v20080_v0  ;;  %v3416_v46 = vshrl.u32 %v19293_v23, 16 }
 0x15b   : > { %16016 = vmatpush3.bf16.msra.mxu0 %v19268_v26  ;;  %v19295_v26 = vld [vmem:[%s23505_s1 + $0xb0] sm:$0xff]  }
 0x15c   : > { %16017 = vmatprep.subr.bf16.mxu0 %v20080_v0  ;;  %16412 = vmatpush3.bf16.msra.mxu1 %v19274_v27  ;;  %v19298_v27 = vld [vmem:[%s20276_s19 + $0x98] ss:$0 sps:$4 sm:$0x11]  }
 0x15d   : > { %15990 = vmatmul.mubr.bf16.gmra.mrb[12].mxu0 %v20825_v63  ;;  %16413 = vmatprep.subr.bf16.mxu1 %v20080_v0  ;;  %v3420_v36 = vshll.u32 %v19298_v27, 16  ;;  %v19313_v27 = vld [vmem:[%s23505_s1 + $0x158] sm:$0xff]  }
 0x15e   : > { %16386 = vmatmul.mubr.bf16.gmra.mrb[12].mxu1 %v20829_v2  ;;  %15993 = vmatprep.mubr.msk.bf16.mxu0 %vm20081_vm0, %v20080_v0 }
 0x15f   : > { %16389 = vmatprep.mubr.msk.bf16.mxu1 %vm20081_vm0, %v20080_v0  ;;  %16018 = vmatpush3.bf16.msra.mxu0 %v19273_v31  ;;  %v3422_v47 = vrot.slane %v3420_v36, 1  ;;  %v19312_v36 = vld [vmem:[%s23505_s1 + $0x168] sm:$0xff]  }
 0x160   : > { %16019 = vmatprep.subr.bf16.mxu0 %v20080_v0  ;;  %16414 = vmatpush3.bf16.msra.mxu1 %v19279_v32  ;;  %v3412_v32 = vshll.u32 %v19293_v23, 16  ;;  %v19978_v23 = vld [vmem:[%s20276_s19 + $0x18] sm:$0xff]  }
 0x161   : > { %16415 = vmatprep.subr.bf16.mxu1 %v20080_v0  ;;  %v1724_v25 = vrot.slane %v19978_v23, 1 }
 0x163   : > { %16020 = vmatpush3.bf16.msra.mxu0 %v19280_v38 }
 0x164   : > { %16416 = vmatpush3.bf16.msra.mxu1 %v19281_v39  ;;  %16049 = vmatprep.subr.bf16.mxu0 %v20080_v0  ;;  %v1533_v39 = vrot.slane %v1531_v30, 1  ;;  %v19309_v30 = vld [vmem:[%s23505_s1 + $0x160] sm:$0xff]  }
 0x165   : > { %15994 = vmatmul.mubr.bf16.gmra.mrb[16].mxu0 %v20956_v41  ;;  %16445 = vmatprep.subr.bf16.mxu1 %v20080_v0 }
 0x166   : > { %16390 = vmatmul.mubr.bf16.gmra.mrb[16].mxu1 %v20968_v44  ;;  %15997 = vmatprep.mubr.msk.bf16.mxu0 %vm20081_vm0, %v20080_v0 }
 0x167   : > { %16393 = vmatprep.mubr.msk.bf16.mxu1 %vm20081_vm0, %v20080_v0 }
 0x16d   : > { %15998 = vmatmul.mubr.bf16.gmra.mrb[20].mxu0 %v20982_v57 }
 0x16e   : > { %16394 = vmatmul.mubr.bf16.gmra.mrb[20].mxu1 %v20985_v59  ;;  %16001 = vmatprep.mubr.msk.bf16.mxu0 %vm20081_vm0, %v20080_v0 }
 0x16f   : > { %16397 = vmatprep.mubr.msk.bf16.mxu1 %vm20081_vm0, %v20080_v0 }
 0x175   : > { %16002 = vmatmul.mubr.bf16.gmra.mrb[24].mxu0 %v1339_v3  ;;  %v19974_v3 = vld [vmem:[%s20276_s19 + $0x44] sm:$0xf] }
 0x176   : > { %16398 = vmatmul.mubr.bf16.gmra.mrb[24].mxu1 %v3221_v4  ;;  %16021 = vmatprep.mubr.msk.bf16.mxu0 %vm20081_vm0, %v20080_v0 }
 0x177   : > { %16417 = vmatprep.mubr.msk.bf16.mxu1 %vm20081_vm0, %v20080_v0 }
 0x17d   : > { %16022 = vmatmul.mubr.bf16.vlgmr.msra.gmra.mrb[0].mxu0 %v20802_v51  ;;  %v19284_v51 = vld [vmem:[%s23505_s1 + $0x90] sm:$0xff]  }
 0x17e   : > { %16418 = vmatmul.mubr.bf16.vlgmr.msra.gmra.mrb[0].mxu1 %v20805_v53  ;;  %16050 = vmatpush3.bf16.msra.mxu0 %v19282_v5  ;;  %v2898_v53 = vld [vmem:[%s20276_s19 + $0x8c] sm:$0xf] }
 0x17f   : > { %16025 = vmatprep.mubr.msk.bf16.mxu0 %vm20081_vm0, %v20080_v0  ;;  %16051 = vmatprep.subr.bf16.mxu0 %v20080_v0  ;;  %v21049_v14 = vcombine.low %v20937_v35, %v2898_v53  ;;  %v19301_v35 = vld [vmem:[%s23505_s1 + $0xb8] sm:$0xff]  }
 0x180   : > { %16421 = vmatprep.mubr.msk.bf16.mxu1 %vm20081_vm0, %v20080_v0  ;;  %16446 = vmatpush3.bf16.msra.mxu1 %v19286_v6 }
 0x181   : > { %16447 = vmatprep.subr.bf16.mxu1 %v20080_v0  ;;  %v3404_v16 = vshll.u32 %v21049_v14, 16  ;;  %v3408_v31 = vshrl.u32 %v21049_v14, 16 }
 0x182   : > { %16052 = vmatpush3.bf16.msra.mxu0 %v19283_v7 }
 0x183   : > { %16053 = vmatprep.subr.bf16.mxu0 %v20080_v0  ;;  %v3406_v21 = vrot.slane %v3404_v16, 1 }
 0x184   : > { %16448 = vmatpush3.bf16.msra.mxu1 %v19288_v9  ;;  %v3599_v9 = vrot.slane %v19975_v8, 1  ;;  %v19326_v8 = vld [vmem:[%s23505_s1 + $0x208] sm:$0xff]  }
 0x185   : > { %16026 = vmatmul.mubr.bf16.gmra.mrb[4].mxu0 %v20825_v63  ;;  %16449 = vmatprep.subr.bf16.mxu1 %v20080_v0  ;;  %v1523_v63 = vshll.u32 %v21034_v11, 16  ;;  %v3407_v38 = vsel %vm1072_vm1, %v20995_v1, %v3406_v21  ;;  %v3410_v50 = vor.u32 %v3408_v31, %v3406_v21  ;;  %v13665_v1 = vcombine.low %v1697_v56, %v19973_v62  ;;  %v19311_v21 = vld [vmem:[%s23505_s1 + $0x150] sm:$0xff]  }
 0x186   : > { %16422 = vmatmul.mubr.bf16.gmra.mrb[4].mxu1 %v20829_v2  ;;  %16029 = vmatprep.mubr.msk.bf16.mxu0 %vm20081_vm0, %v20080_v0  ;;  %v19287_v2 = vld [vmem:[%s23505_s1 + $0xa0] sm:$0xff]  }
 0x187   : > { %16054 = vmatpush3.bf16.msra.mxu0 %v19284_v51  ;;  %16425 = vmatprep.mubr.msk.bf16.mxu1 %vm20081_vm0, %v20080_v0  ;;  %v1525_v18 = vrot.slane %v1523_v63, 1  ;;  %v1719_v6 = vrot.slane %v13665_v1, 1  ;;  %v19976_v51 = vld [vmem:[%s20276_s19 + $0x10] sm:$0xff]  }
 0x188   : > { %16055 = vmatprep.subr.bf16.mxu0 %v20080_v0  ;;  %16450 = vmatpush3.bf16.msra.mxu1 %v19289_v10  ;;  %v1722_v53 = vrot.slane %v19976_v51, 1  ;;  %v19304_v10 = vld [vmem:[%s23505_s1 + $0x140] sm:$0xff]   ;;  %v19327_v51 = vld [vmem:[%s23505_s1 + $0x210] sm:$0xff]  }
 0x189   : > { %16451 = vmatprep.subr.bf16.mxu1 %v20080_v0  ;;  %v1526_v37 = vsel %vm1072_vm1, %v20991_v60, %v1525_v18  ;;  %v1529_v40 = vor.u32 %v1527_v29, %v1525_v18  ;;  %v19310_v18 = vld [vmem:[%s23505_s1 + $0x148] sm:$0xff]  }
 0x18a   : > { %v21185_v31 = vsel %vm1718_vm2, %v1722_v53, %v1724_v25 }
 0x18b   : > { %16056 = vmatpush3.bf16.msra.mxu0 %v19285_v12  ;;  %v1534_v52 = vsel %vm1072_vm1, %v1529_v40, %v1533_v39  ;;  %v1721_v12 = vsel %vm1718_vm2, %v1719_v6, %v1720_v49  ;;  %v19315_v40 = vld [vmem:[%s23505_s1 + $0x170] sm:$0xff]  }
 0x18c   : > { %16057 = vmatprep.subr.bf16.mxu0 %v20080_v0  ;;  %16452 = vmatpush3.bf16.msra.mxu1 %v19291_v13  ;;  %v19308_v13 = vld [vmem:[%s23505_s1 + $0x140] sm:$0xff]  }
 0x18d   : > { %16030 = vmatmul.mubr.bf16.gmra.mrb[8].mxu0 %v20956_v41  ;;  %16453 = vmatprep.subr.bf16.mxu1 %v20080_v0  ;;  %v3414_v41 = vrot.slane %v3412_v32, 1  ;;  %v19314_v32 = vld [vmem:[%s23505_s1 + $0x160] sm:$0xff]  }
 0x18e   : > { %16426 = vmatmul.mubr.bf16.gmra.mrb[8].mxu1 %v20968_v44  ;;  %16033 = vmatprep.mubr.msk.bf16.mxu0 %vm20081_vm0, %v20080_v0  ;;  %v1535_v44 = vshrl.u32 %v19292_v22, 16 }
 0x18f   : > { %16429 = vmatprep.mubr.msk.bf16.mxu1 %vm20081_vm0, %v20080_v0  ;;  %16058 = vmatpush3.bf16.msra.mxu0 %v19287_v2  ;;  %v3415_v54 = vsel %vm1072_vm1, %v3410_v50, %v3414_v41  ;;  %v3418_v60 = vor.u32 %v3416_v46, %v3414_v41  ;;  %v19305_v2 = vld [vmem:[%s23505_s1 + $0x148] sm:$0xff]  }
 0x190   : > { %16059 = vmatprep.subr.bf16.mxu0 %v20080_v0  ;;  %16454 = vmatpush3.bf16.msra.mxu1 %v19294_v15  ;;  %v19977_v15 = vld [vmem:[%s20276_s19 + $0x50] sm:$0xff]   ;;  %v19982_v46 = vld [vmem:[%s20276_s19 + $0x28] sm:$0xff]  }
 0x191   : > { %16455 = vmatprep.subr.bf16.mxu1 %v20080_v0  ;;  %v3423_v5 = vsel %vm1072_vm1, %v3418_v60, %v3422_v47  ;;  %v3601_v16 = vrot.slane %v19977_v15, 1  ;;  %v1728_v47 = vrot.slane %v19982_v46, 1  ;;  %v19983_v50 = vld [vmem:[%s20276_s19 + $0x68] sm:$0xff]   ;;  %v19985_v60 = vld [vmem:[%s20276_s19 + $0x70] sm:$0xff]  }
 0x192   : > { %v19331_v15 = vld [vmem:[%s23505_s1 + $0x230] sm:$0xff]  }
 0x193   : > { %16060 = vmatpush3.bf16.msra.mxu0 %v19290_v19  ;;  %v19306_v19 = vld [vmem:[%s23505_s1 + $0x150] sm:$0xff]   ;;  %v3602_v22 = vsel %vm1718_vm2, %v3599_v9, %v3601_v16 }
 0x194   : > { %16061 = vmatprep.subr.bf16.mxu0 %v20080_v0  ;;  %16456 = vmatpush3.bf16.msra.mxu1 %v19296_v20  ;;  %v1723_v20 = vsel %vm1718_vm2, %v1720_v49, %v1722_v53  ;;  %v19319_v49 = vld [vmem:[%s23505_s1 + $0x178] sm:$0xff]   ;;  %v19349_v46 = vld [vmem:[%s23505_s1 + $0xf0] sm:$0xff]  }
 0x195   : > { %16034 = vmatmul.mubr.bf16.gmra.mrb[12].mxu0 %v20982_v57  ;;  %16457 = vmatprep.subr.bf16.mxu1 %v20080_v0  ;;  %v1537_v57 = vor.u32 %v1535_v44, %v1533_v39  ;;  %v19317_v44 = vld [vmem:[%s23505_s1 + $0x170] sm:$0xff]   ;;  %v19323_v53 = vld [vmem:[%s23505_s1 + $0x218] sm:$0xff]  }
 0x196   : > { %16430 = vmatmul.mubr.bf16.gmra.mrb[12].mxu1 %v20985_v59  ;;  %16037 = vmatprep.mubr.msk.bf16.mxu0 %vm20081_vm0, %v20080_v0  ;;  %v3578_v59 = vld [vmem:[%s20276_s19 + $0x40] sm:$0xe] }
 0x197   : > { %16433 = vmatprep.mubr.msk.bf16.mxu1 %vm20081_vm0, %v20080_v0  ;;  %16062 = vmatpush3.bf16.msra.mxu0 %v19295_v26  ;;  %v1542_v61 = vsel %vm1072_vm1, %v1537_v57, %v1541_v45  ;;  %v13892_v4 = vcombine.low %v3578_v59, %v19974_v3  ;;  %v19307_v26 = vld [vmem:[%s23505_s1 + $0x158] sm:$0xff]   ;;  %v19984_v57 = vld [vmem:[%s20276_s19 + $0x30] sm:$0xff]   ;;  %v1732_v3 = vrot.slane %v20809_v55, 1  ;;  %v19320_v55 = vld [vmem:[%s23505_s1 + $0x200] sm:$0xff]  }
 0x198   : > { %16063 = vmatprep.subr.bf16.mxu0 %v20080_v0  ;;  %16458 = vmatpush3.bf16.msra.mxu1 %v19299_v28  ;;  %v19979_v28 = vld [vmem:[%s20276_s19 + $0x58] sm:$0xff]   ;;  %v21254_v59 = vrot.slane %v19984_v57, 1 }
 0x199   : > { %16459 = vmatprep.subr.bf16.mxu1 %v20080_v0  ;;  %v3598_v7 = vrot.slane %v13892_v4, 1  ;;  %v3603_v29 = vrot.slane %v19979_v28, 1  ;;  %v3611_v4 = vrot.slane %v20819_v58, 1  ;;  %v19324_v58 = vld [vmem:[%s23505_s1 + $0x200] sm:$0xff]  }
 0x19a   : > { %v21263_v62 = vsel %vm1718_vm2, %v1728_v47, %v21254_v59 }
 0x19b   : > { %16064 = vmatpush3.bf16.msra.mxu0 %v19300_v34  ;;  %v3600_v63 = vsel %vm1718_vm2, %v3598_v7, %v3599_v9  ;;  %v21191_v33 = vsel %vm1718_vm2, %v3601_v16, %v3603_v29  ;;  %v19980_v34 = vld [vmem:[%s20276_s19 + $0x20] sm:$0xff]   ;;  %v19321_v7 = vld [vmem:[%s23505_s1 + $0x208] sm:$0xff]   ;;  %v19322_v9 = vld [vmem:[%s23505_s1 + $0x210] sm:$0xff]  }
 0x19c   : > { %16460 = vmatpush3.bf16.msra.mxu1 %v19301_v35  ;;  %16093 = vmatprep.subr.bf16.mxu0 %v20080_v0  ;;  %v1726_v35 = vrot.slane %v19980_v34, 1  ;;  %v19333_v16 = vld [vmem:[%s23505_s1 + $0x230] sm:$0xff]   ;;  %v19342_v34 = vld [vmem:[%s23505_s1 + $0xc8] sm:$0xff]  }
 0x19d   : > { %16038 = vmatmul.mubr.bf16.gmra.mrb[16].mxu0 %v1526_v37  ;;  %16489 = vmatprep.subr.bf16.mxu1 %v20080_v0  ;;  %v19316_v37 = vld [vmem:[%s23505_s1 + $0x168] sm:$0xff]  }
 0x19e   : > { %16434 = vmatmul.mubr.bf16.gmra.mrb[16].mxu1 %v3407_v38  ;;  %16041 = vmatprep.mubr.msk.bf16.mxu0 %vm20081_vm0, %v20080_v0  ;;  %v19981_v38 = vld [vmem:[%s20276_s19 + $0x60] sm:$0xff]   ;;  %v21215_v41 = vsel %vm1718_vm2, %v1724_v25, %v1726_v35 }
 0x19f   : > { %16437 = vmatprep.mubr.msk.bf16.mxu1 %vm20081_vm0, %v20080_v0  ;;  %v3605_v39 = vrot.slane %v19981_v38, 1  ;;  %v19987_v25 = vld [vmem:[%s20276_s19 + $0x80] sm:$0xff]   ;;  %v19345_v38 = vld [vmem:[%s23505_s1 + $0xd8] sm:$0xff]  }
 0x1a1   : > { %v21221_v45 = vsel %vm1718_vm2, %v3603_v29, %v3605_v39  ;;  %v1913_v29 = vrot.slane %v20960_v42, 1  ;;  %v19336_v42 = vld [vmem:[%s23505_s1 + $0xc0] sm:$0xff]  }
 0x1a5   : > { %16042 = vmatmul.mubr.bf16.gmra.mrb[20].mxu0 %v1534_v52  ;;  %v3607_v52 = vrot.slane %v19983_v50, 1  ;;  %v3963_v50 = vrot.slane %v21049_v14, 1  ;;  %v19988_v14 = vld [vmem:[%s20276_s19 + $0x50] sm:$0xff]  }
 0x1a6   : > { %16438 = vmatmul.mubr.bf16.gmra.mrb[20].mxu1 %v3415_v54  ;;  %16045 = vmatprep.mubr.msk.bf16.mxu0 %vm20081_vm0, %v20080_v0  ;;  %v21242_v54 = vsel %vm1718_vm2, %v1726_v35, %v1728_v47  ;;  %v19338_v35 = vld [vmem:[%s23505_s1 + $0xd0] sm:$0xff]   ;;  %v2086_v47 = vrot.slane %v21034_v11, 1 }
 0x1a7   : > { %16441 = vmatprep.mubr.msk.bf16.mxu1 %vm20081_vm0, %v20080_v0  ;;  %v21245_v56 = vsel %vm1718_vm2, %v3605_v39, %v3607_v52  ;;  %v19341_v39 = vld [vmem:[%s23505_s1 + $0xe0] sm:$0xff]  }
 0x1ad   : > { %16046 = vmatmul.mubr.bf16.gmra.mrb[24].mxu0 %v1542_v61  ;;  %v21259_v61 = vrot.slane %v19985_v60, 1 }
 0x1ae   : > { %16442 = vmatmul.mubr.bf16.gmra.mrb[24].mxu1 %v3423_v5  ;;  %16065 = vmatprep.mubr.msk.bf16.mxu0 %vm20081_vm0, %v20080_v0  ;;  %v1733_v5 = vsel %vm1718_vm2, %v21254_v59, %v1732_v3 }
 0x1af   : > { %16461 = vmatprep.mubr.msk.bf16.mxu1 %vm20081_vm0, %v20080_v0  ;;  %v21267_v1 = vsel %vm1718_vm2, %v3607_v52, %v21259_v61  ;;  %v3612_v6 = vsel %vm1718_vm2, %v21259_v61, %v3611_v4 }
 0x1b5   : > { %16066 = vmatmul.mubr.bf16.vlgmr.msra.gmra.mrb[0].mxu0 %v1721_v12  ;;  %v19325_v12 = vld [vmem:[%s23505_s1 + $0x220] sm:$0xff]  }
 0x1b6   : > { %16462 = vmatmul.mubr.bf16.vlgmr.msra.gmra.mrb[0].mxu1 %v3600_v63  ;;  %16094 = vmatpush3.bf16.msra.mxu0 %v19304_v10  ;;  %v19329_v10 = vld [vmem:[%s23505_s1 + $0x218] sm:$0xff]   ;;  %v19328_v63 = vld [vmem:[%s23505_s1 + $0x228] sm:$0xff]  }
 0x1b7   : > { %16069 = vmatprep.mubr.msk.bf16.mxu0 %vm20081_vm0, %v20080_v0  ;;  %16095 = vmatprep.subr.bf16.mxu0 %v20080_v0 }
 0x1b8   : > { %16465 = vmatprep.mubr.msk.bf16.mxu1 %vm20081_vm0, %v20080_v0  ;;  %16490 = vmatpush3.bf16.msra.mxu1 %v19308_v13  ;;  %v19330_v13 = vld [vmem:[%s23505_s1 + $0x220] sm:$0xff]  }
 0x1b9   : > { %16491 = vmatprep.subr.bf16.mxu1 %v20080_v0 }
 0x1ba   : > { %16096 = vmatpush3.bf16.msra.mxu0 %v19305_v2  ;;  %v19332_v2 = vld [vmem:[%s23505_s1 + $0x228] sm:$0xff]  }
 0x1bb   : > { %16097 = vmatprep.subr.bf16.mxu0 %v20080_v0 }
 0x1bc   : > { %16492 = vmatpush3.bf16.msra.mxu1 %v19310_v18  ;;  %v1909_v18 = vrot.slane %v20877_v17, 1 }
 0x1bd   : > { %16070 = vmatmul.mubr.bf16.gmra.mrb[4].mxu0 %v1723_v20  ;;  %16493 = vmatprep.subr.bf16.mxu1 %v20080_v0  ;;  %v3787_v20 = vrot.slane %v20904_v24, 1  ;;  %v19986_v24 = vld [vmem:[%s20276_s19 + $0x40] sm:$0xff]  }
 0x1be   : > { %16466 = vmatmul.mubr.bf16.gmra.mrb[4].mxu1 %v3602_v22  ;;  %16073 = vmatprep.mubr.msk.bf16.mxu0 %vm20081_vm0, %v20080_v0  ;;  %v1910_v17 = vsel %vm1718_vm2, %v21254_v59, %v1909_v18  ;;  %v21382_v23 = vrot.slane %v19986_v24, 1  ;;  %v19379_v24 = vld [vmem:[%s23505_s1 + $0x30] sm:$0xff]  }
 0x1bf   : > { %16098 = vmatpush3.bf16.msra.mxu0 %v19306_v19  ;;  %16469 = vmatprep.mubr.msk.bf16.mxu1 %vm20081_vm0, %v20080_v0  ;;  %v19334_v19 = vld [vmem:[%s23505_s1 + $0x238] sm:$0xff]   ;;  %v3788_v22 = vsel %vm1718_vm2, %v21259_v61, %v3787_v20 }
 0x1c0   : > { %16099 = vmatprep.subr.bf16.mxu0 %v20080_v0  ;;  %16494 = vmatpush3.bf16.msra.mxu1 %v19311_v21  ;;  %v19335_v21 = vld [vmem:[%s23505_s1 + $0x238] sm:$0xff]   ;;  %v2087_v11 = vsel %vm1718_vm2, %v21382_v23, %v2086_v47 }
 0x1c1   : > { %16495 = vmatprep.subr.bf16.mxu1 %v20080_v0  ;;  %v19990_v61 = vld [vmem:[%s20276_s19 + $0x58] ss:$0 sps:$4 sm:$0x11]  }
 0x1c3   : > { %16100 = vmatpush3.bf16.msra.mxu0 %v19307_v26  ;;  %v21387_v26 = vrot.slane %v19987_v25, 1  ;;  %v19381_v25 = vld [vmem:[%s23505_s1 + $0x38] sm:$0xff]  }
 0x1c4   : > { %16101 = vmatprep.subr.bf16.mxu0 %v20080_v0  ;;  %16496 = vmatpush3.bf16.msra.mxu1 %v19313_v27  ;;  %v1912_v27 = vsel %vm1718_vm2, %v1909_v18, %v21382_v23  ;;  %v19374_v18 = vld [vmem:[%s23505_s1 + $0x20] sm:$0xff]  }
 0x1c5   : > { %16074 = vmatmul.mubr.bf16.gmra.mrb[8].mxu0 %v21185_v31  ;;  %16497 = vmatprep.subr.bf16.mxu1 %v20080_v0  ;;  %v21393_v28 = vsel %vm1718_vm2, %v3787_v20, %v21387_v26  ;;  %v3964_v52 = vsel %vm1718_vm2, %v21387_v26, %v3963_v50  ;;  %v19376_v20 = vld [vmem:[%s23505_s1 + $0x28] sm:$0xff]  }
 0x1c6   : > { %16470 = vmatmul.mubr.bf16.gmra.mrb[8].mxu1 %v21191_v33  ;;  %16077 = vmatprep.mubr.msk.bf16.mxu0 %vm20081_vm0, %v20080_v0 }
 0x1c7   : > { %16473 = vmatprep.mubr.msk.bf16.mxu1 %vm20081_vm0, %v20080_v0  ;;  %16102 = vmatpush3.bf16.msra.mxu0 %v19309_v30  ;;  %v3791_v30 = vrot.slane %v20964_v43, 1  ;;  %v19340_v43 = vld [vmem:[%s23505_s1 + $0xc0] sm:$0xff]  }
 0x1c8   : > { %16103 = vmatprep.subr.bf16.mxu0 %v20080_v0  ;;  %16498 = vmatpush3.bf16.msra.mxu1 %v19314_v32 }
 0x1c9   : > { %16499 = vmatprep.subr.bf16.mxu1 %v20080_v0  ;;  %v3792_v32 = vsel %vm1718_vm2, %v21387_v26, %v3791_v30  ;;  %v21631_v26 = vld [vmem:[%s20276_s19 + $0xb0] sm:$0xff]   ;;  %v21658_v30 = vld [vmem:[%s20276_s19 + $0xc0] sm:$0xff]  }
 0x1cb   : > { %16104 = vmatpush3.bf16.msra.mxu0 %v19312_v36  ;;  %v19343_v36 = vld [vmem:[%s23505_s1 + $0xd0] sm:$0xff]  }
 0x1cc   : > { %16105 = vmatprep.subr.bf16.mxu0 %v20080_v0  ;;  %16500 = vmatpush3.bf16.msra.mxu1 %v19316_v37  ;;  %v19339_v37 = vld [vmem:[%s23505_s1 + $0xd8] sm:$0xff]  }
 0x1cd   : > { %16078 = vmatmul.mubr.bf16.gmra.mrb[12].mxu0 %v21215_v41  ;;  %16501 = vmatprep.subr.bf16.mxu1 %v20080_v0 }
 0x1ce   : > { %16474 = vmatmul.mubr.bf16.gmra.mrb[12].mxu1 %v21221_v45  ;;  %16081 = vmatprep.mubr.msk.bf16.mxu0 %vm20081_vm0, %v20080_v0 }
 0x1cf   : > { %16477 = vmatprep.mubr.msk.bf16.mxu1 %vm20081_vm0, %v20080_v0  ;;  %16106 = vmatpush3.bf16.msra.mxu0 %v19315_v40  ;;  %v19346_v40 = vld [vmem:[%s23505_s1 + $0xe0] sm:$0xff]  }
 0x1d0   : > { %16107 = vmatprep.subr.bf16.mxu0 %v20080_v0  ;;  %16502 = vmatpush3.bf16.msra.mxu1 %v19317_v44  ;;  %v19348_v44 = vld [vmem:[%s23505_s1 + $0xe8] sm:$0xff]  }
 0x1d1   : > { %16503 = vmatprep.subr.bf16.mxu1 %v20080_v0 }
 0x1d3   : > { %16108 = vmatpush3.bf16.msra.mxu0 %v19318_v48  ;;  %v19350_v48 = vld [vmem:[%s23505_s1 + $0xf8] sm:$0xff]  }
 0x1d4   : > { %16504 = vmatpush3.bf16.msra.mxu1 %v19319_v49  ;;  %16137 = vmatprep.subr.bf16.mxu0 %v20080_v0  ;;  %v19351_v49 = vld [vmem:[%s23505_s1 + $0xf8] sm:$0xff]  }
 0x1d5   : > { %16082 = vmatmul.mubr.bf16.gmra.mrb[16].mxu0 %v21242_v54  ;;  %16533 = vmatprep.subr.bf16.mxu1 %v20080_v0 }
 0x1d6   : > { %16478 = vmatmul.mubr.bf16.gmra.mrb[16].mxu1 %v21245_v56  ;;  %16085 = vmatprep.mubr.msk.bf16.mxu0 %vm20081_vm0, %v20080_v0 }
 0x1d7   : > { %16481 = vmatprep.mubr.msk.bf16.mxu1 %vm20081_vm0, %v20080_v0 }
 0x1dd   : > { %16086 = vmatmul.mubr.bf16.gmra.mrb[20].mxu0 %v21263_v62 }
 0x1de   : > { %16482 = vmatmul.mubr.bf16.gmra.mrb[20].mxu1 %v21267_v1  ;;  %16089 = vmatprep.mubr.msk.bf16.mxu0 %vm20081_vm0, %v20080_v0 }
 0x1df   : > { %16485 = vmatprep.mubr.msk.bf16.mxu1 %vm20081_vm0, %v20080_v0 }
 0x1e5   : > { %16090 = vmatmul.mubr.bf16.gmra.mrb[24].mxu0 %v1733_v5 }
 0x1e6   : > { %16486 = vmatmul.mubr.bf16.gmra.mrb[24].mxu1 %v3612_v6  ;;  %16109 = vmatprep.mubr.msk.bf16.mxu0 %vm20081_vm0, %v20080_v0  ;;  %v21522_v6 = vld [vmem:[%s20276_s19 + $0x90] sm:$0xff]  }
 0x1e7   : > { %16505 = vmatprep.mubr.msk.bf16.mxu1 %vm20081_vm0, %v20080_v0 }
 0x1ed   : > { %16110 = vmatmul.mubr.bf16.vlgmr.msra.gmra.mrb[0].mxu0 %v21185_v31  ;;  %v1914_v31 = vsel %vm1718_vm2, %v21382_v23, %v1913_v29  ;;  %v19380_v23 = vld [vmem:[%s23505_s1 + $0x38] sm:$0xff]  }
 0x1ee   : > { %16506 = vmatmul.mubr.bf16.vlgmr.msra.gmra.mrb[0].mxu1 %v21191_v33  ;;  %16138 = vmatpush3.bf16.msra.mxu0 %v19320_v55  ;;  %v19337_v33 = vld [vmem:[%s23505_s1 + $0xc8] sm:$0xff]   ;;  %v21525_v55 = vld [vmem:[%s20276_s19 + $0xd0] sm:$0xff]   ;;  %v21649_v29 = vld [vmem:[%s20276_s19 + $0xf8] sm:$0xff]  }
 0x1ef   : > { %16113 = vmatprep.mubr.msk.bf16.mxu0 %vm20081_vm0, %v20080_v0  ;;  %16139 = vmatprep.subr.bf16.mxu0 %v20080_v0 }
 0x1f0   : > { %16509 = vmatprep.mubr.msk.bf16.mxu1 %vm20081_vm0, %v20080_v0  ;;  %16534 = vmatpush3.bf16.msra.mxu1 %v19324_v58  ;;  %v19354_v58 = vld [vmem:[%s23505_s1] sm:$0xff]  }
 0x1f1   : > { %16535 = vmatprep.subr.bf16.mxu1 %v20080_v0 }
 0x1f2   : > { %16140 = vmatpush3.bf16.msra.mxu0 %v19321_v7  ;;  %v19364_v7 = vld [vmem:[%s23505_s1] sm:$0xff]  }
 0x1f3   : > { %16141 = vmatprep.subr.bf16.mxu0 %v20080_v0 }
 0x1f4   : > { %16536 = vmatpush3.bf16.msra.mxu1 %v19326_v8  ;;  %v19356_v8 = vld [vmem:[%s23505_s1 + $0x8] sm:$0xff]  }
 0x1f5   : > { %16114 = vmatmul.mubr.bf16.gmra.mrb[4].mxu0 %v21215_v41  ;;  %16537 = vmatprep.subr.bf16.mxu1 %v20080_v0  ;;  %v19344_v41 = vld [vmem:[%s23505_s1 + $0xe8] sm:$0xff]  }
 0x1f6   : > { %16510 = vmatmul.mubr.bf16.gmra.mrb[4].mxu1 %v21221_v45  ;;  %16117 = vmatprep.mubr.msk.bf16.mxu0 %vm20081_vm0, %v20080_v0  ;;  %v19347_v45 = vld [vmem:[%s23505_s1 + $0xf0] sm:$0xff]  }
 0x1f7   : > { %16142 = vmatpush3.bf16.msra.mxu0 %v19322_v9  ;;  %16513 = vmatprep.mubr.msk.bf16.mxu1 %vm20081_vm0, %v20080_v0  ;;  %v19366_v9 = vld [vmem:[%s23505_s1 + $0x8] sm:$0xff]  }
 0x1f8   : > { %16143 = vmatprep.subr.bf16.mxu0 %v20080_v0  ;;  %16538 = vmatpush3.bf16.msra.mxu1 %v19327_v51  ;;  %v21545_v51 = vld [vmem:[%s20276_s19 + $0x98] sm:$0xff]  }
 0x1f9   : > { %16539 = vmatprep.subr.bf16.mxu1 %v20080_v0 }
 0x1fb   : > { %16144 = vmatpush3.bf16.msra.mxu0 %v19323_v53  ;;  %v21550_v53 = vld [vmem:[%s20276_s19 + $0xd8] sm:$0xff]  }
 0x1fc   : > { %16145 = vmatprep.subr.bf16.mxu0 %v20080_v0  ;;  %16540 = vmatpush3.bf16.msra.mxu1 %v19329_v10  ;;  %v19358_v10 = vld [vmem:[%s23505_s1 + $0x10] sm:$0xff]  }
 0x1fd   : > { %16118 = vmatmul.mubr.bf16.gmra.mrb[8].mxu0 %v21242_v54  ;;  %16541 = vmatprep.subr.bf16.mxu1 %v20080_v0 }
 0x1fe   : > { %16514 = vmatmul.mubr.bf16.gmra.mrb[8].mxu1 %v21245_v56  ;;  %16121 = vmatprep.mubr.msk.bf16.mxu0 %vm20081_vm0, %v20080_v0 }
 0x1ff   : > { %16517 = vmatprep.mubr.msk.bf16.mxu1 %vm20081_vm0, %v20080_v0  ;;  %16146 = vmatpush3.bf16.msra.mxu0 %v19325_v12  ;;  %v19369_v12 = vld [vmem:[%s23505_s1 + $0x10] sm:$0xff]  }
 0x200   : > { %16147 = vmatprep.subr.bf16.mxu0 %v20080_v0  ;;  %16542 = vmatpush3.bf16.msra.mxu1 %v19330_v13  ;;  %v19361_v13 = vld [vmem:[%s23505_s1 + $0x18] sm:$0xff]  }
 0x201   : > { %16543 = vmatprep.subr.bf16.mxu1 %v20080_v0 }
 0x203   : > { %16148 = vmatpush3.bf16.msra.mxu0 %v19328_v63  ;;  %v19371_v63 = vld [vmem:[%s23505_s1 + $0x18] sm:$0xff]  }
 0x204   : > { %16149 = vmatprep.subr.bf16.mxu0 %v20080_v0  ;;  %16544 = vmatpush3.bf16.msra.mxu1 %v19332_v2  ;;  %v21575_v2 = vld [vmem:[%s20276_s19 + $0xa0] sm:$0xff]  }
 0x205   : > { %16122 = vmatmul.mubr.bf16.gmra.mrb[12].mxu0 %v21263_v62  ;;  %16545 = vmatprep.subr.bf16.mxu1 %v20080_v0 }
 0x206   : > { %16518 = vmatmul.mubr.bf16.gmra.mrb[12].mxu1 %v21267_v1  ;;  %16125 = vmatprep.mubr.msk.bf16.mxu0 %vm20081_vm0, %v20080_v0 }
 0x207   : > { %16521 = vmatprep.mubr.msk.bf16.mxu1 %vm20081_vm0, %v20080_v0  ;;  %16150 = vmatpush3.bf16.msra.mxu0 %v19331_v15  ;;  %v21579_v15 = vld [vmem:[%s20276_s19 + $0xe0] sm:$0xff]  }
 0x208   : > { %16151 = vmatprep.subr.bf16.mxu0 %v20080_v0  ;;  %16546 = vmatpush3.bf16.msra.mxu1 %v19333_v16  ;;  %v19365_v16 = vld [vmem:[%s23505_s1 + $0x20] sm:$0xff]  }
 0x209   : > { %16547 = vmatprep.subr.bf16.mxu1 %v20080_v0 }
 0x20b   : > { %16152 = vmatpush3.bf16.msra.mxu0 %v19334_v19  ;;  %v19370_v19 = vld [vmem:[%s23505_s1 + $0x28] sm:$0xff]  }
 0x20c   : > { %16548 = vmatpush3.bf16.msra.mxu1 %v19335_v21  ;;  %16577 = vmatprep.subr.bf16.mxu0 %v20080_v0  ;;  %v21603_v21 = vld [vmem:[%s20276_s19 + $0xa8] sm:$0xff]  }
 0x20d   : > { %16126 = vmatmul.mubr.bf16.gmra.mrb[16].mxu0 %v1910_v17  ;;  %16973 = vmatprep.subr.bf16.mxu1 %v20080_v0 }
 0x20e   : > { %16522 = vmatmul.mubr.bf16.gmra.mrb[16].mxu1 %v3788_v22  ;;  %16129 = vmatprep.mubr.msk.bf16.mxu0 %vm20081_vm0, %v20080_v0 }
 0x20f   : > { %16525 = vmatprep.mubr.msk.bf16.mxu1 %vm20081_vm0, %v20080_v0 }
 0x215   : > { %16130 = vmatmul.mubr.bf16.gmra.mrb[20].mxu0 %v1912_v27 }
 0x216   : > { %16526 = vmatmul.mubr.bf16.gmra.mrb[20].mxu1 %v21393_v28  ;;  %16133 = vmatprep.mubr.msk.bf16.mxu0 %vm20081_vm0, %v20080_v0 }
 0x217   : > { %16529 = vmatprep.mubr.msk.bf16.mxu1 %vm20081_vm0, %v20080_v0 }
 0x21d   : > { %16134 = vmatmul.mubr.bf16.gmra.mrb[24].mxu0 %v1914_v31  ;;  %v21661_v31 = vld [vmem:[%s20276_s19 + $0x100] sm:$0xff]  }
 0x21e   : > { %16530 = vmatmul.mubr.bf16.gmra.mrb[24].mxu1 %v3792_v32  ;;  %16153 = vmatprep.mubr.msk.bf16.mxu0 %vm20081_vm0, %v20080_v0  ;;  %v19382_v32 = vld [vmem:[%s20276_s19 + $0x80] sm:$0xff]  }
 0x21f   : > { %16549 = vmatprep.mubr.msk.bf16.mxu1 %vm20081_vm0, %v20080_v0 }
 0x225   : > { %16154 = vmatmul.mubr.bf16.vlgmr.msra.gmra.mrb[0].mxu0 %v21242_v54  ;;  %v2088_v54 = vrot.slane %v19988_v14, 1  ;;  %v19402_v14 = vld [vmem:[%s23505_s1 + $0x40] sm:$0xff]  }
 0x226   : > { %16550 = vmatmul.mubr.bf16.vlgmr.msra.gmra.mrb[0].mxu1 %v21245_v56  ;;  %16578 = vmatpush3.bf16.msra.mxu0 %v19336_v42  ;;  %v19989_v56 = vld [vmem:[%s20276_s19 + $0x90] sm:$0xff]   ;;  %v19383_v42 = vld [vmem:[%s20276_s19 + $0xc0] sm:$0xff]  }
 0x227   : > { %16157 = vmatprep.mubr.msk.bf16.mxu0 %vm20081_vm0, %v20080_v0  ;;  %16553 = vmatprep.mubr.msk.bf16.mxu1 %vm20081_vm0, %v20080_v0  ;;  %v3965_v57 = vrot.slane %v19989_v56, 1  ;;  %v2089_v59 = vsel %vm1718_vm2, %v2086_v47, %v2088_v54  ;;  %v19394_v47 = vld [vmem:[%s23505_s1 + $0x1a8] sm:$0xff]  }
 0x228   : > { %16579 = vmatprep.subr.bf16.mxu0 %v20080_v0  ;;  %16974 = vmatpush3.bf16.msra.mxu1 %v19340_v43  ;;  %v19384_v43 = vld [vmem:[%s23505_s1 + $0x180] sm:$0xff]   ;;  %v19403_v56 = vld [vmem:[%s23505_s1 + $0x48] sm:$0xff]  }
 0x229   : > { %16975 = vmatprep.subr.bf16.mxu1 %v20080_v0  ;;  %v3966_v60 = vsel %vm1718_vm2, %v3963_v50, %v3965_v57  ;;  %v19399_v50 = vld [vmem:[%s23505_s1 + $0x1b0] sm:$0xff]  }
 0x22a   : > { %16580 = vmatpush3.bf16.msra.mxu0 %v19337_v33  ;;  %v19390_v33 = vld [vmem:[%s23505_s1 + $0x180] sm:$0xff]  }
 0x22b   : > { %16581 = vmatprep.subr.bf16.mxu0 %v20080_v0 }
 0x22c   : > { %16976 = vmatpush3.bf16.msra.mxu1 %v19342_v34  ;;  %v19386_v34 = vld [vmem:[%s23505_s1 + $0x188] sm:$0xff]  }
 0x22d   : > { %16158 = vmatmul.mubr.bf16.gmra.mrb[4].mxu0 %v21263_v62  ;;  %16977 = vmatprep.subr.bf16.mxu1 %v20080_v0  ;;  %v2090_v62 = vrot.slane %v19990_v61, 1  ;;  %v19405_v61 = vld [vmem:[%s23505_s1 + $0x58] sm:$0xff]  }
 0x22e   : > { %16554 = vmatmul.mubr.bf16.gmra.mrb[4].mxu1 %v21267_v1  ;;  %16161 = vmatprep.mubr.msk.bf16.mxu0 %vm20081_vm0, %v20080_v0  ;;  %v19991_v1 = vld [vmem:[%s20276_s19 + $0x98] ss:$0 sps:$4 sm:$0x11]  }
 0x22f   : > { %16557 = vmatprep.mubr.msk.bf16.mxu1 %vm20081_vm0, %v20080_v0  ;;  %16582 = vmatpush3.bf16.msra.mxu0 %v19338_v35  ;;  %v3967_v3 = vrot.slane %v19991_v1, 1  ;;  %v2091_v4 = vsel %vm1718_vm2, %v2088_v54, %v2090_v62  ;;  %v19392_v35 = vld [vmem:[%s23505_s1 + $0x188] sm:$0xff]   ;;  %v19406_v54 = vld [vmem:[%s23505_s1 + $0x40] sm:$0xff]   ;;  %v19411_v62 = vld [vmem:[%s23505_s1 + $0x58] sm:$0xff]  }
 0x230   : > { %16583 = vmatprep.subr.bf16.mxu0 %v20080_v0  ;;  %16978 = vmatpush3.bf16.msra.mxu1 %v19343_v36  ;;  %v19385_v36 = vld [vmem:[%s20276_s19 + $0x88] sm:$0xff]   ;;  %v19407_v1 = vld [vmem:[%s23505_s1 + $0x60] sm:$0xff]  }
 0x231   : > { %16979 = vmatprep.subr.bf16.mxu1 %v20080_v0  ;;  %v3968_v5 = vsel %vm1718_vm2, %v3965_v57, %v3967_v3  ;;  %v19408_v57 = vld [vmem:[%s23505_s1 + $0x48] sm:$0xff]   ;;  %v19414_v3 = vld [vmem:[%s23505_s1 + $0x60] sm:$0xff]  }
 0x233   : > { %16584 = vmatpush3.bf16.msra.mxu0 %v19339_v37  ;;  %v19387_v37 = vld [vmem:[%s20276_s19 + $0xc8] sm:$0xff]  }
 0x234   : > { %16585 = vmatprep.subr.bf16.mxu0 %v20080_v0  ;;  %16980 = vmatpush3.bf16.msra.mxu1 %v19345_v38  ;;  %v19388_v38 = vld [vmem:[%s23505_s1 + $0x190] sm:$0xff]  }
 0x235   : > { %16162 = vmatmul.mubr.bf16.gmra.mrb[8].mxu0 %v1910_v17  ;;  %16981 = vmatprep.subr.bf16.mxu1 %v20080_v0  ;;  %v21607_v17 = vld [vmem:[%s20276_s19 + $0xe8] sm:$0xff]  }
 0x236   : > { %16558 = vmatmul.mubr.bf16.gmra.mrb[8].mxu1 %v3788_v22  ;;  %16165 = vmatprep.mubr.msk.bf16.mxu0 %vm20081_vm0, %v20080_v0  ;;  %v19375_v22 = vld [vmem:[%s23505_s1 + $0x30] sm:$0xff]  }
 0x237   : > { %16561 = vmatprep.mubr.msk.bf16.mxu1 %vm20081_vm0, %v20080_v0  ;;  %16586 = vmatpush3.bf16.msra.mxu0 %v19341_v39  ;;  %v19393_v39 = vld [vmem:[%s23505_s1 + $0x190] sm:$0xff]  }
 0x238   : > { %16587 = vmatprep.subr.bf16.mxu0 %v20080_v0  ;;  %16982 = vmatpush3.bf16.msra.mxu1 %v19346_v40  ;;  %v20082_v40 = vmov 0  }
 0x239   : > { %16983 = vmatprep.subr.bf16.mxu1 %v20080_v0  ;;  %415 = vst [vmem:[#allocation2 + $0x8] sm:$0xff] %v20082_v40  ;;  %414 = vst [vmem:[#allocation2] sm:$0xff] %v20082_v40 }
 0x23a   : > { %416 = vst [vmem:[#allocation2 + $0x10] sm:$0xff] %v20082_v40  ;;  %417 = vst [vmem:[#allocation2 + $0x18] sm:$0xff] %v20082_v40 }
 0x23b   : > { %16588 = vmatpush3.bf16.msra.mxu0 %v19344_v41  ;;  %418 = vst [vmem:[#allocation2 + $0x20] sm:$0xff] %v20082_v40  ;;  %419 = vst [vmem:[#allocation2 + $0x28] sm:$0xff] %v20082_v40  ;;  %v19389_v41 = vld [vmem:[%s23505_s1 + $0x198] sm:$0xff]  }
 0x23c   : > { %16589 = vmatprep.subr.bf16.mxu0 %v20080_v0  ;;  %16984 = vmatpush3.bf16.msra.mxu1 %v19348_v44  ;;  %420 = vst [vmem:[#allocation2 + $0x30] sm:$0xff] %v20082_v40  ;;  %421 = vst [vmem:[#allocation2 + $0x38] sm:$0xff] %v20082_v40  ;;  %v19395_v44 = vld [vmem:[%s23505_s1 + $0x198] sm:$0xff]  }
 0x23d   : > { %16166 = vmatmul.mubr.bf16.gmra.mrb[12].mxu0 %v1912_v27  ;;  %16985 = vmatprep.subr.bf16.mxu1 %v20080_v0  ;;  %v21635_v27 = vld [vmem:[%s20276_s19 + $0xf0] sm:$0xff]   ;;  %422 = vst [vmem:[#allocation2 + $0x40] sm:$0xff] %v20082_v40  ;;  %423 = vst [vmem:[#allocation2 + $0x48] sm:$0xff] %v20082_v40 }
 0x23e   : > { %16562 = vmatmul.mubr.bf16.gmra.mrb[12].mxu1 %v21393_v28  ;;  %16169 = vmatprep.mubr.msk.bf16.mxu0 %vm20081_vm0, %v20080_v0  ;;  %v21646_v28 = vld [vmem:[%s20276_s19 + $0xb8] sm:$0xff]   ;;  %424 = vst [vmem:[#allocation3] sm:$0xff] %v20082_v40  ;;  %425 = vst [vmem:[#allocation3 + $0x8] sm:$0xff] %v20082_v40 }
 0x23f   : > { %16565 = vmatprep.mubr.msk.bf16.mxu1 %vm20081_vm0, %v20080_v0  ;;  %16590 = vmatpush3.bf16.msra.mxu0 %v19347_v45  ;;  %426 = vst [vmem:[#allocation3 + $0x10] sm:$0xff] %v20082_v40  ;;  %427 = vst [vmem:[#allocation3 + $0x18] sm:$0xff] %v20082_v40  ;;  %v19391_v45 = vld [vmem:[%s23505_s1 + $0x1a0] sm:$0xff]  }
 0x240   : > { %16591 = vmatprep.subr.bf16.mxu0 %v20080_v0  ;;  %16986 = vmatpush3.bf16.msra.mxu1 %v19349_v46  ;;  %428 = vst [vmem:[#allocation3 + $0x20] sm:$0xff] %v20082_v40  ;;  %429 = vst [vmem:[#allocation3 + $0x28] sm:$0xff] %v20082_v40  ;;  %v19396_v46 = vld [vmem:[%s23505_s1 + $0x1a0] sm:$0xff]  }
 0x241   : > { %16987 = vmatprep.subr.bf16.mxu1 %v20080_v0 }
 0x243   : > { %16592 = vmatpush3.bf16.msra.mxu0 %v19350_v48  ;;  %v19398_v48 = vld [vmem:[%s23505_s1 + $0x1a8] sm:$0xff]  }
 0x244   : > { %16988 = vmatpush3.bf16.msra.mxu1 %v19351_v49  ;;  %16621 = vmatprep.subr.bf16.mxu0 %v20080_v0  ;;  %v19397_v49 = vld [vmem:[%s23505_s1 + $0x1b0] sm:$0xff]  }
 0x245   : > { %16170 = vmatmul.mubr.bf16.gmra.mrb[16].mxu0 %v2087_v11  ;;  %17017 = vmatprep.subr.bf16.mxu1 %v20080_v0  ;;  %v19400_v11 = vld [vmem:[%s23505_s1 + $0x1b8] sm:$0xff]  }
 0x246   : > { %16566 = vmatmul.mubr.bf16.gmra.mrb[16].mxu1 %v3964_v52  ;;  %16173 = vmatprep.mubr.msk.bf16.mxu0 %vm20081_vm0, %v20080_v0  ;;  %v19401_v52 = vld [vmem:[%s23505_s1 + $0x1b8] sm:$0xff]  }
 0x247   : > { %16569 = vmatprep.mubr.msk.bf16.mxu1 %vm20081_vm0, %v20080_v0 }
 0x24d   : > { %16174 = vmatmul.mubr.bf16.gmra.mrb[20].mxu0 %v2089_v59  ;;  %v19404_v59 = vld [vmem:[%s23505_s1 + $0x50] sm:$0xff]  }
 0x24e   : > { %16570 = vmatmul.mubr.bf16.gmra.mrb[20].mxu1 %v3966_v60  ;;  %16177 = vmatprep.mubr.msk.bf16.mxu0 %vm20081_vm0, %v20080_v0  ;;  %v19409_v60 = vld [vmem:[%s23505_s1 + $0x50] sm:$0xff]  }
 0x24f   : > { %16573 = vmatprep.mubr.msk.bf16.mxu1 %vm20081_vm0, %v20080_v0 }
 0x255   : > { %16178 = vmatmul.mubr.bf16.gmra.mrb[24].mxu0 %v2091_v4  ;;  %v19410_v4 = vld [vmem:[%s23505_s1 + $0x68] sm:$0xff]  }
 0x256   : > { %16574 = vmatmul.mubr.bf16.gmra.mrb[24].mxu1 %v3968_v5  ;;  %16593 = vmatprep.mubr.msk.bf16.mxu0 %vm20081_vm0, %v20080_v0  ;;  %v19416_v5 = vld [vmem:[%s23505_s1 + $0x68] sm:$0xff]  }
 0x257   : > { %16989 = vmatprep.mubr.msk.bf16.mxu1 %vm20081_vm0, %v20080_v0 }
 0x25d   : > { %16594 = vmatmul.mubr.bf16.vlgmr.msra.gmra.mrb[28].mxu0 %v21522_v6 }
 0x25e   : > { %16990 = vmatmul.mubr.bf16.vlgmr.msra.gmra.mrb[28].mxu1 %v21525_v55  ;;  %16622 = vmatpush3.bf16.msra.mxu0 %v19354_v58  ;;  %v19420_v58 = vld [vmem:[%s23505_s1 + $0x78] sm:$0xff]  }
 0x25f   : > { %16597 = vmatprep.mubr.msk.bf16.mxu0 %vm20081_vm0, %v20080_v0  ;;  %16623 = vmatprep.subr.bf16.mxu0 %v20080_v0 }
 0x260   : > { %16993 = vmatprep.mubr.msk.bf16.mxu1 %vm20081_vm0, %v20080_v0  ;;  %17018 = vmatpush3.bf16.msra.mxu1 %v19364_v7  ;;  %v19421_v7 = vld [vmem:[%s23505_s1 + $0x78] sm:$0xff]  }
 0x261   : > { %17019 = vmatprep.subr.bf16.mxu1 %v20080_v0 }
 0x262   : > { %16624 = vmatpush3.bf16.msra.mxu0 %v19356_v8  ;;  %v4740_v8 = vld [vmem:[%s20276_s19 + $0x80] sm:$0xf] }
 0x263   : > { %16625 = vmatprep.subr.bf16.mxu0 %v20080_v0 }
 0x264   : > { %17020 = vmatpush3.bf16.msra.mxu1 %v19366_v9  ;;  %v4741_v9 = vld [vmem:[%s20276_s19 + $0x84] sm:$0xf] }
 0x265   : > { %16598 = vmatmul.mubr.bf16.gmra.mrb[32].mxu0 %v21545_v51  ;;  %17021 = vmatprep.subr.bf16.mxu1 %v20080_v0 }
 0x266   : > { %16994 = vmatmul.mubr.bf16.gmra.mrb[32].mxu1 %v21550_v53  ;;  %16601 = vmatprep.mubr.msk.bf16.mxu0 %vm20081_vm0, %v20080_v0 }
 0x267   : > { %16626 = vmatpush3.bf16.msra.mxu0 %v19358_v10  ;;  %16997 = vmatprep.mubr.msk.bf16.mxu1 %vm20081_vm0, %v20080_v0  ;;  %v19412_v10 = vld [vmem:[%s20276_s19 + $0xc8] sm:$0xff]  }
 0x268   : > { %16627 = vmatprep.subr.bf16.mxu0 %v20080_v0  ;;  %17022 = vmatpush3.bf16.msra.mxu1 %v19369_v12  ;;  %v19413_v12 = vld [vmem:[%s20276_s19 + $0x108] sm:$0xff]  }
 0x269   : > { %17023 = vmatprep.subr.bf16.mxu1 %v20080_v0 }
 0x26b   : > { %16628 = vmatpush3.bf16.msra.mxu0 %v19361_v13  ;;  %v14032_v13 = vcombine.low %v4740_v8, %v4741_v9 }
 0x26c   : > { %16629 = vmatprep.subr.bf16.mxu0 %v20080_v0  ;;  %17024 = vmatpush3.bf16.msra.mxu1 %v19371_v63 }
 0x26d   : > { %16602 = vmatmul.mubr.bf16.gmra.mrb[36].mxu0 %v21575_v2  ;;  %17025 = vmatprep.subr.bf16.mxu1 %v20080_v0 }
 0x26e   : > { %16998 = vmatmul.mubr.bf16.gmra.mrb[36].mxu1 %v21579_v15  ;;  %16605 = vmatprep.mubr.msk.bf16.mxu0 %vm20081_vm0, %v20080_v0 }
 0x26f   : > { %17001 = vmatprep.mubr.msk.bf16.mxu1 %vm20081_vm0, %v20080_v0  ;;  %16630 = vmatpush3.bf16.msra.mxu0 %v19365_v16  ;;  %v19425_v16 = vld [vmem:[%s20276_s19 + $0xc8] sm:$0xff]  }
 0x270   : > { %16631 = vmatprep.subr.bf16.mxu0 %v20080_v0  ;;  %17026 = vmatpush3.bf16.msra.mxu1 %v19374_v18 }
 0x271   : > { %17027 = vmatprep.subr.bf16.mxu1 %v20080_v0 }
 0x273   : > { %16632 = vmatpush3.bf16.msra.mxu0 %v19370_v19 }
 0x274   : > { %16633 = vmatprep.subr.bf16.mxu0 %v20080_v0  ;;  %17028 = vmatpush3.bf16.msra.mxu1 %v19376_v20 }
 0x275   : > { %16606 = vmatmul.mubr.bf16.gmra.mrb[40].mxu0 %v21603_v21  ;;  %17029 = vmatprep.subr.bf16.mxu1 %v20080_v0 }
 0x276   : > { %17002 = vmatmul.mubr.bf16.gmra.mrb[40].mxu1 %v21607_v17  ;;  %16609 = vmatprep.mubr.msk.bf16.mxu0 %vm20081_vm0, %v20080_v0 }
 0x277   : > { %17005 = vmatprep.mubr.msk.bf16.mxu1 %vm20081_vm0, %v20080_v0  ;;  %16634 = vmatpush3.bf16.msra.mxu0 %v19375_v22 }
 0x278   : > { %16635 = vmatprep.subr.bf16.mxu0 %v20080_v0  ;;  %17030 = vmatpush3.bf16.msra.mxu1 %v19379_v24 }
 0x279   : > { %17031 = vmatprep.subr.bf16.mxu1 %v20080_v0 }
 0x27b   : > { %16636 = vmatpush3.bf16.msra.mxu0 %v19380_v23  ;;  %v19418_v23 = vld [vmem:[%s20276_s19 + $0x110] sm:$0xff]  }
 0x27c   : > { %17032 = vmatpush3.bf16.msra.mxu1 %v19381_v25  ;;  %16665 = vmatprep.subr.bf16.mxu0 %v20080_v0  ;;  %v4818_v25 = vshrl.u32 %v14032_v13, 16 }
 0x27d   : > { %16610 = vmatmul.mubr.bf16.gmra.mrb[44].mxu0 %v21631_v26  ;;  %17061 = vmatprep.subr.bf16.mxu1 %v20080_v0 }
 0x27e   : > { %17006 = vmatmul.mubr.bf16.gmra.mrb[44].mxu1 %v21635_v27  ;;  %16613 = vmatprep.mubr.msk.bf16.mxu0 %vm20081_vm0, %v20080_v0 }
 0x27f   : > { %17009 = vmatprep.mubr.msk.bf16.mxu1 %vm20081_vm0, %v20080_v0 }
 0x285   : > { %16614 = vmatmul.mubr.bf16.gmra.mrb[48].mxu0 %v21646_v28 }
 0x286   : > { %17010 = vmatmul.mubr.bf16.gmra.mrb[48].mxu1 %v21649_v29  ;;  %16617 = vmatprep.mubr.msk.bf16.mxu0 %vm20081_vm0, %v20080_v0 }
 0x287   : > { %17013 = vmatprep.mubr.msk.bf16.mxu1 %vm20081_vm0, %v20080_v0 }
 0x28d   : > { %16618 = vmatmul.mubr.bf16.gmra.mrb[52].mxu0 %v21658_v30 }
 0x28e   : > { %17014 = vmatmul.mubr.bf16.gmra.mrb[52].mxu1 %v21661_v31  ;;  %16637 = vmatprep.mubr.msk.bf16.mxu0 %vm20081_vm0, %v20080_v0 }
 0x28f   : > { %17033 = vmatprep.mubr.msk.bf16.mxu1 %vm20081_vm0, %v20080_v0 }
 0x295   : > { %16638 = vmatmul.mubr.bf16.vlgmr.msra.gmra.mrb[28].mxu0 %v19382_v32  ;;  %v6686_v32 = vshll.u32 %v19425_v16, 16 }
 0x296   : > { %17034 = vmatmul.mubr.bf16.vlgmr.msra.gmra.mrb[28].mxu1 %v19383_v42  ;;  %16666 = vmatpush3.bf16.msra.mxu0 %v19384_v43  ;;  %v21884_v43 = vld [vmem:[%s20276_s19 + $0x90] sm:$0xff]  }
 0x297   : > { %16641 = vmatprep.mubr.msk.bf16.mxu0 %vm20081_vm0, %v20080_v0  ;;  %16667 = vmatprep.subr.bf16.mxu0 %v20080_v0 }
 0x298   : > { %17037 = vmatprep.mubr.msk.bf16.mxu1 %vm20081_vm0, %v20080_v0  ;;  %17062 = vmatpush3.bf16.msra.mxu1 %v19390_v33 }
 0x299   : > { %17063 = vmatprep.subr.bf16.mxu1 %v20080_v0 }
 0x29a   : > { %16668 = vmatpush3.bf16.msra.mxu0 %v19386_v34 }
 0x29b   : > { %16669 = vmatprep.subr.bf16.mxu0 %v20080_v0 }
 0x29c   : > { %17064 = vmatpush3.bf16.msra.mxu1 %v19392_v35 }
 0x29d   : > { %16642 = vmatmul.mubr.bf16.gmra.mrb[32].mxu0 %v19385_v36  ;;  %17065 = vmatprep.subr.bf16.mxu1 %v20080_v0  ;;  %v6688_v36 = vrot.slane %v6686_v32, 1 }
 0x29e   : > { %17038 = vmatmul.mubr.bf16.gmra.mrb[32].mxu1 %v19387_v37  ;;  %16645 = vmatprep.mubr.msk.bf16.mxu0 %vm20081_vm0, %v20080_v0  ;;  %v21891_v37 = vld [vmem:[%s20276_s19 + $0xd0] sm:$0xff]  }
 0x29f   : > { %16670 = vmatpush3.bf16.msra.mxu0 %v19388_v38  ;;  %17041 = vmatprep.mubr.msk.bf16.mxu1 %vm20081_vm0, %v20080_v0 }
 0x2a0   : > { %16671 = vmatprep.subr.bf16.mxu0 %v20080_v0  ;;  %17066 = vmatpush3.bf16.msra.mxu1 %v19393_v39 }
 0x2a1   : > { %17067 = vmatprep.subr.bf16.mxu1 %v20080_v0 }
 0x2a3   : > { %16672 = vmatpush3.bf16.msra.mxu0 %v19389_v41  ;;  %v19426_v41 = vld [vmem:[%s23505_s1 + $0x100] sm:$0xff]  }
 0x2a4   : > { %16673 = vmatprep.subr.bf16.mxu0 %v20080_v0  ;;  %17068 = vmatpush3.bf16.msra.mxu1 %v19395_v44 }
 0x2a5   : > { %16646 = vmatmul.mubr.bf16.gmra.mrb[36].mxu0 %v21522_v6  ;;  %17069 = vmatprep.subr.bf16.mxu1 %v20080_v0  ;;  %v19415_v6 = vld [vmem:[%s23505_s1 + $0x70] sm:$0xff]  }
 0x2a6   : > { %17042 = vmatmul.mubr.bf16.gmra.mrb[36].mxu1 %v21525_v55  ;;  %16649 = vmatprep.mubr.msk.bf16.mxu0 %vm20081_vm0, %v20080_v0  ;;  %v19419_v55 = vld [vmem:[%s23505_s1 + $0x70] sm:$0xff]  }
 0x2a7   : > { %17045 = vmatprep.mubr.msk.bf16.mxu1 %vm20081_vm0, %v20080_v0  ;;  %16674 = vmatpush3.bf16.msra.mxu0 %v19391_v45  ;;  %v4833_v45 = vshll.u32 %v21884_v43, 16 }
 0x2a8   : > { %16675 = vmatprep.subr.bf16.mxu0 %v20080_v0  ;;  %17070 = vmatpush3.bf16.msra.mxu1 %v19396_v46 }
 0x2a9   : > { %17071 = vmatprep.subr.bf16.mxu1 %v20080_v0 }
 0x2ab   : > { %16676 = vmatpush3.bf16.msra.mxu0 %v19394_v47 }
 0x2ac   : > { %16677 = vmatprep.subr.bf16.mxu0 %v20080_v0  ;;  %17072 = vmatpush3.bf16.msra.mxu1 %v19398_v48 }
 0x2ad   : > { %16650 = vmatmul.mubr.bf16.gmra.mrb[40].mxu0 %v21545_v51  ;;  %17073 = vmatprep.subr.bf16.mxu1 %v20080_v0  ;;  %v6601_v51 = vld [vmem:[%s20276_s19 + $0xc0] sm:$0xf] }
 0x2ae   : > { %17046 = vmatmul.mubr.bf16.gmra.mrb[40].mxu1 %v21550_v53  ;;  %16653 = vmatprep.mubr.msk.bf16.mxu0 %vm20081_vm0, %v20080_v0  ;;  %v6602_v53 = vld [vmem:[%s20276_s19 + $0xc4] sm:$0xf] }
 0x2af   : > { %17049 = vmatprep.mubr.msk.bf16.mxu1 %vm20081_vm0, %v20080_v0  ;;  %16678 = vmatpush3.bf16.msra.mxu0 %v19397_v49  ;;  %v14258_v63 = vcombine.low %v6601_v51, %v6602_v53  ;;  %v4837_v53 = vshrl.u32 %v21884_v43, 16 }
 0x2b0   : > { %16679 = vmatprep.subr.bf16.mxu0 %v20080_v0  ;;  %17074 = vmatpush3.bf16.msra.mxu1 %v19399_v50 }
 0x2b1   : > { %17075 = vmatprep.subr.bf16.mxu1 %v20080_v0  ;;  %v6681_v18 = vshll.u32 %v14258_v63, 16 }
 0x2b3   : > { %16680 = vmatpush3.bf16.msra.mxu0 %v19400_v11 }
 0x2b4   : > { %17076 = vmatpush3.bf16.msra.mxu1 %v19401_v52  ;;  %16709 = vmatprep.subr.bf16.mxu0 %v20080_v0 }
 0x2b5   : > { %16654 = vmatmul.mubr.bf16.gmra.mrb[44].mxu0 %v21575_v2  ;;  %17105 = vmatprep.subr.bf16.mxu1 %v20080_v0 }
 0x2b6   : > { %17050 = vmatmul.mubr.bf16.gmra.mrb[44].mxu1 %v21579_v15  ;;  %16657 = vmatprep.mubr.msk.bf16.mxu0 %vm20081_vm0, %v20080_v0 }
 0x2b7   : > { %17053 = vmatprep.mubr.msk.bf16.mxu1 %vm20081_vm0, %v20080_v0 }
 0x2bd   : > { %16658 = vmatmul.mubr.bf16.gmra.mrb[48].mxu0 %v21603_v21 }
 0x2be   : > { %17054 = vmatmul.mubr.bf16.gmra.mrb[48].mxu1 %v21607_v17  ;;  %16661 = vmatprep.mubr.msk.bf16.mxu0 %vm20081_vm0, %v20080_v0 }
 0x2bf   : > { %17057 = vmatprep.mubr.msk.bf16.mxu1 %vm20081_vm0, %v20080_v0 }
 0x2c5   : > { %16662 = vmatmul.mubr.bf16.gmra.mrb[52].mxu0 %v21631_v26 }
 0x2c6   : > { %17058 = vmatmul.mubr.bf16.gmra.mrb[52].mxu1 %v21635_v27  ;;  %16681 = vmatprep.mubr.msk.bf16.mxu0 %vm20081_vm0, %v20080_v0 }
 0x2c7   : > { %17077 = vmatprep.mubr.msk.bf16.mxu1 %vm20081_vm0, %v20080_v0 }
 0x2cd   : > { %16682 = vmatmul.mubr.bf16.vlgmr.msra.gmra.mrb[28].mxu0 %v21575_v2  ;;  %v19423_v2 = vld [vmem:[%s20276_s19 + $0x88] sm:$0xff]  }
 0x2ce   : > { %17078 = vmatmul.mubr.bf16.vlgmr.msra.gmra.mrb[28].mxu1 %v21579_v15  ;;  %16710 = vmatpush3.bf16.msra.mxu0 %v19402_v14  ;;  %v4820_v15 = vshll.u32 %v14032_v13, 16  ;;  %v4829_v44 = vshrl.u32 %v19423_v2, 16 }
 0x2cf   : > { %16685 = vmatprep.mubr.msk.bf16.mxu0 %vm20081_vm0, %v20080_v0  ;;  %16711 = vmatprep.subr.bf16.mxu0 %v20080_v0 }
 0x2d0   : > { %17081 = vmatprep.mubr.msk.bf16.mxu1 %vm20081_vm0, %v20080_v0  ;;  %17106 = vmatpush3.bf16.msra.mxu1 %v19406_v54  ;;  %v6690_v54 = vshrl.u32 %v19425_v16, 16  ;;  %v19430_v16 = vld [vmem:[%s23505_s1 + $0x110] sm:$0xff]  }
 0x2d1   : > { %17107 = vmatprep.subr.bf16.mxu1 %v20080_v0 }
 0x2d2   : > { %16712 = vmatpush3.bf16.msra.mxu0 %v19403_v56  ;;  %v6694_v56 = vshll.u32 %v21891_v37, 16 }
 0x2d3   : > { %16713 = vmatprep.subr.bf16.mxu0 %v20080_v0 }
 0x2d4   : > { %17108 = vmatpush3.bf16.msra.mxu1 %v19408_v57 }
 0x2d5   : > { %16686 = vmatmul.mubr.bf16.gmra.mrb[32].mxu0 %v21603_v21  ;;  %17109 = vmatprep.subr.bf16.mxu1 %v20080_v0 }
 0x2d6   : > { %17082 = vmatmul.mubr.bf16.gmra.mrb[32].mxu1 %v21607_v17  ;;  %16689 = vmatprep.mubr.msk.bf16.mxu0 %vm20081_vm0, %v20080_v0  ;;  %v19417_v17 = vld [vmem:[%s20276_s19 + $0xd0] sm:$0xff]  }
 0x2d7   : > { %16714 = vmatpush3.bf16.msra.mxu0 %v19404_v59  ;;  %17085 = vmatprep.mubr.msk.bf16.mxu1 %vm20081_vm0, %v20080_v0  ;;  %v19436_v59 = vld [vmem:[%s23505_s1 + $0x100] sm:$0xff]  }
 0x2d8   : > { %16715 = vmatprep.subr.bf16.mxu0 %v20080_v0  ;;  %17110 = vmatpush3.bf16.msra.mxu1 %v19409_v60 }
 0x2d9   : > { %17111 = vmatprep.subr.bf16.mxu1 %v20080_v0 }
 0x2db   : > { %16716 = vmatpush3.bf16.msra.mxu0 %v19405_v61  ;;  %v4835_v61 = vrot.slane %v4833_v45, 1 }
 0x2dc   : > { %16717 = vmatprep.subr.bf16.mxu0 %v20080_v0  ;;  %17112 = vmatpush3.bf16.msra.mxu1 %v19411_v62  ;;  %v19428_v62 = vld [vmem:[%s23505_s1 + $0x108] sm:$0xff]  }
 0x2dd   : > { %16690 = vmatmul.mubr.bf16.gmra.mrb[36].mxu0 %v21631_v26  ;;  %17113 = vmatprep.subr.bf16.mxu1 %v20080_v0  ;;  %v4822_v26 = vrot.slane %v4820_v15, 1 }
 0x2de   : > { %17086 = vmatmul.mubr.bf16.gmra.mrb[36].mxu1 %v21635_v27  ;;  %16693 = vmatprep.mubr.msk.bf16.mxu0 %vm20081_vm0, %v20080_v0  ;;  %v4825_v27 = vshll.u32 %v19423_v2, 16 }
 0x2df   : > { %17089 = vmatprep.mubr.msk.bf16.mxu1 %vm20081_vm0, %v20080_v0  ;;  %16718 = vmatpush3.bf16.msra.mxu0 %v19407_v1  ;;  %v4823_v33 = vor.u32 %v4822_v26, %v4818_v25  ;;  %v21911_v1 = vld [vmem:[%s20276_s19 + $0x98] sm:$0xff]   ;;  %v21950_v25 = vld [vmem:[%s20276_s19 + $0xe0] sm:$0xff]  }
 0x2e0   : > { %16719 = vmatprep.subr.bf16.mxu0 %v20080_v0  ;;  %17114 = vmatpush3.bf16.msra.mxu1 %v19414_v3  ;;  %v4827_v34 = vrot.slane %v4825_v27, 1  ;;  %v21914_v3 = vld [vmem:[%s20276_s19 + $0xd8] sm:$0xff]  }
 0x2e1   : > { %17115 = vmatprep.subr.bf16.mxu1 %v20080_v0  ;;  %v6702_v13 = vshll.u32 %v21914_v3, 16  ;;  %v19443_v27 = vld [vmem:[%s23505_s1 + $0x118] sm:$0xff]  }
 0x2e2   : > { %v4828_v50 = vsel %vm1072_vm1, %v4823_v33, %v4827_v34  ;;  %v4831_v60 = vor.u32 %v4829_v44, %v4827_v34 }
 0x2e3   : > { %16720 = vmatpush3.bf16.msra.mxu0 %v19410_v4  ;;  %v6692_v4 = vor.u32 %v6690_v54, %v6688_v36  ;;  %v21992_v54 = vld [vmem:[%s20276_s19 + $0xe8] sm:$0xff]  }
 0x2e4   : > { %16721 = vmatprep.subr.bf16.mxu0 %v20080_v0  ;;  %17116 = vmatpush3.bf16.msra.mxu1 %v19416_v5  ;;  %v6696_v5 = vrot.slane %v6694_v56, 1  ;;  %v4836_v8 = vsel %vm1072_vm1, %v4831_v60, %v4835_v61  ;;  %v19442_v56 = vld [vmem:[%s23505_s1 + $0x128] sm:$0xff]  }
 0x2e5   : > { %16694 = vmatmul.mubr.bf16.gmra.mrb[40].mxu0 %v21646_v28  ;;  %17117 = vmatprep.subr.bf16.mxu1 %v20080_v0 }
 0x2e6   : > { %17090 = vmatmul.mubr.bf16.gmra.mrb[40].mxu1 %v21649_v29  ;;  %16697 = vmatprep.mubr.msk.bf16.mxu0 %vm20081_vm0, %v20080_v0  ;;  %v6697_v15 = vsel %vm1072_vm1, %v6692_v4, %v6696_v5 }
 0x2e7   : > { %17093 = vmatprep.mubr.msk.bf16.mxu1 %vm20081_vm0, %v20080_v0  ;;  %16722 = vmatpush3.bf16.msra.mxu0 %v19415_v6 }
 0x2e8   : > { %16723 = vmatprep.subr.bf16.mxu0 %v20080_v0  ;;  %17118 = vmatpush3.bf16.msra.mxu1 %v19419_v55  ;;  %v19438_v55 = vld [vmem:[%s23505_s1 + $0x108] sm:$0xff]  }
 0x2e9   : > { %17119 = vmatprep.subr.bf16.mxu1 %v20080_v0 }
 0x2eb   : > { %16724 = vmatpush3.bf16.msra.mxu0 %v19420_v58 }
 0x2ec   : > { %17120 = vmatpush3.bf16.msra.mxu1 %v19421_v7  ;;  %16753 = vmatprep.subr.bf16.mxu0 %v20080_v0 }
 0x2ed   : > { %16698 = vmatmul.mubr.bf16.gmra.mrb[44].mxu0 %v21658_v30  ;;  %17149 = vmatprep.subr.bf16.mxu1 %v20080_v0  ;;  %v6679_v30 = vshrl.u32 %v14258_v63, 16 }
 0x2ee   : > { %17094 = vmatmul.mubr.bf16.gmra.mrb[44].mxu1 %v21661_v31  ;;  %16701 = vmatprep.mubr.msk.bf16.mxu0 %vm20081_vm0, %v20080_v0  ;;  %v6683_v31 = vrot.slane %v6681_v18, 1 }
 0x2ef   : > { %17097 = vmatprep.mubr.msk.bf16.mxu1 %vm20081_vm0, %v20080_v0 }
 0x2f0   : > { %v6684_v35 = vor.u32 %v6683_v31, %v6679_v30  ;;  %v4845_v30 = vshrl.u32 %v21911_v1, 16 }
 0x2f2   : > { %v6689_v14 = vsel %vm1072_vm1, %v6684_v35, %v6688_v36 }
 0x2f5   : > { %16702 = vmatmul.mubr.bf16.gmra.mrb[48].mxu0 %v19412_v10  ;;  %v4841_v10 = vshll.u32 %v21911_v1, 16 }
 0x2f6   : > { %17098 = vmatmul.mubr.bf16.gmra.mrb[48].mxu1 %v19413_v12  ;;  %16705 = vmatprep.mubr.msk.bf16.mxu0 %vm20081_vm0, %v20080_v0  ;;  %v6698_v12 = vshrl.u32 %v21891_v37, 16 }
 0x2f7   : > { %17101 = vmatprep.mubr.msk.bf16.mxu1 %vm20081_vm0, %v20080_v0 }
 0x2f8   : > { %v2177_v19 = vpop.f32.mrb[0].mxu0 }
 0x2f9   : > { %2246 = vst [vmem:[#allocation4] sm:$0xff] %v2177_v19  ;;  %v4054_v20 = vpop.f32.mrb[0].mxu1  ;;  %v16155_v21 = vpop.f32.mrb[1].mxu0  ;;  %v19441_v19 = vld [vmem:[%s23505_s1 + $0x110] sm:$0xff]  }
 0x2fa   : > { %v16551_v22 = vpop.f32.mrb[1].mxu1  ;;  %v2180_v24 = vpop.f32.mrb[2].mxu0  ;;  %v4839_v21 = vor.u32 %v4837_v53, %v4835_v61 }
 0x2fb   : > { %2247 = vst [vmem:[#allocation4 + $0x8] sm:$0xff] %v2180_v24  ;;  %v4057_v28 = vpop.f32.mrb[2].mxu1  ;;  %v16156_v29 = vpop.f32.mrb[3].mxu0  ;;  %v6700_v22 = vor.u32 %v6698_v12, %v6696_v5  ;;  %v6704_v24 = vrot.slane %v6702_v13, 1  ;;  %v6718_v12 = vshll.u32 %v21992_v54, 16  ;;  %v19447_v13 = vld [vmem:[%s23505_s1 + $0x130] sm:$0xff]  }
 0x2fc   : > { %v16552_v42 = vpop.f32.mrb[3].mxu1 }
 0x2fd   : > { %16706 = vmatmul.mubr.bf16.gmra.mrb[52].mxu0 %v19417_v17  ;;  %v4843_v17 = vrot.slane %v4841_v10, 1  ;;  %v21963_v35 = vsel %vm1072_vm1, %v6700_v22, %v6704_v24  ;;  %v6714_v10 = vshrl.u32 %v21950_v25, 16 }
 0x2fe   : > { %17102 = vmatmul.mubr.bf16.gmra.mrb[52].mxu1 %v19418_v23  ;;  %16725 = vmatprep.mubr.msk.bf16.mxu0 %vm20081_vm0, %v20080_v0  ;;  %v19433_v23 = vld [vmem:[%s23505_s1 + $0x118] sm:$0xff]  }
 0x2ff   : > { %17121 = vmatprep.mubr.msk.bf16.mxu1 %vm20081_vm0, %v20080_v0  ;;  %v21960_v34 = vsel %vm1072_vm1, %v4839_v21, %v4843_v17 }
 0x300   : > { %v2185_v38 = vpop.f32.mrb[4].mxu0 }
 0x301   : > { %v4062_v39 = vpop.f32.mrb[4].mxu1  ;;  %v16159_v40 = vpop.f32.mrb[5].mxu0  ;;  %v6706_v38 = vshrl.u32 %v21914_v3, 16 }
 0x302   : > { %v21897_v46 = vld [vmem:[#allocation4] ss:$2 sm:$0xff]  ;;  %v21899_v47 = vld [vmem:[#allocation4 + $0x1] ss:$2 sm:$0xff]  ;;  %v16555_v48 = vpop.f32.mrb[5].mxu1  ;;  %v2188_v49 = vpop.f32.mrb[6].mxu0 }
 0x303   : > { %4123 = vst [vmem:[#allocation4] sm:$0xff] %v4054_v20  ;;  %4124 = vst [vmem:[#allocation4 + $0x8] sm:$0xff] %v4057_v28  ;;  %v4065_v11 = vpop.f32.mrb[6].mxu1  ;;  %v16160_v52 = vpop.f32.mrb[7].mxu0  ;;  %v21939_v20 = vld [vmem:[%s20276_s19 + $0xa0] sm:$0xff]   ;;  %v6710_v39 = vshll.u32 %v21950_v25, 16 }
 0x304   : > { %v16556_v57 = vpop.f32.mrb[7].mxu1  ;;  %v4849_v31 = vshll.u32 %v21939_v20, 16  ;;  %v19437_v40 = vld [vmem:[%s23505_s1 + $0x120] sm:$0xff]   ;;  %v21974_v48 = vld [vmem:[%s20276_s19 + $0xa8] sm:$0xff]   ;;  %v6708_v52 = vor.u32 %v6706_v38, %v6704_v24  ;;  %v4853_v60 = vshrl.u32 %v21939_v20, 16 }
 0x305   : > { %16726 = vmatmul.mubr.bf16.vlgmr.msra.gmra.mrb[28].mxu0 %v4828_v50  ;;  %v21979_v49 = vld [vmem:[%s23506_s2] ss:$0 sm:$0xff]  ;;  %v4857_v61 = vshll.u32 %v21974_v48, 16 }
 0x306   : > { %17122 = vmatmul.mubr.bf16.vlgmr.msra.gmra.mrb[28].mxu1 %v6689_v14  ;;  %16754 = vmatpush3.bf16.msra.mxu0 %v19426_v41  ;;  %v2263_v41 = vmax.f32 %v21897_v46, %v21899_v47  ;;  %v19446_v50 = vld [vmem:[%s23505_s1 + $0x120] sm:$0xff]   ;;  %v4847_v47 = vor.u32 %v4845_v30, %v4843_v17  ;;  %v4851_v11 = vrot.slane %v4849_v31, 1  ;;  %v6712_v14 = vrot.slane %v6710_v39, 1  ;;  %v19455_v31 = vld [vmem:[%s23505_s1 + $0x138] sm:$0xff]   ;;  %v2290_v39 = vld [vmem:[#allocation2 + $0x8] sm:$0x1f] }
 0x307   : > { %16729 = vmatprep.mubr.msk.bf16.mxu0 %vm20081_vm0, %v20080_v0  ;;  %16755 = vmatprep.subr.bf16.mxu0 %v20080_v0  ;;  %v4859_v22 = vrot.slane %v4857_v61, 1 }
 0x308   : > { %v2193_v6 = vpop.f32.mrb[8].mxu0  ;;  %17125 = vmatprep.mubr.msk.bf16.mxu1 %vm20081_vm0, %v20080_v0  ;;  %17150 = vmatpush3.bf16.msra.mxu1 %v19436_v59  ;;  %v22009_v53 = vsel %vm1072_vm1, %v6708_v52, %v6712_v14  ;;  %v4855_v17 = vor.u32 %v4853_v60, %v4851_v11  ;;  %v6722_v52 = vshrl.u32 %v21992_v54, 16  ;;  %v22066_v60 = vld [vmem:[%s20276_s19 + $0xf8] sm:$0xf] }
 0x309   : > { %2250 = vst [vmem:[#allocation4 + $0x20] sm:$0xff] %v2193_v6  ;;  %v4070_v58 = vpop.f32.mrb[8].mxu1  ;;  %v16163_v7 = vpop.f32.mrb[9].mxu0  ;;  %17151 = vmatprep.subr.bf16.mxu1 %v20080_v0 }
 0x30a   : > { %v16559_v9 = vpop.f32.mrb[9].mxu1  ;;  %v2196_v51 = vpop.f32.mrb[10].mxu0  ;;  %16756 = vmatpush3.bf16.msra.mxu0 %v19428_v62  ;;  %v19448_v62 = vld [vmem:[%s23505_s1 + $0x128] sm:$0xff]  }
 0x30b   : > { %2251 = vst [vmem:[#allocation4 + $0x28] sm:$0xff] %v2196_v51  ;;  %v4073_v63 = vpop.f32.mrb[10].mxu1  ;;  %v16164_v2 = vpop.f32.mrb[11].mxu0  ;;  %16757 = vmatprep.subr.bf16.mxu0 %v20080_v0  ;;  %v4137_v1 = vld [vmem:[#allocation4] ss:$2 sm:$0xff] }
 0x30c   : > { %v16560_v18 = vpop.f32.mrb[11].mxu1  ;;  %17152 = vmatpush3.bf16.msra.mxu1 %v19438_v55  ;;  %v4138_v3 = vld [vmem:[#allocation4 + $0x1] ss:$2 sm:$0xff] }
 0x30d   : > { %16730 = vmatmul.mubr.bf16.gmra.mrb[32].mxu0 %v4836_v8  ;;  %17153 = vmatprep.subr.bf16.mxu1 %v20080_v0  ;;  %v22006_v8 = vsel %vm1072_vm1, %v4847_v47, %v4851_v11 }
 0x30e   : > { %17126 = vmatmul.mubr.bf16.gmra.mrb[32].mxu1 %v6697_v15  ;;  %16733 = vmatprep.mubr.msk.bf16.mxu0 %vm20081_vm0, %v20080_v0  ;;  %v19453_v15 = vld [vmem:[%s23505_s1 + $0x130] sm:$0xff]  }
 0x30f   : > { %16758 = vmatpush3.bf16.msra.mxu0 %v19430_v16  ;;  %17129 = vmatprep.mubr.msk.bf16.mxu1 %vm20081_vm0, %v20080_v0  ;;  %v4139_v16 = vmax.f32 %v4137_v1, %v4138_v3 }
 0x310   : > { %v2201_v26 = vpop.f32.mrb[12].mxu0  ;;  %16759 = vmatprep.subr.bf16.mxu0 %v20080_v0  ;;  %17154 = vmatpush3.bf16.msra.mxu1 %v19441_v19  ;;  %v22022_v19 = vld [vmem:[%s20276_s19 + $0xb0] sm:$0xff]  }
 0x311   : > { %v4078_v28 = vpop.f32.mrb[12].mxu1  ;;  %v16167_v29 = vpop.f32.mrb[13].mxu0  ;;  %17155 = vmatprep.subr.bf16.mxu1 %v20080_v0  ;;  %v6720_v26 = vrot.slane %v6718_v12, 1 }
 0x312   : > { %v2265_v32 = vld [vmem:[#allocation4 + $0x20] ss:$2 sm:$0xff]  ;;  %v2267_v42 = vld [vmem:[#allocation4 + $0x21] ss:$2 sm:$0xff]  ;;  %v16563_v43 = vpop.f32.mrb[13].mxu1  ;;  %v2204_v33 = vpop.f32.mrb[14].mxu0 }
 0x313   : > { %4127 = vst [vmem:[#allocation4 + $0x20] sm:$0xff] %v4070_v58  ;;  %4128 = vst [vmem:[#allocation4 + $0x28] sm:$0xff] %v4073_v63  ;;  %v4081_v36 = vpop.f32.mrb[14].mxu1  ;;  %v16168_v37 = vpop.f32.mrb[15].mxu0  ;;  %16760 = vmatpush3.bf16.msra.mxu0 %v19433_v23  ;;  %v2268_v44 = vmax.f32 %v2265_v32, %v2267_v42  ;;  %v6716_v23 = vor.u32 %v6714_v10, %v6712_v14  ;;  %v19454_v28 = vld [vmem:[%s23505_s1 + $0x138] sm:$0xff]   ;;  %v4861_v33 = vshrl.u32 %v21974_v48, 16 }
 0x314   : > { %v16564_v45 = vpop.f32.mrb[15].mxu1  ;;  %16761 = vmatprep.subr.bf16.mxu0 %v20080_v0  ;;  %17156 = vmatpush3.bf16.msra.mxu1 %v19443_v27  ;;  %v22031_v27 = vld [vmem:[%s20276_s19 + $0xf0] sm:$0xff]   ;;  %v4865_v36 = vshll.u32 %v22022_v19, 16 }
 0x315   : > { %16734 = vmatmul.mubr.bf16.gmra.mrb[36].mxu0 %v21960_v34  ;;  %17157 = vmatprep.subr.bf16.mxu1 %v20080_v0  ;;  %v2269_v46 = vmax.f32 %v2263_v41, %v2268_v44  ;;  %v22052_v11 = vsel %vm1072_vm1, %v6716_v23, %v6720_v26  ;;  %v6726_v14 = vshll.u32 %v22031_v27, 16  ;;  %v4863_v1 = vor.u32 %v4861_v33, %v4859_v22 }
 0x316   : > { %17130 = vmatmul.mubr.bf16.gmra.mrb[36].mxu1 %v21963_v35  ;;  %16737 = vmatprep.mubr.msk.bf16.mxu0 %vm20081_vm0, %v20080_v0  ;;  %v4867_v3 = vrot.slane %v4865_v36, 1 }
 0x317   : > { %17133 = vmatprep.mubr.msk.bf16.mxu1 %vm20081_vm0, %v20080_v0  ;;  %16762 = vmatpush3.bf16.msra.mxu0 %v19437_v40  ;;  %v2276_v57 = vadd.f32 %v21979_v49, %v2269_v46 }
 0x318   : > { %v2209_v59 = vpop.f32.mrb[16].mxu0  ;;  %16763 = vmatprep.subr.bf16.mxu0 %v20080_v0  ;;  %17158 = vmatpush3.bf16.msra.mxu1 %v19446_v50  ;;  %v22049_v50 = vsel %vm1072_vm1, %v4855_v17, %v4859_v22  ;;  %v6730_v22 = vshrl.u32 %v22031_v27, 16 }
 0x319   : > { %2254 = vst [vmem:[#allocation4 + $0x40] sm:$0xff] %v2209_v59  ;;  %v4086_v4 = vpop.f32.mrb[16].mxu1  ;;  %v16171_v5 = vpop.f32.mrb[17].mxu0  ;;  %17159 = vmatprep.subr.bf16.mxu1 %v20080_v0  ;;  %v2277_v63 = vmax.f32 %v2276_v57, 0.0 }
 0x31a   : > { %v4140_v6 = vld [vmem:[#allocation4 + $0x20] ss:$2 sm:$0xff]  ;;  %v4141_v55 = vld [vmem:[#allocation4 + $0x21] ss:$2 sm:$0xff]  ;;  %v16567_v58 = vpop.f32.mrb[17].mxu1  ;;  %v2212_v7 = vpop.f32.mrb[18].mxu0 }
 0x31b   : > { %2255 = vst [vmem:[#allocation4 + $0x48] sm:$0xff] %v2212_v7  ;;  %v4089_v9 = vpop.f32.mrb[18].mxu1  ;;  %v16172_v51 = vpop.f32.mrb[19].mxu0  ;;  %16764 = vmatpush3.bf16.msra.mxu0 %v19442_v56  ;;  %v4142_v18 = vmax.f32 %v4140_v6, %v4141_v55  ;;  %v2278_v21 = vpack.c.bf16 %v2277_v63, %v2277_v63  ;;  %v22057_v56 = vld [vmem:[%s20276_s19 + $0xb8] sm:$0xf]  ;;  %v6724_v55 = vor.u32 %v6722_v52, %v6720_v26  ;;  %v6728_v58 = vrot.slane %v6726_v14, 1 }
 0x31c   : > { %v16568_v2 = vpop.f32.mrb[19].mxu1  ;;  %16765 = vmatprep.subr.bf16.mxu0 %v20080_v0  ;;  %17160 = vmatpush3.bf16.msra.mxu1 %v19448_v62  ;;  %v22084_v7 = vcombine.low %v22066_v60, %v22066_v60 }
 0x31d   : > { %16738 = vmatmul.mubr.bf16.gmra.mrb[40].mxu0 %v22006_v8  ;;  %17161 = vmatprep.subr.bf16.mxu1 %v20080_v0  ;;  %v4143_v24 = vmax.f32 %v4139_v16, %v4142_v18  ;;  %v2280_v29 = vshrl.u32 %v2278_v21, 16  ;;  %v2283_v38 = vshll.u32 %v2278_v21, 16  ;;  %v22087_v2 = vsel %vm1072_vm1, %v4863_v1, %v4867_v3 }
 0x31e   : > { %17134 = vmatmul.mubr.bf16.gmra.mrb[40].mxu1 %v22009_v53  ;;  %16741 = vmatprep.mubr.msk.bf16.mxu0 %vm20081_vm0, %v20080_v0  ;;  %v22092_v17 = vsel %vm1072_vm1, %v6724_v55, %v6728_v58 }
 0x31f   : > { %17137 = vmatprep.mubr.msk.bf16.mxu1 %vm20081_vm0, %v20080_v0  ;;  %16766 = vmatpush3.bf16.msra.mxu0 %v19447_v13  ;;  %v4144_v32 = vadd.f32 %v21979_v49, %v4143_v24  ;;  %v2282_v37 = vrot.slane %v2280_v29, 7  ;;  %v6734_v24 = vshll.u32 %v22084_v7, 16  ;;  %v4155_v29 = vld [vmem:[#allocation2 + $0x18] sm:$0x1f] }
 0x320   : > { %v2217_v30 = vpop.f32.mrb[20].mxu0  ;;  %16767 = vmatprep.subr.bf16.mxu0 %v20080_v0  ;;  %17162 = vmatpush3.bf16.msra.mxu1 %v19453_v15  ;;  %v4869_v15 = vshrl.u32 %v22022_v19, 16 }
 0x321   : > { %v4094_v42 = vpop.f32.mrb[20].mxu1  ;;  %v16175_v43 = vpop.f32.mrb[21].mxu0  ;;  %17163 = vmatprep.subr.bf16.mxu1 %v20080_v0  ;;  %v2285_v61 = vor.u32 %v2283_v38, %v2282_v37  ;;  %v4145_v62 = vmax.f32 %v4144_v32, 0.0 }
 0x322   : > { %v22044_v40 = vld [vmem:[#allocation4 + $0x40] ss:$2 sm:$0xff]  ;;  %v22046_v41 = vld [vmem:[#allocation4 + $0x41] ss:$2 sm:$0xff]  ;;  %v16571_v44 = vpop.f32.mrb[21].mxu1  ;;  %v2220_v45 = vpop.f32.mrb[22].mxu0  ;;  %v22100_v30 = vor.u32 %v4869_v15, %v4867_v3  ;;  %v22104_v42 = vor.u32 %v6730_v22, %v6728_v58 }
 0x323   : > { %4131 = vst [vmem:[#allocation4 + $0x40] sm:$0xff] %v4086_v4  ;;  %4132 = vst [vmem:[#allocation4 + $0x48] sm:$0xff] %v4089_v9  ;;  %v4097_v46 = vpop.f32.mrb[22].mxu1  ;;  %v16176_v47 = vpop.f32.mrb[23].mxu0  ;;  %16768 = vmatpush3.bf16.msra.mxu0 %v19454_v28  ;;  %v22076_v4 = vcombine.low %v22057_v56, %v22057_v56  ;;  %v2291_v5 = vsel %vm22061_vm5, %v2285_v61, %v2290_v39  ;;  %v4146_v6 = vpack.c.bf16 %v4145_v62, %v4145_v62  ;;  %v19456_v61 = vld [vmem:[%s23505_s1 + $0x1c0] sm:$0xff]   ;;  %v19457_v58 = vld [vmem:[%s23505_s1 + $0x1c8] sm:$0xff]  }
 0x324   : > { %v16572_v59 = vpop.f32.mrb[23].mxu1  ;;  %17164 = vmatpush3.bf16.msra.mxu1 %v19455_v31  ;;  %16797 = vmatprep.subr.bf16.mxu0 %v20080_v0  ;;  %2292 = vst [vmem:[#allocation2 + $0x8] sm:$0x1f] %v2291_v5  ;;  %v6736_v43 = vrot.slane %v6734_v24, 1  ;;  %v2297_v39 = vmax.f32 %v22044_v40, %v22046_v41  ;;  %v19460_v5 = vld [vmem:[%s23505_s1 + $0x1c0] sm:$0xff]  }
 0x325   : > { %16742 = vmatmul.mubr.bf16.gmra.mrb[44].mxu0 %v22049_v50  ;;  %17193 = vmatprep.subr.bf16.mxu1 %v20080_v0  ;;  %v4148_v51 = vshrl.u32 %v4146_v6, 16  ;;  %v4873_v16 = vshll.u32 %v22076_v4, 16  ;;  %v4151_v28 = vshll.u32 %v4146_v6, 16  ;;  %v4176_v24 = vld [vmem:[#allocation2 + $0x20] sm:$0x1f] }
 0x326   : > { %17138 = vmatmul.mubr.bf16.gmra.mrb[44].mxu1 %v22052_v11  ;;  %16745 = vmatprep.mubr.msk.bf16.mxu0 %vm20081_vm0, %v20080_v0  ;;  %v6737_v45 = vsel %vm1072_vm1, %v22104_v42, %v6736_v43 }
 0x327   : > { %17141 = vmatprep.mubr.msk.bf16.mxu1 %vm20081_vm0, %v20080_v0  ;;  %v4150_v26 = vrot.slane %v4148_v51, 7  ;;  %v4875_v31 = vrot.slane %v4873_v16, 1  ;;  %v19463_v16 = vld [vmem:[%s23505_s1 + $0x1d0] sm:$0xff]  }
 0x328   : > { %v2225_v9 = vpop.f32.mrb[24].mxu0 }
 0x329   : > { %2258 = vst [vmem:[#allocation4 + $0x60] sm:$0xff] %v2225_v9  ;;  %v4102_v10 = vpop.f32.mrb[24].mxu1  ;;  %v16179_v12 = vpop.f32.mrb[25].mxu0  ;;  %v4153_v32 = vor.u32 %v4151_v28, %v4150_v26  ;;  %v4876_v38 = vsel %vm1072_vm1, %v22100_v30, %v4875_v31  ;;  %v4755_v26 = vld [vmem:[%s20276_s19 + $0xbc] sm:$0xf]  ;;  %v19461_v28 = vld [vmem:[%s23505_s1 + $0x1e0] sm:$0xff]  }
 0x32a   : > { %v16575_v13 = vpop.f32.mrb[25].mxu1  ;;  %v2228_v63 = vpop.f32.mrb[26].mxu0  ;;  %v4158_v52 = vld [vmem:[#allocation4 + $0x40] ss:$2 sm:$0xff]  ;;  %v4159_v14 = vld [vmem:[#allocation4 + $0x41] ss:$2 sm:$0xff]  ;;  %v22178_v43 = vcombine.low %v22057_v56, %v4755_v26 }
 0x32b   : > { %2259 = vst [vmem:[#allocation4 + $0x68] sm:$0xff] %v2228_v63  ;;  %v4105_v18 = vpop.f32.mrb[26].mxu1  ;;  %v16180_v21 = vpop.f32.mrb[27].mxu0  ;;  %v4156_v33 = vsel %vm22061_vm5, %v4153_v32, %v4155_v29  ;;  %v4160_v62 = vmax.f32 %v4158_v52, %v4159_v14  ;;  %v19458_v63 = vld [vmem:[%s23505_s1 + $0x1d0] sm:$0xff]   ;;  %v6616_v31 = vld [vmem:[%s20276_s19 + $0xfc] sm:$0xf] }
 0x32c   : > { %v16576_v23 = vpop.f32.mrb[27].mxu1  ;;  %4157 = vst [vmem:[#allocation2 + $0x18] sm:$0x1f] %v4156_v33  ;;  %v19459_v21 = vld [vmem:[%s23505_s1 + $0x1d8] sm:$0xff]   ;;  %v19468_v32 = vld [vmem:[%s23505_s1 + $0x1e0] sm:$0xff]   ;;  %v22184_v33 = vcombine.low %v22066_v60, %v6616_v31  ;;  %v19470_v56 = vld [vmem:[%s23505_s1 + $0x1e8] sm:$0xff]  }
 0x32d   : > { %16746 = vmatmul.mubr.bf16.gmra.mrb[48].mxu0 %v22087_v2  ;;  %v5063_v60 = vshll.u32 %v22178_v43, 16  ;;  %v19476_v52 = vld [vmem:[%s23505_s1 + $0x1f8] sm:$0xff]   ;;  %v19483_v26 = vld [vmem:[%s23505_s1 + $0xa0] sm:$0xff]  }
 0x32e   : > { %17142 = vmatmul.mubr.bf16.gmra.mrb[48].mxu1 %v22092_v17  ;;  %16749 = vmatprep.mubr.msk.bf16.mxu0 %vm20081_vm0, %v20080_v0  ;;  %v19477_v14 = vld [vmem:[%s23505_s1 + $0x1f8] sm:$0xff]  }
 0x32f   : > { %17145 = vmatprep.mubr.msk.bf16.mxu1 %vm20081_vm0, %v20080_v0 }
 0x332   : > { %v2299_v36 = vld [vmem:[#allocation4 + $0x60] ss:$2 sm:$0xff]  ;;  %v2301_v37 = vld [vmem:[#allocation4 + $0x61] ss:$2 sm:$0xff] }
 0x333   : > { %v2302_v44 = vmax.f32 %v2299_v36, %v2301_v37  ;;  %4135 = vst [vmem:[#allocation4 + $0x60] sm:$0xff] %v4102_v10  ;;  %4136 = vst [vmem:[#allocation4 + $0x68] sm:$0xff] %v4105_v18  ;;  %v19464_v36 = vld [vmem:[%s23505_s1 + $0x1e8] sm:$0xff]   ;;  %v6924_v37 = vshll.u32 %v22184_v33, 16 }
 0x335   : > { %v2303_v46 = vmax.f32 %v2297_v39, %v2302_v44  ;;  %16750 = vmatmul.mubr.bf16.gmra.mrb[52].mxu0 %v4876_v38  ;;  %v19469_v38 = vld [vmem:[%s23505_s1 + $0x1f0] sm:$0xff]   ;;  %v5065_v44 = vrot.slane %v5063_v60, 1 }
 0x336   : > { %17146 = vmatmul.mubr.bf16.gmra.mrb[52].mxu1 %v6737_v45  ;;  %16769 = vmatprep.mubr.msk.bf16.mxu0 %vm20081_vm0, %v20080_v0  ;;  %v19475_v39 = vld [vmem:[%s23505_s1 + $0x1f0] sm:$0xff]   ;;  %v22211_v45 = vld [vmem:[%s20276_s19 + $0xc0] sm:$0xff]  }
 0x337   : > { %v2304_v47 = vadd.f32 %v21979_v49, %v2303_v46  ;;  %17165 = vmatprep.mubr.msk.bf16.mxu1 %vm20081_vm0, %v20080_v0  ;;  %v6926_v46 = vrot.slane %v6924_v37, 1 }
 0x339   : > { %v2305_v40 = vmax.f32 %v2304_v47, 0.0  ;;  %v22216_v47 = vld [vmem:[%s20276_s19 + $0x100] sm:$0xff]  }
 0x33a   : > { %v4161_v41 = vld [vmem:[#allocation4 + $0x60] ss:$2 sm:$0xff]  ;;  %v4162_v59 = vld [vmem:[#allocation4 + $0x61] ss:$2 sm:$0xff] }
 0x33b   : > { %v2306_v1 = vpack.c.bf16 %v2305_v40, %v2305_v40  ;;  %v4163_v3 = vmax.f32 %v4161_v41, %v4162_v59  ;;  %v22228_v40 = vsel %vm1072_vm1, %v22100_v30, %v5065_v44  ;;  %v5067_v41 = vshrl.u32 %v22178_v43, 16 }
 0x33c   : > { %v5071_v59 = vshll.u32 %v22211_v45, 16 }
 0x33d   : > { %v2308_v6 = vshrl.u32 %v2306_v1, 16  ;;  %v4164_v55 = vmax.f32 %v4160_v62, %v4163_v3  ;;  %16770 = vmatmul.mubr.bf16.vlgmr.msra.gmra.mrb[28].mxu0 %v21960_v34  ;;  %v2311_v51 = vshll.u32 %v2306_v1, 16  ;;  %v19462_v34 = vld [vmem:[%s23505_s1 + $0x1c8] sm:$0xff]   ;;  %v6928_v62 = vshrl.u32 %v22184_v33, 16 }
 0x33e   : > { %17166 = vmatmul.mubr.bf16.vlgmr.msra.gmra.mrb[28].mxu1 %v21963_v35  ;;  %16798 = vmatpush3.bf16.msra.mxu0 %v19456_v61  ;;  %v2315_v35 = vld [vmem:[#allocation2 + $0x10] sm:$0x1f]  ;;  %v22234_v61 = vsel %vm1072_vm1, %v22104_v42, %v6926_v46  ;;  %v6932_v1 = vshll.u32 %v22216_v47, 16  ;;  %v22239_v3 = vld [vmem:[%s20276_s19 + $0xc8] sm:$0xf]  ;;  %v5069_v30 = vor.u32 %v5067_v41, %v5065_v44  ;;  %v5073_v42 = vrot.slane %v5071_v59, 1 }
 0x33f   : > { %v2310_v9 = vrot.slane %v2308_v6, 7  ;;  %v4165_v10 = vadd.f32 %v21979_v49, %v4164_v55  ;;  %16773 = vmatprep.mubr.msk.bf16.mxu0 %vm20081_vm0, %v20080_v0  ;;  %16799 = vmatprep.subr.bf16.mxu0 %v20080_v0  ;;  %v22252_v6 = vcombine.low %v22239_v3, %v22239_v3  ;;  %v6930_v55 = vor.u32 %v6928_v62, %v6926_v46  ;;  %v22375_v46 = vld [vmem:[%s20276_s19 + $0xd0] sm:$0xff]   ;;  %v19497_v41 = vld [vmem:[%s23505_s1 + $0xb8] sm:$0xff]  }
 0x340   : > { %17169 = vmatprep.mubr.msk.bf16.mxu1 %vm20081_vm0, %v20080_v0  ;;  %17194 = vmatpush3.bf16.msra.mxu1 %v19460_v5  ;;  %v22242_v5 = vld [vmem:[%s20276_s19 + $0x108] sm:$0xf]  ;;  %v5273_v62 = vshll.u32 %v22375_v46, 16 }
 0x341   : > { %v2313_v12 = vor.u32 %v2311_v51, %v2310_v9  ;;  %v4166_v13 = vmax.f32 %v4165_v10, 0.0  ;;  %17195 = vmatprep.subr.bf16.mxu1 %v20080_v0  ;;  %v22258_v9 = vcombine.low %v22242_v5, %v22242_v5  ;;  %v22261_v51 = vsel %vm1072_vm1, %v5069_v30, %v5073_v42 }
 0x342   : > { %16800 = vmatpush3.bf16.msra.mxu0 %v19457_v58  ;;  %v6934_v58 = vrot.slane %v6932_v1, 1  ;;  %v5075_v10 = vshrl.u32 %v22211_v45, 16 }
 0x343   : > { %v4167_v49 = vpack.c.bf16 %v4166_v13, %v4166_v13  ;;  %16801 = vmatprep.subr.bf16.mxu0 %v20080_v0  ;;  %v2316_v15 = vsel %vm22061_vm5, %v2313_v12, %v2315_v35  ;;  %v6936_v12 = vshrl.u32 %v22216_v47, 16  ;;  %v6940_v13 = vshll.u32 %v22258_v9, 16 }
 0x344   : > { %17196 = vmatpush3.bf16.msra.mxu1 %v19462_v34  ;;  %2317 = vst [vmem:[#allocation2 + $0x10] sm:$0x1f] %v2316_v15  ;;  %v5079_v34 = vshll.u32 %v22252_v6, 16  ;;  %v22266_v35 = vsel %vm1072_vm1, %v6930_v55, %v6934_v58  ;;  %v22403_v55 = vld [vmem:[%s20276_s19 + $0xd8] ss:$0 sps:$4 sm:$0x11]  }
 0x345   : > { %16774 = vmatmul.mubr.bf16.gmra.mrb[32].mxu0 %v22006_v8  ;;  %17197 = vmatprep.subr.bf16.mxu1 %v20080_v0  ;;  %v4169_v18 = vshrl.u32 %v4167_v49, 16  ;;  %v4172_v8 = vshll.u32 %v4167_v49, 16  ;;  %v22274_v49 = vor.u32 %v5075_v10, %v5073_v42  ;;  %v22278_v15 = vor.u32 %v6936_v12, %v6934_v58  ;;  %v22408_v10 = vld [vmem:[%s20276_s19 + $0x118] ss:$0 sps:$4 sm:$0x11]  }
 0x346   : > { %17170 = vmatmul.mubr.bf16.gmra.mrb[32].mxu1 %v22009_v53  ;;  %16777 = vmatprep.mubr.msk.bf16.mxu0 %vm20081_vm0, %v20080_v0  ;;  %v19465_v53 = vld [vmem:[%s23505_s1 + $0x1d8] sm:$0xff]   ;;  %v5275_v42 = vrot.slane %v5273_v62, 1  ;;  %v5281_v12 = vshll.u32 %v22403_v55, 16 }
 0x347   : > { %16802 = vmatpush3.bf16.msra.mxu0 %v19458_v63  ;;  %17173 = vmatprep.mubr.msk.bf16.mxu1 %vm20081_vm0, %v20080_v0  ;;  %v4171_v22 = vrot.slane %v4169_v18, 7  ;;  %v5081_v63 = vrot.slane %v5079_v34, 1 }
 0x348   : > { %16803 = vmatprep.subr.bf16.mxu0 %v20080_v0  ;;  %17198 = vmatpush3.bf16.msra.mxu1 %v19463_v16  ;;  %v6942_v16 = vrot.slane %v6940_v13, 1 }
 0x349   : > { %17199 = vmatprep.subr.bf16.mxu1 %v20080_v0  ;;  %v4174_v23 = vor.u32 %v4172_v8, %v4171_v22  ;;  %v5082_v18 = vsel %vm1072_vm1, %v22274_v49, %v5081_v63  ;;  %v19478_v22 = vld [vmem:[%s23505_s1 + $0x80] sm:$0xff]   ;;  %v7142_v63 = vshll.u32 %v22408_v10, 16 }
 0x34a   : > { %v19482_v8 = vld [vmem:[%s23505_s1 + $0x80] sm:$0xff]  }
 0x34b   : > { %16804 = vmatpush3.bf16.msra.mxu0 %v19459_v21  ;;  %v4177_v29 = vsel %vm22061_vm5, %v4174_v23, %v4176_v24  ;;  %v6943_v21 = vsel %vm1072_vm1, %v22278_v15, %v6942_v16  ;;  %v19485_v24 = vld [vmem:[%s23505_s1 + $0x90] sm:$0xff]   ;;  %v19481_v23 = vld [vmem:[%s23505_s1 + $0x98] sm:$0xff]   ;;  %v5283_v16 = vrot.slane %v5281_v12, 1 }
 0x34c   : > { %16805 = vmatprep.subr.bf16.mxu0 %v20080_v0  ;;  %17200 = vmatpush3.bf16.msra.mxu1 %v19465_v53  ;;  %4178 = vst [vmem:[#allocation2 + $0x20] sm:$0x1f] %v4177_v29  ;;  %v19479_v53 = vld [vmem:[%s23505_s1 + $0x88] sm:$0xff]   ;;  %v19490_v29 = vld [vmem:[%s23505_s1 + $0xa0] sm:$0xff]  }
 0x34d   : > { %16778 = vmatmul.mubr.bf16.gmra.mrb[36].mxu0 %v22049_v50  ;;  %17201 = vmatprep.subr.bf16.mxu1 %v20080_v0 }
 0x34e   : > { %17174 = vmatmul.mubr.bf16.gmra.mrb[36].mxu1 %v22052_v11  ;;  %16781 = vmatprep.mubr.msk.bf16.mxu0 %vm20081_vm0, %v20080_v0 }
 0x34f   : > { %17177 = vmatprep.mubr.msk.bf16.mxu1 %vm20081_vm0, %v20080_v0  ;;  %16806 = vmatpush3.bf16.msra.mxu0 %v19461_v28  ;;  %v6620_v28 = vld [vmem:[%s20276_s19 + $0x10c] sm:$0xf] }
 0x350   : > { %16807 = vmatprep.subr.bf16.mxu0 %v20080_v0  ;;  %17202 = vmatpush3.bf16.msra.mxu1 %v19468_v32  ;;  %v22348_v32 = vcombine.low %v22242_v5, %v6620_v28 }
 0x351   : > { %17203 = vmatprep.subr.bf16.mxu1 %v20080_v0 }
 0x352   : > { %v7126_v37 = vshll.u32 %v22348_v32, 16 }
 0x353   : > { %16808 = vmatpush3.bf16.msra.mxu0 %v19464_v36  ;;  %v19486_v36 = vld [vmem:[%s23505_s1 + $0xa8] sm:$0xff]  }
 0x354   : > { %16809 = vmatprep.subr.bf16.mxu0 %v20080_v0  ;;  %17204 = vmatpush3.bf16.msra.mxu1 %v19470_v56  ;;  %v19492_v56 = vld [vmem:[%s23505_s1 + $0xa8] sm:$0xff]  }
 0x355   : > { %16782 = vmatmul.mubr.bf16.gmra.mrb[40].mxu0 %v22087_v2  ;;  %17205 = vmatprep.subr.bf16.mxu1 %v20080_v0 }
 0x356   : > { %17178 = vmatmul.mubr.bf16.gmra.mrb[40].mxu1 %v22092_v17  ;;  %16785 = vmatprep.mubr.msk.bf16.mxu0 %vm20081_vm0, %v20080_v0 }
 0x357   : > { %17181 = vmatprep.mubr.msk.bf16.mxu1 %vm20081_vm0, %v20080_v0  ;;  %16810 = vmatpush3.bf16.msra.mxu0 %v19469_v38  ;;  %v19491_v38 = vld [vmem:[%s23505_s1 + $0xb0] sm:$0xff]  }
 0x358   : > { %16811 = vmatprep.subr.bf16.mxu0 %v20080_v0  ;;  %17206 = vmatpush3.bf16.msra.mxu1 %v19475_v39  ;;  %v19495_v39 = vld [vmem:[%s23505_s1 + $0xb0] sm:$0xff]  }
 0x359   : > { %17207 = vmatprep.subr.bf16.mxu1 %v20080_v0 }
 0x35b   : > { %16812 = vmatpush3.bf16.msra.mxu0 %v19476_v52  ;;  %v7128_v52 = vrot.slane %v7126_v37, 1  ;;  %v19500_v37 = vld [vmem:[%s23505_s1 + $0x140] sm:$0xff]  }
 0x35c   : > { %17208 = vmatpush3.bf16.msra.mxu1 %v19477_v14  ;;  %16841 = vmatprep.subr.bf16.mxu0 %v20080_v0  ;;  %v22380_v14 = vld [vmem:[%s20276_s19 + $0x110] sm:$0xff]  }
 0x35d   : > { %16786 = vmatmul.mubr.bf16.gmra.mrb[44].mxu0 %v22228_v40  ;;  %17237 = vmatprep.subr.bf16.mxu1 %v20080_v0  ;;  %v7129_v1 = vsel %vm1072_vm1, %v22278_v15, %v7128_v52  ;;  %v7134_v5 = vshll.u32 %v22380_v14, 16 }
 0x35e   : > { %17182 = vmatmul.mubr.bf16.gmra.mrb[44].mxu1 %v22234_v61  ;;  %16789 = vmatprep.mubr.msk.bf16.mxu0 %vm20081_vm0, %v20080_v0 }
 0x35f   : > { %17185 = vmatprep.mubr.msk.bf16.mxu1 %vm20081_vm0, %v20080_v0 }
 0x365   : > { %16790 = vmatmul.mubr.bf16.gmra.mrb[48].mxu0 %v22261_v51 }
 0x366   : > { %17186 = vmatmul.mubr.bf16.gmra.mrb[48].mxu1 %v22266_v35  ;;  %16793 = vmatprep.mubr.msk.bf16.mxu0 %vm20081_vm0, %v20080_v0 }
 0x367   : > { %17189 = vmatprep.mubr.msk.bf16.mxu1 %vm20081_vm0, %v20080_v0 }
 0x36d   : > { %16794 = vmatmul.mubr.bf16.gmra.mrb[52].mxu0 %v5082_v18 }
 0x36e   : > { %17190 = vmatmul.mubr.bf16.gmra.mrb[52].mxu1 %v6943_v21  ;;  %16813 = vmatprep.mubr.msk.bf16.mxu0 %vm20081_vm0, %v20080_v0  ;;  %v7144_v21 = vrot.slane %v7142_v63, 1  ;;  %v19510_v63 = vld [vmem:[%s23505_s1 + $0x160] sm:$0xff]  }
 0x36f   : > { %17209 = vmatprep.mubr.msk.bf16.mxu1 %vm20081_vm0, %v20080_v0 }
 0x375   : > { %16814 = vmatmul.mubr.bf16.vlgmr.msra.gmra.mrb[28].mxu0 %v22049_v50  ;;  %v19484_v50 = vld [vmem:[%s23505_s1 + $0x88] sm:$0xff]  }
 0x376   : > { %17210 = vmatmul.mubr.bf16.vlgmr.msra.gmra.mrb[28].mxu1 %v22052_v11  ;;  %16842 = vmatpush3.bf16.msra.mxu0 %v19478_v22  ;;  %v19480_v11 = vld [vmem:[%s23505_s1 + $0x90] sm:$0xff]   ;;  %v5439_v22 = vld [vmem:[%s20276_s19 + $0x80] sm:$0xe] }
 0x377   : > { %16817 = vmatprep.mubr.msk.bf16.mxu0 %vm20081_vm0, %v20080_v0  ;;  %16843 = vmatprep.subr.bf16.mxu0 %v20080_v0 }
 0x378   : > { %17213 = vmatprep.mubr.msk.bf16.mxu1 %vm20081_vm0, %v20080_v0  ;;  %17238 = vmatpush3.bf16.msra.mxu1 %v19482_v8  ;;  %v7300_v8 = vld [vmem:[%s20276_s19 + $0xc0] sm:$0xe] }
 0x379   : > { %17239 = vmatprep.subr.bf16.mxu1 %v20080_v0 }
 0x37a   : > { %16844 = vmatpush3.bf16.msra.mxu0 %v19479_v53 }
 0x37b   : > { %16845 = vmatprep.subr.bf16.mxu0 %v20080_v0 }
 0x37c   : > { %17240 = vmatpush3.bf16.msra.mxu1 %v19484_v50  ;;  %v19992_v50 = vld [vmem:[%s20276_s19 + $0x84] sm:$0xf] }
 0x37d   : > { %16818 = vmatmul.mubr.bf16.gmra.mrb[32].mxu0 %v22087_v2  ;;  %17241 = vmatprep.subr.bf16.mxu1 %v20080_v0  ;;  %v19487_v2 = vld [vmem:[%s23505_s1 + $0x98] sm:$0xff]  }
 0x37e   : > { %17214 = vmatmul.mubr.bf16.gmra.mrb[32].mxu1 %v22092_v17  ;;  %16821 = vmatprep.mubr.msk.bf16.mxu0 %vm20081_vm0, %v20080_v0  ;;  %v4759_v17 = vld [vmem:[%s20276_s19 + $0xcc] sm:$0xf] }
 0x37f   : > { %16846 = vmatpush3.bf16.msra.mxu0 %v19480_v11  ;;  %17217 = vmatprep.mubr.msk.bf16.mxu1 %vm20081_vm0, %v20080_v0  ;;  %v22342_v31 = vcombine.low %v22239_v3, %v4759_v17  ;;  %v7130_v3 = vshrl.u32 %v22348_v32, 16  ;;  %v14118_v11 = vcombine.low %v5439_v22, %v19992_v50  ;;  %v7329_v50 = vrot.slane %v21992_v54, 1 }
 0x380   : > { %16847 = vmatprep.subr.bf16.mxu0 %v20080_v0  ;;  %17242 = vmatpush3.bf16.msra.mxu1 %v19485_v24  ;;  %v22548_v54 = vrot.slane %v22022_v19, 1  ;;  %v5472_v19 = vrot.slane %v22076_v4, 1  ;;  %v19516_v4 = vld [vmem:[%s23505_s1 + $0x200] sm:$0xff]  }
 0x381   : > { %17243 = vmatprep.subr.bf16.mxu1 %v20080_v0  ;;  %v5265_v60 = vshll.u32 %v22342_v31, 16  ;;  %v7132_v58 = vor.u32 %v7130_v3, %v7128_v52  ;;  %v5459_v17 = vrot.slane %v14118_v11, 1  ;;  %v19502_v3 = vld [vmem:[%s23505_s1 + $0x150] sm:$0xff]   ;;  %v19514_v11 = vld [vmem:[%s23505_s1 + $0x178] sm:$0xff]  }
 0x383   : > { %16848 = vmatpush3.bf16.msra.mxu0 %v19481_v23  ;;  %v5267_v44 = vrot.slane %v5265_v60, 1  ;;  %v19993_v23 = vld [vmem:[%s20276_s19 + $0xc4] sm:$0xf] }
 0x384   : > { %16849 = vmatprep.subr.bf16.mxu0 %v20080_v0  ;;  %17244 = vmatpush3.bf16.msra.mxu1 %v19487_v2  ;;  %v14344_v2 = vcombine.low %v7300_v8, %v19993_v23  ;;  %v19513_v8 = vld [vmem:[%s23505_s1 + $0x170] sm:$0xff]  }
 0x385   : > { %16822 = vmatmul.mubr.bf16.gmra.mrb[36].mxu0 %v22228_v40  ;;  %17245 = vmatprep.subr.bf16.mxu1 %v20080_v0  ;;  %v19496_v40 = vld [vmem:[%s23505_s1 + $0xb8] sm:$0xff]   ;;  %v5268_v59 = vsel %vm1072_vm1, %v22274_v49, %v5267_v44  ;;  %v7138_v49 = vshrl.u32 %v22380_v14, 16 }
 0x386   : > { %17218 = vmatmul.mubr.bf16.gmra.mrb[36].mxu1 %v22234_v61  ;;  %16825 = vmatprep.mubr.msk.bf16.mxu0 %vm20081_vm0, %v20080_v0  ;;  %v5269_v61 = vshrl.u32 %v22342_v31, 16 }
 0x387   : > { %17221 = vmatprep.mubr.msk.bf16.mxu1 %vm20081_vm0, %v20080_v0  ;;  %16850 = vmatpush3.bf16.msra.mxu0 %v19483_v26  ;;  %v19994_v26 = vld [vmem:[%s20276_s19 + $0x88] sm:$0xff]  }
 0x388   : > { %16851 = vmatprep.subr.bf16.mxu0 %v20080_v0  ;;  %17246 = vmatpush3.bf16.msra.mxu1 %v19490_v29  ;;  %v5271_v30 = vor.u32 %v5269_v61, %v5267_v44  ;;  %v5460_v28 = vrot.slane %v19994_v26, 1  ;;  %v7320_v29 = vrot.slane %v14344_v2, 1  ;;  %v19996_v44 = vld [vmem:[%s20276_s19 + $0x90] sm:$0xff]   ;;  %v19506_v61 = vld [vmem:[%s23505_s1 + $0x148] sm:$0xff]   ;;  %v22553_v2 = vrot.slane %v22031_v27, 1 }
 0x389   : > { %17247 = vmatprep.subr.bf16.mxu1 %v20080_v0  ;;  %v5462_v52 = vrot.slane %v19996_v44, 1  ;;  %v7333_v27 = vrot.slane %v22084_v7, 1  ;;  %v19520_v7 = vld [vmem:[%s23505_s1 + $0x200] sm:$0xff]  }
 0x38a   : > { %v5276_v34 = vsel %vm1072_vm1, %v5271_v30, %v5275_v42  ;;  %v5461_v60 = vsel %vm1718_vm2, %v5459_v17, %v5460_v28  ;;  %v19998_v30 = vld [vmem:[%s20276_s19 + $0x98] sm:$0xff]   ;;  %v22561_v26 = vsel %vm1718_vm2, %v7329_v50, %v22553_v2  ;;  %v19521_v44 = vld [vmem:[%s23505_s1 + $0x220] sm:$0xff]  }
 0x38b   : > { %16852 = vmatpush3.bf16.msra.mxu0 %v19486_v36  ;;  %v19995_v36 = vld [vmem:[%s20276_s19 + $0xc8] sm:$0xff]   ;;  %v5463_v62 = vsel %vm1718_vm2, %v5460_v28, %v5462_v52  ;;  %v5473_v28 = vsel %vm1718_vm2, %v22548_v54, %v5472_v19  ;;  %v19546_v19 = vld [vmem:[#allocation5 + $0x30] sm:$0xff]  }
 0x38c   : > { %16853 = vmatprep.subr.bf16.mxu0 %v20080_v0  ;;  %17248 = vmatpush3.bf16.msra.mxu1 %v19492_v56  ;;  %v7321_v56 = vrot.slane %v19995_v36, 1  ;;  %v19517_v36 = vld [vmem:[%s23505_s1 + $0x208] sm:$0xff]  }
 0x38d   : > { %16826 = vmatmul.mubr.bf16.gmra.mrb[40].mxu0 %v22261_v51  ;;  %17249 = vmatprep.subr.bf16.mxu1 %v20080_v0  ;;  %v7136_v51 = vrot.slane %v7134_v5, 1  ;;  %v19507_v5 = vld [vmem:[%s23505_s1 + $0x150] sm:$0xff]  }
 0x38e   : > { %17222 = vmatmul.mubr.bf16.gmra.mrb[40].mxu1 %v22266_v35  ;;  %16829 = vmatprep.mubr.msk.bf16.mxu0 %vm20081_vm0, %v20080_v0  ;;  %v5277_v35 = vshrl.u32 %v22375_v46, 16 }
 0x38f   : > { %17225 = vmatprep.mubr.msk.bf16.mxu1 %vm20081_vm0, %v20080_v0  ;;  %16854 = vmatpush3.bf16.msra.mxu0 %v19491_v38  ;;  %v7137_v13 = vsel %vm1072_vm1, %v7132_v58, %v7136_v51  ;;  %v7140_v18 = vor.u32 %v7138_v49, %v7136_v51  ;;  %v7322_v38 = vsel %vm1718_vm2, %v7320_v29, %v7321_v56  ;;  %v19999_v58 = vld [vmem:[%s20276_s19 + $0xd8] sm:$0xff]   ;;  %v19505_v49 = vld [vmem:[%s23505_s1 + $0x160] sm:$0xff]  }
 0x390   : > { %16855 = vmatprep.subr.bf16.mxu0 %v20080_v0  ;;  %17250 = vmatpush3.bf16.msra.mxu1 %v19495_v39  ;;  %v5279_v15 = vor.u32 %v5277_v35, %v5275_v42  ;;  %v19504_v39 = vld [vmem:[%s23505_s1 + $0x140] sm:$0xff]   ;;  %v5464_v42 = vrot.slane %v19998_v30, 1  ;;  %v7325_v51 = vrot.slane %v19999_v58, 1  ;;  %v19509_v35 = vld [vmem:[%s23505_s1 + $0x158] sm:$0xff]   ;;  %v7334_v29 = vsel %vm1718_vm2, %v22553_v2, %v7333_v27  ;;  %v19532_v30 = vld [vmem:[#allocation5 + $0xc0] sm:$0xff]  }
 0x391   : > { %17251 = vmatprep.subr.bf16.mxu1 %v20080_v0  ;;  %v7145_v24 = vsel %vm1072_vm1, %v7140_v18, %v7144_v21  ;;  %v19508_v18 = vld [vmem:[%s23505_s1 + $0x168] sm:$0xff]   ;;  %v7511_v58 = vrot.slane %v22216_v47, 1 }
 0x392   : > { %v5284_v53 = vsel %vm1072_vm1, %v5279_v15, %v5283_v16  ;;  %v22479_v12 = vsel %vm1718_vm2, %v5462_v52, %v5464_v42  ;;  %v5466_v15 = vrot.slane %v21939_v20, 1  ;;  %v7327_v16 = vrot.slane %v21950_v25, 1  ;;  %v19512_v21 = vld [vmem:[%s23505_s1 + $0x168] sm:$0xff]   ;;  %v19511_v25 = vld [vmem:[%s23505_s1 + $0x170] sm:$0xff]   ;;  %v19526_v52 = vld [vmem:[%s23505_s1 + $0x220] sm:$0xff]  }
 0x393   : > { %16856 = vmatpush3.bf16.msra.mxu0 %v19496_v40  ;;  %v19501_v40 = vld [vmem:[%s23505_s1 + $0x148] sm:$0xff]  }
 0x394   : > { %17252 = vmatpush3.bf16.msra.mxu1 %v19497_v41  ;;  %16885 = vmatprep.subr.bf16.mxu0 %v20080_v0  ;;  %v19997_v41 = vld [vmem:[%s20276_s19 + $0xd0] sm:$0xff]   ;;  %v5467_v20 = vsel %vm1718_vm2, %v5464_v42, %v5466_v15  ;;  %v22510_v22 = vsel %vm1718_vm2, %v7325_v51, %v7327_v16  ;;  %v22539_v23 = vsel %vm1718_vm2, %v7327_v16, %v7329_v50  ;;  %v5650_v42 = vrot.slane %v22211_v45, 1  ;;  %v19539_v16 = vld [vmem:[#allocation5 + $0xf8] sm:$0xff]  }
 0x395   : > { %16830 = vmatmul.mubr.bf16.gmra.mrb[44].mxu0 %v5268_v59  ;;  %17281 = vmatprep.subr.bf16.mxu1 %v20080_v0  ;;  %v7323_v59 = vrot.slane %v19997_v41, 1  ;;  %v19528_v41 = vld [vmem:[%s23505_s1 + $0x228] sm:$0xff]   ;;  %v7513_v45 = vrot.slane %v22258_v9, 1  ;;  %v5828_v50 = vrot.slane %v22403_v55, 1  ;;  %v22736_v55 = vld [vmem:[#allocation2 + $0x18] sm:$0xff] }
 0x396   : > { %17226 = vmatmul.mubr.bf16.gmra.mrb[44].mxu1 %v7129_v1  ;;  %16833 = vmatprep.mubr.msk.bf16.mxu0 %vm20081_vm0, %v20080_v0  ;;  %v19535_v9 = vld [vmem:[#allocation5 + $0xd8] sm:$0xff]  }
 0x397   : > { %17229 = vmatprep.mubr.msk.bf16.mxu1 %vm20081_vm0, %v20080_v0  ;;  %v7324_v1 = vsel %vm1718_vm2, %v7321_v56, %v7323_v59  ;;  %v19522_v56 = vld [vmem:[%s23505_s1 + $0x208] sm:$0xff]   ;;  %v7514_v47 = vsel %vm1718_vm2, %v7511_v58, %v7513_v45 }
 0x398   : > { %v19547_v27 = vld [vmem:[#allocation5 + $0x38] sm:$0xff]  }
 0x39d   : > { %16834 = vmatmul.mubr.bf16.gmra.mrb[48].mxu0 %v5276_v34  ;;  %v19503_v34 = vld [vmem:[%s23505_s1 + $0x158] sm:$0xff]  }
 0x39e   : > { %17230 = vmatmul.mubr.bf16.gmra.mrb[48].mxu1 %v7137_v13  ;;  %16837 = vmatprep.mubr.msk.bf16.mxu0 %vm20081_vm0, %v20080_v0  ;;  %v22482_v13 = vsel %vm1718_vm2, %v7323_v59, %v7325_v51  ;;  %v19527_v59 = vld [vmem:[%s23505_s1 + $0x230] sm:$0xff]  }
 0x39f   : > { %17233 = vmatprep.mubr.msk.bf16.mxu1 %vm20081_vm0, %v20080_v0 }
 0x3a5   : > { %16838 = vmatmul.mubr.bf16.gmra.mrb[52].mxu0 %v5284_v53  ;;  %v5468_v53 = vrot.slane %v21974_v48, 1 }
 0x3a6   : > { %17234 = vmatmul.mubr.bf16.gmra.mrb[52].mxu1 %v7145_v24  ;;  %16857 = vmatprep.mubr.msk.bf16.mxu0 %vm20081_vm0, %v20080_v0  ;;  %v19515_v24 = vld [vmem:[%s23505_s1 + $0x178] sm:$0xff]  }
 0x3a7   : > { %17253 = vmatprep.mubr.msk.bf16.mxu1 %vm20081_vm0, %v20080_v0  ;;  %v22536_v48 = vsel %vm1718_vm2, %v5466_v15, %v5468_v53  ;;  %v22557_v17 = vsel %vm1718_vm2, %v5468_v53, %v22548_v54  ;;  %v19538_v15 = vld [vmem:[#allocation5 + $0xf0] sm:$0xff]  }
 0x3ad   : > { %16858 = vmatmul.mubr.bf16.vlgmr.msra.gmra.mrb[28].mxu0 %v5461_v60  ;;  %v19518_v60 = vld [vmem:[%s23505_s1 + $0x210] sm:$0xff]  }
 0x3ae   : > { %17254 = vmatmul.mubr.bf16.vlgmr.msra.gmra.mrb[28].mxu1 %v7322_v38  ;;  %16886 = vmatpush3.bf16.msra.mxu0 %v19500_v37  ;;  %v19523_v37 = vld [vmem:[%s23505_s1 + $0x210] sm:$0xff]   ;;  %v19519_v38 = vld [vmem:[%s23505_s1 + $0x218] sm:$0xff]  }
 0x3af   : > { %16861 = vmatprep.mubr.msk.bf16.mxu0 %vm20081_vm0, %v20080_v0  ;;  %16887 = vmatprep.subr.bf16.mxu0 %v20080_v0 }
 0x3b0   : > { %17257 = vmatprep.mubr.msk.bf16.mxu1 %vm20081_vm0, %v20080_v0  ;;  %17282 = vmatpush3.bf16.msra.mxu1 %v19504_v39  ;;  %v19525_v39 = vld [vmem:[%s23505_s1 + $0x218] sm:$0xff]  }
 0x3b1   : > { %17283 = vmatprep.subr.bf16.mxu1 %v20080_v0 }
 0x3b2   : > { %16888 = vmatpush3.bf16.msra.mxu0 %v19501_v40  ;;  %v19524_v40 = vld [vmem:[%s23505_s1 + $0x228] sm:$0xff]  }
 0x3b3   : > { %16889 = vmatprep.subr.bf16.mxu0 %v20080_v0 }
 0x3b4   : > { %17284 = vmatpush3.bf16.msra.mxu1 %v19506_v61  ;;  %v19529_v61 = vld [vmem:[%s23505_s1 + $0x230] sm:$0xff]  }
 0x3b5   : > { %16862 = vmatmul.mubr.bf16.gmra.mrb[32].mxu0 %v5463_v62  ;;  %17285 = vmatprep.subr.bf16.mxu1 %v20080_v0  ;;  %v5648_v62 = vrot.slane %v22178_v43, 1 }
 0x3b6   : > { %17258 = vmatmul.mubr.bf16.gmra.mrb[32].mxu1 %v7324_v1  ;;  %16865 = vmatprep.mubr.msk.bf16.mxu0 %vm20081_vm0, %v20080_v0  ;;  %v7509_v1 = vrot.slane %v22184_v33, 1 }
 0x3b7   : > { %16890 = vmatpush3.bf16.msra.mxu0 %v19502_v3  ;;  %17261 = vmatprep.mubr.msk.bf16.mxu1 %vm20081_vm0, %v20080_v0  ;;  %v19530_v3 = vld [vmem:[%s23505_s1 + $0x238] sm:$0xff]   ;;  %v5649_v43 = vsel %vm1718_vm2, %v22548_v54, %v5648_v62  ;;  %v5651_v51 = vsel %vm1718_vm2, %v5648_v62, %v5650_v42  ;;  %v22739_v54 = vld [vmem:[#allocation2 + $0x20] sm:$0xff] }
 0x3b8   : > { %16891 = vmatprep.subr.bf16.mxu0 %v20080_v0  ;;  %17286 = vmatpush3.bf16.msra.mxu1 %v19507_v5  ;;  %v19531_v5 = vld [vmem:[%s23505_s1 + $0x238] sm:$0xff]   ;;  %v7510_v33 = vsel %vm1718_vm2, %v22553_v2, %v7509_v1  ;;  %v22742_v2 = vld [vmem:[#allocation2] sm:$0xff] }
 0x3b9   : > { %17287 = vmatprep.subr.bf16.mxu1 %v20080_v0  ;;  %v19564_v62 = vld [vmem:[#allocation5 + $0x68] sm:$0xff]  }
 0x3bb   : > { %16892 = vmatpush3.bf16.msra.mxu0 %v19503_v34  ;;  %v7512_v34 = vsel %vm1718_vm2, %v7509_v1, %v7511_v58  ;;  %v19565_v1 = vld [vmem:[#allocation5 + $0xd8] sm:$0xff]  }
 0x3bc   : > { %16893 = vmatprep.subr.bf16.mxu0 %v20080_v0  ;;  %17288 = vmatpush3.bf16.msra.mxu1 %v19509_v35  ;;  %v5652_v35 = vrot.slane %v22252_v6, 1  ;;  %v19534_v6 = vld [vmem:[#allocation5 + $0xd0] sm:$0xff]  }
 0x3bd   : > { %16866 = vmatmul.mubr.bf16.gmra.mrb[36].mxu0 %v22479_v12  ;;  %17289 = vmatprep.subr.bf16.mxu1 %v20080_v0 }
 0x3be   : > { %17262 = vmatmul.mubr.bf16.gmra.mrb[36].mxu1 %v22482_v13  ;;  %16869 = vmatprep.mubr.msk.bf16.mxu0 %vm20081_vm0, %v20080_v0 }
 0x3bf   : > { %17265 = vmatprep.mubr.msk.bf16.mxu1 %vm20081_vm0, %v20080_v0  ;;  %16894 = vmatpush3.bf16.msra.mxu0 %v19505_v49  ;;  %v19536_v49 = vld [vmem:[#allocation5 + $0xe0] sm:$0xff]  }
 0x3c0   : > { %16895 = vmatprep.subr.bf16.mxu0 %v20080_v0  ;;  %17290 = vmatpush3.bf16.msra.mxu1 %v19510_v63  ;;  %v19537_v63 = vld [vmem:[#allocation5 + $0xe8] sm:$0xff]  }
 0x3c1   : > { %17291 = vmatprep.subr.bf16.mxu1 %v20080_v0 }
 0x3c3   : > { %16896 = vmatpush3.bf16.msra.mxu0 %v19508_v18  ;;  %v5824_v18 = vrot.slane %v22342_v31, 1  ;;  %v5826_v31 = vrot.slane %v22375_v46, 1  ;;  %v7689_v46 = vrot.slane %v22408_v10, 1  ;;  %v19543_v10 = vld [vmem:[#allocation5 + $0x18] sm:$0xff]  }
 0x3c4   : > { %16897 = vmatprep.subr.bf16.mxu0 %v20080_v0  ;;  %17292 = vmatpush3.bf16.msra.mxu1 %v19512_v21  ;;  %v7685_v21 = vrot.slane %v22348_v32, 1  ;;  %v7687_v32 = vrot.slane %v22380_v14, 1 }
 0x3c5   : > { %16870 = vmatmul.mubr.bf16.gmra.mrb[40].mxu0 %v5467_v20  ;;  %17293 = vmatprep.subr.bf16.mxu1 %v20080_v0 }
 0x3c6   : > { %17266 = vmatmul.mubr.bf16.gmra.mrb[40].mxu1 %v22510_v22  ;;  %16873 = vmatprep.mubr.msk.bf16.mxu0 %vm20081_vm0, %v20080_v0  ;;  %v7688_v53 = vsel %vm1718_vm2, %v7685_v21, %v7687_v32  ;;  %v7690_v14 = vsel %vm1718_vm2, %v7687_v32, %v7689_v46 }
 0x3c7   : > { %17269 = vmatprep.mubr.msk.bf16.mxu1 %vm20081_vm0, %v20080_v0  ;;  %16898 = vmatpush3.bf16.msra.mxu0 %v19511_v25  ;;  %v7686_v25 = vsel %vm1718_vm2, %v7511_v58, %v7685_v21  ;;  %v19576_v58 = vld [vmem:[#allocation5 + $0xf8] sm:$0xff]  }
 0x3c8   : > { %16899 = vmatprep.subr.bf16.mxu0 %v20080_v0  ;;  %17294 = vmatpush3.bf16.msra.mxu1 %v19513_v8  ;;  %v5827_v8 = vsel %vm1718_vm2, %v5824_v18, %v5826_v31 }
 0x3c9   : > { %17295 = vmatprep.subr.bf16.mxu1 %v20080_v0 }
 0x3cb   : > { %16900 = vmatpush3.bf16.msra.mxu0 %v19514_v11  ;;  %v5829_v11 = vsel %vm1718_vm2, %v5826_v31, %v5828_v50 }
 0x3cc   : > { %17296 = vmatpush3.bf16.msra.mxu1 %v19515_v24  ;;  %16929 = vmatprep.subr.bf16.mxu0 %v20080_v0  ;;  %v22730_v24 = vld [vmem:[#allocation2 + $0x8] sm:$0xff] }
 0x3cd   : > { %16874 = vmatmul.mubr.bf16.gmra.mrb[44].mxu0 %v22536_v48  ;;  %17325 = vmatprep.subr.bf16.mxu1 %v20080_v0 }
 0x3ce   : > { %17270 = vmatmul.mubr.bf16.gmra.mrb[44].mxu1 %v22539_v23  ;;  %16877 = vmatprep.mubr.msk.bf16.mxu0 %vm20081_vm0, %v20080_v0 }
 0x3cf   : > { %17273 = vmatprep.mubr.msk.bf16.mxu1 %vm20081_vm0, %v20080_v0 }
 0x3d5   : > { %16878 = vmatmul.mubr.bf16.gmra.mrb[48].mxu0 %v22557_v17 }
 0x3d6   : > { %17274 = vmatmul.mubr.bf16.gmra.mrb[48].mxu1 %v22561_v26  ;;  %16881 = vmatprep.mubr.msk.bf16.mxu0 %vm20081_vm0, %v20080_v0 }
 0x3d7   : > { %17277 = vmatprep.mubr.msk.bf16.mxu1 %vm20081_vm0, %v20080_v0 }
 0x3dd   : > { %16882 = vmatmul.mubr.bf16.gmra.mrb[52].mxu0 %v5473_v28  ;;  %v19548_v28 = vld [vmem:[#allocation5 + $0x180] sm:$0xff]  }
 0x3de   : > { %17278 = vmatmul.mubr.bf16.gmra.mrb[52].mxu1 %v7334_v29  ;;  %16901 = vmatprep.mubr.msk.bf16.mxu0 %vm20081_vm0, %v20080_v0  ;;  %v19549_v29 = vld [vmem:[#allocation5 + $0x188] sm:$0xff]  }
 0x3df   : > { %17297 = vmatprep.mubr.msk.bf16.mxu1 %vm20081_vm0, %v20080_v0 }
 0x3e5   : > { %16902 = vmatmul.mubr.bf16.vlgmr.msra.gmra.mrb[28].mxu0 %v22479_v12  ;;  %v5653_v12 = vsel %vm1718_vm2, %v5650_v42, %v5652_v35 }
 0x3e6   : > { %17298 = vmatmul.mubr.bf16.vlgmr.msra.gmra.mrb[28].mxu1 %v22482_v13  ;;  %16930 = vmatpush3.bf16.msra.mxu0 %v19516_v4  ;;  %v19533_v13 = vld [vmem:[#allocation5 + $0xc8] sm:$0xff]   ;;  %v19550_v4 = vld [vmem:[#allocation5 + $0x190] sm:$0xff]  }
 0x3e7   : > { %16905 = vmatprep.mubr.msk.bf16.mxu0 %vm20081_vm0, %v20080_v0  ;;  %16931 = vmatprep.subr.bf16.mxu0 %v20080_v0 }
 0x3e8   : > { %17301 = vmatprep.mubr.msk.bf16.mxu1 %vm20081_vm0, %v20080_v0  ;;  %17326 = vmatpush3.bf16.msra.mxu1 %v19520_v7  ;;  %v19551_v7 = vld [vmem:[#allocation5 + $0x198] sm:$0xff]  }
 0x3e9   : > { %17327 = vmatprep.subr.bf16.mxu1 %v20080_v0 }
 0x3ea   : > { %16932 = vmatpush3.bf16.msra.mxu0 %v19517_v36  ;;  %v19552_v36 = vld [vmem:[#allocation5 + $0x1a0] sm:$0xff]  }
 0x3eb   : > { %16933 = vmatprep.subr.bf16.mxu0 %v20080_v0 }
 0x3ec   : > { %17328 = vmatpush3.bf16.msra.mxu1 %v19522_v56  ;;  %v19553_v56 = vld [vmem:[#allocation5 + $0x1a8] sm:$0xff]  }
 0x3ed   : > { %16906 = vmatmul.mubr.bf16.gmra.mrb[32].mxu0 %v5467_v20  ;;  %17329 = vmatprep.subr.bf16.mxu1 %v20080_v0  ;;  %v19540_v20 = vld [vmem:[#allocation5] sm:$0xff]  }
 0x3ee   : > { %17302 = vmatmul.mubr.bf16.gmra.mrb[32].mxu1 %v22510_v22  ;;  %16909 = vmatprep.mubr.msk.bf16.mxu0 %vm20081_vm0, %v20080_v0  ;;  %v5825_v22 = vsel %vm1718_vm2, %v5650_v42, %v5824_v18  ;;  %v19573_v42 = vld [vmem:[#allocation5 + $0xf0] sm:$0xff]  }
 0x3ef   : > { %16934 = vmatpush3.bf16.msra.mxu0 %v19518_v60  ;;  %17305 = vmatprep.mubr.msk.bf16.mxu1 %vm20081_vm0, %v20080_v0  ;;  %v19554_v60 = vld [vmem:[#allocation5 + $0x1b0] sm:$0xff]  }
 0x3f0   : > { %16935 = vmatprep.subr.bf16.mxu0 %v20080_v0  ;;  %17330 = vmatpush3.bf16.msra.mxu1 %v19523_v37  ;;  %v19555_v37 = vld [vmem:[#allocation5 + $0x1b8] sm:$0xff]  }
 0x3f1   : > { %17331 = vmatprep.subr.bf16.mxu1 %v20080_v0 }
 0x3f3   : > { %16936 = vmatpush3.bf16.msra.mxu0 %v19519_v38  ;;  %v19556_v38 = vld [vmem:[#allocation5 + $0x40] sm:$0xff]  }
 0x3f4   : > { %16937 = vmatprep.subr.bf16.mxu0 %v20080_v0  ;;  %17332 = vmatpush3.bf16.msra.mxu1 %v19525_v39  ;;  %v19557_v39 = vld [vmem:[#allocation5 + $0xc0] sm:$0xff]  }
 0x3f5   : > { %16910 = vmatmul.mubr.bf16.gmra.mrb[36].mxu0 %v22536_v48  ;;  %17333 = vmatprep.subr.bf16.mxu1 %v20080_v0 }
 0x3f6   : > { %17306 = vmatmul.mubr.bf16.gmra.mrb[36].mxu1 %v22539_v23  ;;  %16913 = vmatprep.mubr.msk.bf16.mxu0 %vm20081_vm0, %v20080_v0 }
 0x3f7   : > { %17309 = vmatprep.mubr.msk.bf16.mxu1 %vm20081_vm0, %v20080_v0  ;;  %16938 = vmatpush3.bf16.msra.mxu0 %v19521_v44  ;;  %v19558_v44 = vld [vmem:[#allocation5 + $0x48] sm:$0xff]  }
 0x3f8   : > { %16939 = vmatprep.subr.bf16.mxu0 %v20080_v0  ;;  %17334 = vmatpush3.bf16.msra.mxu1 %v19526_v52  ;;  %v19559_v52 = vld [vmem:[#allocation5 + $0x50] sm:$0xff]  }
 0x3f9   : > { %17335 = vmatprep.subr.bf16.mxu1 %v20080_v0 }
 0x3fb   : > { %16940 = vmatpush3.bf16.msra.mxu0 %v19524_v40  ;;  %v19561_v40 = vld [vmem:[#allocation5 + $0x58] sm:$0xff]  }
 0x3fc   : > { %16941 = vmatprep.subr.bf16.mxu0 %v20080_v0  ;;  %17336 = vmatpush3.bf16.msra.mxu1 %v19528_v41  ;;  %v19563_v41 = vld [vmem:[#allocation5 + $0x60] sm:$0xff]  }
 0x3fd   : > { %16914 = vmatmul.mubr.bf16.gmra.mrb[40].mxu0 %v22557_v17  ;;  %17337 = vmatprep.subr.bf16.mxu1 %v20080_v0 }
 0x3fe   : > { %17310 = vmatmul.mubr.bf16.gmra.mrb[40].mxu1 %v22561_v26  ;;  %16917 = vmatprep.mubr.msk.bf16.mxu0 %vm20081_vm0, %v20080_v0 }
 0x3ff   : > { %17313 = vmatprep.mubr.msk.bf16.mxu1 %vm20081_vm0, %v20080_v0  ;;  %16942 = vmatpush3.bf16.msra.mxu0 %v19527_v59  ;;  %v19560_v59 = vld [vmem:[#allocation5 + $0xc8] sm:$0xff]  }
 0x400   : > { %16943 = vmatprep.subr.bf16.mxu0 %v20080_v0  ;;  %17338 = vmatpush3.bf16.msra.mxu1 %v19529_v61  ;;  %v19562_v61 = vld [vmem:[#allocation5 + $0xd0] sm:$0xff]  }
 0x401   : > { %17339 = vmatprep.subr.bf16.mxu1 %v20080_v0 }
 0x403   : > { %16944 = vmatpush3.bf16.msra.mxu0 %v19530_v3  ;;  %v19566_v3 = vld [vmem:[#allocation5 + $0x70] sm:$0xff]  }
 0x404   : > { %17340 = vmatpush3.bf16.msra.mxu1 %v19531_v5  ;;  %17369 = vmatprep.subr.bf16.mxu0 %v19532_v30  ;;  %v19567_v5 = vld [vmem:[#allocation5 + $0x78] sm:$0xff]  }
 0x405   : > { %16918 = vmatmul.mubr.bf16.gmra.mrb[44].mxu0 %v5649_v43  ;;  %17585 = vmatprep.subr.bf16.mxu1 %v19557_v39 }
 0x406   : > { %17314 = vmatmul.mubr.bf16.gmra.mrb[44].mxu1 %v7510_v33  ;;  %16921 = vmatprep.mubr.msk.bf16.mxu0 %vm20081_vm0, %v20080_v0 }
 0x407   : > { %17317 = vmatprep.mubr.msk.bf16.mxu1 %vm20081_vm0, %v20080_v0 }
 0x40d   : > { %16922 = vmatmul.mubr.bf16.gmra.mrb[48].mxu0 %v5651_v51 }
 0x40e   : > { %17318 = vmatmul.mubr.bf16.gmra.mrb[48].mxu1 %v7512_v34  ;;  %16925 = vmatprep.mubr.msk.bf16.mxu0 %vm20081_vm0, %v20080_v0 }
 0x40f   : > { %17321 = vmatprep.mubr.msk.bf16.mxu1 %vm20081_vm0, %v20080_v0 }
 0x415   : > { %16926 = vmatmul.mubr.bf16.gmra.mrb[52].mxu0 %v5653_v12 }
 0x416   : > { %17322 = vmatmul.mubr.bf16.gmra.mrb[52].mxu1 %v7514_v47  ;;  %16945 = vmatprep.mubr.msk.bf16.mxu0 %vm20081_vm0, %v20080_v0 }
 0x417   : > { %17341 = vmatprep.mubr.msk.bf16.mxu1 %vm20081_vm0, %v20080_v0 }
 0x41d   : > { %16946 = vmatmul.mubr.bf16.vlgmr.msra.gmra.mrb[28].mxu0 %v22536_v48  ;;  %v19541_v48 = vld [vmem:[#allocation5 + $0x8] sm:$0xff]  }
 0x41e   : > { %17342 = vmatmul.mubr.bf16.vlgmr.msra.gmra.mrb[28].mxu1 %v22539_v23  ;;  %16949 = vmatprep.mubr.msk.bf16.mxu0 %vm20081_vm0, %v20080_v0  ;;  %v22733_v23 = vld [vmem:[#allocation2 + $0x10] sm:$0xff] }
 0x41f   : > { %17345 = vmatprep.mubr.msk.bf16.mxu1 %vm20081_vm0, %v20080_v0  ;;  %17370 = vmatpush3.bf16.msra.mxu0 %v19532_v30  ;;  %v22751_v30 = vld [vmem:[#allocation5 + $0x100] sm:$0xff]  }
 0x420   : > { %17371 = vmatprep.subr.bf16.mxu0 %v19533_v13  ;;  %17586 = vmatpush3.bf16.msra.mxu1 %v19557_v39 }
 0x421   : > { %17587 = vmatprep.subr.bf16.mxu1 %v19560_v59 }
 0x423   : > { %17372 = vmatpush3.bf16.msra.mxu0 %v19533_v13 }
 0x424   : > { %17373 = vmatprep.subr.bf16.mxu0 %v19534_v6  ;;  %17588 = vmatpush3.bf16.msra.mxu1 %v19560_v59 }
 0x425   : > { %16950 = vmatmul.mubr.bf16.gmra.mrb[32].mxu0 %v22557_v17  ;;  %v19544_v17 = vld [vmem:[#allocation5 + $0x20] sm:$0xff]   ;;  %17589 = vmatprep.subr.bf16.mxu1 %v19562_v61 }
 0x426   : > { %17346 = vmatmul.mubr.bf16.gmra.mrb[32].mxu1 %v22561_v26  ;;  %16953 = vmatprep.mubr.msk.bf16.mxu0 %vm20081_vm0, %v20080_v0  ;;  %v19545_v26 = vld [vmem:[#allocation5 + $0x28] sm:$0xff]  }
 0x427   : > { %17349 = vmatprep.mubr.msk.bf16.mxu1 %vm20081_vm0, %v20080_v0  ;;  %17374 = vmatpush3.bf16.msra.mxu0 %v19534_v6 }
 0x428   : > { %17375 = vmatprep.subr.bf16.mxu0 %v19535_v9  ;;  %17590 = vmatpush3.bf16.msra.mxu1 %v19562_v61 }
 0x429   : > { %17591 = vmatprep.subr.bf16.mxu1 %v19565_v1 }
 0x42b   : > { %17376 = vmatpush3.bf16.msra.mxu0 %v19535_v9 }
 0x42c   : > { %17377 = vmatprep.subr.bf16.mxu0 %v19536_v49  ;;  %17592 = vmatpush3.bf16.msra.mxu1 %v19565_v1 }
 0x42d   : > { %16954 = vmatmul.mubr.bf16.gmra.mrb[36].mxu0 %v5649_v43  ;;  %v19568_v43 = vld [vmem:[#allocation5 + $0xe0] sm:$0xff]  }
 0x42e   : > { %17350 = vmatmul.mubr.bf16.gmra.mrb[36].mxu1 %v7510_v33  ;;  %16957 = vmatprep.mubr.msk.bf16.mxu0 %vm20081_vm0, %v20080_v0  ;;  %v19571_v33 = vld [vmem:[#allocation5 + $0xe8] sm:$0xff]  }
 0x42f   : > { %17353 = vmatprep.mubr.msk.bf16.mxu1 %vm20081_vm0, %v20080_v0  ;;  %17378 = vmatpush3.bf16.msra.mxu0 %v19536_v49 }
 0x430   : > { %17379 = vmatprep.subr.bf16.mxu0 %v19537_v63  ;;  %17593 = vmatprep.subr.bf16.mxu1 %v19568_v43 }
 0x431   : > { %17594 = vmatpush3.bf16.msra.mxu1 %v19568_v43 }
 0x432   : > { %17595 = vmatprep.subr.bf16.mxu1 %v19571_v33 }
 0x433   : > { %17380 = vmatpush3.bf16.msra.mxu0 %v19537_v63 }
 0x434   : > { %17381 = vmatprep.subr.bf16.mxu0 %v19538_v15 }
 0x435   : > { %16958 = vmatmul.mubr.bf16.gmra.mrb[40].mxu0 %v5651_v51  ;;  %17596 = vmatpush3.bf16.msra.mxu1 %v19571_v33  ;;  %v22754_v51 = vld [vmem:[#allocation5] sm:$0xff]  }
 0x436   : > { %17354 = vmatmul.mubr.bf16.gmra.mrb[40].mxu1 %v7512_v34  ;;  %16961 = vmatprep.mubr.msk.bf16.mxu0 %vm20081_vm0, %v20080_v0 }
 0x437   : > { %17357 = vmatprep.mubr.msk.bf16.mxu1 %vm20081_vm0, %v20080_v0  ;;  %17382 = vmatpush3.bf16.msra.mxu0 %v19538_v15 }
 0x438   : > { %17383 = vmatprep.subr.bf16.mxu0 %v19539_v16  ;;  %17597 = vmatprep.subr.bf16.mxu1 %v19573_v42 }
 0x439   : > { %17598 = vmatpush3.bf16.msra.mxu1 %v19573_v42 }
 0x43a   : > { %17599 = vmatprep.subr.bf16.mxu1 %v19576_v58 }
 0x43b   : > { %17384 = vmatpush3.bf16.msra.mxu0 %v19539_v16 }
 0x43c   : > { %17393 = vmatprep.subr.bf16.mxu0 %v19540_v20 }
 0x43d   : > { %16962 = vmatmul.mubr.bf16.gmra.mrb[44].mxu0 %v5825_v22  ;;  %17600 = vmatpush3.bf16.msra.mxu1 %v19576_v58 }
 0x43e   : > { %17358 = vmatmul.mubr.bf16.gmra.mrb[44].mxu1 %v7686_v25  ;;  %16965 = vmatprep.mubr.msk.bf16.mxu0 %vm20081_vm0, %v20080_v0 }
 0x43f   : > { %17361 = vmatprep.mubr.msk.bf16.mxu1 %vm20081_vm0, %v20080_v0  ;;  %17609 = vmatprep.subr.bf16.mxu1 %v22754_v51 }
 0x445   : > { %16966 = vmatmul.mubr.bf16.gmra.mrb[48].mxu0 %v5827_v8 }
 0x446   : > { %17362 = vmatmul.mubr.bf16.gmra.mrb[48].mxu1 %v7688_v53  ;;  %16969 = vmatprep.mubr.msk.bf16.mxu0 %vm20081_vm0, %v20080_v0 }
 0x447   : > { %17365 = vmatprep.mubr.msk.bf16.mxu1 %vm20081_vm0, %v20080_v0  ;;  %v19542_v0 = vld [vmem:[#allocation5 + $0x10] sm:$0xff]  }
 0x44d   : > { %16970 = vmatmul.mubr.bf16.gmra.mrb[52].mxu0 %v5829_v11 }
 0x44e   : > { %17366 = vmatmul.mubr.bf16.gmra.mrb[52].mxu1 %v7690_v14  ;;  %17385 = vmatprep.mubr.bf16.mxu0 %v22730_v24 }
 0x455   : > { %17386 = vmatmul.mubr.bf16.vlgmr.msra.gmra.mrb[56].mxu0 %v22733_v23 }
 0x456   : > { %17394 = vmatpush3.bf16.msra.mxu0 %v19540_v20  ;;  %17389 = vmatprep.mubr.bf16.mxu0 %v22736_v55 }
 0x457   : > { %17395 = vmatprep.subr.bf16.mxu0 %v19541_v48 }
 0x45a   : > { %17396 = vmatpush3.bf16.msra.mxu0 %v19541_v48 }
 0x45b   : > { %17397 = vmatprep.subr.bf16.mxu0 %v19542_v0 }
 0x45d   : > { %17390 = vmatmul.mubr.bf16.gmra.mrb[60].mxu0 %v22739_v54 }
 0x45e   : > { %17398 = vmatpush3.bf16.msra.mxu0 %v19542_v0  ;;  %17409 = vmatprep.mubr.bf16.mxu0 %v22742_v2 }
 0x45f   : > { %17399 = vmatprep.subr.bf16.mxu0 %v19543_v10 }
 0x462   : > { %17400 = vmatpush3.bf16.msra.mxu0 %v19543_v10 }
 0x463   : > { %17401 = vmatprep.subr.bf16.mxu0 %v19544_v17 }
 0x466   : > { %17402 = vmatpush3.bf16.msra.mxu0 %v19544_v17 }
 0x467   : > { %17403 = vmatprep.subr.bf16.mxu0 %v19545_v26 }
 0x46a   : > { %17404 = vmatpush3.bf16.msra.mxu0 %v19545_v26 }
 0x46b   : > { %17405 = vmatprep.subr.bf16.mxu0 %v19546_v19 }
 0x46e   : > { %17406 = vmatpush3.bf16.msra.mxu0 %v19546_v19 }
 0x46f   : > { %17407 = vmatprep.subr.bf16.mxu0 %v19547_v27 }
 0x472   : > { %17408 = vmatpush3.bf16.msra.mxu0 %v19547_v27 }
 0x473   : > { %17417 = vmatprep.subr.bf16.mxu0 %v19548_v28 }
 0x475   : > { %17410 = vmatmul.mubr.bf16.vlgmr.msra.gmra.mrb[56].mxu0 %v22730_v24 }
 0x476   : > { %17413 = vmatprep.mubr.bf16.mxu0 %v22733_v23  ;;  %17418 = vmatpush3.bf16.msra.mxu0 %v19548_v28 }
 0x477   : > { %17419 = vmatprep.subr.bf16.mxu0 %v19549_v29 }
 0x47a   : > { %17420 = vmatpush3.bf16.msra.mxu0 %v19549_v29 }
 0x47b   : > { %17421 = vmatprep.subr.bf16.mxu0 %v19550_v4 }
 0x47d   : > { %17414 = vmatmul.mubr.bf16.gmra.mrb[60].mxu0 %v22736_v55 }
 0x47e   : > { %17422 = vmatpush3.bf16.msra.mxu0 %v19550_v4  ;;  %17433 = vmatprep.mubr.bf16.mxu0 %v22733_v23 }
 0x47f   : > { %17423 = vmatprep.subr.bf16.mxu0 %v19551_v7 }
 0x482   : > { %17424 = vmatpush3.bf16.msra.mxu0 %v19551_v7 }
 0x483   : > { %17425 = vmatprep.subr.bf16.mxu0 %v19552_v36 }
 0x486   : > { %17426 = vmatpush3.bf16.msra.mxu0 %v19552_v36 }
 0x487   : > { %17427 = vmatprep.subr.bf16.mxu0 %v19553_v56 }
 0x48a   : > { %17428 = vmatpush3.bf16.msra.mxu0 %v19553_v56 }
 0x48b   : > { %17429 = vmatprep.subr.bf16.mxu0 %v19554_v60 }
 0x48e   : > { %17430 = vmatpush3.bf16.msra.mxu0 %v19554_v60 }
 0x48f   : > { %17431 = vmatprep.subr.bf16.mxu0 %v19555_v37 }
 0x492   : > { %17432 = vmatpush3.bf16.msra.mxu0 %v19555_v37  ;;  %v22760_v37 = vld [vmem:[%s23506_s2] ss:$0 sm:$0xff] }
 0x493   : > { %17441 = vmatprep.subr.bf16.mxu0 %v19556_v38 }
 0x495   : > { %17434 = vmatmul.mubr.bf16.vlgmr.msra.gmra.mrb[56].mxu0 %v22736_v55 }
 0x496   : > { %17437 = vmatprep.mubr.bf16.mxu0 %v22739_v54  ;;  %17442 = vmatpush3.bf16.msra.mxu0 %v19556_v38 }
 0x497   : > { %17443 = vmatprep.subr.bf16.mxu0 %v19558_v44 }
 0x49a   : > { %17444 = vmatpush3.bf16.msra.mxu0 %v19558_v44 }
 0x49b   : > { %17445 = vmatprep.subr.bf16.mxu0 %v19559_v52 }
 0x49e   : > { %17446 = vmatpush3.bf16.msra.mxu0 %v19559_v52 }
 0x49f   : > { %17447 = vmatprep.subr.bf16.mxu0 %v19561_v40 }
 0x4a2   : > { %17448 = vmatpush3.bf16.msra.mxu0 %v19561_v40 }
 0x4a3   : > { %17449 = vmatprep.subr.bf16.mxu0 %v19563_v41 }
 0x4a6   : > { %17450 = vmatpush3.bf16.msra.mxu0 %v19563_v41 }
 0x4a7   : > { %17451 = vmatprep.subr.bf16.mxu0 %v19564_v62 }
 0x4aa   : > { %17452 = vmatpush3.bf16.msra.mxu0 %v19564_v62 }
 0x4ab   : > { %17453 = vmatprep.subr.bf16.mxu0 %v19566_v3 }
 0x4ae   : > { %17454 = vmatpush3.bf16.msra.mxu0 %v19566_v3 }
 0x4af   : > { %17455 = vmatprep.subr.bf16.mxu0 %v19567_v5 }
 0x4b2   : > { %17456 = vmatpush3.bf16.msra.mxu0 %v19567_v5 }
 0x4b3   : > { %17465 = vmatprep.subr.bf16.mxu0 %v22751_v30 }
 0x4f0   : > { %v5915_v34 = vpop.f32.mrb[28].mxu0 }
 0x4f1   : > { %5984 = vst [vmem:[#allocation4] sm:$0xff] %v5915_v34  ;;  %v7776_v35 = vpop.f32.mrb[28].mxu1  ;;  %v16947_v45 = vpop.f32.mrb[29].mxu0 }
 0x4f2   : > { %v17343_v12 = vpop.f32.mrb[29].mxu1  ;;  %v5918_v47 = vpop.f32.mrb[30].mxu0 }
 0x4f3   : > { %5985 = vst [vmem:[#allocation4 + $0x8] sm:$0xff] %v5918_v47  ;;  %v7779_v13 = vpop.f32.mrb[30].mxu1  ;;  %v16948_v6 = vpop.f32.mrb[31].mxu0 }
 0x4f4   : > { %v17344_v9 = vpop.f32.mrb[31].mxu1  ;;  %v8322_v6 = vshll.u32 %v22742_v2, 16 }
 0x4f8   : > { %v5923_v49 = vpop.f32.mrb[32].mxu0 }
 0x4f9   : > { %v7784_v63 = vpop.f32.mrb[32].mxu1  ;;  %v16951_v15 = vpop.f32.mrb[33].mxu0  ;;  %v6016_v49 = vld [vmem:[#allocation2 + $0x28] sm:$0x1f] }
 0x4fa   : > { %v5998_v16 = vld [vmem:[#allocation4] ss:$2 sm:$0xff]  ;;  %v5999_v18 = vld [vmem:[#allocation4 + $0x1] ss:$2 sm:$0xff]  ;;  %v17347_v21 = vpop.f32.mrb[33].mxu1  ;;  %v5926_v20 = vpop.f32.mrb[34].mxu0 }
 0x4fb   : > { %7845 = vst [vmem:[#allocation4] sm:$0xff] %v7776_v35  ;;  %7846 = vst [vmem:[#allocation4 + $0x8] sm:$0xff] %v7779_v13  ;;  %v7787_v22 = vpop.f32.mrb[34].mxu1  ;;  %v16952_v25 = vpop.f32.mrb[35].mxu0  ;;  %v6000_v7 = vmax.f32 %v5998_v16, %v5999_v18 }
 0x4fc   : > { %v17348_v31 = vpop.f32.mrb[35].mxu1 }
 0x500   : > { %v5931_v32 = vpop.f32.mrb[36].mxu0 }
 0x501   : > { %5988 = vst [vmem:[#allocation4 + $0x20] sm:$0xff] %v5931_v32  ;;  %v7792_v8 = vpop.f32.mrb[36].mxu1  ;;  %v16955_v53 = vpop.f32.mrb[37].mxu0 }
 0x502   : > { %v17351_v50 = vpop.f32.mrb[37].mxu1  ;;  %v5934_v46 = vpop.f32.mrb[38].mxu0  ;;  %v7859_v39 = vld [vmem:[#allocation4] ss:$2 sm:$0xff]  ;;  %v7860_v44 = vld [vmem:[#allocation4 + $0x1] ss:$2 sm:$0xff] }
 0x503   : > { %5989 = vst [vmem:[#allocation4 + $0x28] sm:$0xff] %v5934_v46  ;;  %v7795_v11 = vpop.f32.mrb[38].mxu1  ;;  %v16956_v14 = vpop.f32.mrb[39].mxu0  ;;  %v7861_v42 = vmax.f32 %v7859_v39, %v7860_v44  ;;  %v8320_v50 = vshrl.u32 %v22742_v2, 16  ;;  %v8324_v46 = vrot.slane %v8322_v6, 1 }
 0x504   : > { %v17352_v48 = vpop.f32.mrb[39].mxu1  ;;  %v8327_v14 = vshll.u32 %v22730_v24, 16 }
 0x508   : > { %v5939_v0 = vpop.f32.mrb[40].mxu0 }
 0x509   : > { %v7800_v10 = vpop.f32.mrb[40].mxu1  ;;  %v16959_v17 = vpop.f32.mrb[41].mxu0 }
 0x50a   : > { %v6001_v26 = vld [vmem:[#allocation4 + $0x20] ss:$2 sm:$0xff]  ;;  %v6002_v19 = vld [vmem:[#allocation4 + $0x21] ss:$2 sm:$0xff]  ;;  %v17355_v27 = vpop.f32.mrb[41].mxu1  ;;  %v5942_v28 = vpop.f32.mrb[42].mxu0  ;;  %v8325_v17 = vor.u32 %v8324_v46, %v8320_v50 }
 0x50b   : > { %7849 = vst [vmem:[#allocation4 + $0x20] sm:$0xff] %v7792_v8  ;;  %7850 = vst [vmem:[#allocation4 + $0x28] sm:$0xff] %v7795_v11  ;;  %v7803_v29 = vpop.f32.mrb[42].mxu1  ;;  %v16960_v4 = vpop.f32.mrb[43].mxu0  ;;  %v6003_v36 = vmax.f32 %v6001_v26, %v6002_v19  ;;  %v8329_v19 = vrot.slane %v8327_v14, 1  ;;  %v8335_v27 = vshll.u32 %v22733_v23, 16 }
 0x50c   : > { %v17356_v56 = vpop.f32.mrb[43].mxu1  ;;  %v7877_v28 = vld [vmem:[#allocation2 + $0x38] sm:$0x1f]  ;;  %v6037_v46 = vld [vmem:[#allocation2 + $0x30] sm:$0x1f] }
 0x50d   : > { %v6004_v60 = vmax.f32 %v6000_v7, %v6003_v36 }
 0x50f   : > { %v6005_v38 = vadd.f32 %v22760_v37, %v6004_v60 }
 0x510   : > { %v5947_v52 = vpop.f32.mrb[44].mxu0 }
 0x511   : > { %5992 = vst [vmem:[#allocation4 + $0x40] sm:$0xff] %v5947_v52  ;;  %v7808_v40 = vpop.f32.mrb[44].mxu1  ;;  %v16963_v41 = vpop.f32.mrb[45].mxu0  ;;  %v6006_v59 = vmax.f32 %v6005_v38, 0.0 }
 0x512   : > { %v7862_v61 = vld [vmem:[#allocation4 + $0x20] ss:$2 sm:$0xff]  ;;  %v7863_v62 = vld [vmem:[#allocation4 + $0x21] ss:$2 sm:$0xff]  ;;  %v17359_v1 = vpop.f32.mrb[45].mxu1  ;;  %v5950_v3 = vpop.f32.mrb[46].mxu0 }
 0x513   : > { %5993 = vst [vmem:[#allocation4 + $0x48] sm:$0xff] %v5950_v3  ;;  %v7811_v5 = vpop.f32.mrb[46].mxu1  ;;  %v16964_v43 = vpop.f32.mrb[47].mxu0  ;;  %v6007_v33 = vpack.c.bf16 %v6006_v59, %v6006_v59  ;;  %v7864_v58 = vmax.f32 %v7862_v61, %v7863_v62  ;;  %v8337_v41 = vrot.slane %v8335_v27, 1  ;;  %v8339_v59 = vshrl.u32 %v22733_v23, 16 }
 0x514   : > { %v17360_v34 = vpop.f32.mrb[47].mxu1  ;;  %v8343_v61 = vshll.u32 %v22736_v55, 16  ;;  %v8331_v62 = vshrl.u32 %v22730_v24, 16 }
 0x515   : > { %v6009_v35 = vshrl.u32 %v6007_v33, 16  ;;  %v7865_v45 = vmax.f32 %v7861_v42, %v7864_v58  ;;  %v6012_v47 = vshll.u32 %v6007_v33, 16  ;;  %v8341_v1 = vor.u32 %v8339_v59, %v8337_v41  ;;  %v19570_v42 = vld [vmem:[#allocation5 + $0x108] sm:$0xff]   ;;  %v19587_v59 = vld [vmem:[#allocation5 + $0x20] sm:$0xff]  }
 0x516   : > { %v8333_v3 = vor.u32 %v8331_v62, %v8329_v19  ;;  %v8345_v33 = vrot.slane %v8343_v61, 1  ;;  %v9676_v61 = vshrl.u32 %v22739_v54, 16 }
 0x517   : > { %v6011_v12 = vrot.slane %v6009_v35, 7  ;;  %v7866_v13 = vadd.f32 %v22760_v37, %v7865_v45 }
 0x518   : > { %v5955_v9 = vpop.f32.mrb[48].mxu0  ;;  %v8338_v35 = vsel %vm1072_vm1, %v8333_v3, %v8337_v41  ;;  %v22781_v45 = vsel %vm1072_vm1, %v8341_v1, %v8345_v33  ;;  %v19586_v41 = vld [vmem:[#allocation5 + $0x1d0] sm:$0xff]   ;;  %v19588_v1 = vld [vmem:[#allocation5 + $0x1d8] sm:$0xff]   ;;  %v19589_v3 = vld [vmem:[#allocation5 + $0x28] sm:$0xff]  }
 0x519   : > { %v7816_v63 = vpop.f32.mrb[48].mxu1  ;;  %v16967_v15 = vpop.f32.mrb[49].mxu0  ;;  %v6014_v16 = vor.u32 %v6012_v47, %v6011_v12  ;;  %v7867_v18 = vmax.f32 %v7866_v13, 0.0  ;;  %v19572_v47 = vld [vmem:[#allocation5 + $0x110] sm:$0xff]  }
 0x51a   : > { %v6019_v21 = vld [vmem:[#allocation4 + $0x40] ss:$2 sm:$0xff]  ;;  %v6020_v20 = vld [vmem:[#allocation4 + $0x41] ss:$2 sm:$0xff]  ;;  %v17363_v22 = vpop.f32.mrb[49].mxu1  ;;  %v5958_v25 = vpop.f32.mrb[50].mxu0 }
 0x51b   : > { %7853 = vst [vmem:[#allocation4 + $0x40] sm:$0xff] %v7808_v40  ;;  %7854 = vst [vmem:[#allocation4 + $0x48] sm:$0xff] %v7811_v5  ;;  %v7819_v31 = vpop.f32.mrb[50].mxu1  ;;  %v16968_v32 = vpop.f32.mrb[51].mxu0  ;;  %v6017_v8 = vsel %vm22061_vm5, %v6014_v16, %v6016_v49  ;;  %v7868_v53 = vpack.c.bf16 %v7867_v18, %v7867_v18  ;;  %v8330_v40 = vsel %vm1072_vm1, %v8325_v17, %v8329_v19  ;;  %v8347_v49 = vshrl.u32 %v22736_v55, 16 }
 0x51c   : > { %v17364_v11 = vpop.f32.mrb[51].mxu1  ;;  %6018 = vst [vmem:[#allocation2 + $0x28] sm:$0x1f] %v6017_v8  ;;  %v6021_v58 = vmax.f32 %v6019_v21, %v6020_v20  ;;  %v19574_v21 = vld [vmem:[#allocation5 + $0x118] sm:$0xff]   ;;  %v19575_v32 = vld [vmem:[#allocation5 + $0x120] sm:$0xff]  }
 0x51d   : > { %v7870_v48 = vshrl.u32 %v7868_v53, 16  ;;  %v7873_v10 = vshll.u32 %v7868_v53, 16  ;;  %v8349_v18 = vor.u32 %v8347_v49, %v8345_v33  ;;  %v19592_v33 = vld [vmem:[#allocation5 + $0x1e8] sm:$0xff]  }
 0x51e   : > { %v19600_v49 = vld [vmem:[#allocation5 + $0x88] sm:$0xff]  }
 0x51f   : > { %v7872_v0 = vrot.slane %v7870_v48, 7  ;;  %v19577_v48 = vld [vmem:[#allocation5 + $0x128] sm:$0xff]  }
 0x520   : > { %v5963_v26 = vpop.f32.mrb[52].mxu0 }
 0x521   : > { %5996 = vst [vmem:[#allocation4 + $0x60] sm:$0xff] %v5963_v26  ;;  %v7824_v29 = vpop.f32.mrb[52].mxu1  ;;  %v16971_v4 = vpop.f32.mrb[53].mxu0  ;;  %v7875_v7 = vor.u32 %v7873_v10, %v7872_v0  ;;  %v19578_v26 = vld [vmem:[#allocation5 + $0x130] sm:$0xff]  }
 0x522   : > { %v17367_v36 = vpop.f32.mrb[53].mxu1  ;;  %v5966_v2 = vpop.f32.mrb[54].mxu0  ;;  %v7880_v6 = vld [vmem:[#allocation4 + $0x40] ss:$2 sm:$0xff]  ;;  %v7881_v9 = vld [vmem:[#allocation4 + $0x41] ss:$2 sm:$0xff] }
 0x523   : > { %5997 = vst [vmem:[#allocation4 + $0x68] sm:$0xff] %v5966_v2  ;;  %v7827_v56 = vpop.f32.mrb[54].mxu1  ;;  %v16972_v60 = vpop.f32.mrb[55].mxu0  ;;  %v7907_v38 = vld [vmem:[#allocation2 + $0x28] sm:$0xf]  ;;  %v7878_v44 = vsel %vm22061_vm5, %v7875_v7, %v7877_v28  ;;  %v7882_v20 = vmax.f32 %v7880_v6, %v7881_v9  ;;  %v19581_v7 = vld [vmem:[#allocation5 + $0x8] sm:$0xff]  }
 0x524   : > { %v22770_v39 = vld [vmem:[#allocation2 + $0x28] sm:$0xff]  ;;  %v17368_v52 = vpop.f32.mrb[55].mxu1  ;;  %17438 = vmatmul.mubr.bf16.gmra.mrb[60].mxu0 %v7907_v38  ;;  %7879 = vst [vmem:[#allocation2 + $0x38] sm:$0x1f] %v7878_v44  ;;  %v7898_v28 = vld [vmem:[#allocation2 + $0x40] sm:$0x1f] }
 0x525   : > { %17601 = vmatprep.mubr.bf16.mxu1 %v22770_v39  ;;  %17457 = vmatprep.mubr.bf16.mxu0 %v8330_v40  ;;  %v8491_v2 = vshll.u32 %v22739_v54, 16  ;;  %v19582_v60 = vld [vmem:[#allocation5 + $0x1c0] sm:$0xff]   ;;  %v19583_v38 = vld [vmem:[#allocation5 + $0x10] sm:$0xff]   ;;  %v19584_v52 = vld [vmem:[#allocation5 + $0x1c8] sm:$0xff]  }
 0x526   : > { %v19585_v40 = vld [vmem:[#allocation5 + $0x18] sm:$0xff]   ;;  %v19599_v6 = vld [vmem:[#allocation5 + $0x190] sm:$0xff]  }
 0x527   : > { %v8493_v44 = vrot.slane %v8491_v2, 1 }
 0x529   : > { %v22807_v62 = vor.u32 %v9676_v61, %v8493_v44 }
 0x52a   : > { %v6022_v5 = vld [vmem:[#allocation4 + $0x60] ss:$2 sm:$0xff]  ;;  %v6023_v43 = vld [vmem:[#allocation4 + $0x61] ss:$2 sm:$0xff] }
 0x52b   : > { %v6024_v34 = vmax.f32 %v6022_v5, %v6023_v43  ;;  %7857 = vst [vmem:[#allocation4 + $0x60] sm:$0xff] %v7824_v29  ;;  %7858 = vst [vmem:[#allocation4 + $0x68] sm:$0xff] %v7827_v56  ;;  %v19580_v29 = vld [vmem:[#allocation5 + $0x138] sm:$0xff]   ;;  %v22797_v56 = vld [vmem:[#allocation2 + $0x38] sm:$0xff] }
 0x52c   : > { %17458 = vmatmul.mubr.bf16.vlgmr.msra.gmra.mrb[56].mxu0 %v8338_v35  ;;  %v19590_v5 = vld [vmem:[#allocation5 + $0x1e0] sm:$0xff]   ;;  %v19591_v43 = vld [vmem:[#allocation5 + $0x30] sm:$0xff]  }
 0x52d   : > { %v6025_v12 = vmax.f32 %v6021_v58, %v6024_v34  ;;  %17466 = vmatpush3.bf16.msra.mxu0 %v22751_v30  ;;  %17461 = vmatprep.mubr.bf16.mxu0 %v22781_v45  ;;  %v19594_v58 = vld [vmem:[#allocation5 + $0x1f0] sm:$0xff]   ;;  %v19595_v34 = vld [vmem:[#allocation5 + $0x180] sm:$0xff]  }
 0x52e   : > { %17467 = vmatprep.subr.bf16.mxu0 %v19570_v42 }
 0x52f   : > { %v6026_v13 = vadd.f32 %v22760_v37, %v6025_v12  ;;  %v19597_v12 = vld [vmem:[#allocation5 + $0x188] sm:$0xff]  }
 0x531   : > { %v6027_v63 = vmax.f32 %v6026_v13, 0.0  ;;  %17468 = vmatpush3.bf16.msra.mxu0 %v19570_v42  ;;  %v19593_v42 = vld [vmem:[#allocation5 + $0x38] sm:$0xff]   ;;  %v19598_v13 = vld [vmem:[#allocation5 + $0x80] sm:$0xff]  }
 0x532   : > { %v7883_v15 = vld [vmem:[#allocation4 + $0x60] ss:$2 sm:$0xff]  ;;  %v7884_v16 = vld [vmem:[#allocation4 + $0x61] ss:$2 sm:$0xff]  ;;  %17469 = vmatprep.subr.bf16.mxu0 %v19572_v47 }
 0x533   : > { %v6028_v22 = vpack.c.bf16 %v6027_v63, %v6027_v63  ;;  %v7885_v30 = vmax.f32 %v7883_v15, %v7884_v16  ;;  %v19601_v15 = vld [vmem:[#allocation5 + $0x198] sm:$0xff]   ;;  %v8765_v16 = vld [vmem:[#allocation2] sm:$0xfe] }
 0x534   : > { %17462 = vmatmul.mubr.bf16.gmra.mrb[60].mxu0 %v8349_v18 }
 0x535   : > { %v6030_v25 = vshrl.u32 %v6028_v22, 16  ;;  %17470 = vmatpush3.bf16.msra.mxu0 %v19572_v47  ;;  %17481 = vmatprep.mubr.bf16.mxu0 %v8338_v35  ;;  %v7886_v31 = vmax.f32 %v7882_v20, %v7885_v30  ;;  %v6033_v53 = vshll.u32 %v6028_v22, 16  ;;  %v22811_v35 = vld [vmem:[#allocation2 + $0x28] sm:$0x1f]  ;;  %v8787_v22 = vrot.slane %v8765_v16, 1 }
 0x536   : > { %17471 = vmatprep.subr.bf16.mxu0 %v19574_v21  ;;  %v8637_v47 = vshll.u32 %v22811_v35, 16  ;;  %v8641_v20 = vshrl.u32 %v22811_v35, 16  ;;  %v8788_v30 = vrot.slane %v22730_v24, 1  ;;  %v19608_v24 = vld [vmem:[#allocation5 + $0xa8] sm:$0xff]  }
 0x537   : > { %v6032_v8 = vrot.slane %v6030_v25, 7  ;;  %v7887_v50 = vadd.f32 %v22760_v37, %v7886_v31  ;;  %v19604_v31 = vld [vmem:[#allocation5 + $0x98] sm:$0xff]  }
 0x538   : > { %v8639_v9 = vrot.slane %v8637_v47, 1 }
 0x539   : > { %17472 = vmatpush3.bf16.msra.mxu0 %v19574_v21  ;;  %v6035_v11 = vor.u32 %v6033_v53, %v6032_v8  ;;  %v7888_v14 = vmax.f32 %v7887_v50, 0.0  ;;  %v19603_v21 = vld [vmem:[#allocation5 + $0x1a0] sm:$0xff]   ;;  %v8789_v8 = vsel %vm1718_vm2, %v8787_v22, %v8788_v30  ;;  %v19607_v50 = vld [vmem:[#allocation5 + $0x1b0] sm:$0xff]   ;;  %v19637_v22 = vld [vmem:[#allocation5 + $0x128] sm:$0xff]  }
 0x53a   : > { %17473 = vmatprep.subr.bf16.mxu0 %v19575_v32  ;;  %v8640_v63 = vsel %vm1072_vm1, %v22807_v62, %v8639_v9  ;;  %v8643_v25 = vor.u32 %v8641_v20, %v8639_v9  ;;  %v19606_v53 = vld [vmem:[#allocation5 + $0xa0] sm:$0xff]   ;;  %v22849_v9 = vrot.slane %v22739_v54, 1  ;;  %v19636_v20 = vld [vmem:[#allocation5 + $0x218] sm:$0xff]  }
 0x53b   : > { %v6038_v0 = vsel %vm22061_vm5, %v6035_v11, %v6037_v46  ;;  %v7889_v10 = vpack.c.bf16 %v7888_v14, %v7888_v14  ;;  %v19609_v46 = vld [vmem:[#allocation5 + $0x1b8] sm:$0xff]   ;;  %v19610_v11 = vld [vmem:[#allocation5 + $0xb0] sm:$0xff]   ;;  %v19611_v14 = vld [vmem:[#allocation5 + $0x40] sm:$0xff]  }
 0x53c   : > { %6039 = vst [vmem:[#allocation2 + $0x30] sm:$0x1f] %v6038_v0  ;;  %v19613_v0 = vld [vmem:[#allocation5 + $0x48] sm:$0xff]  }
 0x53d   : > { %17474 = vmatpush3.bf16.msra.mxu0 %v19575_v32  ;;  %v7891_v17 = vshrl.u32 %v7889_v10, 16  ;;  %v7894_v27 = vshll.u32 %v7889_v10, 16  ;;  %v19605_v32 = vld [vmem:[#allocation5 + $0x1a8] sm:$0xff]   ;;  %v9683_v10 = vshll.u32 %v22770_v39, 16 }
 0x53e   : > { %17475 = vmatprep.subr.bf16.mxu0 %v19577_v48 }
 0x53f   : > { %v7893_v19 = vrot.slane %v7891_v17, 7  ;;  %v19614_v17 = vld [vmem:[#allocation5 + $0x140] sm:$0xff]  }
 0x541   : > { %17476 = vmatpush3.bf16.msra.mxu0 %v19577_v48  ;;  %v7896_v37 = vor.u32 %v7894_v27, %v7893_v19  ;;  %v19612_v48 = vld [vmem:[#allocation5 + $0xb8] sm:$0xff]   ;;  %v19615_v19 = vld [vmem:[#allocation5 + $0x50] sm:$0xff]  }
 0x542   : > { %17477 = vmatprep.subr.bf16.mxu0 %v19578_v26  ;;  %v9266_v27 = vld [vmem:[#allocation2 + $0x48] sm:$0xf] }
 0x543   : > { %v22790_v4 = vld [vmem:[#allocation2 + $0x30] sm:$0xff]  ;;  %v7899_v36 = vsel %vm22061_vm5, %v7896_v37, %v7898_v28  ;;  %v9685_v28 = vrot.slane %v9683_v10, 1  ;;  %v22828_v37 = vrot.slane %v22736_v55, 1  ;;  %v19618_v55 = vld [vmem:[#allocation5 + $0x150] sm:$0xff]   ;;  %v9076_v10 = vrot.slane %v22811_v35, 1 }
 0x544   : > { %17602 = vmatmul.mubr.bf16.vlgmr.msra.gmra.mrb[56].mxu1 %v22790_v4  ;;  %7900 = vst [vmem:[#allocation2 + $0x40] sm:$0x1f] %v7899_v36  ;;  %v19617_v36 = vld [vmem:[#allocation5 + $0x58] sm:$0xff]   ;;  %v19650_v35 = vld [vmem:[#allocation5 + $0x1f0] sm:$0xff]  }
 0x545   : > { %17478 = vmatpush3.bf16.msra.mxu0 %v19578_v26  ;;  %17610 = vmatpush3.bf16.msra.mxu1 %v22754_v51  ;;  %v8494_v51 = vsel %vm1072_vm1, %v8349_v18, %v8493_v44  ;;  %v19602_v18 = vld [vmem:[#allocation5 + $0x90] sm:$0xff]   ;;  %v8790_v26 = vrot.slane %v22733_v23, 1  ;;  %v9686_v23 = vsel %vm1072_vm1, %v22807_v62, %v9685_v28  ;;  %v19621_v44 = vld [vmem:[#allocation5 + $0x68] sm:$0xff]   ;;  %v8936_v16 = vsel %vm1718_vm2, %v22828_v37, %v22849_v9 }
 0x546   : > { %17605 = vmatprep.mubr.bf16.mxu1 %v22797_v56  ;;  %17479 = vmatprep.subr.bf16.mxu0 %v19580_v29 }
 0x547   : > { %17611 = vmatprep.subr.bf16.mxu1 %v19581_v7  ;;  %v22833_v2 = vsel %vm1718_vm2, %v8790_v26, %v22828_v37 }
 0x549   : > { %17480 = vmatpush3.bf16.msra.mxu0 %v19580_v29  ;;  %17612 = vmatpush3.bf16.msra.mxu1 %v19581_v7  ;;  %v8791_v29 = vsel %vm1718_vm2, %v8788_v30, %v8790_v26  ;;  %v19616_v7 = vld [vmem:[#allocation5 + $0x148] sm:$0xff]   ;;  %v19638_v30 = vld [vmem:[#allocation5 + $0x220] sm:$0xff]   ;;  %v19647_v26 = vld [vmem:[#allocation5 + $0x1d8] sm:$0xff]  }
 0x54a   : > { %17489 = vmatprep.subr.bf16.mxu0 %v19582_v60  ;;  %17613 = vmatprep.subr.bf16.mxu1 %v19583_v38 }
 0x54b   : > { %v22800_v57 = vld [vmem:[#allocation2 + $0x40] sm:$0xff] }
 0x54c   : > { %17482 = vmatmul.mubr.bf16.vlgmr.msra.gmra.mrb[56].mxu0 %v22781_v45  ;;  %17606 = vmatmul.mubr.bf16.gmra.mrb[60].mxu1 %v22800_v57 }
 0x54d   : > { %17485 = vmatprep.mubr.bf16.mxu0 %v8494_v51  ;;  %17490 = vmatpush3.bf16.msra.mxu0 %v19582_v60  ;;  %v19619_v60 = vld [vmem:[#allocation5 + $0x60] sm:$0xff]  }
 0x54e   : > { %17614 = vmatpush3.bf16.msra.mxu1 %v19583_v38  ;;  %17625 = vmatprep.mubr.bf16.mxu1 %v22739_v54  ;;  %v19620_v38 = vld [vmem:[#allocation5 + $0x158] sm:$0xff]   ;;  %v19634_v54 = vld [vmem:[#allocation5 + $0x210] sm:$0xff]  }
 0x54f   : > { %17491 = vmatprep.subr.bf16.mxu0 %v19584_v52  ;;  %17615 = vmatprep.subr.bf16.mxu1 %v19585_v40 }
 0x551   : > { %17492 = vmatpush3.bf16.msra.mxu0 %v19584_v52  ;;  %v19622_v52 = vld [vmem:[#allocation5 + $0x160] sm:$0xff]  }
 0x552   : > { %17616 = vmatpush3.bf16.msra.mxu1 %v19585_v40  ;;  %17493 = vmatprep.subr.bf16.mxu0 %v19586_v41  ;;  %v19623_v40 = vld [vmem:[#allocation5 + $0x70] sm:$0xff]  }
 0x553   : > { %17617 = vmatprep.subr.bf16.mxu1 %v19587_v59 }
 0x554   : > { %17486 = vmatmul.mubr.bf16.gmra.mrb[60].mxu0 %v22807_v62  ;;  %v19626_v62 = vld [vmem:[#allocation5 + $0x170] sm:$0xff]  }
 0x555   : > { %17494 = vmatpush3.bf16.msra.mxu0 %v19586_v41  ;;  %17505 = vmatprep.mubr.bf16.mxu0 %v22781_v45  ;;  %v19596_v45 = vld [vmem:[#allocation5 + $0x1f8] sm:$0xff]   ;;  %v19624_v41 = vld [vmem:[#allocation5 + $0x168] sm:$0xff]  }
 0x556   : > { %17618 = vmatpush3.bf16.msra.mxu1 %v19587_v59  ;;  %17495 = vmatprep.subr.bf16.mxu0 %v19588_v1  ;;  %v19625_v59 = vld [vmem:[#allocation5 + $0x78] sm:$0xff]  }
 0x557   : > { %17619 = vmatprep.subr.bf16.mxu1 %v19589_v3 }
 0x559   : > { %17496 = vmatpush3.bf16.msra.mxu0 %v19588_v1  ;;  %v19627_v1 = vld [vmem:[#allocation5 + $0x100] sm:$0xff]  }
 0x55a   : > { %17620 = vmatpush3.bf16.msra.mxu1 %v19589_v3  ;;  %17497 = vmatprep.subr.bf16.mxu0 %v19590_v5  ;;  %v9695_v3 = vshrl.u32 %v22790_v4, 16 }
 0x55b   : > { %17621 = vmatprep.subr.bf16.mxu1 %v19591_v43 }
 0x55d   : > { %17498 = vmatpush3.bf16.msra.mxu0 %v19590_v5  ;;  %v9699_v5 = vshll.u32 %v22797_v56, 16 }
 0x55e   : > { %17622 = vmatpush3.bf16.msra.mxu1 %v19591_v43  ;;  %17499 = vmatprep.subr.bf16.mxu0 %v19592_v33  ;;  %v9687_v43 = vshrl.u32 %v22770_v39, 16 }
 0x55f   : > { %17623 = vmatprep.subr.bf16.mxu1 %v19593_v42 }
 0x561   : > { %17500 = vmatpush3.bf16.msra.mxu0 %v19592_v33 }
 0x562   : > { %17624 = vmatpush3.bf16.msra.mxu1 %v19593_v42  ;;  %17501 = vmatprep.subr.bf16.mxu0 %v19594_v58  ;;  %v9689_v42 = vor.u32 %v9687_v43, %v9685_v28  ;;  %v19649_v28 = vld [vmem:[#allocation5 + $0x1e8] sm:$0xff]   ;;  %v10145_v43 = vrot.slane %v22797_v56, 1 }
 0x563   : > { %17633 = vmatprep.subr.bf16.mxu1 %v19595_v34 }
 0x565   : > { %17626 = vmatmul.mubr.bf16.vlgmr.msra.gmra.mrb[56].mxu1 %v22770_v39  ;;  %17502 = vmatpush3.bf16.msra.mxu0 %v19594_v58  ;;  %v9701_v58 = vrot.slane %v9699_v5, 1  ;;  %v10143_v5 = vrot.slane %v22790_v4, 1 }
 0x566   : > { %17629 = vmatprep.mubr.bf16.mxu1 %v22790_v4  ;;  %17634 = vmatpush3.bf16.msra.mxu1 %v19595_v34  ;;  %v19628_v34 = vld [vmem:[#allocation5 + $0x178] sm:$0xff]  }
 0x567   : > { %17503 = vmatprep.subr.bf16.mxu0 %v19596_v45  ;;  %17635 = vmatprep.subr.bf16.mxu1 %v19597_v12 }
 0x569   : > { %17504 = vmatpush3.bf16.msra.mxu0 %v19596_v45  ;;  %v19629_v45 = vld [vmem:[#allocation5 + $0x108] sm:$0xff]  }
 0x56a   : > { %17636 = vmatpush3.bf16.msra.mxu1 %v19597_v12  ;;  %17513 = vmatprep.subr.bf16.mxu0 %v19598_v13 }
 0x56b   : > { %17637 = vmatprep.subr.bf16.mxu1 %v19599_v6 }
 0x56c   : > { %17506 = vmatmul.mubr.bf16.vlgmr.msra.gmra.mrb[56].mxu0 %v8494_v51  ;;  %v9691_v51 = vshll.u32 %v22790_v4, 16 }
 0x56d   : > { %17630 = vmatmul.mubr.bf16.gmra.mrb[60].mxu1 %v22797_v56  ;;  %17509 = vmatprep.mubr.bf16.mxu0 %v8640_v63 }
 0x56e   : > { %17514 = vmatpush3.bf16.msra.mxu0 %v19598_v13  ;;  %17638 = vmatpush3.bf16.msra.mxu1 %v19599_v6  ;;  %v9693_v61 = vrot.slane %v9691_v51, 1  ;;  %v19630_v13 = vld [vmem:[#allocation5 + $0x200] sm:$0xff]   ;;  %v19631_v6 = vld [vmem:[#allocation5 + $0x110] sm:$0xff]  }
 0x56f   : > { %17649 = vmatprep.mubr.bf16.mxu1 %v22790_v4  ;;  %17515 = vmatprep.subr.bf16.mxu0 %v19600_v49  ;;  %v19664_v4 = vld [vmem:[#allocation5 + $0x160] sm:$0xff]  }
 0x570   : > { %17639 = vmatprep.subr.bf16.mxu1 %v19601_v15  ;;  %v9697_v33 = vor.u32 %v9695_v3, %v9693_v61  ;;  %v9694_v12 = vsel %vm1072_vm1, %v9689_v42, %v9693_v61  ;;  %v19656_v61 = vld [vmem:[#allocation5 + $0xa0] sm:$0xff]  }
 0x571   : > { %v19660_v3 = vld [vmem:[#allocation5 + $0x140] sm:$0xff]  }
 0x572   : > { %17516 = vmatpush3.bf16.msra.mxu0 %v19600_v49  ;;  %17640 = vmatpush3.bf16.msra.mxu1 %v19601_v15  ;;  %v22845_v47 = vsel %vm1072_vm1, %v9697_v33, %v9701_v58  ;;  %v9703_v49 = vshrl.u32 %v22797_v56, 16  ;;  %v19632_v15 = vld [vmem:[#allocation5 + $0x208] sm:$0xff]  }
 0x573   : > { %17517 = vmatprep.subr.bf16.mxu0 %v19602_v18  ;;  %17641 = vmatprep.subr.bf16.mxu1 %v19603_v21  ;;  %v19661_v33 = vld [vmem:[#allocation5 + $0x148] sm:$0xff]  }
 0x574   : > { %17510 = vmatmul.mubr.bf16.gmra.mrb[60].mxu0 %v8643_v25  ;;  %v9705_v63 = vor.u32 %v9703_v49, %v9701_v58  ;;  %v19639_v25 = vld [vmem:[#allocation5 + $0x130] sm:$0xff]   ;;  %v10146_v58 = vsel %vm1718_vm2, %v10143_v5, %v10145_v43 }
 0x575   : > { %17529 = vmatprep.mubr.bf16.mxu0 %v8789_v8  ;;  %v9846_v8 = vshll.u32 %v22800_v57, 16 }
 0x576   : > { %17518 = vmatpush3.bf16.msra.mxu0 %v19602_v18  ;;  %17642 = vmatpush3.bf16.msra.mxu1 %v19603_v21  ;;  %v19633_v18 = vld [vmem:[#allocation5 + $0x118] sm:$0xff]   ;;  %v19635_v21 = vld [vmem:[#allocation5 + $0x120] sm:$0xff]  }
 0x577   : > { %17519 = vmatprep.subr.bf16.mxu0 %v19604_v31  ;;  %17643 = vmatprep.subr.bf16.mxu1 %v19605_v32 }
 0x57a   : > { %17520 = vmatpush3.bf16.msra.mxu0 %v19604_v31  ;;  %17644 = vmatpush3.bf16.msra.mxu1 %v19605_v32  ;;  %v19640_v31 = vld [vmem:[#allocation5 + $0x228] sm:$0xff]   ;;  %v19641_v32 = vld [vmem:[#allocation5 + $0x138] sm:$0xff]  }
 0x57b   : > { %17521 = vmatprep.subr.bf16.mxu0 %v19606_v53  ;;  %17645 = vmatprep.subr.bf16.mxu1 %v19607_v50 }
 0x57e   : > { %17522 = vmatpush3.bf16.msra.mxu0 %v19606_v53  ;;  %17646 = vmatpush3.bf16.msra.mxu1 %v19607_v50  ;;  %v19642_v53 = vld [vmem:[#allocation5 + $0x230] sm:$0xff]   ;;  %v19643_v50 = vld [vmem:[#allocation5 + $0x1c0] sm:$0xff]  }
 0x57f   : > { %17523 = vmatprep.subr.bf16.mxu0 %v19608_v24  ;;  %17647 = vmatprep.subr.bf16.mxu1 %v19609_v46 }
 0x582   : > { %17524 = vmatpush3.bf16.msra.mxu0 %v19608_v24  ;;  %17648 = vmatpush3.bf16.msra.mxu1 %v19609_v46  ;;  %v9848_v24 = vrot.slane %v9846_v8, 1  ;;  %v19644_v46 = vld [vmem:[#allocation5 + $0x238] sm:$0xff]  }
 0x583   : > { %17525 = vmatprep.subr.bf16.mxu0 %v19610_v11  ;;  %17657 = vmatprep.subr.bf16.mxu1 %v19611_v14 }
 0x585   : > { %17650 = vmatmul.mubr.bf16.vlgmr.msra.gmra.mrb[56].mxu1 %v22797_v56  ;;  %v19665_v56 = vld [vmem:[#allocation5 + $0x168] sm:$0xff]  }
 0x586   : > { %17526 = vmatpush3.bf16.msra.mxu0 %v19610_v11  ;;  %17653 = vmatprep.mubr.bf16.mxu1 %v22800_v57  ;;  %v19645_v11 = vld [vmem:[#allocation5 + $0x1c8] sm:$0xff]  }
 0x587   : > { %17658 = vmatpush3.bf16.msra.mxu1 %v19611_v14  ;;  %17527 = vmatprep.subr.bf16.mxu0 %v19612_v48  ;;  %v9849_v14 = vsel %vm1072_vm1, %v9705_v63, %v9848_v24 }
 0x588   : > { %17659 = vmatprep.subr.bf16.mxu1 %v19613_v0 }
 0x58a   : > { %17528 = vmatpush3.bf16.msra.mxu0 %v19612_v48  ;;  %v19646_v48 = vld [vmem:[#allocation5 + $0x1d0] sm:$0xff]  }
 0x58b   : > { %17660 = vmatpush3.bf16.msra.mxu1 %v19613_v0  ;;  %17537 = vmatprep.subr.bf16.mxu0 %v19614_v17  ;;  %v9850_v0 = vshrl.u32 %v22800_v57, 16 }
 0x58c   : > { %17661 = vmatprep.subr.bf16.mxu1 %v19615_v19 }
 0x58d   : > { %17530 = vmatmul.mubr.bf16.vlgmr.msra.gmra.mrb[56].mxu0 %v8791_v29  ;;  %17654 = vmatmul.mubr.bf16.gmra.mrb[60].mxu1 %v9266_v27  ;;  %v19648_v27 = vld [vmem:[#allocation5 + $0x1e0] sm:$0xff]  }
 0x58e   : > { %17533 = vmatprep.mubr.bf16.mxu0 %v22833_v2  ;;  %17538 = vmatpush3.bf16.msra.mxu0 %v19614_v17  ;;  %v9852_v17 = vor.u32 %v9850_v0, %v9848_v24  ;;  %v22881_v24 = vld [vmem:[#allocation2] sm:$0xff] }
 0x58f   : > { %17662 = vmatpush3.bf16.msra.mxu1 %v19615_v19  ;;  %17673 = vmatprep.mubr.bf16.mxu1 %v9686_v23  ;;  %v9077_v19 = vsel %vm1718_vm2, %v22849_v9, %v9076_v10  ;;  %v19653_v23 = vld [vmem:[#allocation5 + $0x88] sm:$0xff]  }
 0x590   : > { %17539 = vmatprep.subr.bf16.mxu0 %v19616_v7  ;;  %17663 = vmatprep.subr.bf16.mxu1 %v19617_v36 }
 0x592   : > { %17540 = vmatpush3.bf16.msra.mxu0 %v19616_v7 }
 0x593   : > { %17664 = vmatpush3.bf16.msra.mxu1 %v19617_v36  ;;  %17541 = vmatprep.subr.bf16.mxu0 %v19618_v55  ;;  %v19652_v36 = vld [vmem:[#allocation5 + $0x80] sm:$0xff]  }
 0x594   : > { %17665 = vmatprep.subr.bf16.mxu1 %v19619_v60 }
 0x595   : > { %17534 = vmatmul.mubr.bf16.gmra.mrb[60].mxu0 %v22828_v37  ;;  %v19651_v37 = vld [vmem:[#allocation5 + $0x1f8] sm:$0xff]  }
 0x596   : > { %17542 = vmatpush3.bf16.msra.mxu0 %v19618_v55  ;;  %17553 = vmatprep.mubr.bf16.mxu0 %v8791_v29  ;;  %v22866_v29 = vld [vmem:[#allocation2 + $0x48] sm:$0x1f] }
 0x597   : > { %17666 = vmatpush3.bf16.msra.mxu1 %v19619_v60  ;;  %17543 = vmatprep.subr.bf16.mxu0 %v19620_v38  ;;  %v9991_v7 = vshll.u32 %v22866_v29, 16  ;;  %v9995_v60 = vshrl.u32 %v22866_v29, 16  ;;  %v10427_v8 = vrot.slane %v22866_v29, 1  ;;  %v19684_v29 = vld [vmem:[#allocation7] sm:$0xff]  }
 0x598   : > { %17667 = vmatprep.subr.bf16.mxu1 %v19621_v44 }
 0x59a   : > { %17544 = vmatpush3.bf16.msra.mxu0 %v19620_v38  ;;  %v19654_v38 = vld [vmem:[#allocation5 + $0x90] sm:$0xff]  }
 0x59b   : > { %17668 = vmatpush3.bf16.msra.mxu1 %v19621_v44  ;;  %17545 = vmatprep.subr.bf16.mxu0 %v19622_v52  ;;  %v10119_v44 = vld [vmem:[#allocation2 + $0x20] sm:$0xfe] }
 0x59c   : > { %17669 = vmatprep.subr.bf16.mxu1 %v19623_v40  ;;  %v10140_v51 = vrot.slane %v10119_v44, 1 }
 0x59e   : > { %17546 = vmatpush3.bf16.msra.mxu0 %v19622_v52 }
 0x59f   : > { %17670 = vmatpush3.bf16.msra.mxu1 %v19623_v40  ;;  %17547 = vmatprep.subr.bf16.mxu0 %v19624_v41  ;;  %v10141_v40 = vrot.slane %v22770_v39, 1  ;;  %v19659_v39 = vld [vmem:[#allocation5 + $0xb8] sm:$0xff]  }
 0x5a0   : > { %17671 = vmatprep.subr.bf16.mxu1 %v19625_v59 }
 0x5a1   : > { %v10144_v42 = vsel %vm1718_vm2, %v10141_v40, %v10143_v5  ;;  %v9235_v5 = vld [vmem:[#allocation3 + $0x8] sm:$0x7] }
 0x5a2   : > { %17548 = vmatpush3.bf16.msra.mxu0 %v19624_v41  ;;  %v19655_v41 = vld [vmem:[#allocation5 + $0x98] sm:$0xff]  }
 0x5a3   : > { %17672 = vmatpush3.bf16.msra.mxu1 %v19625_v59  ;;  %17549 = vmatprep.subr.bf16.mxu0 %v19626_v62  ;;  %v10142_v59 = vsel %vm1718_vm2, %v10140_v51, %v10141_v40 }
 0x5a4   : > { %17681 = vmatprep.subr.bf16.mxu1 %v19627_v1 }
 0x5a6   : > { %17674 = vmatmul.mubr.bf16.vlgmr.msra.gmra.mrb[56].mxu1 %v9694_v12  ;;  %17550 = vmatpush3.bf16.msra.mxu0 %v19626_v62  ;;  %v19657_v62 = vld [vmem:[#allocation5 + $0xa8] sm:$0xff]  }
 0x5a7   : > { %17677 = vmatprep.mubr.bf16.mxu1 %v22845_v47  ;;  %17682 = vmatpush3.bf16.msra.mxu1 %v19627_v1  ;;  %v19658_v1 = vld [vmem:[#allocation5 + $0xb0] sm:$0xff]  }
 0x5a8   : > { %17551 = vmatprep.subr.bf16.mxu0 %v19628_v34  ;;  %17683 = vmatprep.subr.bf16.mxu1 %v19629_v45 }
 0x5aa   : > { %17552 = vmatpush3.bf16.msra.mxu0 %v19628_v34  ;;  %v19662_v34 = vld [vmem:[#allocation5 + $0x150] sm:$0xff]  }
 0x5ab   : > { %17684 = vmatpush3.bf16.msra.mxu1 %v19629_v45  ;;  %17561 = vmatprep.subr.bf16.mxu0 %v19630_v13  ;;  %v19663_v45 = vld [vmem:[#allocation5 + $0x158] sm:$0xff]  }
 0x5ac   : > { %17685 = vmatprep.subr.bf16.mxu1 %v19631_v6 }
 0x5ad   : > { %17554 = vmatmul.mubr.bf16.vlgmr.msra.gmra.mrb[56].mxu0 %v22833_v2 }
 0x5ae   : > { %17678 = vmatmul.mubr.bf16.gmra.mrb[60].mxu1 %v9705_v63  ;;  %17557 = vmatprep.mubr.bf16.mxu0 %v8936_v16  ;;  %v19670_v63 = vld [vmem:[#allocation5 + $0x210] sm:$0xff]  }
 0x5af   : > { %17562 = vmatpush3.bf16.msra.mxu0 %v19630_v13  ;;  %17686 = vmatpush3.bf16.msra.mxu1 %v19631_v6  ;;  %v19668_v13 = vld [vmem:[#allocation5 + $0x200] sm:$0xff]   ;;  %v10287_v6 = vrot.slane %v22800_v57, 1 }
 0x5b0   : > { %17697 = vmatprep.mubr.bf16.mxu1 %v9694_v12  ;;  %17563 = vmatprep.subr.bf16.mxu0 %v19632_v15  ;;  %v19666_v12 = vld [vmem:[#allocation5 + $0x170] sm:$0xff]   ;;  %v19672_v57 = vld [vmem:[#allocation5 + $0x220] sm:$0xff]  }
 0x5b1   : > { %17687 = vmatprep.subr.bf16.mxu1 %v19633_v18  ;;  %v10288_v49 = vsel %vm1718_vm2, %v10145_v43, %v10287_v6 }
 0x5b3   : > { %17564 = vmatpush3.bf16.msra.mxu0 %v19632_v15  ;;  %17688 = vmatpush3.bf16.msra.mxu1 %v19633_v18  ;;  %v19671_v15 = vld [vmem:[#allocation5 + $0x218] sm:$0xff]   ;;  %v19677_v18 = vld [vmem:[#allocation7 + $0xc8] sm:$0xff]  }
 0x5b4   : > { %17565 = vmatprep.subr.bf16.mxu0 %v19634_v54  ;;  %17689 = vmatprep.subr.bf16.mxu1 %v19635_v21 }
 0x5b5   : > { %17558 = vmatmul.mubr.bf16.gmra.mrb[60].mxu0 %v22849_v9  ;;  %v19669_v9 = vld [vmem:[#allocation5 + $0x208] sm:$0xff]  }
 0x5b6   : > { %17577 = vmatprep.mubr.bf16.mxu0 %v22833_v2  ;;  %v9993_v2 = vrot.slane %v9991_v7, 1 }
 0x5b7   : > { %17566 = vmatpush3.bf16.msra.mxu0 %v19634_v54  ;;  %17690 = vmatpush3.bf16.msra.mxu1 %v19635_v21  ;;  %v19678_v54 = vld [vmem:[#allocation7 + $0xd0] sm:$0xff]   ;;  %v19673_v21 = vld [vmem:[#allocation5 + $0x228] sm:$0xff]  }
 0x5b8   : > { %17567 = vmatprep.subr.bf16.mxu0 %v19636_v20  ;;  %17691 = vmatprep.subr.bf16.mxu1 %v19637_v22  ;;  %v9994_v55 = vsel %vm1072_vm1, %v9852_v17, %v9993_v2  ;;  %v9997_v52 = vor.u32 %v9995_v60, %v9993_v2 }
 0x5bb   : > { %17568 = vmatpush3.bf16.msra.mxu0 %v19636_v20  ;;  %17692 = vmatpush3.bf16.msra.mxu1 %v19637_v22  ;;  %v19679_v20 = vld [vmem:[#allocation7 + $0xd8] sm:$0xff]   ;;  %v19674_v22 = vld [vmem:[#allocation5 + $0x230] sm:$0xff]  }
 0x5bc   : > { %17569 = vmatprep.subr.bf16.mxu0 %v19638_v30  ;;  %17693 = vmatprep.subr.bf16.mxu1 %v19639_v25 }
 0x5bf   : > { %17570 = vmatpush3.bf16.msra.mxu0 %v19638_v30  ;;  %17694 = vmatpush3.bf16.msra.mxu1 %v19639_v25  ;;  %v19680_v30 = vld [vmem:[#allocation7 + $0xe0] sm:$0xff]   ;;  %v19675_v25 = vld [vmem:[#allocation5 + $0x238] sm:$0xff]  }
 0x5c0   : > { %17571 = vmatprep.subr.bf16.mxu0 %v19640_v31  ;;  %17695 = vmatprep.subr.bf16.mxu1 %v19641_v32 }
 0x5c3   : > { %17572 = vmatpush3.bf16.msra.mxu0 %v19640_v31  ;;  %17696 = vmatpush3.bf16.msra.mxu1 %v19641_v32  ;;  %v19681_v31 = vld [vmem:[#allocation7 + $0xe8] sm:$0xff]   ;;  %v19682_v32 = vld [vmem:[#allocation7 + $0xf0] sm:$0xff]  }
 0x5c4   : > { %17573 = vmatprep.subr.bf16.mxu0 %v19642_v53  ;;  %17705 = vmatprep.subr.bf16.mxu1 %v19643_v50 }
 0x5c6   : > { %17698 = vmatmul.mubr.bf16.vlgmr.msra.gmra.mrb[56].mxu1 %v22845_v47 }
 0x5c7   : > { %17574 = vmatpush3.bf16.msra.mxu0 %v19642_v53  ;;  %17701 = vmatprep.mubr.bf16.mxu1 %v9849_v14  ;;  %v19683_v53 = vld [vmem:[#allocation7 + $0xf8] sm:$0xff]  }
 0x5c8   : > { %17706 = vmatpush3.bf16.msra.mxu1 %v19643_v50  ;;  %17575 = vmatprep.subr.bf16.mxu0 %v19644_v46  ;;  %v10428_v50 = vsel %vm1718_vm2, %v10287_v6, %v10427_v8 }
 0x5c9   : > { %17707 = vmatprep.subr.bf16.mxu1 %v19645_v11 }
 0x5cb   : > { %17576 = vmatpush3.bf16.msra.mxu0 %v19644_v46 }
 0x5cc   : > { %17708 = vmatpush3.bf16.msra.mxu1 %v19645_v11 }
 0x5cd   : > { %17709 = vmatprep.subr.bf16.mxu1 %v19646_v48 }
 0x5ce   : > { %17578 = vmatmul.mubr.bf16.vlgmr.msra.gmra.mrb[56].mxu0 %v8936_v16  ;;  %17702 = vmatmul.mubr.bf16.gmra.mrb[60].mxu1 %v9852_v17  ;;  %v19676_v16 = vld [vmem:[#allocation7 + $0xc0] sm:$0xff]  }
 0x5cf   : > { %17581 = vmatprep.mubr.bf16.mxu0 %v9077_v19  ;;  %17721 = vmatprep.mubr.bf16.mxu1 %v22845_v47  ;;  %v19667_v47 = vld [vmem:[#allocation5 + $0x178] sm:$0xff]  }
 0x5d0   : > { %17710 = vmatpush3.bf16.msra.mxu1 %v19646_v48  ;;  %17801 = vmatprep.subr.bf16.mxu0 %v19676_v16 }
 0x5d1   : > { %17711 = vmatprep.subr.bf16.mxu1 %v19647_v26  ;;  %17802 = vmatpush3.bf16.msra.mxu0 %v19676_v16  ;;  %v19689_v16 = vld [vmem:[#allocation7 + $0x28] sm:$0xff]  }
 0x5d2   : > { %17803 = vmatprep.subr.bf16.mxu0 %v19677_v18 }
 0x5d4   : > { %17712 = vmatpush3.bf16.msra.mxu1 %v19647_v26 }
 0x5d5   : > { %17713 = vmatprep.subr.bf16.mxu1 %v19648_v27  ;;  %17804 = vmatpush3.bf16.msra.mxu0 %v19677_v18  ;;  %v19691_v18 = vld [vmem:[#allocation7 + $0x38] sm:$0xff]  }
 0x5d6   : > { %17582 = vmatmul.mubr.bf16.gmra.mrb[60].mxu0 %v9076_v10  ;;  %17805 = vmatprep.subr.bf16.mxu0 %v19678_v54 }
 0x5d8   : > { %17714 = vmatpush3.bf16.msra.mxu1 %v19648_v27 }
 0x5d9   : > { %17715 = vmatprep.subr.bf16.mxu1 %v19649_v28  ;;  %17806 = vmatpush3.bf16.msra.mxu0 %v19678_v54  ;;  %v22905_v54 = vld [vmem:[#allocation7 + $0x180] sm:$0xff]  }
 0x5da   : > { %17807 = vmatprep.subr.bf16.mxu0 %v19679_v20 }
 0x5dc   : > { %17716 = vmatpush3.bf16.msra.mxu1 %v19649_v28 }
 0x5dd   : > { %17717 = vmatprep.subr.bf16.mxu1 %v19650_v35  ;;  %17808 = vmatpush3.bf16.msra.mxu0 %v19679_v20 }
 0x5de   : > { %17809 = vmatprep.subr.bf16.mxu0 %v19680_v30 }
 0x5e0   : > { %17718 = vmatpush3.bf16.msra.mxu1 %v19650_v35 }
 0x5e1   : > { %17719 = vmatprep.subr.bf16.mxu1 %v19651_v37  ;;  %17810 = vmatpush3.bf16.msra.mxu0 %v19680_v30 }
 0x5e2   : > { %17811 = vmatprep.subr.bf16.mxu0 %v19681_v31 }
 0x5e4   : > { %17720 = vmatpush3.bf16.msra.mxu1 %v19651_v37 }
 0x5e5   : > { %17729 = vmatprep.subr.bf16.mxu1 %v19652_v36  ;;  %17812 = vmatpush3.bf16.msra.mxu0 %v19681_v31 }
 0x5e6   : > { %17813 = vmatprep.subr.bf16.mxu0 %v19682_v32 }
 0x5e7   : > { %17722 = vmatmul.mubr.bf16.vlgmr.msra.gmra.mrb[56].mxu1 %v9849_v14 }
 0x5e8   : > { %17725 = vmatprep.mubr.bf16.mxu1 %v9994_v55  ;;  %17730 = vmatpush3.bf16.msra.mxu1 %v19652_v36  ;;  %v22887_v36 = vld [vmem:[%s23508_s4] ss:$0 sm:$0xff] }
 0x5e9   : > { %17731 = vmatprep.subr.bf16.mxu1 %v19653_v23  ;;  %17814 = vmatpush3.bf16.msra.mxu0 %v19682_v32 }
 0x5ea   : > { %17815 = vmatprep.subr.bf16.mxu0 %v19683_v53 }
 0x5ec   : > { %17732 = vmatpush3.bf16.msra.mxu1 %v19653_v23 }
 0x5ed   : > { %17733 = vmatprep.subr.bf16.mxu1 %v19654_v38  ;;  %17816 = vmatpush3.bf16.msra.mxu0 %v19683_v53 }
 0x5ee   : > { %17825 = vmatprep.subr.bf16.mxu0 %v19684_v29 }
 0x5ef   : > { %17726 = vmatmul.mubr.bf16.gmra.mrb[60].mxu1 %v9997_v52 }
 0x5f0   : > { %17734 = vmatpush3.bf16.msra.mxu1 %v19654_v38  ;;  %17745 = vmatprep.mubr.bf16.mxu1 %v10142_v59 }
 0x5f1   : > { %17735 = vmatprep.subr.bf16.mxu1 %v19655_v41 }
 0x5f4   : > { %17736 = vmatpush3.bf16.msra.mxu1 %v19655_v41 }
 0x5f5   : > { %17737 = vmatprep.subr.bf16.mxu1 %v19656_v61 }
 0x5f8   : > { %17738 = vmatpush3.bf16.msra.mxu1 %v19656_v61 }
 0x5f9   : > { %17739 = vmatprep.subr.bf16.mxu1 %v19657_v62 }
 0x5fc   : > { %17740 = vmatpush3.bf16.msra.mxu1 %v19657_v62 }
 0x5fd   : > { %17741 = vmatprep.subr.bf16.mxu1 %v19658_v1 }
 0x600   : > { %17742 = vmatpush3.bf16.msra.mxu1 %v19658_v1 }
 0x601   : > { %17743 = vmatprep.subr.bf16.mxu1 %v19659_v39 }
 0x604   : > { %17744 = vmatpush3.bf16.msra.mxu1 %v19659_v39 }
 0x605   : > { %17753 = vmatprep.subr.bf16.mxu1 %v19660_v3 }
 0x607   : > { %17746 = vmatmul.mubr.bf16.vlgmr.msra.gmra.mrb[56].mxu1 %v10144_v42 }
 0x608   : > { %17749 = vmatprep.mubr.bf16.mxu1 %v10146_v58  ;;  %17754 = vmatpush3.bf16.msra.mxu1 %v19660_v3 }
 0x609   : > { %17755 = vmatprep.subr.bf16.mxu1 %v19661_v33 }
 0x60c   : > { %17756 = vmatpush3.bf16.msra.mxu1 %v19661_v33 }
 0x60d   : > { %17757 = vmatprep.subr.bf16.mxu1 %v19662_v34 }
 0x60f   : > { %17750 = vmatmul.mubr.bf16.gmra.mrb[60].mxu1 %v10145_v43 }
 0x610   : > { %17758 = vmatpush3.bf16.msra.mxu1 %v19662_v34  ;;  %17769 = vmatprep.mubr.bf16.mxu1 %v10144_v42 }
 0x611   : > { %17759 = vmatprep.subr.bf16.mxu1 %v19663_v45 }
 0x614   : > { %17760 = vmatpush3.bf16.msra.mxu1 %v19663_v45 }
 0x615   : > { %17761 = vmatprep.subr.bf16.mxu1 %v19664_v4 }
 0x618   : > { %17762 = vmatpush3.bf16.msra.mxu1 %v19664_v4 }
 0x619   : > { %17763 = vmatprep.subr.bf16.mxu1 %v19665_v56 }
 0x61c   : > { %17764 = vmatpush3.bf16.msra.mxu1 %v19665_v56  ;;  %v9258_v56 = vld [vmem:[#allocation3 + $0x10] sm:$0x7] }
 0x61d   : > { %17765 = vmatprep.subr.bf16.mxu1 %v19666_v12 }
 0x620   : > { %17766 = vmatpush3.bf16.msra.mxu1 %v19666_v12 }
 0x621   : > { %17767 = vmatprep.subr.bf16.mxu1 %v19667_v47 }
 0x624   : > { %17768 = vmatpush3.bf16.msra.mxu1 %v19667_v47 }
 0x625   : > { %17777 = vmatprep.subr.bf16.mxu1 %v19668_v13 }
 0x627   : > { %17770 = vmatmul.mubr.bf16.vlgmr.msra.gmra.mrb[56].mxu1 %v10146_v58 }
 0x628   : > { %17773 = vmatprep.mubr.bf16.mxu1 %v10288_v49  ;;  %17778 = vmatpush3.bf16.msra.mxu1 %v19668_v13 }
 0x629   : > { %17779 = vmatprep.subr.bf16.mxu1 %v19669_v9 }
 0x62c   : > { %17780 = vmatpush3.bf16.msra.mxu1 %v19669_v9 }
 0x62d   : > { %17781 = vmatprep.subr.bf16.mxu1 %v19670_v63 }
 0x62f   : > { %17774 = vmatmul.mubr.bf16.gmra.mrb[60].mxu1 %v10287_v6  ;;  %v19685_v6 = vld [vmem:[#allocation7 + $0x8] sm:$0xff]  }
 0x630   : > { %17782 = vmatpush3.bf16.msra.mxu1 %v19670_v63  ;;  %17793 = vmatprep.mubr.bf16.mxu1 %v10146_v58  ;;  %v19687_v63 = vld [vmem:[#allocation7 + $0x18] sm:$0xff]  }
 0x631   : > { %17783 = vmatprep.subr.bf16.mxu1 %v19671_v15 }
 0x634   : > { %17784 = vmatpush3.bf16.msra.mxu1 %v19671_v15  ;;  %v19688_v15 = vld [vmem:[#allocation7 + $0x20] sm:$0xff]  }
 0x635   : > { %17785 = vmatprep.subr.bf16.mxu1 %v19672_v57 }
 0x638   : > { %17786 = vmatpush3.bf16.msra.mxu1 %v19672_v57  ;;  %v19690_v57 = vld [vmem:[#allocation7 + $0x30] sm:$0xff]  }
 0x639   : > { %17787 = vmatprep.subr.bf16.mxu1 %v19673_v21 }
 0x63c   : > { %17788 = vmatpush3.bf16.msra.mxu1 %v19673_v21 }
 0x63d   : > { %17789 = vmatprep.subr.bf16.mxu1 %v19674_v22 }
 0x640   : > { %17790 = vmatpush3.bf16.msra.mxu1 %v19674_v22 }
 0x641   : > { %17791 = vmatprep.subr.bf16.mxu1 %v19675_v25 }
 0x644   : > { %17792 = vmatpush3.bf16.msra.mxu1 %v19675_v25 }
 0x647   : > { %17794 = vmatmul.mubr.bf16.vlgmr.msra.gmra.mrb[56].mxu1 %v10288_v49  ;;  %v19686_v49 = vld [vmem:[#allocation7 + $0x10] sm:$0xff]  }
 0x648   : > { %17797 = vmatprep.mubr.bf16.mxu1 %v10428_v50 }
 0x64f   : > { %17798 = vmatmul.mubr.bf16.gmra.mrb[60].mxu1 %v10427_v8 }
 0x650   : > { %12190 = vmatprep.mubr.bf16.mxu1 %v22881_v24 }
 0x6a1   : > { %v17579_v46 = vpop.f32.mrb[56].mxu0 }
 0x6a2   : > { %9201 = vst [vmem:[#allocation4 + $0x10] sm:$0xff] %v17579_v46  ;;  %v9162_v11 = vpop.f32.mrb[57].mxu0 }
 0x6a3   : > { %9199 = vst [vmem:[#allocation4] sm:$0xff] %v9162_v11  ;;  %v17580_v14 = vpop.f32.mrb[58].mxu0 }
 0x6a4   : > { %v9165_v48 = vpop.f32.mrb[59].mxu0 }
 0x6a9   : > { %v9210_v0 = vld [vmem:[#allocation4 + $0x10] ss:$2 sm:$0xf]  ;;  %v9212_v10 = vld [vmem:[#allocation4 + $0x11] ss:$2 sm:$0xf] }
 0x6aa   : > { %v9213_v17 = vmax.f32 %v9210_v0, %v9212_v10  ;;  %v17583_v26 = vpop.f32.mrb[60].mxu0  ;;  %v9206_v19 = vld [vmem:[#allocation4] ss:$2 sm:$0xf] }
 0x6ab   : > { %9205 = vst [vmem:[#allocation4 + $0x30] sm:$0xff] %v17583_v26  ;;  %v9178_v27 = vpop.f32.mrb[61].mxu0  ;;  %v9207_v28 = vld [vmem:[#allocation4 + $0x1] ss:$2 sm:$0xf] }
 0x6ac   : > { %9203 = vst [vmem:[#allocation4 + $0x20] sm:$0xff] %v9178_v27  ;;  %v17584_v35 = vpop.f32.mrb[62].mxu0  ;;  %v9208_v37 = vmax.f32 %v9206_v19, %v9207_v28 }
 0x6ad   : > { %v9181_v7 = vpop.f32.mrb[63].mxu0 }
 0x6ae   : > { %v9214_v2 = vmax.f32 %v9208_v37, %v9213_v17 }
 0x6b0   : > { %v9221_v23 = vadd.f32 %v22887_v36, %v9214_v2 }
 0x6b2   : > { %v9242_v55 = vld [vmem:[#allocation4 + $0x30] ss:$2 sm:$0xf]  ;;  %v9244_v60 = vld [vmem:[#allocation4 + $0x31] ss:$2 sm:$0xf] }
 0x6b3   : > { %v9245_v38 = vmax.f32 %v9242_v55, %v9244_v60  ;;  %v9222_v44 = vmax.f32 %v9221_v23, 0.0  ;;  %v9238_v52 = vld [vmem:[#allocation4 + $0x20] ss:$2 sm:$0xf] }
 0x6b4   : > { %v9239_v40 = vld [vmem:[#allocation4 + $0x21] ss:$2 sm:$0xf] }
 0x6b5   : > { %v9223_v51 = vpack.c.bf16 %v9222_v44, %v9222_v44  ;;  %v9240_v41 = vmax.f32 %v9238_v52, %v9239_v40 }
 0x6b7   : > { %v9225_v59 = vshrl.u32 %v9223_v51, 16  ;;  %v9246_v61 = vmax.f32 %v9240_v41, %v9245_v38  ;;  %v9228_v1 = vshll.u32 %v9223_v51, 16  ;;  %v10575_v38 = vld [vmem:[#allocation3 + $0x18] sm:$0x7] }
 0x6b9   : > { %v9227_v62 = vrot.slane %v9225_v59, 7  ;;  %v9247_v39 = vadd.f32 %v22887_v36, %v9246_v61 }
 0x6bb   : > { %v9230_v43 = vor.u32 %v9228_v1, %v9227_v62  ;;  %v9248_v33 = vmax.f32 %v9247_v39, 0.0  ;;  %v10596_v62 = vld [vmem:[#allocation3 + $0x20] sm:$0x7] }
 0x6bd   : > { %v9236_v42 = vsel %vm22891_vm8, %v9230_v43, %v9235_v5  ;;  %v9249_v58 = vpack.c.bf16 %v9248_v33, %v9248_v33 }
 0x6be   : > { %9237 = vst [vmem:[#allocation3 + $0x8] sm:$0x7] %v9236_v42 }
 0x6bf   : > { %v9251_v34 = vshrl.u32 %v9249_v58, 16  ;;  %v9254_v4 = vshll.u32 %v9249_v58, 16 }
 0x6c1   : > { %v9253_v45 = vrot.slane %v9251_v34, 7 }
 0x6c3   : > { %v9256_v12 = vor.u32 %v9254_v4, %v9253_v45 }
 0x6c5   : > { %v22897_v47 = vld [vmem:[#allocation3 + $0x8] sm:$0xff]  ;;  %v9259_v13 = vsel %vm22891_vm8, %v9256_v12, %v9258_v56 }
 0x6c6   : > { %17817 = vmatprep.mubr.bf16.mxu0 %v22897_v47  ;;  %9260 = vst [vmem:[#allocation3 + $0x10] sm:$0x7] %v9259_v13  ;;  %v19693_v13 = vld [vmem:[#allocation7 + $0x188] sm:$0xff]  }
 0x6cd   : > { %v22902_v9 = vld [vmem:[#allocation3 + $0x10] sm:$0xff] }
 0x6ce   : > { %17818 = vmatmul.mubr.bf16.vlgmr.msra.gmra.mrb[64].mxu0 %v22902_v9 }
 0x6cf   : > { %17826 = vmatpush3.bf16.msra.mxu0 %v19684_v29 }
 0x6d0   : > { %17827 = vmatprep.subr.bf16.mxu0 %v19685_v6 }
 0x6d3   : > { %17828 = vmatpush3.bf16.msra.mxu0 %v19685_v6  ;;  %v19694_v6 = vld [vmem:[#allocation7 + $0x190] sm:$0xff]  }
 0x6d4   : > { %17829 = vmatprep.subr.bf16.mxu0 %v19686_v49 }
 0x6d7   : > { %17830 = vmatpush3.bf16.msra.mxu0 %v19686_v49  ;;  %v19695_v49 = vld [vmem:[#allocation7 + $0x198] sm:$0xff]  }
 0x6d8   : > { %17831 = vmatprep.subr.bf16.mxu0 %v19687_v63 }
 0x6db   : > { %17832 = vmatpush3.bf16.msra.mxu0 %v19687_v63  ;;  %v19696_v63 = vld [vmem:[#allocation7 + $0x1a0] sm:$0xff]  }
 0x6dc   : > { %17833 = vmatprep.subr.bf16.mxu0 %v19688_v15 }
 0x6df   : > { %17834 = vmatpush3.bf16.msra.mxu0 %v19688_v15  ;;  %v19697_v15 = vld [vmem:[#allocation7 + $0x1a8] sm:$0xff]  }
 0x6e0   : > { %17835 = vmatprep.subr.bf16.mxu0 %v19689_v16 }
 0x6e3   : > { %17836 = vmatpush3.bf16.msra.mxu0 %v19689_v16  ;;  %v19698_v16 = vld [vmem:[#allocation7 + $0x1b0] sm:$0xff]  }
 0x6e4   : > { %17837 = vmatprep.subr.bf16.mxu0 %v19690_v57 }
 0x6e7   : > { %17838 = vmatpush3.bf16.msra.mxu0 %v19690_v57  ;;  %v19699_v57 = vld [vmem:[#allocation7 + $0x1b8] sm:$0xff]  }
 0x6e8   : > { %17839 = vmatprep.subr.bf16.mxu0 %v19691_v18 }
 0x6eb   : > { %17840 = vmatpush3.bf16.msra.mxu0 %v19691_v18  ;;  %v19700_v18 = vld [vmem:[#allocation7 + $0x40] sm:$0xff]  }
 0x6ec   : > { %17849 = vmatprep.subr.bf16.mxu0 %v22905_v54 }
 0x71a   : > { %v17795_v21 = vpop.f32.mrb[56].mxu1 }
 0x71b   : > { %10552 = vst [vmem:[#allocation4 + $0x10] sm:$0xff] %v17795_v21  ;;  %v10513_v20 = vpop.f32.mrb[57].mxu1  ;;  %v19701_v21 = vld [vmem:[#allocation7 + $0x48] sm:$0xff]  }
 0x71c   : > { %10550 = vst [vmem:[#allocation4] sm:$0xff] %v10513_v20  ;;  %v17796_v22 = vpop.f32.mrb[58].mxu1  ;;  %v11018_v20 = vshrl.u32 %v22881_v24, 16 }
 0x71d   : > { %v10516_v30 = vpop.f32.mrb[59].mxu1 }
 0x71e   : > { %v11025_v30 = vshll.u32 %v22897_v47, 16 }
 0x722   : > { %v10560_v25 = vld [vmem:[#allocation4 + $0x10] ss:$2 sm:$0xf]  ;;  %v10561_v31 = vld [vmem:[#allocation4 + $0x11] ss:$2 sm:$0xf] }
 0x723   : > { %v10562_v32 = vmax.f32 %v10560_v25, %v10561_v31  ;;  %v17799_v8 = vpop.f32.mrb[60].mxu1  ;;  %v10557_v53 = vld [vmem:[#allocation4] ss:$2 sm:$0xf] }
 0x724   : > { %10556 = vst [vmem:[#allocation4 + $0x30] sm:$0xff] %v17799_v8  ;;  %v10529_v50 = vpop.f32.mrb[61].mxu1  ;;  %v10558_v46 = vld [vmem:[#allocation4 + $0x1] ss:$2 sm:$0xf] }
 0x725   : > { %10554 = vst [vmem:[#allocation4 + $0x20] sm:$0xff] %v10529_v50  ;;  %v17800_v11 = vpop.f32.mrb[62].mxu1  ;;  %v10559_v14 = vmax.f32 %v10557_v53, %v10558_v46  ;;  %v19702_v25 = vld [vmem:[#allocation7 + $0x50] sm:$0xff]   ;;  %v10605_v8 = vld [vmem:[#allocation3 + $0x28] sm:$0x3]  ;;  %v19703_v53 = vld [vmem:[#allocation7 + $0x58] sm:$0xff]  }
 0x726   : > { %v10532_v48 = vpop.f32.mrb[63].mxu1  ;;  %v19704_v46 = vld [vmem:[#allocation7 + $0x60] sm:$0xff]   ;;  %v19705_v11 = vld [vmem:[#allocation7 + $0x68] sm:$0xff]  }
 0x727   : > { %v10563_v0 = vmax.f32 %v10559_v14, %v10562_v32  ;;  %v11027_v32 = vrot.slane %v11025_v30, 1  ;;  %v19706_v14 = vld [vmem:[#allocation7 + $0x70] sm:$0xff]   ;;  %v19707_v48 = vld [vmem:[#allocation7 + $0x78] sm:$0xff]   ;;  %v19729_v30 = vld [vmem:[#allocation7 + $0xa8] sm:$0xff]  }
 0x729   : > { %v10564_v10 = vadd.f32 %v22887_v36, %v10563_v0  ;;  %v11033_v0 = vshll.u32 %v22902_v9, 16 }
 0x72b   : > { %v10581_v17 = vld [vmem:[#allocation4 + $0x30] ss:$2 sm:$0xf]  ;;  %v10582_v26 = vld [vmem:[#allocation4 + $0x31] ss:$2 sm:$0xf] }
 0x72c   : > { %v10583_v19 = vmax.f32 %v10581_v17, %v10582_v26  ;;  %v10565_v27 = vmax.f32 %v10564_v10, 0.0  ;;  %v10578_v28 = vld [vmem:[#allocation4 + $0x20] ss:$2 sm:$0xf]  ;;  %v11035_v10 = vrot.slane %v11033_v0, 1  ;;  %v19708_v17 = vld [vmem:[#allocation7 + $0x100] sm:$0xff]  }
 0x72d   : > { %v10579_v35 = vld [vmem:[#allocation4 + $0x21] ss:$2 sm:$0xf]  ;;  %v11029_v26 = vshrl.u32 %v22897_v47, 16  ;;  %v19739_v0 = vld [vmem:[#allocation7 + $0x178] sm:$0xff]  }
 0x72e   : > { %v10566_v37 = vpack.c.bf16 %v10565_v27, %v10565_v27  ;;  %v10580_v29 = vmax.f32 %v10578_v28, %v10579_v35  ;;  %v19709_v35 = vld [vmem:[#allocation7 + $0x108] sm:$0xff]  }
 0x72f   : > { %v11031_v27 = vor.u32 %v11029_v26, %v11027_v32  ;;  %v19743_v26 = vld [vmem:[#allocation7 + $0x218] sm:$0xff]  }
 0x730   : > { %v10568_v7 = vshrl.u32 %v10566_v37, 16  ;;  %v10584_v2 = vmax.f32 %v10580_v29, %v10583_v19  ;;  %v10571_v55 = vshll.u32 %v10566_v37, 16  ;;  %v11037_v19 = vshrl.u32 %v22902_v9, 16 }
 0x731   : > { %v11036_v37 = vsel %vm1072_vm1, %v11031_v27, %v11035_v10  ;;  %v19745_v27 = vld [vmem:[#allocation7 + $0x228] sm:$0xff]  }
 0x732   : > { %v10570_v23 = vrot.slane %v10568_v7, 7  ;;  %v10585_v60 = vadd.f32 %v22887_v36, %v10584_v2  ;;  %v11039_v28 = vor.u32 %v11037_v19, %v11035_v10  ;;  %v19710_v7 = vld [vmem:[#allocation7 + $0x110] sm:$0xff]   ;;  %v19711_v2 = vld [vmem:[#allocation7 + $0x118] sm:$0xff]   ;;  %v19740_v10 = vld [vmem:[#allocation7 + $0x200] sm:$0xff]  }
 0x733   : > { %v19744_v19 = vld [vmem:[#allocation7 + $0x220] sm:$0xff]  }
 0x734   : > { %v10573_v44 = vor.u32 %v10571_v55, %v10570_v23  ;;  %v10586_v52 = vmax.f32 %v10585_v60, 0.0  ;;  %v19712_v23 = vld [vmem:[#allocation7 + $0x120] sm:$0xff]   ;;  %v19713_v55 = vld [vmem:[#allocation7 + $0x128] sm:$0xff]   ;;  %v19714_v60 = vld [vmem:[#allocation7 + $0x130] sm:$0xff]  }
 0x736   : > { %v10576_v40 = vsel %vm22891_vm8, %v10573_v44, %v10575_v38  ;;  %v10587_v51 = vpack.c.bf16 %v10586_v52, %v10586_v52  ;;  %v19715_v38 = vld [vmem:[#allocation7 + $0x138] sm:$0xff]   ;;  %v19716_v44 = vld [vmem:[#allocation7 + $0x1c0] sm:$0xff]   ;;  %v19717_v52 = vld [vmem:[#allocation7 + $0x1c8] sm:$0xff]  }
 0x737   : > { %10577 = vst [vmem:[#allocation3 + $0x18] sm:$0x7] %v10576_v40  ;;  %v19718_v40 = vld [vmem:[#allocation7 + $0x1d0] sm:$0xff]  }
 0x738   : > { %v10589_v41 = vshrl.u32 %v10587_v51, 16  ;;  %v10592_v61 = vshll.u32 %v10587_v51, 16 }
 0x73a   : > { %v10591_v59 = vrot.slane %v10589_v41, 7 }
 0x73c   : > { %v10594_v1 = vor.u32 %v10592_v61, %v10591_v59  ;;  %v19719_v59 = vld [vmem:[#allocation7 + $0x1d8] sm:$0xff]   ;;  %v19748_v61 = vld [vmem:[%s23511_s7 + $0x100] ss:$16 sps:$4 sm:$0xff]  }
 0x73e   : > { %v10603_v39 = vld [vmem:[#allocation3 + $0x18] sm:$0xff]  ;;  %v10597_v5 = vsel %vm22891_vm8, %v10594_v1, %v10596_v62  ;;  %v19750_v62 = vld [vmem:[%s23511_s7 + $0x104] ss:$16 sps:$4 sm:$0xff]  }
 0x73f   : > { %17821 = vmatprep.mubr.bf16.mxu0 %v10603_v39  ;;  %10598 = vst [vmem:[#allocation3 + $0x20] sm:$0x7] %v10597_v5  ;;  %v11041_v36 = vshll.u32 %v10603_v39, 16  ;;  %v11045_v42 = vshrl.u32 %v10603_v39, 16  ;;  %v22920_v34 = vrot.slane %v10603_v39, 1  ;;  %12158 = vmatprep.subr.bf16.mxu1 %v19750_v62 }
 0x740   : > { %v19753_v1 = vld [vmem:[%s23511_s7 + $0x124] ss:$16 sps:$4 sm:$0xff]   ;;  %12159 = vmatpush1.bf16.msra.mxu1 %v19748_v61  ;;  %v19751_v5 = vld [vmem:[%s23511_s7 + $0x120] ss:$16 sps:$4 sm:$0xff]  }
 0x741   : > { %v22914_v43 = vrot.slane %v11041_v36, 1  ;;  %12160 = vmatprep.subr.bf16.mxu1 %v19753_v1  ;;  %v19756_v36 = vld [vmem:[%s23511_s7 + $0x144] ss:$16 sps:$4 sm:$0xff]  }
 0x743   : > { %v22927_v3 = vor.u32 %v11045_v42, %v22914_v43  ;;  %v11044_v29 = vsel %vm1072_vm1, %v11039_v28, %v22914_v43  ;;  %v19721_v43 = vld [vmem:[#allocation7 + $0x1e8] sm:$0xff]   ;;  %v19722_v42 = vld [vmem:[#allocation7 + $0x1f0] sm:$0xff]  }
 0x744   : > { %12161 = vmatpush1.bf16.msra.mxu1 %v19751_v5  ;;  %v19746_v28 = vld [vmem:[#allocation7 + $0x230] sm:$0xff]  }
 0x745   : > { %12162 = vmatprep.subr.bf16.mxu1 %v19756_v36 }
 0x746   : > { %v22916_v33 = vld [vmem:[#allocation3 + $0x20] sm:$0xff] }
 0x747   : > { %17822 = vmatmul.mubr.bf16.gmra.mrb[68].mxu0 %v22916_v33  ;;  %v11189_v58 = vshll.u32 %v22916_v33, 16  ;;  %v22923_v45 = vrot.slane %v22916_v33, 1  ;;  %v11193_v51 = vshrl.u32 %v22916_v33, 16 }
 0x748   : > { %17841 = vmatprep.mubr.bf16.mxu0 %v22881_v24 }
 0x749   : > { %v22929_v4 = vrot.slane %v11189_v58, 1  ;;  %v22934_v56 = vsel %vm1718_vm2, %v22920_v34, %v22923_v45  ;;  %v19723_v58 = vld [vmem:[#allocation7 + $0x1f8] sm:$0xff]  }
 0x74b   : > { %v22939_v12 = vsel %vm1072_vm1, %v22927_v3, %v22929_v4  ;;  %v11195_v41 = vor.u32 %v11193_v51, %v22929_v4 }
 0x74f   : > { %17842 = vmatmul.mubr.bf16.vlgmr.msra.gmra.mrb[64].mxu0 %v22897_v47 }
 0x750   : > { %17850 = vmatpush3.bf16.msra.mxu0 %v22905_v54  ;;  %17845 = vmatprep.mubr.bf16.mxu0 %v22902_v9  ;;  %v11020_v54 = vshll.u32 %v22881_v24, 16 }
 0x751   : > { %17851 = vmatprep.subr.bf16.mxu0 %v19693_v13 }
 0x752   : > { %v11022_v22 = vrot.slane %v11020_v54, 1 }
 0x754   : > { %17852 = vmatpush3.bf16.msra.mxu0 %v19693_v13  ;;  %v11023_v31 = vor.u32 %v11022_v22, %v11018_v20  ;;  %v19724_v13 = vld [vmem:[#allocation7 + $0x80] sm:$0xff]   ;;  %v19727_v20 = vld [vmem:[#allocation7 + $0x98] sm:$0xff]  }
 0x755   : > { %17853 = vmatprep.subr.bf16.mxu0 %v19694_v6 }
 0x756   : > { %v11028_v50 = vsel %vm1072_vm1, %v11023_v31, %v11027_v32  ;;  %v19731_v31 = vld [vmem:[#allocation7 + $0xb8] sm:$0xff]   ;;  %v11488_v32 = vrot.slane %v22902_v9, 1 }
 0x757   : > { %17846 = vmatmul.mubr.bf16.gmra.mrb[68].mxu0 %v10603_v39 }
 0x758   : > { %17854 = vmatpush3.bf16.msra.mxu0 %v19694_v6  ;;  %17865 = vmatprep.mubr.bf16.mxu0 %v22902_v9  ;;  %v19736_v9 = vld [vmem:[#allocation7 + $0x160] sm:$0xff]  }
 0x759   : > { %17855 = vmatprep.subr.bf16.mxu0 %v19695_v49 }
 0x75c   : > { %17856 = vmatpush3.bf16.msra.mxu0 %v19695_v49  ;;  %v19725_v49 = vld [vmem:[#allocation7 + $0x88] sm:$0xff]  }
 0x75d   : > { %17857 = vmatprep.subr.bf16.mxu0 %v19696_v63 }
 0x760   : > { %17858 = vmatpush3.bf16.msra.mxu0 %v19696_v63 }
 0x761   : > { %17859 = vmatprep.subr.bf16.mxu0 %v19697_v15 }
 0x764   : > { %17860 = vmatpush3.bf16.msra.mxu0 %v19697_v15 }
 0x765   : > { %17861 = vmatprep.subr.bf16.mxu0 %v19698_v16 }
 0x768   : > { %17862 = vmatpush3.bf16.msra.mxu0 %v19698_v16  ;;  %v11463_v16 = vld [vmem:[#allocation3] sm:$0xfe] }
 0x769   : > { %17863 = vmatprep.subr.bf16.mxu0 %v19699_v57  ;;  %v11485_v54 = vrot.slane %v11463_v16, 1 }
 0x76c   : > { %17864 = vmatpush3.bf16.msra.mxu0 %v19699_v57  ;;  %v19726_v57 = vld [vmem:[#allocation7 + $0x90] sm:$0xff]  }
 0x76d   : > { %17873 = vmatprep.subr.bf16.mxu0 %v19700_v18 }
 0x76f   : > { %17866 = vmatmul.mubr.bf16.vlgmr.msra.gmra.mrb[64].mxu0 %v10603_v39  ;;  %v19720_v39 = vld [vmem:[#allocation7 + $0x1e0] sm:$0xff]  }
 0x770   : > { %17869 = vmatprep.mubr.bf16.mxu0 %v22916_v33  ;;  %17874 = vmatpush3.bf16.msra.mxu0 %v19700_v18  ;;  %v19754_v33 = vld [vmem:[%s23511_s7 + $0x140] ss:$16 sps:$4 sm:$0xff]  }
 0x771   : > { %17875 = vmatprep.subr.bf16.mxu0 %v19701_v21  ;;  %12163 = vmatpush1.bf16.msra.mxu1 %v19754_v33 }
 0x774   : > { %17876 = vmatpush3.bf16.msra.mxu0 %v19701_v21  ;;  %v11486_v21 = vrot.slane %v22897_v47, 1  ;;  %v19732_v47 = vld [vmem:[#allocation7 + $0x140] sm:$0xff]  }
 0x775   : > { %17877 = vmatprep.subr.bf16.mxu0 %v19702_v25 }
 0x776   : > { %v11487_v22 = vsel %vm1718_vm2, %v11485_v54, %v11486_v21  ;;  %v19780_v54 = vld [vmem:[%s23511_s7 + $0x14c] ss:$16 sps:$4 sm:$0xff]  }
 0x777   : > { %17870 = vmatmul.mubr.bf16.gmra.mrb[68].mxu0 %v10605_v8  ;;  %v19733_v8 = vld [vmem:[#allocation7 + $0x148] sm:$0xff]  }
 0x778   : > { %17878 = vmatpush3.bf16.msra.mxu0 %v19702_v25  ;;  %17889 = vmatprep.mubr.bf16.mxu0 %v11028_v50  ;;  %v19730_v25 = vld [vmem:[#allocation7 + $0xb0] sm:$0xff]   ;;  %v11491_v50 = vsel %vm1718_vm2, %v11488_v32, %v22920_v34 }
 0x779   : > { %17879 = vmatprep.subr.bf16.mxu0 %v19703_v53 }
 0x77c   : > { %17880 = vmatpush3.bf16.msra.mxu0 %v19703_v53  ;;  %v11489_v53 = vsel %vm1718_vm2, %v11486_v21, %v11488_v32  ;;  %v19778_v21 = vld [vmem:[%s23511_s7 + $0x148] ss:$16 sps:$4 sm:$0xff]  }
 0x77d   : > { %17881 = vmatprep.subr.bf16.mxu0 %v19704_v46  ;;  %v19790_v32 = vld [vmem:[%s23511_s7 + $0x1c8] ss:$16 sps:$4 sm:$0xff]  }
 0x780   : > { %17882 = vmatpush3.bf16.msra.mxu0 %v19704_v46  ;;  %v19734_v46 = vld [vmem:[#allocation7 + $0x150] sm:$0xff]  }
 0x781   : > { %17883 = vmatprep.subr.bf16.mxu0 %v19705_v11 }
 0x784   : > { %17884 = vmatpush3.bf16.msra.mxu0 %v19705_v11  ;;  %v19735_v11 = vld [vmem:[#allocation7 + $0x158] sm:$0xff]  }
 0x785   : > { %17885 = vmatprep.subr.bf16.mxu0 %v19706_v14 }
 0x788   : > { %17886 = vmatpush3.bf16.msra.mxu0 %v19706_v14  ;;  %v19737_v14 = vld [vmem:[#allocation7 + $0x168] sm:$0xff]  }
 0x789   : > { %17887 = vmatprep.subr.bf16.mxu0 %v19707_v48 }
 0x78c   : > { %17888 = vmatpush3.bf16.msra.mxu0 %v19707_v48  ;;  %v19738_v48 = vld [vmem:[#allocation7 + $0x170] sm:$0xff]  }
 0x78d   : > { %17897 = vmatprep.subr.bf16.mxu0 %v19708_v17 }
 0x78f   : > { %17890 = vmatmul.mubr.bf16.vlgmr.msra.gmra.mrb[64].mxu0 %v11036_v37 }
 0x790   : > { %17893 = vmatprep.mubr.bf16.mxu0 %v11044_v29  ;;  %17898 = vmatpush3.bf16.msra.mxu0 %v19708_v17  ;;  %v19741_v17 = vld [vmem:[#allocation7 + $0x208] sm:$0xff]  }
 0x791   : > { %17899 = vmatprep.subr.bf16.mxu0 %v19709_v35 }
 0x794   : > { %17900 = vmatpush3.bf16.msra.mxu0 %v19709_v35  ;;  %v19747_v35 = vld [vmem:[#allocation7 + $0x238] sm:$0xff]  }
 0x795   : > { %17901 = vmatprep.subr.bf16.mxu0 %v19710_v7 }
 0x797   : > { %17894 = vmatmul.mubr.bf16.gmra.mrb[68].mxu0 %v22927_v3  ;;  %v22978_v3 = vld [vmem:[#allocation3 + $0x28] sm:$0x7] }
 0x798   : > { %17902 = vmatpush3.bf16.msra.mxu0 %v19710_v7  ;;  %17913 = vmatprep.mubr.bf16.mxu0 %v11036_v37  ;;  %v11335_v4 = vshll.u32 %v22978_v3, 16  ;;  %v11339_v15 = vshrl.u32 %v22978_v3, 16  ;;  %v11774_v37 = vrot.slane %v22978_v3, 1  ;;  %v19759_v7 = vld [vmem:[%s23511_s7 + $0x164] ss:$16 sps:$4 sm:$0xff]  }
 0x799   : > { %17903 = vmatprep.subr.bf16.mxu0 %v19711_v2  ;;  %12164 = vmatprep.subr.bf16.mxu1 %v19759_v7  ;;  %v19820_v7 = vld [vmem:[%s23511_s7 + $0x8] ss:$16 sps:$4 sm:$0xff]  }
 0x79a   : > { %v11337_v6 = vrot.slane %v11335_v4, 1  ;;  %v23033_v4 = vld [vmem:[%s23510_s6] ss:$0 sm:$0xff] }
 0x79c   : > { %17904 = vmatpush3.bf16.msra.mxu0 %v19711_v2  ;;  %v11338_v63 = vsel %vm1072_vm1, %v11195_v41, %v11337_v6  ;;  %v11341_v18 = vor.u32 %v11339_v15, %v11337_v6  ;;  %v19757_v2 = vld [vmem:[%s23511_s7 + $0x160] ss:$16 sps:$4 sm:$0xff]   ;;  %v19772_v15 = vld [vmem:[%s23511_s7 + $0x108] ss:$16 sps:$4 sm:$0xff]  }
 0x79d   : > { %17905 = vmatprep.subr.bf16.mxu0 %v19712_v23  ;;  %12165 = vmatpush1.bf16.msra.mxu1 %v19757_v2  ;;  %v19825_v2 = vld [vmem:[%s23511_s7 + $0x2c] ss:$16 sps:$4 sm:$0xff]  }
 0x7a0   : > { %17906 = vmatpush3.bf16.msra.mxu0 %v19712_v23  ;;  %v19762_v23 = vld [vmem:[%s23511_s7 + $0x184] ss:$16 sps:$4 sm:$0xff]  }
 0x7a1   : > { %17907 = vmatprep.subr.bf16.mxu0 %v19713_v55  ;;  %12166 = vmatprep.subr.bf16.mxu1 %v19762_v23  ;;  %v19823_v23 = vld [vmem:[%s23511_s7 + $0x28] ss:$16 sps:$4 sm:$0xff]  }
 0x7a4   : > { %17908 = vmatpush3.bf16.msra.mxu0 %v19713_v55  ;;  %v19763_v55 = vld [vmem:[%s23511_s7 + $0x1a0] ss:$16 sps:$4 sm:$0xff]  }
 0x7a5   : > { %17909 = vmatprep.subr.bf16.mxu0 %v19714_v60 }
 0x7a8   : > { %17910 = vmatpush3.bf16.msra.mxu0 %v19714_v60  ;;  %v19768_v60 = vld [vmem:[%s23511_s7 + $0x1c4] ss:$16 sps:$4 sm:$0xff]  }
 0x7a9   : > { %17911 = vmatprep.subr.bf16.mxu0 %v19715_v38 }
 0x7ac   : > { %17912 = vmatpush3.bf16.msra.mxu0 %v19715_v38  ;;  %v19766_v38 = vld [vmem:[%s23511_s7 + $0x1c0] ss:$16 sps:$4 sm:$0xff]  }
 0x7ad   : > { %17921 = vmatprep.subr.bf16.mxu0 %v19716_v44 }
 0x7af   : > { %17914 = vmatmul.mubr.bf16.vlgmr.msra.gmra.mrb[64].mxu0 %v11044_v29 }
 0x7b0   : > { %17917 = vmatprep.mubr.bf16.mxu0 %v22939_v12  ;;  %17922 = vmatpush3.bf16.msra.mxu0 %v19716_v44  ;;  %v19771_v44 = vld [vmem:[%s23511_s7 + $0x1e4] ss:$16 sps:$4 sm:$0xff]  }
 0x7b1   : > { %17923 = vmatprep.subr.bf16.mxu0 %v19717_v52 }
 0x7b4   : > { %17924 = vmatpush3.bf16.msra.mxu0 %v19717_v52  ;;  %v19769_v52 = vld [vmem:[%s23511_s7 + $0x1e0] ss:$16 sps:$4 sm:$0xff]  }
 0x7b5   : > { %17925 = vmatprep.subr.bf16.mxu0 %v19718_v40 }
 0x7b7   : > { %17918 = vmatmul.mubr.bf16.gmra.mrb[68].mxu0 %v11195_v41 }
 0x7b8   : > { %17926 = vmatpush3.bf16.msra.mxu0 %v19718_v40  ;;  %17937 = vmatprep.mubr.bf16.mxu0 %v11044_v29  ;;  %v11775_v29 = vsel %vm1718_vm2, %v22923_v45, %v11774_v37  ;;  %v19774_v40 = vld [vmem:[%s23511_s7 + $0x10c] ss:$16 sps:$4 sm:$0xff]  }
 0x7b9   : > { %17927 = vmatprep.subr.bf16.mxu0 %v19719_v59 }
 0x7bc   : > { %17928 = vmatpush3.bf16.msra.mxu0 %v19719_v59 }
 0x7bd   : > { %17929 = vmatprep.subr.bf16.mxu0 %v19720_v39 }
 0x7c0   : > { %17930 = vmatpush3.bf16.msra.mxu0 %v19720_v39 }
 0x7c1   : > { %17931 = vmatprep.subr.bf16.mxu0 %v19721_v43 }
 0x7c4   : > { %17932 = vmatpush3.bf16.msra.mxu0 %v19721_v43 }
 0x7c5   : > { %17933 = vmatprep.subr.bf16.mxu0 %v19722_v42 }
 0x7c8   : > { %17934 = vmatpush3.bf16.msra.mxu0 %v19722_v42 }
 0x7c9   : > { %17935 = vmatprep.subr.bf16.mxu0 %v19723_v58 }
 0x7cc   : > { %17936 = vmatpush3.bf16.msra.mxu0 %v19723_v58 }
 0x7cd   : > { %17945 = vmatprep.subr.bf16.mxu0 %v19724_v13 }
 0x7cf   : > { %17938 = vmatmul.mubr.bf16.vlgmr.msra.gmra.mrb[64].mxu0 %v22939_v12  ;;  %v19728_v12 = vld [vmem:[#allocation7 + $0xa0] sm:$0xff]  }
 0x7d0   : > { %17941 = vmatprep.mubr.bf16.mxu0 %v11338_v63  ;;  %17946 = vmatpush3.bf16.msra.mxu0 %v19724_v13 }
 0x7d1   : > { %17947 = vmatprep.subr.bf16.mxu0 %v19725_v49 }
 0x7d4   : > { %17948 = vmatpush3.bf16.msra.mxu0 %v19725_v49 }
 0x7d5   : > { %17949 = vmatprep.subr.bf16.mxu0 %v19726_v57 }
 0x7d7   : > { %17942 = vmatmul.mubr.bf16.gmra.mrb[68].mxu0 %v11341_v18  ;;  %v19775_v18 = vld [vmem:[%s23511_s7 + $0x128] ss:$16 sps:$4 sm:$0xff]  }
 0x7d8   : > { %17950 = vmatpush3.bf16.msra.mxu0 %v19726_v57  ;;  %17961 = vmatprep.mubr.bf16.mxu0 %v11487_v22  ;;  %v19777_v57 = vld [vmem:[%s23511_s7 + $0x12c] ss:$16 sps:$4 sm:$0xff]   ;;  %v19781_v22 = vld [vmem:[%s23511_s7 + $0x168] ss:$16 sps:$4 sm:$0xff]  }
 0x7d9   : > { %17951 = vmatprep.subr.bf16.mxu0 %v19727_v20 }
 0x7dc   : > { %17952 = vmatpush3.bf16.msra.mxu0 %v19727_v20  ;;  %v19783_v20 = vld [vmem:[%s23511_s7 + $0x16c] ss:$16 sps:$4 sm:$0xff]  }
 0x7dd   : > { %17953 = vmatprep.subr.bf16.mxu0 %v19728_v12 }
 0x7e0   : > { %17954 = vmatpush3.bf16.msra.mxu0 %v19728_v12  ;;  %v19786_v12 = vld [vmem:[%s23511_s7 + $0x18c] ss:$16 sps:$4 sm:$0xff]  }
 0x7e1   : > { %17955 = vmatprep.subr.bf16.mxu0 %v19729_v30 }
 0x7e4   : > { %17956 = vmatpush3.bf16.msra.mxu0 %v19729_v30  ;;  %v19784_v30 = vld [vmem:[%s23511_s7 + $0x188] ss:$16 sps:$4 sm:$0xff]  }
 0x7e5   : > { %17957 = vmatprep.subr.bf16.mxu0 %v19730_v25 }
 0x7e8   : > { %17958 = vmatpush3.bf16.msra.mxu0 %v19730_v25  ;;  %v19789_v25 = vld [vmem:[%s23511_s7 + $0x1ac] ss:$16 sps:$4 sm:$0xff]  }
 0x7e9   : > { %17959 = vmatprep.subr.bf16.mxu0 %v19731_v31 }
 0x7ec   : > { %17960 = vmatpush3.bf16.msra.mxu0 %v19731_v31  ;;  %v19787_v31 = vld [vmem:[%s23511_s7 + $0x1a8] ss:$16 sps:$4 sm:$0xff]  }
 0x7ed   : > { %17969 = vmatprep.subr.bf16.mxu0 %v19732_v47 }
 0x7ef   : > { %17962 = vmatmul.mubr.bf16.vlgmr.msra.gmra.mrb[64].mxu0 %v11489_v53 }
 0x7f0   : > { %17965 = vmatprep.mubr.bf16.mxu0 %v11491_v50  ;;  %17970 = vmatpush3.bf16.msra.mxu0 %v19732_v47  ;;  %v19792_v47 = vld [vmem:[%s23511_s7 + $0x1cc] ss:$16 sps:$4 sm:$0xff]  }
 0x7f1   : > { %17971 = vmatprep.subr.bf16.mxu0 %v19733_v8 }
 0x7f4   : > { %17972 = vmatpush3.bf16.msra.mxu0 %v19733_v8  ;;  %v19795_v8 = vld [vmem:[%s23511_s7 + $0x1ec] ss:$16 sps:$4 sm:$0xff]  }
 0x7f5   : > { %17973 = vmatprep.subr.bf16.mxu0 %v19734_v46 }
 0x7f7   : > { %17966 = vmatmul.mubr.bf16.gmra.mrb[68].mxu0 %v22920_v34  ;;  %v19742_v34 = vld [vmem:[#allocation7 + $0x210] sm:$0xff]  }
 0x7f8   : > { %17974 = vmatpush3.bf16.msra.mxu0 %v19734_v46  ;;  %17985 = vmatprep.mubr.bf16.mxu0 %v11489_v53  ;;  %v19793_v53 = vld [vmem:[%s23511_s7 + $0x1e8] ss:$16 sps:$4 sm:$0xff]   ;;  %v19796_v46 = vld [vmem:[%s23511_s7] ss:$16 sps:$4 sm:$0xff]  }
 0x7f9   : > { %17975 = vmatprep.subr.bf16.mxu0 %v19735_v11 }
 0x7fc   : > { %17976 = vmatpush3.bf16.msra.mxu0 %v19735_v11  ;;  %v19801_v11 = vld [vmem:[%s23511_s7 + $0x24] ss:$16 sps:$4 sm:$0xff]  }
 0x7fd   : > { %17977 = vmatprep.subr.bf16.mxu0 %v19736_v9 }
 0x800   : > { %17978 = vmatpush3.bf16.msra.mxu0 %v19736_v9  ;;  %v19799_v9 = vld [vmem:[%s23511_s7 + $0x20] ss:$16 sps:$4 sm:$0xff]  }
 0x801   : > { %17979 = vmatprep.subr.bf16.mxu0 %v19737_v14 }
 0x804   : > { %17980 = vmatpush3.bf16.msra.mxu0 %v19737_v14  ;;  %v19804_v14 = vld [vmem:[%s23511_s7 + $0x44] ss:$16 sps:$4 sm:$0xff]  }
 0x805   : > { %17981 = vmatprep.subr.bf16.mxu0 %v19738_v48 }
 0x808   : > { %17982 = vmatpush3.bf16.msra.mxu0 %v19738_v48  ;;  %v19802_v48 = vld [vmem:[%s23511_s7 + $0x40] ss:$16 sps:$4 sm:$0xff]  }
 0x809   : > { %17983 = vmatprep.subr.bf16.mxu0 %v19739_v0 }
 0x80c   : > { %17984 = vmatpush3.bf16.msra.mxu0 %v19739_v0  ;;  %v19807_v0 = vld [vmem:[%s23511_s7 + $0x64] ss:$16 sps:$4 sm:$0xff]  }
 0x80d   : > { %17993 = vmatprep.subr.bf16.mxu0 %v19740_v10 }
 0x80f   : > { %17986 = vmatmul.mubr.bf16.vlgmr.msra.gmra.mrb[64].mxu0 %v11491_v50 }
 0x810   : > { %17989 = vmatprep.mubr.bf16.mxu0 %v22934_v56  ;;  %17994 = vmatpush3.bf16.msra.mxu0 %v19740_v10  ;;  %v19805_v10 = vld [vmem:[%s23511_s7 + $0x60] ss:$16 sps:$4 sm:$0xff]  }
 0x811   : > { %17995 = vmatprep.subr.bf16.mxu0 %v19741_v17 }
 0x814   : > { %17996 = vmatpush3.bf16.msra.mxu0 %v19741_v17  ;;  %v19810_v17 = vld [vmem:[%s23511_s7 + $0x84] ss:$16 sps:$4 sm:$0xff]  }
 0x815   : > { %17997 = vmatprep.subr.bf16.mxu0 %v19742_v34 }
 0x817   : > { %17990 = vmatmul.mubr.bf16.gmra.mrb[68].mxu0 %v22923_v45  ;;  %v19760_v45 = vld [vmem:[%s23511_s7 + $0x180] ss:$16 sps:$4 sm:$0xff]  }
 0x818   : > { %17998 = vmatpush3.bf16.msra.mxu0 %v19742_v34  ;;  %18009 = vmatprep.mubr.bf16.mxu0 %v11491_v50  ;;  %v19798_v50 = vld [vmem:[%s23511_s7 + $0x4] ss:$16 sps:$4 sm:$0xff]   ;;  %v19808_v34 = vld [vmem:[%s23511_s7 + $0x80] ss:$16 sps:$4 sm:$0xff]  }
 0x819   : > { %17999 = vmatprep.subr.bf16.mxu0 %v19743_v26  ;;  %12167 = vmatpush1.bf16.msra.mxu1 %v19760_v45  ;;  %v19828_v45 = vld [vmem:[%s23511_s7 + $0x4c] ss:$16 sps:$4 sm:$0xff]  }
 0x81c   : > { %18000 = vmatpush3.bf16.msra.mxu0 %v19743_v26  ;;  %v19813_v26 = vld [vmem:[%s23511_s7 + $0xa4] ss:$16 sps:$4 sm:$0xff]  }
 0x81d   : > { %18001 = vmatprep.subr.bf16.mxu0 %v19744_v19 }
 0x820   : > { %18002 = vmatpush3.bf16.msra.mxu0 %v19744_v19  ;;  %v19811_v19 = vld [vmem:[%s23511_s7 + $0xa0] ss:$16 sps:$4 sm:$0xff]  }
 0x821   : > { %18003 = vmatprep.subr.bf16.mxu0 %v19745_v27 }
 0x824   : > { %18004 = vmatpush3.bf16.msra.mxu0 %v19745_v27  ;;  %v19816_v27 = vld [vmem:[%s23511_s7 + $0xc4] ss:$16 sps:$4 sm:$0xff]  }
 0x825   : > { %18005 = vmatprep.subr.bf16.mxu0 %v19746_v28 }
 0x828   : > { %18006 = vmatpush3.bf16.msra.mxu0 %v19746_v28  ;;  %v19814_v28 = vld [vmem:[%s23511_s7 + $0xc0] ss:$16 sps:$4 sm:$0xff]  }
 0x829   : > { %18007 = vmatprep.subr.bf16.mxu0 %v19747_v35 }
 0x82c   : > { %18008 = vmatpush3.bf16.msra.mxu0 %v19747_v35  ;;  %v19819_v35 = vld [vmem:[%s23511_s7 + $0xe4] ss:$16 sps:$4 sm:$0xff]  }
 0x82f   : > { %18010 = vmatmul.mubr.bf16.vlgmr.msra.gmra.mrb[64].mxu0 %v22934_v56  ;;  %v19765_v56 = vld [vmem:[%s23511_s7 + $0x1a4] ss:$16 sps:$4 sm:$0xff]  }
 0x830   : > { %18013 = vmatprep.mubr.bf16.mxu0 %v11775_v29  ;;  %12168 = vmatprep.subr.bf16.mxu1 %v19765_v56  ;;  %v19822_v29 = vld [vmem:[%s23511_s7 + $0xc] ss:$16 sps:$4 sm:$0xff]   ;;  %v19826_v56 = vld [vmem:[%s23511_s7 + $0x48] ss:$16 sps:$4 sm:$0xff]  }
 0x831   : > { %12169 = vmatpush1.bf16.msra.mxu1 %v19763_v55  ;;  %v19831_v55 = vld [vmem:[%s23511_s7 + $0x6c] ss:$16 sps:$4 sm:$0xff]  }
 0x832   : > { %12170 = vmatprep.subr.bf16.mxu1 %v19768_v60  ;;  %v19834_v60 = vld [vmem:[%s23511_s7 + $0x8c] ss:$16 sps:$4 sm:$0xff]  }
 0x835   : > { %12171 = vmatpush1.bf16.msra.mxu1 %v19766_v38  ;;  %v19832_v38 = vld [vmem:[%s23511_s7 + $0x88] ss:$16 sps:$4 sm:$0xff]  }
 0x836   : > { %12172 = vmatprep.subr.bf16.mxu1 %v19771_v44  ;;  %v19837_v44 = vld [vmem:[%s23511_s7 + $0xac] ss:$16 sps:$4 sm:$0xff]  }
 0x837   : > { %18014 = vmatmul.mubr.bf16.gmra.mrb[68].mxu0 %v11774_v37  ;;  %v19817_v37 = vld [vmem:[%s23511_s7 + $0xe0] ss:$16 sps:$4 sm:$0xff]  }
 0x839   : > { %12173 = vmatpush1.bf16.msra.mxu1 %v19769_v52  ;;  %v19835_v52 = vld [vmem:[%s23511_s7 + $0xa8] ss:$16 sps:$4 sm:$0xff]  }
 0x83a   : > { %12199 = vmatprep.subr.bf16.mxu1 %v19774_v40  ;;  %v19840_v40 = vld [vmem:[%s23511_s7 + $0xcc] ss:$16 sps:$4 sm:$0xff]  }
 0x902   : > { %v18011_v51 = vpop.f32.mrb[64].mxu0 }
 0x903   : > { %11899 = vst [vmem:[#allocation4 + $0x10] sm:$0xff] %v18011_v51  ;;  %v11860_v41 = vpop.f32.mrb[65].mxu0  ;;  %v19838_v51 = vld [vmem:[%s23511_s7 + $0xc8] ss:$16 sps:$4 sm:$0xff]  }
 0x904   : > { %11897 = vst [vmem:[#allocation4] sm:$0xff] %v11860_v41  ;;  %v18012_v59 = vpop.f32.mrb[66].mxu0  ;;  %v19843_v41 = vld [vmem:[%s23511_s7 + $0xec] ss:$16 sps:$4 sm:$0xff]  }
 0x905   : > { %v11863_v61 = vpop.f32.mrb[67].mxu0  ;;  %v19841_v59 = vld [vmem:[%s23511_s7 + $0xe8] ss:$16 sps:$4 sm:$0xff]  }
 0x906   : > { %11898 = vst [vmem:[#allocation4 + $0x8] sm:$0xff] %v11863_v61  ;;  %v19846_v61 = vld [vmem:[%s23511_s7 + $0x204] ss:$16 sps:$4 sm:$0xff]  }
 0x90a   : > { %v18015_v62 = vpop.f32.mrb[68].mxu0  ;;  %v11907_v1 = vld [vmem:[#allocation4 + $0x10] ss:$2 sm:$0x3] }
 0x90b   : > { %11903 = vst [vmem:[#allocation4 + $0x30] sm:$0xf] %v18015_v62  ;;  %v11876_v39 = vpop.f32.mrb[69].mxu0  ;;  %v11904_v5 = vld [vmem:[#allocation4] ss:$2 sm:$0x3] }
 0x90c   : > { %11901 = vst [vmem:[#allocation4 + $0x20] sm:$0xff] %v11876_v39  ;;  %v18016_v36 = vpop.f32.mrb[70].mxu0  ;;  %v11905_v43 = vld [vmem:[#allocation4 + $0x1] ss:$2 sm:$0x3] }
 0x90d   : > { %v11879_v33 = vpop.f32.mrb[71].mxu0  ;;  %v11906_v42 = vmax.f32 %v11904_v5, %v11905_v43  ;;  %v11908_v58 = vld [vmem:[#allocation4 + $0x11] ss:$2 sm:$0x3]  ;;  %v23197_v5 = vld [vmem:[#allocation2] sm:$0xff] }
 0x90e   : > { %11902 = vst [vmem:[#allocation4 + $0x28] sm:$0xff] %v11879_v33  ;;  %v11909_v3 = vmax.f32 %v11907_v1, %v11908_v58  ;;  %v19844_v62 = vld [vmem:[%s23511_s7 + $0x200] ss:$16 sps:$4 sm:$0xff]   ;;  %v19849_v1 = vld [vmem:[%s23511_s7 + $0x224] ss:$16 sps:$4 sm:$0xff]  }
 0x90f   : > { %v19847_v39 = vld [vmem:[%s23511_s7 + $0x220] ss:$16 sps:$4 sm:$0xff]   ;;  %v19852_v36 = vld [vmem:[%s23511_s7 + $0x244] ss:$16 sps:$4 sm:$0xff]  }
 0x910   : > { %v11910_v13 = vmax.f32 %v11906_v42, %v11909_v3  ;;  %v19850_v43 = vld [vmem:[%s23511_s7 + $0x240] ss:$16 sps:$4 sm:$0xff]   ;;  %v19855_v33 = vld [vmem:[%s23511_s7 + $0x264] ss:$16 sps:$4 sm:$0xff]  }
 0x911   : > { %v19853_v42 = vld [vmem:[%s23511_s7 + $0x260] ss:$16 sps:$4 sm:$0xff]   ;;  %v19858_v58 = vld [vmem:[%s23511_s7 + $0x284] ss:$16 sps:$4 sm:$0xff]  }
 0x912   : > { %v11917_v6 = vadd.f32 %v23033_v4, %v11910_v13  ;;  %v11922_v3 = vld [vmem:[#allocation4 + $0x30] ss:$2 sm:$0x3]  ;;  %v11923_v13 = vld [vmem:[#allocation4 + $0x31] ss:$2 sm:$0x3] }
 0x914   : > { %v11918_v49 = vmax.f32 %v11917_v6, 0.0  ;;  %v11919_v6 = vld [vmem:[#allocation4 + $0x20] ss:$2 sm:$0x3] }
 0x916   : > { %v23036_v63 = vpack.c.bf16 %v11918_v49, %v11918_v49  ;;  %v11920_v49 = vld [vmem:[#allocation4 + $0x21] ss:$2 sm:$0x3] }
 0x918   : > { %v11995_v16 = vshrl.u32 %v23036_v63, 16 }
 0x91a   : > { %12191 = vmatmul.mubr.bf16.vlgmr.msra.gmra.mrb[64].mxu1 %v11995_v16 }
 0x91b   : > { %12200 = vmatpush1.bf16.msra.mxu1 %v19772_v15  ;;  %12231 = vmatprep.mubr.bf16.mxu1 %v22881_v24  ;;  %v19861_v15 = vld [vmem:[%s23511_s7 + $0x2a4] ss:$16 sps:$4 sm:$0xff]  }
 0x91c   : > { %12201 = vmatprep.subr.bf16.mxu1 %v19777_v57  ;;  %v11924_v57 = vmax.f32 %v11922_v3, %v11923_v13 }
 0x91f   : > { %12202 = vmatpush1.bf16.msra.mxu1 %v19775_v18  ;;  %v19859_v18 = vld [vmem:[%s23511_s7 + $0x2a0] ss:$16 sps:$4 sm:$0xff]  }
 0x920   : > { %12203 = vmatprep.subr.bf16.mxu1 %v19780_v54  ;;  %v19864_v54 = vld [vmem:[%s23511_s7 + $0x2c4] ss:$16 sps:$4 sm:$0xff]  }
 0x923   : > { %12204 = vmatpush1.bf16.msra.mxu1 %v19778_v21 }
 0x924   : > { %12205 = vmatprep.subr.bf16.mxu1 %v19783_v20  ;;  %v19862_v20 = vld [vmem:[%s23511_s7 + $0x2c0] ss:$16 sps:$4 sm:$0xff]  }
 0x927   : > { %12206 = vmatpush1.bf16.msra.mxu1 %v19781_v22  ;;  %v19867_v22 = vld [vmem:[%s23511_s7 + $0x2e4] ss:$16 sps:$4 sm:$0xff]  }
 0x928   : > { %12207 = vmatprep.subr.bf16.mxu1 %v19786_v12 }
 0x92b   : > { %12208 = vmatpush1.bf16.msra.mxu1 %v19784_v30  ;;  %v19865_v30 = vld [vmem:[%s23511_s7 + $0x2e0] ss:$16 sps:$4 sm:$0xff]  }
 0x92c   : > { %12209 = vmatprep.subr.bf16.mxu1 %v19789_v25 }
 0x92f   : > { %12210 = vmatpush1.bf16.msra.mxu1 %v19787_v31  ;;  %v19870_v31 = vld [vmem:[%s23511_s7 + $0x20c] ss:$16 sps:$4 sm:$0xff]  }
 0x930   : > { %12211 = vmatprep.subr.bf16.mxu1 %v19792_v47  ;;  %v19868_v47 = vld [vmem:[%s23511_s7 + $0x208] ss:$16 sps:$4 sm:$0xff]  }
 0x933   : > { %12212 = vmatpush1.bf16.msra.mxu1 %v19790_v32 }
 0x934   : > { %12213 = vmatprep.subr.bf16.mxu1 %v19795_v8  ;;  %v19871_v8 = vld [vmem:[%s23511_s7 + $0x228] ss:$16 sps:$4 sm:$0xff]  }
 0x937   : > { %12214 = vmatpush1.bf16.msra.mxu1 %v19793_v53  ;;  %v19876_v53 = vld [vmem:[%s23511_s7 + $0x24c] ss:$16 sps:$4 sm:$0xff]  }
 0x938   : > { %12400 = vmatprep.subr.bf16.mxu1 %v19798_v50  ;;  %v19874_v50 = vld [vmem:[%s23511_s7 + $0x248] ss:$16 sps:$4 sm:$0xff]  }
 0x93a   : > { %12232 = vmatmul.mubr.bf16.vlgmr.msra.gmra.mrb[68].mxu1 %v11995_v16  ;;  %v11921_v16 = vmax.f32 %v11919_v6, %v11920_v49  ;;  %v19934_v6 = vld [vmem:[%s23511_s7 + $0x3c8] ss:$16 sps:$4 sm:$0xff]  }
 0x93b   : > { %12401 = vmatpush1.bf16.msra.mxu1 %v19796_v46  ;;  %12432 = vmatprep.mubr.bf16.mxu1 %v22881_v24  ;;  %v19879_v46 = vld [vmem:[%s23511_s7 + $0x26c] ss:$16 sps:$4 sm:$0xff]  }
 0x93c   : > { %12402 = vmatprep.subr.bf16.mxu1 %v19801_v11  ;;  %v11925_v21 = vmax.f32 %v11921_v16, %v11924_v57  ;;  %v19877_v11 = vld [vmem:[%s23511_s7 + $0x268] ss:$16 sps:$4 sm:$0xff]  }
 0x93e   : > { %v11926_v12 = vadd.f32 %v23033_v4, %v11925_v21  ;;  %v19873_v4 = vld [vmem:[%s23511_s7 + $0x22c] ss:$16 sps:$4 sm:$0xff]   ;;  %v19940_v21 = vld [vmem:[%s23513_s9 + $0x40] sm:$0xff]  }
 0x93f   : > { %12403 = vmatpush1.bf16.msra.mxu1 %v19799_v9  ;;  %v19882_v9 = vld [vmem:[%s23511_s7 + $0x28c] ss:$16 sps:$4 sm:$0xff]  }
 0x940   : > { %12404 = vmatprep.subr.bf16.mxu1 %v19804_v14  ;;  %v11927_v25 = vmax.f32 %v11926_v12, 0.0  ;;  %v19880_v14 = vld [vmem:[%s23511_s7 + $0x288] ss:$16 sps:$4 sm:$0xff]  }
 0x941   : > { %v19943_v12 = vld [vmem:[%s23513_s9 + $0x8] sm:$0xff]  }
 0x942   : > { %v23243_v32 = vpack.c.bf16 %v11927_v25, %v11927_v25  ;;  %v19945_v25 = vld [vmem:[%s23513_s9 + $0x10] sm:$0xff]  }
 0x943   : > { %12405 = vmatpush1.bf16.msra.mxu1 %v19802_v48  ;;  %v19885_v48 = vld [vmem:[%s23511_s7 + $0x2ac] ss:$16 sps:$4 sm:$0xff]  }
 0x944   : > { %12406 = vmatprep.subr.bf16.mxu1 %v19807_v0  ;;  %v19883_v0 = vld [vmem:[%s23511_s7 + $0x2a8] ss:$16 sps:$4 sm:$0xff]  }
 0x947   : > { %12407 = vmatpush1.bf16.msra.mxu1 %v19805_v10  ;;  %v19888_v10 = vld [vmem:[%s23511_s7 + $0x2cc] ss:$16 sps:$4 sm:$0xff]  }
 0x948   : > { %12408 = vmatprep.subr.bf16.mxu1 %v19810_v17  ;;  %v19886_v17 = vld [vmem:[%s23511_s7 + $0x2c8] ss:$16 sps:$4 sm:$0xff]  }
 0x94b   : > { %12409 = vmatpush1.bf16.msra.mxu1 %v19808_v34  ;;  %v19891_v34 = vld [vmem:[%s23511_s7 + $0x2ec] ss:$16 sps:$4 sm:$0xff]  }
 0x94c   : > { %12410 = vmatprep.subr.bf16.mxu1 %v19813_v26  ;;  %v19889_v26 = vld [vmem:[%s23511_s7 + $0x2e8] ss:$16 sps:$4 sm:$0xff]  }
 0x94f   : > { %12411 = vmatpush1.bf16.msra.mxu1 %v19811_v19  ;;  %v19894_v19 = vld [vmem:[%s23511_s7 + $0x304] ss:$16 sps:$4 sm:$0xff]  }
 0x950   : > { %12412 = vmatprep.subr.bf16.mxu1 %v19816_v27  ;;  %v19892_v27 = vld [vmem:[%s23511_s7 + $0x300] ss:$16 sps:$4 sm:$0xff]  }
 0x953   : > { %12413 = vmatpush1.bf16.msra.mxu1 %v19814_v28  ;;  %v19897_v28 = vld [vmem:[%s23511_s7 + $0x324] ss:$16 sps:$4 sm:$0xff]  }
 0x954   : > { %12414 = vmatprep.subr.bf16.mxu1 %v19819_v35  ;;  %v19895_v35 = vld [vmem:[%s23511_s7 + $0x320] ss:$16 sps:$4 sm:$0xff]  }
 0x957   : > { %12415 = vmatpush1.bf16.msra.mxu1 %v19817_v37  ;;  %v19900_v37 = vld [vmem:[%s23511_s7 + $0x344] ss:$16 sps:$4 sm:$0xff]  }
 0x958   : > { %12441 = vmatprep.subr.bf16.mxu1 %v19822_v29  ;;  %v19898_v29 = vld [vmem:[%s23511_s7 + $0x340] ss:$16 sps:$4 sm:$0xff]  }
 0x95a   : > { %12433 = vmatmul.mubr.bf16.vlgmr.msra.gmra.mrb[72].mxu1 %v23036_v63 }
 0x95b   : > { %12442 = vmatpush1.bf16.msra.mxu1 %v19820_v7  ;;  %12473 = vmatprep.mubr.bf16.mxu1 %v22881_v24  ;;  %v19829_v24 = vld [vmem:[%s23511_s7 + $0x68] ss:$16 sps:$4 sm:$0xff]   ;;  %v19903_v7 = vld [vmem:[%s23511_s7 + $0x364] ss:$16 sps:$4 sm:$0xff]  }
 0x95c   : > { %12443 = vmatprep.subr.bf16.mxu1 %v19825_v2  ;;  %v19901_v2 = vld [vmem:[%s23511_s7 + $0x360] ss:$16 sps:$4 sm:$0xff]  }
 0x95f   : > { %12444 = vmatpush1.bf16.msra.mxu1 %v19823_v23  ;;  %v19906_v23 = vld [vmem:[%s23511_s7 + $0x384] ss:$16 sps:$4 sm:$0xff]  }
 0x960   : > { %12445 = vmatprep.subr.bf16.mxu1 %v19828_v45  ;;  %v19904_v45 = vld [vmem:[%s23511_s7 + $0x380] ss:$16 sps:$4 sm:$0xff]  }
 0x963   : > { %12446 = vmatpush1.bf16.msra.mxu1 %v19826_v56  ;;  %v19909_v56 = vld [vmem:[%s23511_s7 + $0x3a4] ss:$16 sps:$4 sm:$0xff]  }
 0x964   : > { %12447 = vmatprep.subr.bf16.mxu1 %v19831_v55  ;;  %v19907_v55 = vld [vmem:[%s23511_s7 + $0x3a0] ss:$16 sps:$4 sm:$0xff]  }
 0x967   : > { %12448 = vmatpush1.bf16.msra.mxu1 %v19829_v24  ;;  %v19912_v24 = vld [vmem:[%s23511_s7 + $0x3c4] ss:$16 sps:$4 sm:$0xff]  }
 0x968   : > { %12449 = vmatprep.subr.bf16.mxu1 %v19834_v60  ;;  %v19910_v60 = vld [vmem:[%s23511_s7 + $0x3c0] ss:$16 sps:$4 sm:$0xff]  }
 0x96b   : > { %12450 = vmatpush1.bf16.msra.mxu1 %v19832_v38  ;;  %v19915_v38 = vld [vmem:[%s23511_s7 + $0x3e4] ss:$16 sps:$4 sm:$0xff]  }
 0x96c   : > { %12451 = vmatprep.subr.bf16.mxu1 %v19837_v44  ;;  %v19913_v44 = vld [vmem:[%s23511_s7 + $0x3e0] ss:$16 sps:$4 sm:$0xff]  }
 0x96f   : > { %12452 = vmatpush1.bf16.msra.mxu1 %v19835_v52  ;;  %v19918_v52 = vld [vmem:[%s23511_s7 + $0x30c] ss:$16 sps:$4 sm:$0xff]  }
 0x970   : > { %12453 = vmatprep.subr.bf16.mxu1 %v19840_v40  ;;  %v19916_v40 = vld [vmem:[%s23511_s7 + $0x308] ss:$16 sps:$4 sm:$0xff]  }
 0x973   : > { %12454 = vmatpush1.bf16.msra.mxu1 %v19838_v51  ;;  %v12796_v51 = vshrl.u32 %v23243_v32, 16 }
 0x974   : > { %12455 = vmatprep.subr.bf16.mxu1 %v19843_v41  ;;  %v19921_v41 = vld [vmem:[%s23511_s7 + $0x32c] ss:$16 sps:$4 sm:$0xff]  }
 0x977   : > { %12456 = vmatpush1.bf16.msra.mxu1 %v19841_v59  ;;  %v19919_v59 = vld [vmem:[%s23511_s7 + $0x328] ss:$16 sps:$4 sm:$0xff]  }
 0x978   : > { %12676 = vmatprep.subr.bf16.mxu1 %v19846_v61  ;;  %v19924_v61 = vld [vmem:[%s23511_s7 + $0x34c] ss:$16 sps:$4 sm:$0xff]  }
 0x97a   : > { %12474 = vmatmul.mubr.bf16.vlgmr.msra.gmra.mrb[76].mxu1 %v23036_v63  ;;  %v19856_v63 = vld [vmem:[%s23511_s7 + $0x280] ss:$16 sps:$4 sm:$0xff]  }
 0x97b   : > { %12677 = vmatpush1.bf16.msra.mxu1 %v19844_v62  ;;  %12708 = vmatprep.mubr.bf16.mxu1 %v23197_v5  ;;  %v19922_v62 = vld [vmem:[%s23511_s7 + $0x348] ss:$16 sps:$4 sm:$0xff]  }
 0x97c   : > { %12678 = vmatprep.subr.bf16.mxu1 %v19849_v1  ;;  %v19927_v1 = vld [vmem:[%s23511_s7 + $0x36c] ss:$16 sps:$4 sm:$0xff]  }
 0x97f   : > { %12679 = vmatpush1.bf16.msra.mxu1 %v19847_v39  ;;  %v19925_v39 = vld [vmem:[%s23511_s7 + $0x368] ss:$16 sps:$4 sm:$0xff]  }
 0x980   : > { %12680 = vmatprep.subr.bf16.mxu1 %v19852_v36  ;;  %v19928_v36 = vld [vmem:[%s23511_s7 + $0x388] ss:$16 sps:$4 sm:$0xff]  }
 0x983   : > { %12681 = vmatpush1.bf16.msra.mxu1 %v19850_v43  ;;  %v19933_v43 = vld [vmem:[%s23511_s7 + $0x3ac] ss:$16 sps:$4 sm:$0xff]  }
 0x984   : > { %12682 = vmatprep.subr.bf16.mxu1 %v19855_v33  ;;  %v19931_v33 = vld [vmem:[%s23511_s7 + $0x3a8] ss:$16 sps:$4 sm:$0xff]  }
 0x987   : > { %12683 = vmatpush1.bf16.msra.mxu1 %v19853_v42  ;;  %v19936_v42 = vld [vmem:[%s23511_s7 + $0x3cc] ss:$16 sps:$4 sm:$0xff]  }
 0x988   : > { %12684 = vmatprep.subr.bf16.mxu1 %v19858_v58 }
 0x98b   : > { %12685 = vmatpush1.bf16.msra.mxu1 %v19856_v63  ;;  %v19939_v63 = vld [vmem:[%s23511_s7 + $0x3ec] ss:$16 sps:$4 sm:$0xff]  }
 0x98c   : > { %12686 = vmatprep.subr.bf16.mxu1 %v19861_v15  ;;  %v19937_v15 = vld [vmem:[%s23511_s7 + $0x3e8] ss:$16 sps:$4 sm:$0xff]  }
 0x98f   : > { %12687 = vmatpush1.bf16.msra.mxu1 %v19859_v18 }
 0x990   : > { %12688 = vmatprep.subr.bf16.mxu1 %v19864_v54 }
 0x993   : > { %12689 = vmatpush1.bf16.msra.mxu1 %v19862_v20  ;;  %v19941_v20 = vld [vmem:[%s23513_s9] sm:$0xff]  }
 0x994   : > { %12690 = vmatprep.subr.bf16.mxu1 %v19867_v22  ;;  %v19942_v22 = vld [vmem:[%s23513_s9 + $0x48] sm:$0xff]  }
 0x997   : > { %12691 = vmatpush1.bf16.msra.mxu1 %v19865_v30  ;;  %v19944_v30 = vld [vmem:[%s23513_s9 + $0x50] sm:$0xff]  }
 0x998   : > { %12717 = vmatprep.subr.bf16.mxu1 %v19870_v31  ;;  %v19946_v31 = vld [vmem:[%s23513_s9 + $0x58] sm:$0xff]  }
 0x99a   : > { %12709 = vmatmul.mubr.bf16.vlgmr.msra.gmra.mrb[80].mxu1 %v23243_v32 }
 0x99b   : > { %12718 = vmatpush1.bf16.msra.mxu1 %v19868_v47  ;;  %12749 = vmatprep.mubr.bf16.mxu1 %v23197_v5  ;;  %v19947_v47 = vld [vmem:[%s23513_s9 + $0x18] sm:$0xff]  }
 0x99c   : > { %12719 = vmatprep.subr.bf16.mxu1 %v19873_v4  ;;  %v19949_v4 = vld [vmem:[%s23513_s9 + $0x20] sm:$0xff]  }
 0x99f   : > { %12720 = vmatpush1.bf16.msra.mxu1 %v19871_v8  ;;  %v19950_v8 = vld [vmem:[%s23513_s9 + $0x68] sm:$0xff]  }
 0x9a0   : > { %12721 = vmatprep.subr.bf16.mxu1 %v19876_v53  ;;  %v19951_v53 = vld [vmem:[%s23513_s9 + $0x28] sm:$0xff]  }
 0x9a3   : > { %12722 = vmatpush1.bf16.msra.mxu1 %v19874_v50 }
 0x9a4   : > { %12723 = vmatprep.subr.bf16.mxu1 %v19879_v46 }
 0x9a7   : > { %12724 = vmatpush1.bf16.msra.mxu1 %v19877_v11 }
 0x9a8   : > { %12725 = vmatprep.subr.bf16.mxu1 %v19882_v9  ;;  %v19952_v9 = vld [vmem:[%s23513_s9 + $0x70] sm:$0xff]  }
 0x9ab   : > { %12726 = vmatpush1.bf16.msra.mxu1 %v19880_v14 }
 0x9ac   : > { %12727 = vmatprep.subr.bf16.mxu1 %v19885_v48 }
 0x9af   : > { %12728 = vmatpush1.bf16.msra.mxu1 %v19883_v0  ;;  %v19953_v0 = vld [vmem:[%s23513_s9 + $0x30] sm:$0xff]  }
 0x9b0   : > { %12729 = vmatprep.subr.bf16.mxu1 %v19888_v10 }
 0x9b3   : > { %12730 = vmatpush1.bf16.msra.mxu1 %v19886_v17  ;;  %v19954_v17 = vld [vmem:[%s23513_s9 + $0x78] sm:$0xff]  }
 0x9b4   : > { %12731 = vmatprep.subr.bf16.mxu1 %v19891_v34  ;;  %v19955_v34 = vld [vmem:[%s23513_s9 + $0x38] sm:$0xff]  }
 0x9b7   : > { %12732 = vmatpush1.bf16.msra.mxu1 %v19889_v26  ;;  %v19956_v26 = vld [vmem:[%s23513_s9 + $0xc0] sm:$0xff]  }
 0x9b8   : > { %12959 = vmatprep.subr.bf16.mxu1 %v19894_v19  ;;  %v19957_v19 = vld [vmem:[%s23513_s9 + $0x80] sm:$0xff]   ;;  %15763 = vmatprep.subr.bf16.mxu0 %v19956_v26 }
 0x9b9   : > { %15764 = vmatpush3.bf16.msra.mxu0 %v19957_v19 }
 0x9ba   : > { %12750 = vmatmul.mubr.bf16.vlgmr.msra.gmra.mrb[84].mxu1 %v23243_v32  ;;  %v19948_v32 = vld [vmem:[%s23513_s9 + $0x60] sm:$0xff]  }
 0x9bb   : > { %12960 = vmatpush1.bf16.msra.mxu1 %v19892_v27  ;;  %12991 = vmatprep.mubr.bf16.mxu1 %v23197_v5  ;;  %v19958_v27 = vld [vmem:[%s23513_s9 + $0xc8] sm:$0xff]  }
 0x9bc   : > { %12961 = vmatprep.subr.bf16.mxu1 %v19897_v28  ;;  %v19959_v28 = vld [vmem:[%s23513_s9 + $0x88] sm:$0xff]   ;;  %15765 = vmatprep.subr.bf16.mxu0 %v19958_v27 }
 0x9bd   : > { %15766 = vmatpush3.bf16.msra.mxu0 %v19959_v28 }
 0x9bf   : > { %12962 = vmatpush1.bf16.msra.mxu1 %v19895_v35  ;;  %v19960_v35 = vld [vmem:[%s23513_s9 + $0xd0] sm:$0xff]  }
 0x9c0   : > { %12963 = vmatprep.subr.bf16.mxu1 %v19900_v37  ;;  %v19961_v37 = vld [vmem:[%s23513_s9 + $0x90] sm:$0xff]   ;;  %15767 = vmatprep.subr.bf16.mxu0 %v19960_v35 }
 0x9c1   : > { %15768 = vmatpush3.bf16.msra.mxu0 %v19961_v37 }
 0x9c3   : > { %12964 = vmatpush1.bf16.msra.mxu1 %v19898_v29  ;;  %v19962_v29 = vld [vmem:[%s23513_s9 + $0xd8] sm:$0xff]  }
 0x9c4   : > { %12965 = vmatprep.subr.bf16.mxu1 %v19903_v7  ;;  %v19963_v7 = vld [vmem:[%s23513_s9 + $0x98] sm:$0xff]   ;;  %15769 = vmatprep.subr.bf16.mxu0 %v19962_v29 }
 0x9c5   : > { %15770 = vmatpush3.bf16.msra.mxu0 %v19963_v7 }
 0x9c7   : > { %12966 = vmatpush1.bf16.msra.mxu1 %v19901_v2  ;;  %v19964_v2 = vld [vmem:[%s23513_s9 + $0xe0] sm:$0xff]  }
 0x9c8   : > { %12967 = vmatprep.subr.bf16.mxu1 %v19906_v23  ;;  %v19965_v23 = vld [vmem:[%s23513_s9 + $0xa0] sm:$0xff]   ;;  %15771 = vmatprep.subr.bf16.mxu0 %v19964_v2 }
 0x9c9   : > { %15772 = vmatpush3.bf16.msra.mxu0 %v19965_v23 }
 0x9cb   : > { %12968 = vmatpush1.bf16.msra.mxu1 %v19904_v45  ;;  %v19966_v45 = vld [vmem:[%s23513_s9 + $0xe8] sm:$0xff]  }
 0x9cc   : > { %12969 = vmatprep.subr.bf16.mxu1 %v19909_v56  ;;  %15773 = vmatprep.subr.bf16.mxu0 %v19966_v45  ;;  %v19967_v56 = vld [vmem:[%s23513_s9 + $0xa8] sm:$0xff]   ;;  %v13143_v45 = vld [vmem:[%s23514_s10] sm:$0x1] }
 0x9cd   : > { %15774 = vmatpush3.bf16.msra.mxu0 %v19967_v56 }
 0x9cf   : > { %12970 = vmatpush1.bf16.msra.mxu1 %v19907_v55 }
 0x9d0   : > { %12971 = vmatprep.subr.bf16.mxu1 %v19912_v24 }
 0x9d3   : > { %12972 = vmatpush1.bf16.msra.mxu1 %v19910_v60 }
 0x9d4   : > { %12973 = vmatprep.subr.bf16.mxu1 %v19915_v38  ;;  %v19968_v38 = vld [vmem:[%s23513_s9 + $0xf0] sm:$0xff]  }
 0x9d5   : > { %15775 = vmatprep.subr.bf16.mxu0 %v19968_v38 }
 0x9d7   : > { %12974 = vmatpush1.bf16.msra.mxu1 %v19913_v44 }
 0x9d8   : > { %13000 = vmatprep.subr.bf16.mxu1 %v19918_v52 }
 0x9da   : > { %12992 = vmatmul.mubr.bf16.vlgmr.msra.gmra.mrb[88].mxu1 %v12796_v51 }
 0x9db   : > { %13001 = vmatpush1.bf16.msra.mxu1 %v19916_v40  ;;  %13032 = vmatprep.mubr.bf16.mxu1 %v23197_v5  ;;  %v19930_v5 = vld [vmem:[%s23511_s7 + $0x38c] ss:$16 sps:$4 sm:$0xff]   ;;  %v19969_v40 = vld [vmem:[%s23513_s9 + $0xb0] sm:$0xff]  }
 0x9dc   : > { %13002 = vmatprep.subr.bf16.mxu1 %v19921_v41  ;;  %15776 = vmatpush3.bf16.msra.mxu0 %v19969_v40  ;;  %v19970_v41 = vld [vmem:[%s23513_s9 + $0xf8] sm:$0xff]  }
 0x9dd   : > { %15777 = vmatprep.subr.bf16.mxu0 %v19970_v41 }
 0x9df   : > { %13003 = vmatpush1.bf16.msra.mxu1 %v19919_v59  ;;  %v19971_v59 = vld [vmem:[%s23513_s9 + $0xb8] sm:$0xff]  }
 0x9e0   : > { %13004 = vmatprep.subr.bf16.mxu1 %v19924_v61  ;;  %15778 = vmatpush3.bf16.msra.mxu0 %v19971_v59 }
 0x9e3   : > { %13005 = vmatpush1.bf16.msra.mxu1 %v19922_v62 }
 0x9e4   : > { %13006 = vmatprep.subr.bf16.mxu1 %v19927_v1 }
 0x9e7   : > { %13007 = vmatpush1.bf16.msra.mxu1 %v19925_v39 }
 0x9e8   : > { %13008 = vmatprep.subr.bf16.mxu1 %v19930_v5 }
 0x9eb   : > { %13009 = vmatpush1.bf16.msra.mxu1 %v19928_v36 }
 0x9ec   : > { %13010 = vmatprep.subr.bf16.mxu1 %v19933_v43 }
 0x9ed   : > { %v12192_v58 = vpop.f32.mrb[64].mxu1 }
 0x9ee   : > { %v12194_v3 = vpop.f32.mrb[65].mxu1 }
 0x9ef   : > { %13011 = vmatpush1.bf16.msra.mxu1 %v19931_v33  ;;  %v12196_v13 = vpop.f32.mrb[66].mxu1 }
 0x9f0   : > { %v12197_v49 = vpop.f32.mrb[67].mxu1  ;;  %13012 = vmatprep.subr.bf16.mxu1 %v19936_v42 }
 0x9f3   : > { %13013 = vmatpush1.bf16.msra.mxu1 %v19934_v6  ;;  %v13047_v6 = vlaneseq }
 0x9f4   : > { %13014 = vmatprep.subr.bf16.mxu1 %v19939_v63 }
 0x9f5   : > { %v13048_v49 = vshrl.u32 %v13047_v6, 7 }
 0x9f7   : > { %13015 = vmatpush1.bf16.msra.mxu1 %v19937_v15  ;;  %v13049_v63 = vsub.s32 0, %v13048_v49  ;;  %v13045_v15 = vld [vmem:[%s23512_s8] sm:$0xf] }
 0x9f8   : > { %15741 = vmatprep.subr.bf16.mxu1 %v19940_v21 }
 0x9fa   : > { %13033 = vmatmul.mubr.bf16.vlgmr.msra.gmra.mrb[92].mxu1 %v12796_v51 }
 0x9fb   : > { %15742 = vmatpush3.bf16.msra.mxu1 %v19941_v20 }
 0x9fc   : > { %15743 = vmatprep.subr.bf16.mxu1 %v19942_v22 }
 0x9ff   : > { %15744 = vmatpush3.bf16.msra.mxu1 %v19943_v12 }
 0xa00   : > { %15745 = vmatprep.subr.bf16.mxu1 %v19944_v30 }
 0xa03   : > { %15746 = vmatpush3.bf16.msra.mxu1 %v19945_v25 }
 0xa04   : > { %15747 = vmatprep.subr.bf16.mxu1 %v19946_v31 }
 0xa07   : > { %15748 = vmatpush3.bf16.msra.mxu1 %v19947_v47 }
 0xa08   : > { %15749 = vmatprep.subr.bf16.mxu1 %v19948_v32 }
 0xa0b   : > { %15750 = vmatpush3.bf16.msra.mxu1 %v19949_v4 }
 0xa0c   : > { %15751 = vmatprep.subr.bf16.mxu1 %v19950_v8 }
 0xa0d   : > { %v23389_v16 = vpop.f32.mrb[68].mxu1 }
 0xa0e   : > { %v23391_v57 = vpop.f32.mrb[69].mxu1 }
 0xa0f   : > { %v12237_v18 = vpop.f32.mrb[70].mxu1  ;;  %15752 = vmatpush3.bf16.msra.mxu1 %v19951_v53  ;;  %v13057_v53 = vsub.s32 2, %v13048_v49 }
 0xa10   : > { %v12238_v54 = vpop.f32.mrb[71].mxu1  ;;  %15753 = vmatprep.subr.bf16.mxu1 %v19952_v9 }
 0xa13   : > { %15754 = vmatpush3.bf16.msra.mxu1 %v19953_v0 }
 0xa14   : > { %15755 = vmatprep.subr.bf16.mxu1 %v19954_v17 }
 0xa17   : > { %15756 = vmatpush3.bf16.msra.mxu1 %v19955_v34 }
 0xa2d   : > { %v12434_v50 = vpop.f32.mrb[72].mxu1 }
 0xa2e   : > { %v12435_v46 = vadd.f32 %v12434_v50, %v12192_v58  ;;  %v12436_v11 = vpop.f32.mrb[73].mxu1  ;;  %v13061_v50 = vsub.s32 3, %v13048_v49 }
 0xa2f   : > { %v12437_v14 = vadd.f32 %v12436_v11, %v12194_v3  ;;  %v12438_v48 = vpop.f32.mrb[74].mxu1 }
 0xa30   : > { %v12439_v10 = vpop.f32.mrb[75].mxu1  ;;  %v13062_v9 = vrot.slane %v13045_v15, %v13061_v50 }
 0xa4d   : > { %v12475_v55 = vpop.f32.mrb[76].mxu1 }
 0xa4e   : > { %v12476_v24 = vadd.f32 %v12475_v55, %v23389_v16  ;;  %v12477_v60 = vpop.f32.mrb[77].mxu1  ;;  %v13053_v16 = vsub.s32 1, %v13048_v49 }
 0xa4f   : > { %v12478_v44 = vadd.f32 %v12477_v60, %v23391_v57  ;;  %v12479_v52 = vpop.f32.mrb[78].mxu1  ;;  %v13050_v57 = vrot.slane %v13045_v15, %v13049_v63 }
 0xa50   : > { %v12480_v51 = vpop.f32.mrb[79].mxu1  ;;  %v13054_v54 = vrot.slane %v13045_v15, %v13053_v16 }
 0xa6d   : > { %v12710_v61 = vpop.f32.mrb[80].mxu1 }
 0xa6e   : > { %v12758_v62 = vadd.f32 %v12710_v61, %v12435_v46  ;;  %v12712_v1 = vpop.f32.mrb[81].mxu1  ;;  %v13058_v46 = vrot.slane %v13045_v15, %v13057_v53 }
 0xa6f   : > { %v12759_v39 = vadd.f32 %v12712_v1, %v12437_v14  ;;  %v12714_v5 = vpop.f32.mrb[82].mxu1 }
 0xa70   : > { %v12715_v36 = vpop.f32.mrb[83].mxu1 }
 0xa8d   : > { %v12751_v43 = vpop.f32.mrb[84].mxu1 }
 0xa8e   : > { %v12760_v33 = vadd.f32 %v12751_v43, %v12476_v24  ;;  %v12753_v42 = vpop.f32.mrb[85].mxu1 }
 0xa8f   : > { %v12761_v58 = vadd.f32 %v12753_v42, %v12478_v44  ;;  %v12755_v3 = vpop.f32.mrb[86].mxu1 }
 0xa90   : > { %v12756_v13 = vpop.f32.mrb[87].mxu1 }
 0xaad   : > { %v12993_v18 = vpop.f32.mrb[88].mxu1 }
 0xaae   : > { %v13041_v21 = vadd.f32 %v12993_v18, %v12758_v62  ;;  %v12995_v20 = vpop.f32.mrb[89].mxu1 }
 0xaaf   : > { %v13042_v22 = vadd.f32 %v12995_v20, %v12759_v39  ;;  %v12997_v12 = vpop.f32.mrb[90].mxu1 }
 0xab0   : > { %v13067_v30 = vadd.f32 %v13050_v57, %v13041_v21  ;;  %v12998_v25 = vpop.f32.mrb[91].mxu1 }
 0xab1   : > { %v13068_v31 = vadd.f32 %v13054_v54, %v13042_v22 }
 0xab2   : > { %v13071_v47 = vmax.f32 %v13067_v30, 0.0 }
 0xab3   : > { %v13072_v32 = vmax.f32 %v13068_v31, 0.0 }
 0xab4   : > { %v13075_v8 = vpack.c.bf16 %v13071_v47, %v13071_v47 }
 0xab5   : > { %v13076_v4 = vpack.c.bf16 %v13072_v32, %v13072_v32 }
 0xab7   : > { %13368 = vmatprep.mubr.bf16.mxu1 %v13076_v4 }
 0xab8   : > { %13369 = vmatmul.mubr.bf16.vlgmr.msra.gmra.mrb[96].mxu1 %v13075_v8 }
 0xacd   : > { %v13034_v11 = vpop.f32.mrb[92].mxu1 }
 0xace   : > { %v13043_v14 = vadd.f32 %v13034_v11, %v12760_v33  ;;  %v13036_v48 = vpop.f32.mrb[93].mxu1 }
 0xacf   : > { %v13044_v0 = vadd.f32 %v13036_v48, %v12761_v58  ;;  %v13038_v10 = vpop.f32.mrb[94].mxu1 }
 0xad0   : > { %v13069_v17 = vadd.f32 %v13058_v46, %v13043_v14  ;;  %v13039_v34 = vpop.f32.mrb[95].mxu1 }
 0xad1   : > { %v13070_v26 = vadd.f32 %v13062_v9, %v13044_v0 }
 0xad2   : > { %v13073_v19 = vmax.f32 %v13069_v17, 0.0 }
 0xad3   : > { %v13074_v27 = vmax.f32 %v13070_v26, 0.0 }
 0xad4   : > { %v13077_v35 = vpack.c.bf16 %v13073_v19, %v13073_v19 }
 0xad5   : > { %v13078_v28 = vpack.c.bf16 %v13074_v27, %v13074_v27 }
 0xad7   : > { %13408 = vmatprep.mubr.bf16.mxu0 %v13078_v28 }
 0xad8   : > { %13409 = vmatmul.mubr.bf16.vlgmr.msra.gmra.mrb[72].mxu0 %v13077_v35 }
 0xb8b   : > { %v15757_v37 = vpop.f32.mrb[96].mxu1 }
 0xb8c   : > { %v15758_v29 = vpop.f32.mrb[97].mxu1 }
 0xb8d   : > { %v15759_v7 = vadd.f32 %v15758_v29, %v15757_v37  ;;  %v15760_v2 = vpop.f32.mrb[98].mxu1 }
 0xb8e   : > { %v15761_v23 = vpop.f32.mrb[99].mxu1 }
 0xb8f   : > { %v13371_v24 = vadd.f32 %v15759_v7, %v13143_v45 }
 0xbab   : > { %v15779_v56 = vpop.f32.mrb[72].mxu0 }
 0xbac   : > { %v15780_v55 = vpop.f32.mrb[73].mxu0 }
 0xbad   : > { %v15781_v60 = vadd.f32 %v15780_v55, %v15779_v56  ;;  %v15782_v38 = vpop.f32.mrb[74].mxu0 }
 0xbae   : > { %v15783_v44 = vpop.f32.mrb[75].mxu0 }
 0xbaf   : > { %v13411_v52 = vadd.f32 %v15781_v60, %v13371_v24 }
 0xbb1   : > { %13416 = vst [vmem:[%s412_s27] sm:$0x1] %v13411_v52 }
 0xbb2 PF: > { %s23_s17 = sadd.s32 1, %s20074_s17  }
 0xbb3   : > { %p20_p9 = scmp.ge.s32.totalorder %s23_s17, 4  }
 0xbb5   :  { %22 = sbr.rel (!%p20_p9) target bundleno = 2 (0x2), region = 141 }
 0xbbc   :  { %13434 = vsyncpa [#allocation6], 1 }
 0xbbd   :  { %13436 = vsyncpa [#allocation6 + $0x1], 1 }
 0xbbe   :  { %13437 = vsyncpa [#allocation8], 1 }

</bundles_post_ra>
